<compile_context>
chip_gen: v7x
topology: tpu7x:2x2x1
jax: 0.10.0
libtpu: 0.0.40
codegen_flags: <defaults>
</compile_context>

<pallas_src>
import jax
import jax.numpy as jnp
from jax import lax
from jax.experimental import pallas as pl
from jax.experimental.pallas import tpu as pltpu


def _round_up(x, m):
    return ((x + m - 1) // m) * m


def make_params(key, input_size, num_classes):
    """Deterministic synthetic weights matching the PyTorch module's shapes."""
    H, C = input_size, num_classes
    ks = jax.random.split(key, 10)
    s = 0.1
    return {
        "W_i2h": jax.random.normal(ks[0], (H, H), jnp.float32) * s,
        "b_i2h": jax.random.normal(ks[1], (H,), jnp.float32) * s,
        "W_h2h": jax.random.normal(ks[2], (H, H), jnp.float32) * s,
        "W_score": jax.random.normal(ks[3], (1, H), jnp.float32) * s,
        "W_ih": jax.random.normal(ks[4], (4 * H, H + C), jnp.float32) * s,
        "W_hh": jax.random.normal(ks[5], (4 * H, H), jnp.float32) * s,
        "b_ih": jax.random.normal(ks[6], (4 * H,), jnp.float32) * s,
        "b_hh": jax.random.normal(ks[7], (4 * H,), jnp.float32) * s,
        "W_gen": jax.random.normal(ks[8], (C, H), jnp.float32) * s,
        "b_gen": jax.random.normal(ks[9], (C,), jnp.float32) * s,
    }


def attention_forward_pallas(D_prime, text, params, num_steps,
                             *, step_block=None, batch_block=None,
                             t_chunk=None):
    """Equivalent of Attention.forward(D_prime, text, is_train=True)."""
    B, T, H = D_prime.shape
    C = params["W_gen"].shape[0]
    H4 = 4 * H
    Cp = _round_up(C, 128)                       # lane-dense padded class dim

    f32, bf16 = jnp.float32, jnp.bfloat16

    # --- step fusion: pad num_steps so K=8 steps fuse per grid iteration ---
    K = 8 if step_block is None else step_block
    S_pad = _round_up(num_steps, K)
    ns = S_pad // K

    # --- batch padding (sublane multiple of 8) and blocking ----------------
    B_pad = _round_up(B, 8)
    if batch_block is None:
        TB = B_pad
        # >= 2 batch blocks when the padded batch allows it (v7x dual-TC can
        # split the "parallel" axis); cap TB at 128 rows to bound the
        # per-block VMEM working set (D block + i2h cache + x_char/out blocks)
        # under v7x's 64 MiB physical VMEM.
        if TB % 16 == 0:
            TB //= 2
        while TB > 128 and TB % 16 == 0:
            TB //= 2
    else:
        TB = batch_block
    assert B_pad % TB == 0 and TB % 8 == 0
    nb = B_pad // TB

    # --- T chunking for the tanh/score intermediate ------------------------
    if t_chunk is None:
        t_chunk = T
        if T % 8 == 0:
            for cand in (32, 16, 8):
                if T % cand == 0:
                    t_chunk = cand
                    break
    assert T % t_chunk == 0
    nT = T // t_chunk

    # --- wrapper glue: pads, pre-transposed bf16 MXU operands, XLA gather ---
    if B_pad != B:
        D_in = jnp.pad(D_prime, ((0, B_pad - B), (0, 0), (0, 0)))
    else:
        D_in = D_prime
    d_b16 = D_in.astype(bf16)                                   # (B_pad, T, H)

    text_i32 = text[:, :num_steps].astype(jnp.int32)
    text_pad = jnp.pad(text_i32, ((0, B_pad - B), (0, S_pad - num_steps)))

    # Character contribution with LSTM biases folded in (teacher forcing).
    w_ih_cls = params["W_ih"][:, H:].T                          # (C, 4H)
    b_lstm = params["b_ih"] + params["b_hh"]                    # (4H,)
    x_char_all = (w_ih_cls[text_pad] + b_lstm[None, None, :]).astype(f32)
    # -> (B_pad, S_pad, 4H) f32, streamed (TB, K, 4H) per grid step.

    w_i2h_t = params["W_i2h"].T.astype(bf16)                    # (H, H)
    b_i2h = params["b_i2h"][None, :].astype(f32)                # (1, H)
    # Fused h-operand: [W_h2h^T | W_hh^T] -> one MXU push per step on h.
    w_h_fused = jnp.concatenate(
        [params["W_h2h"].T, params["W_hh"].T], axis=1).astype(bf16)   # (H, 5H)
    w_score = params["W_score"].astype(f32)                     # (1, H) VPU row
    w_ih_g_t = params["W_ih"][:, :H].T.astype(bf16)             # (H, 4H)
    w_gen_t = jnp.pad(params["W_gen"].T, ((0, 0), (0, Cp - C))).astype(bf16)
    b_gen = jnp.pad(params["b_gen"], (0, Cp - C))[None, :].astype(f32)

    def kernel(x_char_ref,                                      # (TB, K, 4H) f32
               d_ref,                                           # (TB, T, H) bf16
               w_i2h_ref, b_i2h_ref, w_h_ref, w_score_ref,
               w_ih_g_ref, w_gen_ref, b_gen_ref,
               out_ref,                                         # (TB, K, Cp) f32
               i2h_scr,                                         # (TB, T, H) bf16
               h_scr, c_scr):                                   # (TB, H) f32
        si = pl.program_id(1)          # step block ("arbitrary", sequential)

        @pl.when(si == 0)
        def _():
            h_scr[...] = jnp.zeros_like(h_scr)
            c_scr[...] = jnp.zeros_like(c_scr)
            # Step-invariant i2h(D_prime): computed once per batch block.
            i2h = lax.dot_general(
                d_ref[...], w_i2h_ref[...],
                (((2,), (0,)), ((), ())),
                preferred_element_type=jnp.float32) + b_i2h_ref[...]
            i2h_scr[...] = i2h.astype(i2h_scr.dtype)            # bf16 resident

        h = h_scr[...]                                          # (TB, H) f32
        c = c_scr[...]
        w_score_row = w_score_ref[...]                          # (1, H) f32

        for s in range(K):
            h_b16 = h.astype(jnp.bfloat16)

            # Fused h matmuls: [h2h | W_hh gate contribution] in one MXU push.
            hmat = jnp.dot(h_b16, w_h_ref[...],
                           preferred_element_type=jnp.float32)   # (TB, 5H)
            h2h = hmat[:, :H]

            # Attention scores, chunked over T so only one (TB, t_chunk, H)
            # f32 tanh intermediate is live at a time (no full-z spill).
            e_parts = []
            for tc in range(nT):
                lo = tc * t_chunk
                z = jnp.tanh(
                    i2h_scr[:, lo:lo + t_chunk, :].astype(jnp.float32)
                    + h2h[:, None, :])                           # (TB, tc, H)
                e_parts.append(jnp.sum(z * w_score_row, axis=-1))  # (TB, tc)
            e = e_parts[0] if nT == 1 else jnp.concatenate(e_parts, axis=-1)

            # softmax over the source-sequence axis (tiny (TB, T) matrix)
            e = e - jnp.max(e, axis=1, keepdims=True)
            p = jnp.exp(e)
            a = p * pl.reciprocal(jnp.sum(p, axis=1, keepdims=True),
                                  approx=True)

            # context vector g_t = a_t @ D_prime (batched MXU contraction)
            g = lax.dot_general(
                a.astype(jnp.bfloat16)[:, None, :], d_ref[...],
                (((2,), (1,)), ((0,), (0,))),
                preferred_element_type=jnp.float32)[:, 0, :]     # (TB, H)

            # LSTMCell on cat(g_t, onehot); PyTorch gate order i, f, g, o.
            x_char_s = x_char_ref[:, s:s + 1, :][:, 0, :]        # (TB, 4H) f32
            gates = (jnp.dot(g.astype(jnp.bfloat16), w_ih_g_ref[...],
                             preferred_element_type=jnp.float32)
                     + hmat[:, H:] + x_char_s)                   # (TB, 4H)
            i_g = jax.nn.sigmoid(gates[:, 0 * H:1 * H])
            f_g = jax.nn.sigmoid(gates[:, 1 * H:2 * H])
            g_g = jnp.tanh(gates[:, 2 * H:3 * H])
            o_g = jax.nn.sigmoid(gates[:, 3 * H:4 * H])
            c = f_g * c + i_g * g_g
            h = o_g * jnp.tanh(c)

            # generator(h_t) -> lane-dense padded logits, stored B-major.
            logits = jnp.dot(h.astype(jnp.bfloat16), w_gen_ref[...],
                             preferred_element_type=jnp.float32) + b_gen_ref[...]
            out_ref[:, s:s + 1, :] = logits[:, None, :].astype(out_ref.dtype)

        h_scr[...] = h
        c_scr[...] = c

    grid_spec = pltpu.PrefetchScalarGridSpec(
        num_scalar_prefetch=0,
        grid=(nb, ns),
        in_specs=[
            pl.BlockSpec((TB, K, H4), lambda bi, si: (bi, si, 0)),  # x_char
            pl.BlockSpec((TB, T, H), lambda bi, si: (bi, 0, 0)),    # D_prime
            pl.BlockSpec((H, H), lambda bi, si: (0, 0)),            # W_i2h^T
            pl.BlockSpec((1, H), lambda bi, si: (0, 0)),            # b_i2h
            pl.BlockSpec((H, 5 * H), lambda bi, si: (0, 0)),        # [W_h2h|W_hh]^T
            pl.BlockSpec((1, H), lambda bi, si: (0, 0)),            # W_score row
            pl.BlockSpec((H, H4), lambda bi, si: (0, 0)),           # W_ih (g_t)^T
            pl.BlockSpec((H, Cp), lambda bi, si: (0, 0)),           # W_gen^T pad
            pl.BlockSpec((1, Cp), lambda bi, si: (0, 0)),           # b_gen pad
        ],
        out_specs=pl.BlockSpec((TB, K, Cp), lambda bi, si: (bi, si, 0)),
        scratch_shapes=[
            pltpu.VMEM((TB, T, H), jnp.bfloat16),   # cached i2h(D) (bf16)
            pltpu.VMEM((TB, H), jnp.float32),       # h state
            pltpu.VMEM((TB, H), jnp.float32),       # c state
        ],
    )

    # Advisory cost estimate so XLA schedules surrounding glue ops sensibly.
    flops = int(
        2 * B_pad * T * H * H
        + 2 * B_pad * S_pad * (5 * H * H + 2 * T * H + 4 * H * H + H * Cp))
    transcendentals = int(B_pad * S_pad * (T * H + T + 4 * H))
    bytes_accessed = int(
        d_b16.size * 2 + x_char_all.size * 4 + B_pad * S_pad * Cp * 4
        + (w_i2h_t.size + w_h_fused.size + w_ih_g_t.size + w_gen_t.size) * 2
        + (b_i2h.size + w_score.size + b_gen.size) * 4)

    out_bsc = pl.pallas_call(
        kernel,
        grid_spec=grid_spec,
        out_shape=jax.ShapeDtypeStruct((B_pad, S_pad, Cp), jnp.float32),
        compiler_params=pltpu.CompilerParams(
            dimension_semantics=("parallel", "arbitrary"),
            vmem_limit_bytes=32 * 1024 * 1024),
        cost_estimate=pl.CostEstimate(flops=flops,
                                      transcendentals=transcendentals,
                                      bytes_accessed=bytes_accessed),
    )(x_char_all, d_b16, w_i2h_t, b_i2h, w_h_fused, w_score,
      w_ih_g_t, w_gen_t, b_gen)

    # B-major output from the kernel: just slice off batch/step/class padding.
    return out_bsc[:B, :num_steps, :C]


def attention_forward_ref(D_prime, text, params, num_steps):
    """Pure-JAX f32 reference replicating the PyTorch forward (is_train=True)."""
    B, T, H = D_prime.shape
    C = params["W_gen"].shape[0]
    h = jnp.zeros((B, H), jnp.float32)
    c = jnp.zeros((B, H), jnp.float32)
    outs = []
    for i in range(num_steps):
        i2h = D_prime.reshape(B * T, H) @ params["W_i2h"].T + params["b_i2h"]
        h2h = h @ params["W_h2h"].T
        z = jnp.tanh(i2h.reshape(B, T, H) + h2h[:, None, :])
        e = (z.reshape(B * T, H) @ params["W_score"].T).reshape(B, T)
        a = jax.nn.softmax(e, axis=1)
        g = jnp.sum(a[:, :, None] * D_prime, axis=1)
        onehot = jax.nn.one_hot(text[:, i], C, dtype=jnp.float32)
        x = jnp.concatenate([g, onehot], axis=-1)
        gates = x @ params["W_ih"].T + params["b_ih"] + h @ params["W_hh"].T + params["b_hh"]
        i_g = jax.nn.sigmoid(gates[:, 0 * H:1 * H])
        f_g = jax.nn.sigmoid(gates[:, 1 * H:2 * H])
        g_g = jnp.tanh(gates[:, 2 * H:3 * H])
        o_g = jax.nn.sigmoid(gates[:, 3 * H:4 * H])
        c = f_g * c + i_g * g_g
        h = o_g * jnp.tanh(c)
        outs.append(h @ params["W_gen"].T + params["b_gen"])
    return jnp.stack(outs, axis=1)


if __name__ == "__main__":
    # small shapes consistent with the module
    B = 2                 # batch
    T = 8                 # length of D_prime (attended sequence)
    H = 32                # input_size (= hidden size)
    C = 16                # num_classes
    batch_max_length = 7
    num_steps = batch_max_length + 1

    key = jax.random.PRNGKey(0)
    k_param, k_d, k_t = jax.random.split(key, 3)
    params = make_params(k_param, H, C)
    D_prime = jax.random.normal(k_d, (B, T, H), jnp.float32)
    text = jax.random.randint(k_t, (B, num_steps), 0, C, dtype=jnp.int32)

    probs = attention_forward_pallas(D_prime, text, params, num_steps)
    probs = jax.block_until_ready(probs)

    ref = attention_forward_ref(D_prime, text, params, num_steps)
    assert probs.shape == (B, num_steps, C)
    # bf16 MXU operands vs. the f32 reference -> loosened tolerance.
    assert jnp.allclose(probs, ref, atol=5e-2, rtol=5e-2), \
        f"max abs diff {jnp.max(jnp.abs(probs - ref))}"

    print("KERNEL_OK")
</pallas_src>

<mosaic_0001>
module attributes {stable_mosaic.version = 11 : i64} {
  func.func @kernel(%arg0: i32, %arg1: i32, %arg2: memref<8x8x128xf32, #tpu.memory_space<vmem>>, %arg3: memref<8x8x32xbf16, #tpu.memory_space<vmem>>, %arg4: memref<32x32xbf16, #tpu.memory_space<vmem>>, %arg5: memref<1x32xf32, #tpu.memory_space<vmem>>, %arg6: memref<32x160xbf16, #tpu.memory_space<vmem>>, %arg7: memref<1x32xf32, #tpu.memory_space<vmem>>, %arg8: memref<32x128xbf16, #tpu.memory_space<vmem>>, %arg9: memref<32x128xbf16, #tpu.memory_space<vmem>>, %arg10: memref<1x128xf32, #tpu.memory_space<vmem>>, %arg11: memref<8x8x128xf32, #tpu.memory_space<vmem>>, %arg12: memref<8x8x32xbf16, #tpu.memory_space<vmem>>, %arg13: memref<8x32xf32, #tpu.memory_space<vmem>>, %arg14: memref<8x32xf32, #tpu.memory_space<vmem>>) attributes {dimension_semantics = [#tpu.dimension_semantics<parallel>, #tpu.dimension_semantics<arbitrary>], iteration_bounds = array<i64: 1, 1>, scalar_prefetch = 0 : i64, scratch_operands = 3 : i64, tpu.core_type = #tpu.core_type<tc>, window_params = [{transform_indices = @transform_0, window_bounds = array<i64: 8, 8, 128>}, {transform_indices = @transform_1, window_bounds = array<i64: 8, 8, 32>}, {pipeline_mode = #tpu.pipeline_mode<synchronous>, transform_indices = @transform_2, window_bounds = array<i64: 32, 32>}, {pipeline_mode = #tpu.pipeline_mode<synchronous>, transform_indices = @transform_3, window_bounds = array<i64: 1, 32>}, {pipeline_mode = #tpu.pipeline_mode<synchronous>, transform_indices = @transform_4, window_bounds = array<i64: 32, 160>}, {pipeline_mode = #tpu.pipeline_mode<synchronous>, transform_indices = @transform_5, window_bounds = array<i64: 1, 32>}, {pipeline_mode = #tpu.pipeline_mode<synchronous>, transform_indices = @transform_6, window_bounds = array<i64: 32, 128>}, {pipeline_mode = #tpu.pipeline_mode<synchronous>, transform_indices = @transform_7, window_bounds = array<i64: 32, 128>}, {pipeline_mode = #tpu.pipeline_mode<synchronous>, transform_indices = @transform_8, window_bounds = array<i64: 1, 128>}, {transform_indices = @transform_9, window_bounds = array<i64: 8, 8, 128>}]} {
    %c0_i32 = arith.constant 0 : i32
    %0 = arith.cmpi eq, %arg1, %c0_i32 : i32
    %1 = arith.extui %0 : i1 to i32
    %c0_i32_0 = arith.constant 0 : i32
    %2 = arith.cmpi ne, %1, %c0_i32_0 : i32
    scf.if %2 {
      %cst_242 = arith.constant 0.000000e+00 : f32
      %568 = vector.broadcast %cst_242 : f32 to vector<8x32xf32>
      %c0_243 = arith.constant 0 : index
      %c0_244 = arith.constant 0 : index
      %569 = vector.load %arg13[%c0_243, %c0_244] : memref<8x32xf32, #tpu.memory_space<vmem>>, vector<8x32xf32>
      tpu.vector_store %arg13[%c0_243, %c0_244], %568 {strides = array<i32>} : memref<8x32xf32, #tpu.memory_space<vmem>>, vector<8x32xf32>,
      %cst_245 = arith.constant 0.000000e+00 : f32
      %570 = vector.broadcast %cst_245 : f32 to vector<8x32xf32>
      %c0_246 = arith.constant 0 : index
      %c0_247 = arith.constant 0 : index
      %571 = vector.load %arg14[%c0_246, %c0_247] : memref<8x32xf32, #tpu.memory_space<vmem>>, vector<8x32xf32>
      tpu.vector_store %arg14[%c0_246, %c0_247], %570 {strides = array<i32>} : memref<8x32xf32, #tpu.memory_space<vmem>>, vector<8x32xf32>,
      %c0_248 = arith.constant 0 : index
      %c0_249 = arith.constant 0 : index
      %c0_250 = arith.constant 0 : index
      %572 = vector.load %arg3[%c0_248, %c0_249, %c0_250] : memref<8x8x32xbf16, #tpu.memory_space<vmem>>, vector<8x8x32xbf16>
      %c0_251 = arith.constant 0 : index
      %c0_252 = arith.constant 0 : index
      %573 = vector.load %arg4[%c0_251, %c0_252] : memref<32x32xbf16, #tpu.memory_space<vmem>>, vector<32x32xbf16>
      %cst_253 = arith.constant dense<0.000000e+00> : vector<8x8x32xf32>
      %574 = tpu.matmul %572, %573, %cst_253 {dimension_numbers = #tpu.dot_dimension_numbers<[2], [0], [0, 1], [1], [0, 0, 0, 1, 1, 1], [], []>} : vector<8x8x32xbf16>, vector<32x32xbf16>, vector<8x8x32xf32> -> vector<8x8x32xf32>
      %c0_254 = arith.constant 0 : index
      %c0_255 = arith.constant 0 : index
      %575 = vector.load %arg5[%c0_254, %c0_255] : memref<1x32xf32, #tpu.memory_space<vmem>>, vector<1x32xf32>
      %576 = vector.shape_cast %575 : vector<1x32xf32> to vector<1x1x32xf32>
      %577 = vector.broadcast %576 : vector<1x1x32xf32> to vector<8x8x32xf32>
      %578 = arith.addf %574, %577 : vector<8x8x32xf32>
      %579 = arith.truncf %578 : vector<8x8x32xf32> to vector<8x8x32xbf16>
      %c0_256 = arith.constant 0 : index
      %c0_257 = arith.constant 0 : index
      %c0_258 = arith.constant 0 : index
      %580 = vector.load %arg12[%c0_256, %c0_257, %c0_258] : memref<8x8x32xbf16, #tpu.memory_space<vmem>>, vector<8x8x32xbf16>
      tpu.vector_store %arg12[%c0_256, %c0_257, %c0_258], %579 {strides = array<i32>} : memref<8x8x32xbf16, #tpu.memory_space<vmem>>, vector<8x8x32xbf16>,
    } else {
    }
    %c0 = arith.constant 0 : index
    %c0_1 = arith.constant 0 : index
    %3 = vector.load %arg13[%c0, %c0_1] : memref<8x32xf32, #tpu.memory_space<vmem>>, vector<8x32xf32>
    %c0_2 = arith.constant 0 : index
    %c0_3 = arith.constant 0 : index
    %4 = vector.load %arg14[%c0_2, %c0_3] : memref<8x32xf32, #tpu.memory_space<vmem>>, vector<8x32xf32>
    %c0_4 = arith.constant 0 : index
    %c0_5 = arith.constant 0 : index
    %5 = vector.load %arg7[%c0_4, %c0_5] : memref<1x32xf32, #tpu.memory_space<vmem>>, vector<1x32xf32>
    %6 = arith.truncf %3 : vector<8x32xf32> to vector<8x32xbf16>
    %c0_6 = arith.constant 0 : index
    %c0_7 = arith.constant 0 : index
    %7 = vector.load %arg6[%c0_6, %c0_7] : memref<32x160xbf16, #tpu.memory_space<vmem>>, vector<32x160xbf16>
    %cst = arith.constant dense<0.000000e+00> : vector<8x160xf32>
    %8 = tpu.matmul %6, %7, %cst {dimension_numbers = #tpu.dot_dimension_numbers<[1], [0], [0], [1], [0, 0, 1, 1], [], []>} : vector<8x32xbf16>, vector<32x160xbf16>, vector<8x160xf32> -> vector<8x160xf32>
    %9 = vector.extract_strided_slice %8 {offsets = [0, 0], sizes = [8, 32], strides = [1, 1]} : vector<8x160xf32> to vector<8x32xf32>
    %c0_8 = arith.constant 0 : index
    %c0_9 = arith.constant 0 : index
    %c0_10 = arith.constant 0 : index
    %10 = vector.load %arg12[%c0_8, %c0_9, %c0_10] : memref<8x8x32xbf16, #tpu.memory_space<vmem>>, vector<8x8x32xbf16>
    %11 = arith.extf %10 : vector<8x8x32xbf16> to vector<8x8x32xf32>
    %12 = vector.shape_cast %9 : vector<8x32xf32> to vector<8x1x32xf32>
    %13 = vector.broadcast %12 : vector<8x1x32xf32> to vector<8x8x32xf32>
    %14 = arith.addf %11, %13 : vector<8x8x32xf32>
    %15 = math.tanh %14 : vector<8x8x32xf32>
    %16 = vector.shape_cast %5 : vector<1x32xf32> to vector<1x1x32xf32>
    %17 = vector.broadcast %16 : vector<1x1x32xf32> to vector<8x8x32xf32>
    %18 = arith.mulf %15, %17 : vector<8x8x32xf32>
    %cst_11 = arith.constant dense<0.000000e+00> : vector<8x8xf32>
    %19 = vector.multi_reduction <add>, %18, %cst_11 [2] : vector<8x8x32xf32> to vector<8x8xf32>
    %cst_12 = arith.constant dense<0xFF800000> : vector<8xf32>
    %20 = vector.multi_reduction <maximumf>, %19, %cst_12 [1] : vector<8x8xf32> to vector<8xf32>
    %21 = vector.shape_cast %20 : vector<8xf32> to vector<8x1xf32>
    %22 = vector.broadcast %21 : vector<8x1xf32> to vector<8x8xf32>
    %23 = arith.subf %19, %22 : vector<8x8xf32>
    %24 = math.exp %23 : vector<8x8xf32>
    %cst_13 = arith.constant dense<0.000000e+00> : vector<8xf32>
    %25 = vector.multi_reduction <add>, %24, %cst_13 [1] : vector<8x8xf32> to vector<8xf32>
    %26 = vector.shape_cast %25 : vector<8xf32> to vector<8x1xf32>
    %27 = tpu.reciprocal %26 {approx = true} : vector<8x1xf32> -> vector<8x1xf32>
    %28 = vector.broadcast %27 : vector<8x1xf32> to vector<8x8xf32>
    %29 = arith.mulf %24, %28 : vector<8x8xf32>
    %30 = arith.truncf %29 : vector<8x8xf32> to vector<8x8xbf16>
    %31 = vector.shape_cast %30 : vector<8x8xbf16> to vector<8x1x8xbf16>
    %c0_14 = arith.constant 0 : index
    %c0_15 = arith.constant 0 : index
    %c0_16 = arith.constant 0 : index
    %32 = vector.load %arg3[%c0_14, %c0_15, %c0_16] : memref<8x8x32xbf16, #tpu.memory_space<vmem>>, vector<8x8x32xbf16>
    %cst_17 = arith.constant dense<0.000000e+00> : vector<8x1x32xf32>
    %33 = tpu.matmul %31, %32, %cst_17 {dimension_numbers = #tpu.dot_dimension_numbers<[2], [1], [1], [2], [0, 0, 0, 1, 1, 2], [0], [0]>} : vector<8x1x8xbf16>, vector<8x8x32xbf16>, vector<8x1x32xf32> -> vector<8x1x32xf32>
    %34 = vector.shape_cast %33 : vector<8x1x32xf32> to vector<8x32xf32>
    %c0_18 = arith.constant 0 : index
    %c0_19 = arith.constant 0 : index
    %c0_20 = arith.constant 0 : index
    %35 = vector.load %arg2[%c0_18, %c0_19, %c0_20] : memref<8x8x128xf32, #tpu.memory_space<vmem>>, vector<8x1x128xf32>
    %36 = vector.shape_cast %35 : vector<8x1x128xf32> to vector<8x128xf32>
    %37 = arith.truncf %34 : vector<8x32xf32> to vector<8x32xbf16>
    %c0_21 = arith.constant 0 : index
    %c0_22 = arith.constant 0 : index
    %38 = vector.load %arg8[%c0_21, %c0_22] : memref<32x128xbf16, #tpu.memory_space<vmem>>, vector<32x128xbf16>
    %cst_23 = arith.constant dense<0.000000e+00> : vector<8x128xf32>
    %39 = tpu.matmul %37, %38, %cst_23 {dimension_numbers = #tpu.dot_dimension_numbers<[1], [0], [0], [1], [0, 0, 1, 1], [], []>} : vector<8x32xbf16>, vector<32x128xbf16>, vector<8x128xf32> -> vector<8x128xf32>
    %40 = vector.extract_strided_slice %8 {offsets = [0, 32], sizes = [8, 128], strides = [1, 1]} : vector<8x160xf32> to vector<8x128xf32>
    %41 = arith.addf %39, %40 : vector<8x128xf32>
    %42 = arith.addf %41, %36 : vector<8x128xf32>
    %43 = vector.extract_strided_slice %42 {offsets = [0, 0], sizes = [8, 32], strides = [1, 1]} : vector<8x128xf32> to vector<8x32xf32>
    %44 = arith.negf %43 : vector<8x32xf32>
    %45 = math.exp %44 : vector<8x32xf32>
    %cst_24 = arith.constant 1.000000e+00 : f32
    %46 = vector.broadcast %cst_24 : f32 to vector<8x32xf32>
    %47 = arith.addf %46, %45 : vector<8x32xf32>
    %48 = arith.divf %46, %47 : vector<8x32xf32>
    %49 = vector.extract_strided_slice %42 {offsets = [0, 32], sizes = [8, 32], strides = [1, 1]} : vector<8x128xf32> to vector<8x32xf32>
    %50 = arith.negf %49 : vector<8x32xf32>
    %51 = math.exp %50 : vector<8x32xf32>
    %cst_25 = arith.constant 1.000000e+00 : f32
    %52 = vector.broadcast %cst_25 : f32 to vector<8x32xf32>
    %53 = arith.addf %52, %51 : vector<8x32xf32>
    %54 = arith.divf %52, %53 : vector<8x32xf32>
    %55 = vector.extract_strided_slice %42 {offsets = [0, 64], sizes = [8, 32], strides = [1, 1]} : vector<8x128xf32> to vector<8x32xf32>
    %56 = math.tanh %55 : vector<8x32xf32>
    %57 = vector.extract_strided_slice %42 {offsets = [0, 96], sizes = [8, 32], strides = [1, 1]} : vector<8x128xf32> to vector<8x32xf32>
    %58 = arith.negf %57 : vector<8x32xf32>
    %59 = math.exp %58 : vector<8x32xf32>
    %cst_26 = arith.constant 1.000000e+00 : f32
    %60 = vector.broadcast %cst_26 : f32 to vector<8x32xf32>
    %61 = arith.addf %60, %59 : vector<8x32xf32>
    %62 = arith.divf %60, %61 : vector<8x32xf32>
    %63 = arith.mulf %54, %4 : vector<8x32xf32>
    %64 = arith.mulf %48, %56 : vector<8x32xf32>
    %65 = arith.addf %63, %64 : vector<8x32xf32>
    %66 = math.tanh %65 : vector<8x32xf32>
    %67 = arith.mulf %62, %66 : vector<8x32xf32>
    %68 = arith.truncf %67 : vector<8x32xf32> to vector<8x32xbf16>
    %c0_27 = arith.constant 0 : index
    %c0_28 = arith.constant 0 : index
    %69 = vector.load %arg9[%c0_27, %c0_28] : memref<32x128xbf16, #tpu.memory_space<vmem>>, vector<32x128xbf16>
    %cst_29 = arith.constant dense<0.000000e+00> : vector<8x128xf32>
    %70 = tpu.matmul %68, %69, %cst_29 {dimension_numbers = #tpu.dot_dimension_numbers<[1], [0], [0], [1], [0, 0, 1, 1], [], []>} : vector<8x32xbf16>, vector<32x128xbf16>, vector<8x128xf32> -> vector<8x128xf32>
    %c0_30 = arith.constant 0 : index
    %c0_31 = arith.constant 0 : index
    %71 = vector.load %arg10[%c0_30, %c0_31] : memref<1x128xf32, #tpu.memory_space<vmem>>, vector<1x128xf32>
    %72 = vector.broadcast %71 : vector<1x128xf32> to vector<8x128xf32>
    %73 = arith.addf %70, %72 : vector<8x128xf32>
    %74 = vector.shape_cast %73 : vector<8x128xf32> to vector<8x1x128xf32>
    %c0_32 = arith.constant 0 : index
    %c0_33 = arith.constant 0 : index
    %c0_34 = arith.constant 0 : index
    %75 = vector.load %arg11[%c0_32, %c0_33, %c0_34] : memref<8x8x128xf32, #tpu.memory_space<vmem>>, vector<8x1x128xf32>
    tpu.vector_store %arg11[%c0_32, %c0_33, %c0_34], %74 {strides = array<i32>} : memref<8x8x128xf32, #tpu.memory_space<vmem>>, vector<8x1x128xf32>,
    %76 = arith.truncf %67 : vector<8x32xf32> to vector<8x32xbf16>
    %c0_35 = arith.constant 0 : index
    %c0_36 = arith.constant 0 : index
    %77 = vector.load %arg6[%c0_35, %c0_36] : memref<32x160xbf16, #tpu.memory_space<vmem>>, vector<32x160xbf16>
    %cst_37 = arith.constant dense<0.000000e+00> : vector<8x160xf32>
    %78 = tpu.matmul %76, %77, %cst_37 {dimension_numbers = #tpu.dot_dimension_numbers<[1], [0], [0], [1], [0, 0, 1, 1], [], []>} : vector<8x32xbf16>, vector<32x160xbf16>, vector<8x160xf32> -> vector<8x160xf32>
    %79 = vector.extract_strided_slice %78 {offsets = [0, 0], sizes = [8, 32], strides = [1, 1]} : vector<8x160xf32> to vector<8x32xf32>
    %c0_38 = arith.constant 0 : index
    %c0_39 = arith.constant 0 : index
    %c0_40 = arith.constant 0 : index
    %80 = vector.load %arg12[%c0_38, %c0_39, %c0_40] : memref<8x8x32xbf16, #tpu.memory_space<vmem>>, vector<8x8x32xbf16>
    %81 = arith.extf %80 : vector<8x8x32xbf16> to vector<8x8x32xf32>
    %82 = vector.shape_cast %79 : vector<8x32xf32> to vector<8x1x32xf32>
    %83 = vector.broadcast %82 : vector<8x1x32xf32> to vector<8x8x32xf32>
    %84 = arith.addf %81, %83 : vector<8x8x32xf32>
    %85 = math.tanh %84 : vector<8x8x32xf32>
    %86 = vector.shape_cast %5 : vector<1x32xf32> to vector<1x1x32xf32>
    %87 = vector.broadcast %86 : vector<1x1x32xf32> to vector<8x8x32xf32>
    %88 = arith.mulf %85, %87 : vector<8x8x32xf32>
    %cst_41 = arith.constant dense<0.000000e+00> : vector<8x8xf32>
    %89 = vector.multi_reduction <add>, %88, %cst_41 [2] : vector<8x8x32xf32> to vector<8x8xf32>
    %cst_42 = arith.constant dense<0xFF800000> : vector<8xf32>
    %90 = vector.multi_reduction <maximumf>, %89, %cst_42 [1] : vector<8x8xf32> to vector<8xf32>
    %91 = vector.shape_cast %90 : vector<8xf32> to vector<8x1xf32>
    %92 = vector.broadcast %91 : vector<8x1xf32> to vector<8x8xf32>
    %93 = arith.subf %89, %92 : vector<8x8xf32>
    %94 = math.exp %93 : vector<8x8xf32>
    %cst_43 = arith.constant dense<0.000000e+00> : vector<8xf32>
    %95 = vector.multi_reduction <add>, %94, %cst_43 [1] : vector<8x8xf32> to vector<8xf32>
    %96 = vector.shape_cast %95 : vector<8xf32> to vector<8x1xf32>
    %97 = tpu.reciprocal %96 {approx = true} : vector<8x1xf32> -> vector<8x1xf32>
    %98 = vector.broadcast %97 : vector<8x1xf32> to vector<8x8xf32>
    %99 = arith.mulf %94, %98 : vector<8x8xf32>
    %100 = arith.truncf %99 : vector<8x8xf32> to vector<8x8xbf16>
    %101 = vector.shape_cast %100 : vector<8x8xbf16> to vector<8x1x8xbf16>
    %c0_44 = arith.constant 0 : index
    %c0_45 = arith.constant 0 : index
    %c0_46 = arith.constant 0 : index
    %102 = vector.load %arg3[%c0_44, %c0_45, %c0_46] : memref<8x8x32xbf16, #tpu.memory_space<vmem>>, vector<8x8x32xbf16>
    %cst_47 = arith.constant dense<0.000000e+00> : vector<8x1x32xf32>
    %103 = tpu.matmul %101, %102, %cst_47 {dimension_numbers = #tpu.dot_dimension_numbers<[2], [1], [1], [2], [0, 0, 0, 1, 1, 2], [0], [0]>} : vector<8x1x8xbf16>, vector<8x8x32xbf16>, vector<8x1x32xf32> -> vector<8x1x32xf32>
    %104 = vector.shape_cast %103 : vector<8x1x32xf32> to vector<8x32xf32>
    %c0_48 = arith.constant 0 : index
    %c1 = arith.constant 1 : index
    %c0_49 = arith.constant 0 : index
    %105 = vector.load %arg2[%c0_48, %c1, %c0_49] : memref<8x8x128xf32, #tpu.memory_space<vmem>>, vector<8x1x128xf32>
    %106 = vector.shape_cast %105 : vector<8x1x128xf32> to vector<8x128xf32>
    %107 = arith.truncf %104 : vector<8x32xf32> to vector<8x32xbf16>
    %c0_50 = arith.constant 0 : index
    %c0_51 = arith.constant 0 : index
    %108 = vector.load %arg8[%c0_50, %c0_51] : memref<32x128xbf16, #tpu.memory_space<vmem>>, vector<32x128xbf16>
    %cst_52 = arith.constant dense<0.000000e+00> : vector<8x128xf32>
    %109 = tpu.matmul %107, %108, %cst_52 {dimension_numbers = #tpu.dot_dimension_numbers<[1], [0], [0], [1], [0, 0, 1, 1], [], []>} : vector<8x32xbf16>, vector<32x128xbf16>, vector<8x128xf32> -> vector<8x128xf32>
    %110 = vector.extract_strided_slice %78 {offsets = [0, 32], sizes = [8, 128], strides = [1, 1]} : vector<8x160xf32> to vector<8x128xf32>
    %111 = arith.addf %109, %110 : vector<8x128xf32>
    %112 = arith.addf %111, %106 : vector<8x128xf32>
    %113 = vector.extract_strided_slice %112 {offsets = [0, 0], sizes = [8, 32], strides = [1, 1]} : vector<8x128xf32> to vector<8x32xf32>
    %114 = arith.negf %113 : vector<8x32xf32>
    %115 = math.exp %114 : vector<8x32xf32>
    %cst_53 = arith.constant 1.000000e+00 : f32
    %116 = vector.broadcast %cst_53 : f32 to vector<8x32xf32>
    %117 = arith.addf %116, %115 : vector<8x32xf32>
    %118 = arith.divf %116, %117 : vector<8x32xf32>
    %119 = vector.extract_strided_slice %112 {offsets = [0, 32], sizes = [8, 32], strides = [1, 1]} : vector<8x128xf32> to vector<8x32xf32>
    %120 = arith.negf %119 : vector<8x32xf32>
    %121 = math.exp %120 : vector<8x32xf32>
    %cst_54 = arith.constant 1.000000e+00 : f32
    %122 = vector.broadcast %cst_54 : f32 to vector<8x32xf32>
    %123 = arith.addf %122, %121 : vector<8x32xf32>
    %124 = arith.divf %122, %123 : vector<8x32xf32>
    %125 = vector.extract_strided_slice %112 {offsets = [0, 64], sizes = [8, 32], strides = [1, 1]} : vector<8x128xf32> to vector<8x32xf32>
    %126 = math.tanh %125 : vector<8x32xf32>
    %127 = vector.extract_strided_slice %112 {offsets = [0, 96], sizes = [8, 32], strides = [1, 1]} : vector<8x128xf32> to vector<8x32xf32>
    %128 = arith.negf %127 : vector<8x32xf32>
    %129 = math.exp %128 : vector<8x32xf32>
    %cst_55 = arith.constant 1.000000e+00 : f32
    %130 = vector.broadcast %cst_55 : f32 to vector<8x32xf32>
    %131 = arith.addf %130, %129 : vector<8x32xf32>
    %132 = arith.divf %130, %131 : vector<8x32xf32>
    %133 = arith.mulf %124, %65 : vector<8x32xf32>
    %134 = arith.mulf %118, %126 : vector<8x32xf32>
    %135 = arith.addf %133, %134 : vector<8x32xf32>
    %136 = math.tanh %135 : vector<8x32xf32>
    %137 = arith.mulf %132, %136 : vector<8x32xf32>
    %138 = arith.truncf %137 : vector<8x32xf32> to vector<8x32xbf16>
    %c0_56 = arith.constant 0 : index
    %c0_57 = arith.constant 0 : index
    %139 = vector.load %arg9[%c0_56, %c0_57] : memref<32x128xbf16, #tpu.memory_space<vmem>>, vector<32x128xbf16>
    %cst_58 = arith.constant dense<0.000000e+00> : vector<8x128xf32>
    %140 = tpu.matmul %138, %139, %cst_58 {dimension_numbers = #tpu.dot_dimension_numbers<[1], [0], [0], [1], [0, 0, 1, 1], [], []>} : vector<8x32xbf16>, vector<32x128xbf16>, vector<8x128xf32> -> vector<8x128xf32>
    %c0_59 = arith.constant 0 : index
    %c0_60 = arith.constant 0 : index
    %141 = vector.load %arg10[%c0_59, %c0_60] : memref<1x128xf32, #tpu.memory_space<vmem>>, vector<1x128xf32>
    %142 = vector.broadcast %141 : vector<1x128xf32> to vector<8x128xf32>
    %143 = arith.addf %140, %142 : vector<8x128xf32>
    %144 = vector.shape_cast %143 : vector<8x128xf32> to vector<8x1x128xf32>
    %c0_61 = arith.constant 0 : index
    %c1_62 = arith.constant 1 : index
    %c0_63 = arith.constant 0 : index
    %145 = vector.load %arg11[%c0_61, %c1_62, %c0_63] : memref<8x8x128xf32, #tpu.memory_space<vmem>>, vector<8x1x128xf32>
    tpu.vector_store %arg11[%c0_61, %c1_62, %c0_63], %144 {strides = array<i32>} : memref<8x8x128xf32, #tpu.memory_space<vmem>>, vector<8x1x128xf32>,
    %146 = arith.truncf %137 : vector<8x32xf32> to vector<8x32xbf16>
    %c0_64 = arith.constant 0 : index
    %c0_65 = arith.constant 0 : index
    %147 = vector.load %arg6[%c0_64, %c0_65] : memref<32x160xbf16, #tpu.memory_space<vmem>>, vector<32x160xbf16>
    %cst_66 = arith.constant dense<0.000000e+00> : vector<8x160xf32>
    %148 = tpu.matmul %146, %147, %cst_66 {dimension_numbers = #tpu.dot_dimension_numbers<[1], [0], [0], [1], [0, 0, 1, 1], [], []>} : vector<8x32xbf16>, vector<32x160xbf16>, vector<8x160xf32> -> vector<8x160xf32>
    %149 = vector.extract_strided_slice %148 {offsets = [0, 0], sizes = [8, 32], strides = [1, 1]} : vector<8x160xf32> to vector<8x32xf32>
    %c0_67 = arith.constant 0 : index
    %c0_68 = arith.constant 0 : index
    %c0_69 = arith.constant 0 : index
    %150 = vector.load %arg12[%c0_67, %c0_68, %c0_69] : memref<8x8x32xbf16, #tpu.memory_space<vmem>>, vector<8x8x32xbf16>
    %151 = arith.extf %150 : vector<8x8x32xbf16> to vector<8x8x32xf32>
    %152 = vector.shape_cast %149 : vector<8x32xf32> to vector<8x1x32xf32>
    %153 = vector.broadcast %152 : vector<8x1x32xf32> to vector<8x8x32xf32>
    %154 = arith.addf %151, %153 : vector<8x8x32xf32>
    %155 = math.tanh %154 : vector<8x8x32xf32>
    %156 = vector.shape_cast %5 : vector<1x32xf32> to vector<1x1x32xf32>
    %157 = vector.broadcast %156 : vector<1x1x32xf32> to vector<8x8x32xf32>
    %158 = arith.mulf %155, %157 : vector<8x8x32xf32>
    %cst_70 = arith.constant dense<0.000000e+00> : vector<8x8xf32>
    %159 = vector.multi_reduction <add>, %158, %cst_70 [2] : vector<8x8x32xf32> to vector<8x8xf32>
    %cst_71 = arith.constant dense<0xFF800000> : vector<8xf32>
    %160 = vector.multi_reduction <maximumf>, %159, %cst_71 [1] : vector<8x8xf32> to vector<8xf32>
    %161 = vector.shape_cast %160 : vector<8xf32> to vector<8x1xf32>
    %162 = vector.broadcast %161 : vector<8x1xf32> to vector<8x8xf32>
    %163 = arith.subf %159, %162 : vector<8x8xf32>
    %164 = math.exp %163 : vector<8x8xf32>
    %cst_72 = arith.constant dense<0.000000e+00> : vector<8xf32>
    %165 = vector.multi_reduction <add>, %164, %cst_72 [1] : vector<8x8xf32> to vector<8xf32>
    %166 = vector.shape_cast %165 : vector<8xf32> to vector<8x1xf32>
    %167 = tpu.reciprocal %166 {approx = true} : vector<8x1xf32> -> vector<8x1xf32>
    %168 = vector.broadcast %167 : vector<8x1xf32> to vector<8x8xf32>
    %169 = arith.mulf %164, %168 : vector<8x8xf32>
    %170 = arith.truncf %169 : vector<8x8xf32> to vector<8x8xbf16>
    %171 = vector.shape_cast %170 : vector<8x8xbf16> to vector<8x1x8xbf16>
    %c0_73 = arith.constant 0 : index
    %c0_74 = arith.constant 0 : index
    %c0_75 = arith.constant 0 : index
    %172 = vector.load %arg3[%c0_73, %c0_74, %c0_75] : memref<8x8x32xbf16, #tpu.memory_space<vmem>>, vector<8x8x32xbf16>
    %cst_76 = arith.constant dense<0.000000e+00> : vector<8x1x32xf32>
    %173 = tpu.matmul %171, %172, %cst_76 {dimension_numbers = #tpu.dot_dimension_numbers<[2], [1], [1], [2], [0, 0, 0, 1, 1, 2], [0], [0]>} : vector<8x1x8xbf16>, vector<8x8x32xbf16>, vector<8x1x32xf32> -> vector<8x1x32xf32>
    %174 = vector.shape_cast %173 : vector<8x1x32xf32> to vector<8x32xf32>
    %c0_77 = arith.constant 0 : index
    %c2 = arith.constant 2 : index
    %c0_78 = arith.constant 0 : index
    %175 = vector.load %arg2[%c0_77, %c2, %c0_78] : memref<8x8x128xf32, #tpu.memory_space<vmem>>, vector<8x1x128xf32>
    %176 = vector.shape_cast %175 : vector<8x1x128xf32> to vector<8x128xf32>
    %177 = arith.truncf %174 : vector<8x32xf32> to vector<8x32xbf16>
    %c0_79 = arith.constant 0 : index
    %c0_80 = arith.constant 0 : index
    %178 = vector.load %arg8[%c0_79, %c0_80] : memref<32x128xbf16, #tpu.memory_space<vmem>>, vector<32x128xbf16>
    %cst_81 = arith.constant dense<0.000000e+00> : vector<8x128xf32>
    %179 = tpu.matmul %177, %178, %cst_81 {dimension_numbers = #tpu.dot_dimension_numbers<[1], [0], [0], [1], [0, 0, 1, 1], [], []>} : vector<8x32xbf16>, vector<32x128xbf16>, vector<8x128xf32> -> vector<8x128xf32>
    %180 = vector.extract_strided_slice %148 {offsets = [0, 32], sizes = [8, 128], strides = [1, 1]} : vector<8x160xf32> to vector<8x128xf32>
    %181 = arith.addf %179, %180 : vector<8x128xf32>
    %182 = arith.addf %181, %176 : vector<8x128xf32>
    %183 = vector.extract_strided_slice %182 {offsets = [0, 0], sizes = [8, 32], strides = [1, 1]} : vector<8x128xf32> to vector<8x32xf32>
    %184 = arith.negf %183 : vector<8x32xf32>
    %185 = math.exp %184 : vector<8x32xf32>
    %cst_82 = arith.constant 1.000000e+00 : f32
    %186 = vector.broadcast %cst_82 : f32 to vector<8x32xf32>
    %187 = arith.addf %186, %185 : vector<8x32xf32>
    %188 = arith.divf %186, %187 : vector<8x32xf32>
    %189 = vector.extract_strided_slice %182 {offsets = [0, 32], sizes = [8, 32], strides = [1, 1]} : vector<8x128xf32> to vector<8x32xf32>
    %190 = arith.negf %189 : vector<8x32xf32>
    %191 = math.exp %190 : vector<8x32xf32>
    %cst_83 = arith.constant 1.000000e+00 : f32
    %192 = vector.broadcast %cst_83 : f32 to vector<8x32xf32>
    %193 = arith.addf %192, %191 : vector<8x32xf32>
    %194 = arith.divf %192, %193 : vector<8x32xf32>
    %195 = vector.extract_strided_slice %182 {offsets = [0, 64], sizes = [8, 32], strides = [1, 1]} : vector<8x128xf32> to vector<8x32xf32>
    %196 = math.tanh %195 : vector<8x32xf32>
    %197 = vector.extract_strided_slice %182 {offsets = [0, 96], sizes = [8, 32], strides = [1, 1]} : vector<8x128xf32> to vector<8x32xf32>
    %198 = arith.negf %197 : vector<8x32xf32>
    %199 = math.exp %198 : vector<8x32xf32>
    %cst_84 = arith.constant 1.000000e+00 : f32
    %200 = vector.broadcast %cst_84 : f32 to vector<8x32xf32>
    %201 = arith.addf %200, %199 : vector<8x32xf32>
    %202 = arith.divf %200, %201 : vector<8x32xf32>
    %203 = arith.mulf %194, %135 : vector<8x32xf32>
    %204 = arith.mulf %188, %196 : vector<8x32xf32>
    %205 = arith.addf %203, %204 : vector<8x32xf32>
    %206 = math.tanh %205 : vector<8x32xf32>
    %207 = arith.mulf %202, %206 : vector<8x32xf32>
    %208 = arith.truncf %207 : vector<8x32xf32> to vector<8x32xbf16>
    %c0_85 = arith.constant 0 : index
    %c0_86 = arith.constant 0 : index
    %209 = vector.load %arg9[%c0_85, %c0_86] : memref<32x128xbf16, #tpu.memory_space<vmem>>, vector<32x128xbf16>
    %cst_87 = arith.constant dense<0.000000e+00> : vector<8x128xf32>
    %210 = tpu.matmul %208, %209, %cst_87 {dimension_numbers = #tpu.dot_dimension_numbers<[1], [0], [0], [1], [0, 0, 1, 1], [], []>} : vector<8x32xbf16>, vector<32x128xbf16>, vector<8x128xf32> -> vector<8x128xf32>
    %c0_88 = arith.constant 0 : index
    %c0_89 = arith.constant 0 : index
    %211 = vector.load %arg10[%c0_88, %c0_89] : memref<1x128xf32, #tpu.memory_space<vmem>>, vector<1x128xf32>
    %212 = vector.broadcast %211 : vector<1x128xf32> to vector<8x128xf32>
    %213 = arith.addf %210, %212 : vector<8x128xf32>
    %214 = vector.shape_cast %213 : vector<8x128xf32> to vector<8x1x128xf32>
    %c0_90 = arith.constant 0 : index
    %c2_91 = arith.constant 2 : index
    %c0_92 = arith.constant 0 : index
    %215 = vector.load %arg11[%c0_90, %c2_91, %c0_92] : memref<8x8x128xf32, #tpu.memory_space<vmem>>, vector<8x1x128xf32>
    tpu.vector_store %arg11[%c0_90, %c2_91, %c0_92], %214 {strides = array<i32>} : memref<8x8x128xf32, #tpu.memory_space<vmem>>, vector<8x1x128xf32>,
    %216 = arith.truncf %207 : vector<8x32xf32> to vector<8x32xbf16>
    %c0_93 = arith.constant 0 : index
    %c0_94 = arith.constant 0 : index
    %217 = vector.load %arg6[%c0_93, %c0_94] : memref<32x160xbf16, #tpu.memory_space<vmem>>, vector<32x160xbf16>
    %cst_95 = arith.constant dense<0.000000e+00> : vector<8x160xf32>
    %218 = tpu.matmul %216, %217, %cst_95 {dimension_numbers = #tpu.dot_dimension_numbers<[1], [0], [0], [1], [0, 0, 1, 1], [], []>} : vector<8x32xbf16>, vector<32x160xbf16>, vector<8x160xf32> -> vector<8x160xf32>
    %219 = vector.extract_strided_slice %218 {offsets = [0, 0], sizes = [8, 32], strides = [1, 1]} : vector<8x160xf32> to vector<8x32xf32>
    %c0_96 = arith.constant 0 : index
    %c0_97 = arith.constant 0 : index
    %c0_98 = arith.constant 0 : index
    %220 = vector.load %arg12[%c0_96, %c0_97, %c0_98] : memref<8x8x32xbf16, #tpu.memory_space<vmem>>, vector<8x8x32xbf16>
    %221 = arith.extf %220 : vector<8x8x32xbf16> to vector<8x8x32xf32>
    %222 = vector.shape_cast %219 : vector<8x32xf32> to vector<8x1x32xf32>
    %223 = vector.broadcast %222 : vector<8x1x32xf32> to vector<8x8x32xf32>
    %224 = arith.addf %221, %223 : vector<8x8x32xf32>
    %225 = math.tanh %224 : vector<8x8x32xf32>
    %226 = vector.shape_cast %5 : vector<1x32xf32> to vector<1x1x32xf32>
    %227 = vector.broadcast %226 : vector<1x1x32xf32> to vector<8x8x32xf32>
    %228 = arith.mulf %225, %227 : vector<8x8x32xf32>
    %cst_99 = arith.constant dense<0.000000e+00> : vector<8x8xf32>
    %229 = vector.multi_reduction <add>, %228, %cst_99 [2] : vector<8x8x32xf32> to vector<8x8xf32>
    %cst_100 = arith.constant dense<0xFF800000> : vector<8xf32>
    %230 = vector.multi_reduction <maximumf>, %229, %cst_100 [1] : vector<8x8xf32> to vector<8xf32>
    %231 = vector.shape_cast %230 : vector<8xf32> to vector<8x1xf32>
    %232 = vector.broadcast %231 : vector<8x1xf32> to vector<8x8xf32>
    %233 = arith.subf %229, %232 : vector<8x8xf32>
    %234 = math.exp %233 : vector<8x8xf32>
    %cst_101 = arith.constant dense<0.000000e+00> : vector<8xf32>
    %235 = vector.multi_reduction <add>, %234, %cst_101 [1] : vector<8x8xf32> to vector<8xf32>
    %236 = vector.shape_cast %235 : vector<8xf32> to vector<8x1xf32>
    %237 = tpu.reciprocal %236 {approx = true} : vector<8x1xf32> -> vector<8x1xf32>
    %238 = vector.broadcast %237 : vector<8x1xf32> to vector<8x8xf32>
    %239 = arith.mulf %234, %238 : vector<8x8xf32>
    %240 = arith.truncf %239 : vector<8x8xf32> to vector<8x8xbf16>
    %241 = vector.shape_cast %240 : vector<8x8xbf16> to vector<8x1x8xbf16>
    %c0_102 = arith.constant 0 : index
    %c0_103 = arith.constant 0 : index
    %c0_104 = arith.constant 0 : index
    %242 = vector.load %arg3[%c0_102, %c0_103, %c0_104] : memref<8x8x32xbf16, #tpu.memory_space<vmem>>, vector<8x8x32xbf16>
    %cst_105 = arith.constant dense<0.000000e+00> : vector<8x1x32xf32>
    %243 = tpu.matmul %241, %242, %cst_105 {dimension_numbers = #tpu.dot_dimension_numbers<[2], [1], [1], [2], [0, 0, 0, 1, 1, 2], [0], [0]>} : vector<8x1x8xbf16>, vector<8x8x32xbf16>, vector<8x1x32xf32> -> vector<8x1x32xf32>
    %244 = vector.shape_cast %243 : vector<8x1x32xf32> to vector<8x32xf32>
    %c0_106 = arith.constant 0 : index
    %c3 = arith.constant 3 : index
    %c0_107 = arith.constant 0 : index
    %245 = vector.load %arg2[%c0_106, %c3, %c0_107] : memref<8x8x128xf32, #tpu.memory_space<vmem>>, vector<8x1x128xf32>
    %246 = vector.shape_cast %245 : vector<8x1x128xf32> to vector<8x128xf32>
    %247 = arith.truncf %244 : vector<8x32xf32> to vector<8x32xbf16>
    %c0_108 = arith.constant 0 : index
    %c0_109 = arith.constant 0 : index
    %248 = vector.load %arg8[%c0_108, %c0_109] : memref<32x128xbf16, #tpu.memory_space<vmem>>, vector<32x128xbf16>
    %cst_110 = arith.constant dense<0.000000e+00> : vector<8x128xf32>
    %249 = tpu.matmul %247, %248, %cst_110 {dimension_numbers = #tpu.dot_dimension_numbers<[1], [0], [0], [1], [0, 0, 1, 1], [], []>} : vector<8x32xbf16>, vector<32x128xbf16>, vector<8x128xf32> -> vector<8x128xf32>
    %250 = vector.extract_strided_slice %218 {offsets = [0, 32], sizes = [8, 128], strides = [1, 1]} : vector<8x160xf32> to vector<8x128xf32>
    %251 = arith.addf %249, %250 : vector<8x128xf32>
    %252 = arith.addf %251, %246 : vector<8x128xf32>
    %253 = vector.extract_strided_slice %252 {offsets = [0, 0], sizes = [8, 32], strides = [1, 1]} : vector<8x128xf32> to vector<8x32xf32>
    %254 = arith.negf %253 : vector<8x32xf32>
    %255 = math.exp %254 : vector<8x32xf32>
    %cst_111 = arith.constant 1.000000e+00 : f32
    %256 = vector.broadcast %cst_111 : f32 to vector<8x32xf32>
    %257 = arith.addf %256, %255 : vector<8x32xf32>
    %258 = arith.divf %256, %257 : vector<8x32xf32>
    %259 = vector.extract_strided_slice %252 {offsets = [0, 32], sizes = [8, 32], strides = [1, 1]} : vector<8x128xf32> to vector<8x32xf32>
    %260 = arith.negf %259 : vector<8x32xf32>
    %261 = math.exp %260 : vector<8x32xf32>
    %cst_112 = arith.constant 1.000000e+00 : f32
    %262 = vector.broadcast %cst_112 : f32 to vector<8x32xf32>
    %263 = arith.addf %262, %261 : vector<8x32xf32>
    %264 = arith.divf %262, %263 : vector<8x32xf32>
    %265 = vector.extract_strided_slice %252 {offsets = [0, 64], sizes = [8, 32], strides = [1, 1]} : vector<8x128xf32> to vector<8x32xf32>
    %266 = math.tanh %265 : vector<8x32xf32>
    %267 = vector.extract_strided_slice %252 {offsets = [0, 96], sizes = [8, 32], strides = [1, 1]} : vector<8x128xf32> to vector<8x32xf32>
    %268 = arith.negf %267 : vector<8x32xf32>
    %269 = math.exp %268 : vector<8x32xf32>
    %cst_113 = arith.constant 1.000000e+00 : f32
    %270 = vector.broadcast %cst_113 : f32 to vector<8x32xf32>
    %271 = arith.addf %270, %269 : vector<8x32xf32>
    %272 = arith.divf %270, %271 : vector<8x32xf32>
    %273 = arith.mulf %264, %205 : vector<8x32xf32>
    %274 = arith.mulf %258, %266 : vector<8x32xf32>
    %275 = arith.addf %273, %274 : vector<8x32xf32>
    %276 = math.tanh %275 : vector<8x32xf32>
    %277 = arith.mulf %272, %276 : vector<8x32xf32>
    %278 = arith.truncf %277 : vector<8x32xf32> to vector<8x32xbf16>
    %c0_114 = arith.constant 0 : index
    %c0_115 = arith.constant 0 : index
    %279 = vector.load %arg9[%c0_114, %c0_115] : memref<32x128xbf16, #tpu.memory_space<vmem>>, vector<32x128xbf16>
    %cst_116 = arith.constant dense<0.000000e+00> : vector<8x128xf32>
    %280 = tpu.matmul %278, %279, %cst_116 {dimension_numbers = #tpu.dot_dimension_numbers<[1], [0], [0], [1], [0, 0, 1, 1], [], []>} : vector<8x32xbf16>, vector<32x128xbf16>, vector<8x128xf32> -> vector<8x128xf32>
    %c0_117 = arith.constant 0 : index
    %c0_118 = arith.constant 0 : index
    %281 = vector.load %arg10[%c0_117, %c0_118] : memref<1x128xf32, #tpu.memory_space<vmem>>, vector<1x128xf32>
    %282 = vector.broadcast %281 : vector<1x128xf32> to vector<8x128xf32>
    %283 = arith.addf %280, %282 : vector<8x128xf32>
    %284 = vector.shape_cast %283 : vector<8x128xf32> to vector<8x1x128xf32>
    %c0_119 = arith.constant 0 : index
    %c3_120 = arith.constant 3 : index
    %c0_121 = arith.constant 0 : index
    %285 = vector.load %arg11[%c0_119, %c3_120, %c0_121] : memref<8x8x128xf32, #tpu.memory_space<vmem>>, vector<8x1x128xf32>
    tpu.vector_store %arg11[%c0_119, %c3_120, %c0_121], %284 {strides = array<i32>} : memref<8x8x128xf32, #tpu.memory_space<vmem>>, vector<8x1x128xf32>,
    %286 = arith.truncf %277 : vector<8x32xf32> to vector<8x32xbf16>
    %c0_122 = arith.constant 0 : index
    %c0_123 = arith.constant 0 : index
    %287 = vector.load %arg6[%c0_122, %c0_123] : memref<32x160xbf16, #tpu.memory_space<vmem>>, vector<32x160xbf16>
    %cst_124 = arith.constant dense<0.000000e+00> : vector<8x160xf32>
    %288 = tpu.matmul %286, %287, %cst_124 {dimension_numbers = #tpu.dot_dimension_numbers<[1], [0], [0], [1], [0, 0, 1, 1], [], []>} : vector<8x32xbf16>, vector<32x160xbf16>, vector<8x160xf32> -> vector<8x160xf32>
    %289 = vector.extract_strided_slice %288 {offsets = [0, 0], sizes = [8, 32], strides = [1, 1]} : vector<8x160xf32> to vector<8x32xf32>
    %c0_125 = arith.constant 0 : index
    %c0_126 = arith.constant 0 : index
    %c0_127 = arith.constant 0 : index
    %290 = vector.load %arg12[%c0_125, %c0_126, %c0_127] : memref<8x8x32xbf16, #tpu.memory_space<vmem>>, vector<8x8x32xbf16>
    %291 = arith.extf %290 : vector<8x8x32xbf16> to vector<8x8x32xf32>
    %292 = vector.shape_cast %289 : vector<8x32xf32> to vector<8x1x32xf32>
    %293 = vector.broadcast %292 : vector<8x1x32xf32> to vector<8x8x32xf32>
    %294 = arith.addf %291, %293 : vector<8x8x32xf32>
    %295 = math.tanh %294 : vector<8x8x32xf32>
    %296 = vector.shape_cast %5 : vector<1x32xf32> to vector<1x1x32xf32>
    %297 = vector.broadcast %296 : vector<1x1x32xf32> to vector<8x8x32xf32>
    %298 = arith.mulf %295, %297 : vector<8x8x32xf32>
    %cst_128 = arith.constant dense<0.000000e+00> : vector<8x8xf32>
    %299 = vector.multi_reduction <add>, %298, %cst_128 [2] : vector<8x8x32xf32> to vector<8x8xf32>
    %cst_129 = arith.constant dense<0xFF800000> : vector<8xf32>
    %300 = vector.multi_reduction <maximumf>, %299, %cst_129 [1] : vector<8x8xf32> to vector<8xf32>
    %301 = vector.shape_cast %300 : vector<8xf32> to vector<8x1xf32>
    %302 = vector.broadcast %301 : vector<8x1xf32> to vector<8x8xf32>
    %303 = arith.subf %299, %302 : vector<8x8xf32>
    %304 = math.exp %303 : vector<8x8xf32>
    %cst_130 = arith.constant dense<0.000000e+00> : vector<8xf32>
    %305 = vector.multi_reduction <add>, %304, %cst_130 [1] : vector<8x8xf32> to vector<8xf32>
    %306 = vector.shape_cast %305 : vector<8xf32> to vector<8x1xf32>
    %307 = tpu.reciprocal %306 {approx = true} : vector<8x1xf32> -> vector<8x1xf32>
    %308 = vector.broadcast %307 : vector<8x1xf32> to vector<8x8xf32>
    %309 = arith.mulf %304, %308 : vector<8x8xf32>
    %310 = arith.truncf %309 : vector<8x8xf32> to vector<8x8xbf16>
    %311 = vector.shape_cast %310 : vector<8x8xbf16> to vector<8x1x8xbf16>
    %c0_131 = arith.constant 0 : index
    %c0_132 = arith.constant 0 : index
    %c0_133 = arith.constant 0 : index
    %312 = vector.load %arg3[%c0_131, %c0_132, %c0_133] : memref<8x8x32xbf16, #tpu.memory_space<vmem>>, vector<8x8x32xbf16>
    %cst_134 = arith.constant dense<0.000000e+00> : vector<8x1x32xf32>
    %313 = tpu.matmul %311, %312, %cst_134 {dimension_numbers = #tpu.dot_dimension_numbers<[2], [1], [1], [2], [0, 0, 0, 1, 1, 2], [0], [0]>} : vector<8x1x8xbf16>, vector<8x8x32xbf16>, vector<8x1x32xf32> -> vector<8x1x32xf32>
    %314 = vector.shape_cast %313 : vector<8x1x32xf32> to vector<8x32xf32>
    %c0_135 = arith.constant 0 : index
    %c4 = arith.constant 4 : index
    %c0_136 = arith.constant 0 : index
    %315 = vector.load %arg2[%c0_135, %c4, %c0_136] : memref<8x8x128xf32, #tpu.memory_space<vmem>>, vector<8x1x128xf32>
    %316 = vector.shape_cast %315 : vector<8x1x128xf32> to vector<8x128xf32>
    %317 = arith.truncf %314 : vector<8x32xf32> to vector<8x32xbf16>
    %c0_137 = arith.constant 0 : index
    %c0_138 = arith.constant 0 : index
    %318 = vector.load %arg8[%c0_137, %c0_138] : memref<32x128xbf16, #tpu.memory_space<vmem>>, vector<32x128xbf16>
    %cst_139 = arith.constant dense<0.000000e+00> : vector<8x128xf32>
    %319 = tpu.matmul %317, %318, %cst_139 {dimension_numbers = #tpu.dot_dimension_numbers<[1], [0], [0], [1], [0, 0, 1, 1], [], []>} : vector<8x32xbf16>, vector<32x128xbf16>, vector<8x128xf32> -> vector<8x128xf32>
    %320 = vector.extract_strided_slice %288 {offsets = [0, 32], sizes = [8, 128], strides = [1, 1]} : vector<8x160xf32> to vector<8x128xf32>
    %321 = arith.addf %319, %320 : vector<8x128xf32>
    %322 = arith.addf %321, %316 : vector<8x128xf32>
    %323 = vector.extract_strided_slice %322 {offsets = [0, 0], sizes = [8, 32], strides = [1, 1]} : vector<8x128xf32> to vector<8x32xf32>
    %324 = arith.negf %323 : vector<8x32xf32>
    %325 = math.exp %324 : vector<8x32xf32>
    %cst_140 = arith.constant 1.000000e+00 : f32
    %326 = vector.broadcast %cst_140 : f32 to vector<8x32xf32>
    %327 = arith.addf %326, %325 : vector<8x32xf32>
    %328 = arith.divf %326, %327 : vector<8x32xf32>
    %329 = vector.extract_strided_slice %322 {offsets = [0, 32], sizes = [8, 32], strides = [1, 1]} : vector<8x128xf32> to vector<8x32xf32>
    %330 = arith.negf %329 : vector<8x32xf32>
    %331 = math.exp %330 : vector<8x32xf32>
    %cst_141 = arith.constant 1.000000e+00 : f32
    %332 = vector.broadcast %cst_141 : f32 to vector<8x32xf32>
    %333 = arith.addf %332, %331 : vector<8x32xf32>
    %334 = arith.divf %332, %333 : vector<8x32xf32>
    %335 = vector.extract_strided_slice %322 {offsets = [0, 64], sizes = [8, 32], strides = [1, 1]} : vector<8x128xf32> to vector<8x32xf32>
    %336 = math.tanh %335 : vector<8x32xf32>
    %337 = vector.extract_strided_slice %322 {offsets = [0, 96], sizes = [8, 32], strides = [1, 1]} : vector<8x128xf32> to vector<8x32xf32>
    %338 = arith.negf %337 : vector<8x32xf32>
    %339 = math.exp %338 : vector<8x32xf32>
    %cst_142 = arith.constant 1.000000e+00 : f32
    %340 = vector.broadcast %cst_142 : f32 to vector<8x32xf32>
    %341 = arith.addf %340, %339 : vector<8x32xf32>
    %342 = arith.divf %340, %341 : vector<8x32xf32>
    %343 = arith.mulf %334, %275 : vector<8x32xf32>
    %344 = arith.mulf %328, %336 : vector<8x32xf32>
    %345 = arith.addf %343, %344 : vector<8x32xf32>
    %346 = math.tanh %345 : vector<8x32xf32>
    %347 = arith.mulf %342, %346 : vector<8x32xf32>
    %348 = arith.truncf %347 : vector<8x32xf32> to vector<8x32xbf16>
    %c0_143 = arith.constant 0 : index
    %c0_144 = arith.constant 0 : index
    %349 = vector.load %arg9[%c0_143, %c0_144] : memref<32x128xbf16, #tpu.memory_space<vmem>>, vector<32x128xbf16>
    %cst_145 = arith.constant dense<0.000000e+00> : vector<8x128xf32>
    %350 = tpu.matmul %348, %349, %cst_145 {dimension_numbers = #tpu.dot_dimension_numbers<[1], [0], [0], [1], [0, 0, 1, 1], [], []>} : vector<8x32xbf16>, vector<32x128xbf16>, vector<8x128xf32> -> vector<8x128xf32>
    %c0_146 = arith.constant 0 : index
    %c0_147 = arith.constant 0 : index
    %351 = vector.load %arg10[%c0_146, %c0_147] : memref<1x128xf32, #tpu.memory_space<vmem>>, vector<1x128xf32>
    %352 = vector.broadcast %351 : vector<1x128xf32> to vector<8x128xf32>
    %353 = arith.addf %350, %352 : vector<8x128xf32>
    %354 = vector.shape_cast %353 : vector<8x128xf32> to vector<8x1x128xf32>
    %c0_148 = arith.constant 0 : index
    %c4_149 = arith.constant 4 : index
    %c0_150 = arith.constant 0 : index
    %355 = vector.load %arg11[%c0_148, %c4_149, %c0_150] : memref<8x8x128xf32, #tpu.memory_space<vmem>>, vector<8x1x128xf32>
    tpu.vector_store %arg11[%c0_148, %c4_149, %c0_150], %354 {strides = array<i32>} : memref<8x8x128xf32, #tpu.memory_space<vmem>>, vector<8x1x128xf32>,
    %356 = arith.truncf %347 : vector<8x32xf32> to vector<8x32xbf16>
    %c0_151 = arith.constant 0 : index
    %c0_152 = arith.constant 0 : index
    %357 = vector.load %arg6[%c0_151, %c0_152] : memref<32x160xbf16, #tpu.memory_space<vmem>>, vector<32x160xbf16>
    %cst_153 = arith.constant dense<0.000000e+00> : vector<8x160xf32>
    %358 = tpu.matmul %356, %357, %cst_153 {dimension_numbers = #tpu.dot_dimension_numbers<[1], [0], [0], [1], [0, 0, 1, 1], [], []>} : vector<8x32xbf16>, vector<32x160xbf16>, vector<8x160xf32> -> vector<8x160xf32>
    %359 = vector.extract_strided_slice %358 {offsets = [0, 0], sizes = [8, 32], strides = [1, 1]} : vector<8x160xf32> to vector<8x32xf32>
    %c0_154 = arith.constant 0 : index
    %c0_155 = arith.constant 0 : index
    %c0_156 = arith.constant 0 : index
    %360 = vector.load %arg12[%c0_154, %c0_155, %c0_156] : memref<8x8x32xbf16, #tpu.memory_space<vmem>>, vector<8x8x32xbf16>
    %361 = arith.extf %360 : vector<8x8x32xbf16> to vector<8x8x32xf32>
    %362 = vector.shape_cast %359 : vector<8x32xf32> to vector<8x1x32xf32>
    %363 = vector.broadcast %362 : vector<8x1x32xf32> to vector<8x8x32xf32>
    %364 = arith.addf %361, %363 : vector<8x8x32xf32>
    %365 = math.tanh %364 : vector<8x8x32xf32>
    %366 = vector.shape_cast %5 : vector<1x32xf32> to vector<1x1x32xf32>
    %367 = vector.broadcast %366 : vector<1x1x32xf32> to vector<8x8x32xf32>
    %368 = arith.mulf %365, %367 : vector<8x8x32xf32>
    %cst_157 = arith.constant dense<0.000000e+00> : vector<8x8xf32>
    %369 = vector.multi_reduction <add>, %368, %cst_157 [2] : vector<8x8x32xf32> to vector<8x8xf32>
    %cst_158 = arith.constant dense<0xFF800000> : vector<8xf32>
    %370 = vector.multi_reduction <maximumf>, %369, %cst_158 [1] : vector<8x8xf32> to vector<8xf32>
    %371 = vector.shape_cast %370 : vector<8xf32> to vector<8x1xf32>
    %372 = vector.broadcast %371 : vector<8x1xf32> to vector<8x8xf32>
    %373 = arith.subf %369, %372 : vector<8x8xf32>
    %374 = math.exp %373 : vector<8x8xf32>
    %cst_159 = arith.constant dense<0.000000e+00> : vector<8xf32>
    %375 = vector.multi_reduction <add>, %374, %cst_159 [1] : vector<8x8xf32> to vector<8xf32>
    %376 = vector.shape_cast %375 : vector<8xf32> to vector<8x1xf32>
    %377 = tpu.reciprocal %376 {approx = true} : vector<8x1xf32> -> vector<8x1xf32>
    %378 = vector.broadcast %377 : vector<8x1xf32> to vector<8x8xf32>
    %379 = arith.mulf %374, %378 : vector<8x8xf32>
    %380 = arith.truncf %379 : vector<8x8xf32> to vector<8x8xbf16>
    %381 = vector.shape_cast %380 : vector<8x8xbf16> to vector<8x1x8xbf16>
    %c0_160 = arith.constant 0 : index
    %c0_161 = arith.constant 0 : index
    %c0_162 = arith.constant 0 : index
    %382 = vector.load %arg3[%c0_160, %c0_161, %c0_162] : memref<8x8x32xbf16, #tpu.memory_space<vmem>>, vector<8x8x32xbf16>
    %cst_163 = arith.constant dense<0.000000e+00> : vector<8x1x32xf32>
    %383 = tpu.matmul %381, %382, %cst_163 {dimension_numbers = #tpu.dot_dimension_numbers<[2], [1], [1], [2], [0, 0, 0, 1, 1, 2], [0], [0]>} : vector<8x1x8xbf16>, vector<8x8x32xbf16>, vector<8x1x32xf32> -> vector<8x1x32xf32>
    %384 = vector.shape_cast %383 : vector<8x1x32xf32> to vector<8x32xf32>
    %c0_164 = arith.constant 0 : index
    %c5 = arith.constant 5 : index
    %c0_165 = arith.constant 0 : index
    %385 = vector.load %arg2[%c0_164, %c5, %c0_165] : memref<8x8x128xf32, #tpu.memory_space<vmem>>, vector<8x1x128xf32>
    %386 = vector.shape_cast %385 : vector<8x1x128xf32> to vector<8x128xf32>
    %387 = arith.truncf %384 : vector<8x32xf32> to vector<8x32xbf16>
    %c0_166 = arith.constant 0 : index
    %c0_167 = arith.constant 0 : index
    %388 = vector.load %arg8[%c0_166, %c0_167] : memref<32x128xbf16, #tpu.memory_space<vmem>>, vector<32x128xbf16>
    %cst_168 = arith.constant dense<0.000000e+00> : vector<8x128xf32>
    %389 = tpu.matmul %387, %388, %cst_168 {dimension_numbers = #tpu.dot_dimension_numbers<[1], [0], [0], [1], [0, 0, 1, 1], [], []>} : vector<8x32xbf16>, vector<32x128xbf16>, vector<8x128xf32> -> vector<8x128xf32>
    %390 = vector.extract_strided_slice %358 {offsets = [0, 32], sizes = [8, 128], strides = [1, 1]} : vector<8x160xf32> to vector<8x128xf32>
    %391 = arith.addf %389, %390 : vector<8x128xf32>
    %392 = arith.addf %391, %386 : vector<8x128xf32>
    %393 = vector.extract_strided_slice %392 {offsets = [0, 0], sizes = [8, 32], strides = [1, 1]} : vector<8x128xf32> to vector<8x32xf32>
    %394 = arith.negf %393 : vector<8x32xf32>
    %395 = math.exp %394 : vector<8x32xf32>
    %cst_169 = arith.constant 1.000000e+00 : f32
    %396 = vector.broadcast %cst_169 : f32 to vector<8x32xf32>
    %397 = arith.addf %396, %395 : vector<8x32xf32>
    %398 = arith.divf %396, %397 : vector<8x32xf32>
    %399 = vector.extract_strided_slice %392 {offsets = [0, 32], sizes = [8, 32], strides = [1, 1]} : vector<8x128xf32> to vector<8x32xf32>
    %400 = arith.negf %399 : vector<8x32xf32>
    %401 = math.exp %400 : vector<8x32xf32>
    %cst_170 = arith.constant 1.000000e+00 : f32
    %402 = vector.broadcast %cst_170 : f32 to vector<8x32xf32>
    %403 = arith.addf %402, %401 : vector<8x32xf32>
    %404 = arith.divf %402, %403 : vector<8x32xf32>
    %405 = vector.extract_strided_slice %392 {offsets = [0, 64], sizes = [8, 32], strides = [1, 1]} : vector<8x128xf32> to vector<8x32xf32>
    %406 = math.tanh %405 : vector<8x32xf32>
    %407 = vector.extract_strided_slice %392 {offsets = [0, 96], sizes = [8, 32], strides = [1, 1]} : vector<8x128xf32> to vector<8x32xf32>
    %408 = arith.negf %407 : vector<8x32xf32>
    %409 = math.exp %408 : vector<8x32xf32>
    %cst_171 = arith.constant 1.000000e+00 : f32
    %410 = vector.broadcast %cst_171 : f32 to vector<8x32xf32>
    %411 = arith.addf %410, %409 : vector<8x32xf32>
    %412 = arith.divf %410, %411 : vector<8x32xf32>
    %413 = arith.mulf %404, %345 : vector<8x32xf32>
    %414 = arith.mulf %398, %406 : vector<8x32xf32>
    %415 = arith.addf %413, %414 : vector<8x32xf32>
    %416 = math.tanh %415 : vector<8x32xf32>
    %417 = arith.mulf %412, %416 : vector<8x32xf32>
    %418 = arith.truncf %417 : vector<8x32xf32> to vector<8x32xbf16>
    %c0_172 = arith.constant 0 : index
    %c0_173 = arith.constant 0 : index
    %419 = vector.load %arg9[%c0_172, %c0_173] : memref<32x128xbf16, #tpu.memory_space<vmem>>, vector<32x128xbf16>
    %cst_174 = arith.constant dense<0.000000e+00> : vector<8x128xf32>
    %420 = tpu.matmul %418, %419, %cst_174 {dimension_numbers = #tpu.dot_dimension_numbers<[1], [0], [0], [1], [0, 0, 1, 1], [], []>} : vector<8x32xbf16>, vector<32x128xbf16>, vector<8x128xf32> -> vector<8x128xf32>
    %c0_175 = arith.constant 0 : index
    %c0_176 = arith.constant 0 : index
    %421 = vector.load %arg10[%c0_175, %c0_176] : memref<1x128xf32, #tpu.memory_space<vmem>>, vector<1x128xf32>
    %422 = vector.broadcast %421 : vector<1x128xf32> to vector<8x128xf32>
    %423 = arith.addf %420, %422 : vector<8x128xf32>
    %424 = vector.shape_cast %423 : vector<8x128xf32> to vector<8x1x128xf32>
    %c0_177 = arith.constant 0 : index
    %c5_178 = arith.constant 5 : index
    %c0_179 = arith.constant 0 : index
    %425 = vector.load %arg11[%c0_177, %c5_178, %c0_179] : memref<8x8x128xf32, #tpu.memory_space<vmem>>, vector<8x1x128xf32>
    tpu.vector_store %arg11[%c0_177, %c5_178, %c0_179], %424 {strides = array<i32>} : memref<8x8x128xf32, #tpu.memory_space<vmem>>, vector<8x1x128xf32>,
    %426 = arith.truncf %417 : vector<8x32xf32> to vector<8x32xbf16>
    %c0_180 = arith.constant 0 : index
    %c0_181 = arith.constant 0 : index
    %427 = vector.load %arg6[%c0_180, %c0_181] : memref<32x160xbf16, #tpu.memory_space<vmem>>, vector<32x160xbf16>
    %cst_182 = arith.constant dense<0.000000e+00> : vector<8x160xf32>
    %428 = tpu.matmul %426, %427, %cst_182 {dimension_numbers = #tpu.dot_dimension_numbers<[1], [0], [0], [1], [0, 0, 1, 1], [], []>} : vector<8x32xbf16>, vector<32x160xbf16>, vector<8x160xf32> -> vector<8x160xf32>
    %429 = vector.extract_strided_slice %428 {offsets = [0, 0], sizes = [8, 32], strides = [1, 1]} : vector<8x160xf32> to vector<8x32xf32>
    %c0_183 = arith.constant 0 : index
    %c0_184 = arith.constant 0 : index
    %c0_185 = arith.constant 0 : index
    %430 = vector.load %arg12[%c0_183, %c0_184, %c0_185] : memref<8x8x32xbf16, #tpu.memory_space<vmem>>, vector<8x8x32xbf16>
    %431 = arith.extf %430 : vector<8x8x32xbf16> to vector<8x8x32xf32>
    %432 = vector.shape_cast %429 : vector<8x32xf32> to vector<8x1x32xf32>
    %433 = vector.broadcast %432 : vector<8x1x32xf32> to vector<8x8x32xf32>
    %434 = arith.addf %431, %433 : vector<8x8x32xf32>
    %435 = math.tanh %434 : vector<8x8x32xf32>
    %436 = vector.shape_cast %5 : vector<1x32xf32> to vector<1x1x32xf32>
    %437 = vector.broadcast %436 : vector<1x1x32xf32> to vector<8x8x32xf32>
    %438 = arith.mulf %435, %437 : vector<8x8x32xf32>
    %cst_186 = arith.constant dense<0.000000e+00> : vector<8x8xf32>
    %439 = vector.multi_reduction <add>, %438, %cst_186 [2] : vector<8x8x32xf32> to vector<8x8xf32>
    %cst_187 = arith.constant dense<0xFF800000> : vector<8xf32>
    %440 = vector.multi_reduction <maximumf>, %439, %cst_187 [1] : vector<8x8xf32> to vector<8xf32>
    %441 = vector.shape_cast %440 : vector<8xf32> to vector<8x1xf32>
    %442 = vector.broadcast %441 : vector<8x1xf32> to vector<8x8xf32>
    %443 = arith.subf %439, %442 : vector<8x8xf32>
    %444 = math.exp %443 : vector<8x8xf32>
    %cst_188 = arith.constant dense<0.000000e+00> : vector<8xf32>
    %445 = vector.multi_reduction <add>, %444, %cst_188 [1] : vector<8x8xf32> to vector<8xf32>
    %446 = vector.shape_cast %445 : vector<8xf32> to vector<8x1xf32>
    %447 = tpu.reciprocal %446 {approx = true} : vector<8x1xf32> -> vector<8x1xf32>
    %448 = vector.broadcast %447 : vector<8x1xf32> to vector<8x8xf32>
    %449 = arith.mulf %444, %448 : vector<8x8xf32>
    %450 = arith.truncf %449 : vector<8x8xf32> to vector<8x8xbf16>
    %451 = vector.shape_cast %450 : vector<8x8xbf16> to vector<8x1x8xbf16>
    %c0_189 = arith.constant 0 : index
    %c0_190 = arith.constant 0 : index
    %c0_191 = arith.constant 0 : index
    %452 = vector.load %arg3[%c0_189, %c0_190, %c0_191] : memref<8x8x32xbf16, #tpu.memory_space<vmem>>, vector<8x8x32xbf16>
    %cst_192 = arith.constant dense<0.000000e+00> : vector<8x1x32xf32>
    %453 = tpu.matmul %451, %452, %cst_192 {dimension_numbers = #tpu.dot_dimension_numbers<[2], [1], [1], [2], [0, 0, 0, 1, 1, 2], [0], [0]>} : vector<8x1x8xbf16>, vector<8x8x32xbf16>, vector<8x1x32xf32> -> vector<8x1x32xf32>
    %454 = vector.shape_cast %453 : vector<8x1x32xf32> to vector<8x32xf32>
    %c0_193 = arith.constant 0 : index
    %c6 = arith.constant 6 : index
    %c0_194 = arith.constant 0 : index
    %455 = vector.load %arg2[%c0_193, %c6, %c0_194] : memref<8x8x128xf32, #tpu.memory_space<vmem>>, vector<8x1x128xf32>
    %456 = vector.shape_cast %455 : vector<8x1x128xf32> to vector<8x128xf32>
    %457 = arith.truncf %454 : vector<8x32xf32> to vector<8x32xbf16>
    %c0_195 = arith.constant 0 : index
    %c0_196 = arith.constant 0 : index
    %458 = vector.load %arg8[%c0_195, %c0_196] : memref<32x128xbf16, #tpu.memory_space<vmem>>, vector<32x128xbf16>
    %cst_197 = arith.constant dense<0.000000e+00> : vector<8x128xf32>
    %459 = tpu.matmul %457, %458, %cst_197 {dimension_numbers = #tpu.dot_dimension_numbers<[1], [0], [0], [1], [0, 0, 1, 1], [], []>} : vector<8x32xbf16>, vector<32x128xbf16>, vector<8x128xf32> -> vector<8x128xf32>
    %460 = vector.extract_strided_slice %428 {offsets = [0, 32], sizes = [8, 128], strides = [1, 1]} : vector<8x160xf32> to vector<8x128xf32>
    %461 = arith.addf %459, %460 : vector<8x128xf32>
    %462 = arith.addf %461, %456 : vector<8x128xf32>
    %463 = vector.extract_strided_slice %462 {offsets = [0, 0], sizes = [8, 32], strides = [1, 1]} : vector<8x128xf32> to vector<8x32xf32>
    %464 = arith.negf %463 : vector<8x32xf32>
    %465 = math.exp %464 : vector<8x32xf32>
    %cst_198 = arith.constant 1.000000e+00 : f32
    %466 = vector.broadcast %cst_198 : f32 to vector<8x32xf32>
    %467 = arith.addf %466, %465 : vector<8x32xf32>
    %468 = arith.divf %466, %467 : vector<8x32xf32>
    %469 = vector.extract_strided_slice %462 {offsets = [0, 32], sizes = [8, 32], strides = [1, 1]} : vector<8x128xf32> to vector<8x32xf32>
    %470 = arith.negf %469 : vector<8x32xf32>
    %471 = math.exp %470 : vector<8x32xf32>
    %cst_199 = arith.constant 1.000000e+00 : f32
    %472 = vector.broadcast %cst_199 : f32 to vector<8x32xf32>
    %473 = arith.addf %472, %471 : vector<8x32xf32>
    %474 = arith.divf %472, %473 : vector<8x32xf32>
    %475 = vector.extract_strided_slice %462 {offsets = [0, 64], sizes = [8, 32], strides = [1, 1]} : vector<8x128xf32> to vector<8x32xf32>
    %476 = math.tanh %475 : vector<8x32xf32>
    %477 = vector.extract_strided_slice %462 {offsets = [0, 96], sizes = [8, 32], strides = [1, 1]} : vector<8x128xf32> to vector<8x32xf32>
    %478 = arith.negf %477 : vector<8x32xf32>
    %479 = math.exp %478 : vector<8x32xf32>
    %cst_200 = arith.constant 1.000000e+00 : f32
    %480 = vector.broadcast %cst_200 : f32 to vector<8x32xf32>
    %481 = arith.addf %480, %479 : vector<8x32xf32>
    %482 = arith.divf %480, %481 : vector<8x32xf32>
    %483 = arith.mulf %474, %415 : vector<8x32xf32>
    %484 = arith.mulf %468, %476 : vector<8x32xf32>
    %485 = arith.addf %483, %484 : vector<8x32xf32>
    %486 = math.tanh %485 : vector<8x32xf32>
    %487 = arith.mulf %482, %486 : vector<8x32xf32>
    %488 = arith.truncf %487 : vector<8x32xf32> to vector<8x32xbf16>
    %c0_201 = arith.constant 0 : index
    %c0_202 = arith.constant 0 : index
    %489 = vector.load %arg9[%c0_201, %c0_202] : memref<32x128xbf16, #tpu.memory_space<vmem>>, vector<32x128xbf16>
    %cst_203 = arith.constant dense<0.000000e+00> : vector<8x128xf32>
    %490 = tpu.matmul %488, %489, %cst_203 {dimension_numbers = #tpu.dot_dimension_numbers<[1], [0], [0], [1], [0, 0, 1, 1], [], []>} : vector<8x32xbf16>, vector<32x128xbf16>, vector<8x128xf32> -> vector<8x128xf32>
    %c0_204 = arith.constant 0 : index
    %c0_205 = arith.constant 0 : index
    %491 = vector.load %arg10[%c0_204, %c0_205] : memref<1x128xf32, #tpu.memory_space<vmem>>, vector<1x128xf32>
    %492 = vector.broadcast %491 : vector<1x128xf32> to vector<8x128xf32>
    %493 = arith.addf %490, %492 : vector<8x128xf32>
    %494 = vector.shape_cast %493 : vector<8x128xf32> to vector<8x1x128xf32>
    %c0_206 = arith.constant 0 : index
    %c6_207 = arith.constant 6 : index
    %c0_208 = arith.constant 0 : index
    %495 = vector.load %arg11[%c0_206, %c6_207, %c0_208] : memref<8x8x128xf32, #tpu.memory_space<vmem>>, vector<8x1x128xf32>
    tpu.vector_store %arg11[%c0_206, %c6_207, %c0_208], %494 {strides = array<i32>} : memref<8x8x128xf32, #tpu.memory_space<vmem>>, vector<8x1x128xf32>,
    %496 = arith.truncf %487 : vector<8x32xf32> to vector<8x32xbf16>
    %c0_209 = arith.constant 0 : index
    %c0_210 = arith.constant 0 : index
    %497 = vector.load %arg6[%c0_209, %c0_210] : memref<32x160xbf16, #tpu.memory_space<vmem>>, vector<32x160xbf16>
    %cst_211 = arith.constant dense<0.000000e+00> : vector<8x160xf32>
    %498 = tpu.matmul %496, %497, %cst_211 {dimension_numbers = #tpu.dot_dimension_numbers<[1], [0], [0], [1], [0, 0, 1, 1], [], []>} : vector<8x32xbf16>, vector<32x160xbf16>, vector<8x160xf32> -> vector<8x160xf32>
    %499 = vector.extract_strided_slice %498 {offsets = [0, 0], sizes = [8, 32], strides = [1, 1]} : vector<8x160xf32> to vector<8x32xf32>
    %c0_212 = arith.constant 0 : index
    %c0_213 = arith.constant 0 : index
    %c0_214 = arith.constant 0 : index
    %500 = vector.load %arg12[%c0_212, %c0_213, %c0_214] : memref<8x8x32xbf16, #tpu.memory_space<vmem>>, vector<8x8x32xbf16>
    %501 = arith.extf %500 : vector<8x8x32xbf16> to vector<8x8x32xf32>
    %502 = vector.shape_cast %499 : vector<8x32xf32> to vector<8x1x32xf32>
    %503 = vector.broadcast %502 : vector<8x1x32xf32> to vector<8x8x32xf32>
    %504 = arith.addf %501, %503 : vector<8x8x32xf32>
    %505 = math.tanh %504 : vector<8x8x32xf32>
    %506 = vector.shape_cast %5 : vector<1x32xf32> to vector<1x1x32xf32>
    %507 = vector.broadcast %506 : vector<1x1x32xf32> to vector<8x8x32xf32>
    %508 = arith.mulf %505, %507 : vector<8x8x32xf32>
    %cst_215 = arith.constant dense<0.000000e+00> : vector<8x8xf32>
    %509 = vector.multi_reduction <add>, %508, %cst_215 [2] : vector<8x8x32xf32> to vector<8x8xf32>
    %cst_216 = arith.constant dense<0xFF800000> : vector<8xf32>
    %510 = vector.multi_reduction <maximumf>, %509, %cst_216 [1] : vector<8x8xf32> to vector<8xf32>
    %511 = vector.shape_cast %510 : vector<8xf32> to vector<8x1xf32>
    %512 = vector.broadcast %511 : vector<8x1xf32> to vector<8x8xf32>
    %513 = arith.subf %509, %512 : vector<8x8xf32>
    %514 = math.exp %513 : vector<8x8xf32>
    %cst_217 = arith.constant dense<0.000000e+00> : vector<8xf32>
    %515 = vector.multi_reduction <add>, %514, %cst_217 [1] : vector<8x8xf32> to vector<8xf32>
    %516 = vector.shape_cast %515 : vector<8xf32> to vector<8x1xf32>
    %517 = tpu.reciprocal %516 {approx = true} : vector<8x1xf32> -> vector<8x1xf32>
    %518 = vector.broadcast %517 : vector<8x1xf32> to vector<8x8xf32>
    %519 = arith.mulf %514, %518 : vector<8x8xf32>
    %520 = arith.truncf %519 : vector<8x8xf32> to vector<8x8xbf16>
    %521 = vector.shape_cast %520 : vector<8x8xbf16> to vector<8x1x8xbf16>
    %c0_218 = arith.constant 0 : index
    %c0_219 = arith.constant 0 : index
    %c0_220 = arith.constant 0 : index
    %522 = vector.load %arg3[%c0_218, %c0_219, %c0_220] : memref<8x8x32xbf16, #tpu.memory_space<vmem>>, vector<8x8x32xbf16>
    %cst_221 = arith.constant dense<0.000000e+00> : vector<8x1x32xf32>
    %523 = tpu.matmul %521, %522, %cst_221 {dimension_numbers = #tpu.dot_dimension_numbers<[2], [1], [1], [2], [0, 0, 0, 1, 1, 2], [0], [0]>} : vector<8x1x8xbf16>, vector<8x8x32xbf16>, vector<8x1x32xf32> -> vector<8x1x32xf32>
    %524 = vector.shape_cast %523 : vector<8x1x32xf32> to vector<8x32xf32>
    %c0_222 = arith.constant 0 : index
    %c7 = arith.constant 7 : index
    %c0_223 = arith.constant 0 : index
    %525 = vector.load %arg2[%c0_222, %c7, %c0_223] : memref<8x8x128xf32, #tpu.memory_space<vmem>>, vector<8x1x128xf32>
    %526 = vector.shape_cast %525 : vector<8x1x128xf32> to vector<8x128xf32>
    %527 = arith.truncf %524 : vector<8x32xf32> to vector<8x32xbf16>
    %c0_224 = arith.constant 0 : index
    %c0_225 = arith.constant 0 : index
    %528 = vector.load %arg8[%c0_224, %c0_225] : memref<32x128xbf16, #tpu.memory_space<vmem>>, vector<32x128xbf16>
    %cst_226 = arith.constant dense<0.000000e+00> : vector<8x128xf32>
    %529 = tpu.matmul %527, %528, %cst_226 {dimension_numbers = #tpu.dot_dimension_numbers<[1], [0], [0], [1], [0, 0, 1, 1], [], []>} : vector<8x32xbf16>, vector<32x128xbf16>, vector<8x128xf32> -> vector<8x128xf32>
    %530 = vector.extract_strided_slice %498 {offsets = [0, 32], sizes = [8, 128], strides = [1, 1]} : vector<8x160xf32> to vector<8x128xf32>
    %531 = arith.addf %529, %530 : vector<8x128xf32>
    %532 = arith.addf %531, %526 : vector<8x128xf32>
    %533 = vector.extract_strided_slice %532 {offsets = [0, 0], sizes = [8, 32], strides = [1, 1]} : vector<8x128xf32> to vector<8x32xf32>
    %534 = arith.negf %533 : vector<8x32xf32>
    %535 = math.exp %534 : vector<8x32xf32>
    %cst_227 = arith.constant 1.000000e+00 : f32
    %536 = vector.broadcast %cst_227 : f32 to vector<8x32xf32>
    %537 = arith.addf %536, %535 : vector<8x32xf32>
    %538 = arith.divf %536, %537 : vector<8x32xf32>
    %539 = vector.extract_strided_slice %532 {offsets = [0, 32], sizes = [8, 32], strides = [1, 1]} : vector<8x128xf32> to vector<8x32xf32>
    %540 = arith.negf %539 : vector<8x32xf32>
    %541 = math.exp %540 : vector<8x32xf32>
    %cst_228 = arith.constant 1.000000e+00 : f32
    %542 = vector.broadcast %cst_228 : f32 to vector<8x32xf32>
    %543 = arith.addf %542, %541 : vector<8x32xf32>
    %544 = arith.divf %542, %543 : vector<8x32xf32>
    %545 = vector.extract_strided_slice %532 {offsets = [0, 64], sizes = [8, 32], strides = [1, 1]} : vector<8x128xf32> to vector<8x32xf32>
    %546 = math.tanh %545 : vector<8x32xf32>
    %547 = vector.extract_strided_slice %532 {offsets = [0, 96], sizes = [8, 32], strides = [1, 1]} : vector<8x128xf32> to vector<8x32xf32>
    %548 = arith.negf %547 : vector<8x32xf32>
    %549 = math.exp %548 : vector<8x32xf32>
    %cst_229 = arith.constant 1.000000e+00 : f32
    %550 = vector.broadcast %cst_229 : f32 to vector<8x32xf32>
    %551 = arith.addf %550, %549 : vector<8x32xf32>
    %552 = arith.divf %550, %551 : vector<8x32xf32>
    %553 = arith.mulf %544, %485 : vector<8x32xf32>
    %554 = arith.mulf %538, %546 : vector<8x32xf32>
    %555 = arith.addf %553, %554 : vector<8x32xf32>
    %556 = math.tanh %555 : vector<8x32xf32>
    %557 = arith.mulf %552, %556 : vector<8x32xf32>
    %558 = arith.truncf %557 : vector<8x32xf32> to vector<8x32xbf16>
    %c0_230 = arith.constant 0 : index
    %c0_231 = arith.constant 0 : index
    %559 = vector.load %arg9[%c0_230, %c0_231] : memref<32x128xbf16, #tpu.memory_space<vmem>>, vector<32x128xbf16>
    %cst_232 = arith.constant dense<0.000000e+00> : vector<8x128xf32>
    %560 = tpu.matmul %558, %559, %cst_232 {dimension_numbers = #tpu.dot_dimension_numbers<[1], [0], [0], [1], [0, 0, 1, 1], [], []>} : vector<8x32xbf16>, vector<32x128xbf16>, vector<8x128xf32> -> vector<8x128xf32>
    %c0_233 = arith.constant 0 : index
    %c0_234 = arith.constant 0 : index
    %561 = vector.load %arg10[%c0_233, %c0_234] : memref<1x128xf32, #tpu.memory_space<vmem>>, vector<1x128xf32>
    %562 = vector.broadcast %561 : vector<1x128xf32> to vector<8x128xf32>
    %563 = arith.addf %560, %562 : vector<8x128xf32>
    %564 = vector.shape_cast %563 : vector<8x128xf32> to vector<8x1x128xf32>
    %c0_235 = arith.constant 0 : index
    %c7_236 = arith.constant 7 : index
    %c0_237 = arith.constant 0 : index
    %565 = vector.load %arg11[%c0_235, %c7_236, %c0_237] : memref<8x8x128xf32, #tpu.memory_space<vmem>>, vector<8x1x128xf32>
    tpu.vector_store %arg11[%c0_235, %c7_236, %c0_237], %564 {strides = array<i32>} : memref<8x8x128xf32, #tpu.memory_space<vmem>>, vector<8x1x128xf32>,
    %c0_238 = arith.constant 0 : index
    %c0_239 = arith.constant 0 : index
    %566 = vector.load %arg13[%c0_238, %c0_239] : memref<8x32xf32, #tpu.memory_space<vmem>>, vector<8x32xf32>
    tpu.vector_store %arg13[%c0_238, %c0_239], %557 {strides = array<i32>} : memref<8x32xf32, #tpu.memory_space<vmem>>, vector<8x32xf32>,
    %c0_240 = arith.constant 0 : index
    %c0_241 = arith.constant 0 : index
    %567 = vector.load %arg14[%c0_240, %c0_241] : memref<8x32xf32, #tpu.memory_space<vmem>>, vector<8x32xf32>
    tpu.vector_store %arg14[%c0_240, %c0_241], %555 {strides = array<i32>} : memref<8x32xf32, #tpu.memory_space<vmem>>, vector<8x32xf32>,
    return
  }
  func.func @transform_0(%arg0: i32, %arg1: i32) -> (i32, i32, i32) {
    %c0_i32 = arith.constant 0 : i32
    %c0_i32_0 = arith.constant 0 : i32
    return %arg0, %arg1, %c0_i32 : i32, i32, i32
  }
  func.func @transform_1(%arg0: i32, %arg1: i32) -> (i32, i32, i32) {
    %c0_i32 = arith.constant 0 : i32
    %c0_i32_0 = arith.constant 0 : i32
    %c0_i32_1 = arith.constant 0 : i32
    return %arg0, %c0_i32, %c0_i32_0 : i32, i32, i32
  }
  func.func @transform_2(%arg0: i32, %arg1: i32) -> (i32, i32) {
    %c0_i32 = arith.constant 0 : i32
    %c0_i32_0 = arith.constant 0 : i32
    %c0_i32_1 = arith.constant 0 : i32
    return %c0_i32, %c0_i32_0 : i32, i32
  }
  func.func @transform_3(%arg0: i32, %arg1: i32) -> (i32, i32) {
    %c0_i32 = arith.constant 0 : i32
    %c0_i32_0 = arith.constant 0 : i32
    %c0_i32_1 = arith.constant 0 : i32
    return %c0_i32, %c0_i32_0 : i32, i32
  }
  func.func @transform_4(%arg0: i32, %arg1: i32) -> (i32, i32) {
    %c0_i32 = arith.constant 0 : i32
    %c0_i32_0 = arith.constant 0 : i32
    %c0_i32_1 = arith.constant 0 : i32
    return %c0_i32, %c0_i32_0 : i32, i32
  }
  func.func @transform_5(%arg0: i32, %arg1: i32) -> (i32, i32) {
    %c0_i32 = arith.constant 0 : i32
    %c0_i32_0 = arith.constant 0 : i32
    %c0_i32_1 = arith.constant 0 : i32
    return %c0_i32, %c0_i32_0 : i32, i32
  }
  func.func @transform_6(%arg0: i32, %arg1: i32) -> (i32, i32) {
    %c0_i32 = arith.constant 0 : i32
    %c0_i32_0 = arith.constant 0 : i32
    %c0_i32_1 = arith.constant 0 : i32
    return %c0_i32, %c0_i32_0 : i32, i32
  }
  func.func @transform_7(%arg0: i32, %arg1: i32) -> (i32, i32) {
    %c0_i32 = arith.constant 0 : i32
    %c0_i32_0 = arith.constant 0 : i32
    %c0_i32_1 = arith.constant 0 : i32
    return %c0_i32, %c0_i32_0 : i32, i32
  }
  func.func @transform_8(%arg0: i32, %arg1: i32) -> (i32, i32) {
    %c0_i32 = arith.constant 0 : i32
    %c0_i32_0 = arith.constant 0 : i32
    %c0_i32_1 = arith.constant 0 : i32
    return %c0_i32, %c0_i32_0 : i32, i32
  }
  func.func @transform_9(%arg0: i32, %arg1: i32) -> (i32, i32, i32) {
    %c0_i32 = arith.constant 0 : i32
    %c0_i32_0 = arith.constant 0 : i32
    return %arg0, %arg1, %c0_i32 : i32, i32, i32
  }
}

</mosaic_0001>

<bundles_post_ra>
// kernel: tpu_custom_call.1
= control target key start
LH: loop header
LB: loop body
LE: loop exit
PB: predicated region body
PF: predicated region fallthrough
CT: control target
= control target key end

     0   :  { %14 = vsyncpa [#allocation6], 0  ;;  %s13819_s0 = inlined_call_operand.hbm [shape: f32[8,8,128], index: 0, kind: input, shape index: {}]   ;;  %s13820_s1 = inlined_call_operand.hbm [shape: bf16[8,8,32], index: 1, kind: input, shape index: {}]   ;;  %s13821_s2 = inlined_call_operand.hbm [shape: bf16[32,32], index: 2, kind: input, shape index: {}]   ;;  %s13822_s3 = inlined_call_operand.vmem [shape: f32[1,32], index: 3, kind: input, shape index: {}]   ;;  %s13823_s4 = inlined_call_operand.hbm [shape: bf16[32,160], index: 4, kind: input, shape index: {}]   ;;  %s13824_s5 = inlined_call_operand.vmem [shape: f32[1,32], index: 5, kind: input, shape index: {}]   ;;  %s13825_s6 = inlined_call_operand.vmem [shape: bf16[32,128], index: 6, kind: input, shape index: {}]   ;;  %s13826_s7 = inlined_call_operand.hbm [shape: bf16[32,128], index: 7, kind: input, shape index: {}]   ;;  %s13827_s8 = inlined_call_operand.vmem [shape: f32[1,128], index: 8, kind: input, shape index: {}]   ;;  %s13828_s9 = inlined_call_operand.hbm [shape: f32[8,8,128], index: 9, kind: output, shape index: {}]  }
   0x1   :  { %15 = vsyncpa [#allocation9], 0 }
   0x2   :  { %16 = vsyncpa [#allocation12], 0 }
   0x3   :  { %17 = vsyncpa [#allocation7], 0  ;;  %s11716_s30 = smov [#allocation8]   ;;  %s11576_s13 = scalar_lea.hbm %s13820_s1, 512 }
   0x4   :  { %s35_s10 = sshll.u32 %s11716_s30, 4  ;;  %p11577_p0 = scmp.ne.s32.totalorder %s13820_s1, %s11576_s13  ;;  %s36_s10 = int_to_ptr.vmem [resolvable:$true] %s35_s10 }
   0x5   :  { %p11580_p1 = scmp.lt.u32.totalorder %s11576_s13, %s13820_s1 }
   0x7   :  { %p11582_p2 = pnand %p11580_p1, %p11577_p0 }
   0x9   :  { %11585 = shalt.err (!%p11582_p2)
}
   0xa   :  { %s11586_s18 = scalar_lea.vmem %s36_s10, 512  ;;  %p11591_p4 = scmp.lt.s32.totalorder %s36_s10, %s36_s10 }
   0xb   :  { %p11587_p3 = scmp.ne.s32.totalorder %s36_s10, %s11586_s18  ;;  %p11592_p5 = scmp.lt.s32.totalorder %s11586_s18, %s11586_s18 }
   0xd   :  { %p11593_p6 = por %p11592_p5, %p11591_p4 }
   0xf   :  { %p11594_p7 = pnand %p11593_p6, %p11587_p3 }
  0x11   :  { %11597 = shalt.err (!%p11594_p7)
}
  0x12   :  { %s11717_s19 = smov 64   ;;  %s11718_s20 = smov 4  }
  0x13   :  { %41 = dma.hbm_to_vmem [thread:$0]  %s13820_s1, 512, %s36_s10, [#allocation9], %s11717_s19, %s11717_s19, %s11718_s20  }
  0x14   :  { %s11719_s23 = smov [#allocation11]   ;;  %s11720_s25 = smov [#allocation5]  }
  0x15   :  { %s61_s24 = sshll.u32 %s11719_s23, 4  ;;  %s23_s26 = sshll.u32 %s11720_s25, 4  ;;  %s62_s24 = int_to_ptr.vmem [resolvable:$true] %s61_s24  ;;  %s24_s26 = int_to_ptr.vmem [resolvable:$true] %s23_s26 }
  0x16   :  { %s11598_s29 = scalar_lea.hbm %s13823_s4, 512 }
  0x17   :  { %p11599_p8 = scmp.ne.s32.totalorder %s13823_s4, %s11598_s29  ;;  %p11602_p9 = scmp.lt.u32.totalorder %s11598_s29, %s13823_s4 }
  0x19   :  { %p11604_p10 = pnand %p11602_p9, %p11599_p8 }
  0x1b   :  { %11607 = shalt.err (!%p11604_p10)
}
  0x1c   :  { %s11608_s1 = scalar_lea.vmem %s62_s24, 512  ;;  %p11613_p12 = scmp.lt.s32.totalorder %s62_s24, %s62_s24 }
  0x1d   :  { %p11609_p11 = scmp.ne.s32.totalorder %s62_s24, %s11608_s1  ;;  %p11614_p13 = scmp.lt.s32.totalorder %s11608_s1, %s11608_s1 }
  0x1f   :  { %p11615_p0 = por %p11614_p13, %p11613_p12 }
  0x21   :  { %p11616_p1 = pnand %p11615_p0, %p11609_p11 }
  0x23   :  { %11619 = shalt.err (!%p11616_p1)
}
  0x24   :  { %s11721_s10 = smov 128   ;;  %s11722_s14 = smov 8  }
  0x25   :  { %67 = dma.hbm_to_vmem [thread:$0]  %s13823_s4, 512, %s62_s24, [#allocation12], %s11721_s10, %s11721_s10, %s11722_s14  }
  0x26   :  { %s11620_s21 = scalar_lea.hbm %s13819_s0, 1024 }
  0x27   :  { %p11621_p2 = scmp.ne.s32.totalorder %s13819_s0, %s11620_s21  ;;  %p11624_p3 = scmp.lt.u32.totalorder %s11620_s21, %s13819_s0 }
  0x29   :  { %p11626_p4 = pnand %p11624_p3, %p11621_p2 }
  0x2b   :  { %11629 = shalt.err (!%p11626_p4)
}
  0x2c   :  { %s11630_s28 = scalar_lea.vmem %s24_s26, 1024  ;;  %p11635_p6 = scmp.lt.s32.totalorder %s24_s26, %s24_s26 }
  0x2d   :  { %p11631_p5 = scmp.ne.s32.totalorder %s24_s26, %s11630_s28  ;;  %p11636_p7 = scmp.lt.s32.totalorder %s11630_s28, %s11630_s28 }
  0x2f   :  { %p11637_p8 = por %p11636_p7, %p11635_p6 }
  0x31   :  { %p11638_p9 = pnand %p11637_p8, %p11631_p5 }
  0x33   :  { %11641 = shalt.err (!%p11638_p9)
}
  0x34   :  { %29 = dma.hbm_to_vmem [thread:$0]  %s13819_s0, 1024, %s24_s26, [#allocation6], %s11721_s10, %s11721_s10, %s11722_s14  }
  0x35   :  { %s11723_s29 = smov [#allocation10]   ;;  %s11724_s11 = smov [#allocation13]  }
  0x36   :  { %s47_s30 = sshll.u32 %s11723_s29, 4  ;;  %s77_s12 = sshll.u32 %s11724_s11, 4  ;;  %s48_s30 = int_to_ptr.vmem [resolvable:$true] %s47_s30  ;;  %s78_s12 = int_to_ptr.vmem [resolvable:$true] %s77_s12 }
  0x37   :  { %s11642_s15 = scalar_lea.hbm %s13821_s2, 256 }
  0x38   :  { %p11643_p10 = scmp.ne.s32.totalorder %s13821_s2, %s11642_s15  ;;  %p11646_p11 = scmp.lt.u32.totalorder %s11642_s15, %s13821_s2 }
  0x3a   :  { %p11648_p12 = pnand %p11646_p11, %p11643_p10 }
  0x3c   :  { %11651 = shalt.err (!%p11648_p12)
}
  0x3d   :  { %s11652_s0 = scalar_lea.vmem %s48_s30, 256  ;;  %p11657_p0 = scmp.lt.s32.totalorder %s48_s30, %s48_s30 }
  0x3e   :  { %p11653_p13 = scmp.ne.s32.totalorder %s48_s30, %s11652_s0  ;;  %p11658_p1 = scmp.lt.s32.totalorder %s11652_s0, %s11652_s0 }
  0x40   :  { %p11659_p2 = por %p11658_p1, %p11657_p0 }
  0x42   :  { %p11660_p3 = pnand %p11659_p2, %p11653_p13 }
  0x44   :  { %11663 = shalt.err (!%p11660_p3)
}
  0x45   :  { %53 = dma.hbm_to_vmem [thread:$0]  %s13821_s2, 256, %s48_s30, [#allocation9], %s11717_s19, %s11717_s19, %s11718_s20  }
  0x46   :  { %s11664_s27 = scalar_lea.hbm %s13826_s7, 256 }
  0x47   :  { %p11665_p4 = scmp.ne.s32.totalorder %s13826_s7, %s11664_s27  ;;  %p11668_p5 = scmp.lt.u32.totalorder %s11664_s27, %s13826_s7 }
  0x49   :  { %p11670_p6 = pnand %p11668_p5, %p11665_p4 }
  0x4b   :  { %11673 = shalt.err (!%p11670_p6)
}
  0x4c   :  { %s11674_s11 = scalar_lea.vmem %s78_s12, 256  ;;  %p11679_p8 = scmp.lt.s32.totalorder %s78_s12, %s78_s12 }
  0x4d   :  { %p11675_p7 = scmp.ne.s32.totalorder %s78_s12, %s11674_s11  ;;  %p11680_p9 = scmp.lt.s32.totalorder %s11674_s11, %s11674_s11 }
  0x4f   :  { %p11681_p10 = por %p11680_p9, %p11679_p8 }
  0x51   :  { %p11682_p11 = pnand %p11681_p10, %p11675_p7 }
  0x53   :  { %11685 = shalt.err (!%p11682_p11)
}
  0x54   :  { %83 = dma.hbm_to_vmem [thread:$0]  %s13826_s7, 256, %s78_s12, [#allocation12], %s11717_s19, %s11717_s19, %s11718_s20  }
  0x55   :  { %11708 = dma.done.wait [#allocation6], 1024  }
  0x56   :  { %11709 = vsyncadd [#allocation6], 4294966272 }
  0x57   :  { %11710 = dma.done.wait [#allocation9], 768  }
  0x58   :  { %11711 = vsyncadd [#allocation9], 4294966528 }
  0x59   :  { %11712 = dma.done.wait [#allocation12], 768  }
  0x5a   :  { %11713 = vsyncadd [#allocation12], 4294966528  ;;  %vm106_vm0 = vcmask 261120   ;;  %v11725_v0 = vmov 0   ;;  %v11726_v1 = vmov 0.0   ;;  %v11169_v2 = vld [vmem:[#allocation10] sm:$0xff]   ;;  %v348_v16 = vlaneseq }
  0x5b   :  { %318 = vmatprep.mubr.bf16.mxu1 %v11725_v0  ;;  %107 = vst.msk [vmem:[#allocation3] sm:$0xff] %vm106_vm0, %v11726_v1  ;;  %108 = vst.msk [vmem:[#allocation4] sm:$0xff] %vm106_vm0, %v11726_v1  ;;  %11168 = vset.pattern.permute.xlu0 %v11725_v0  ;;  %v11170_v3 = vld [vmem:[#allocation10 + $0x8] sm:$0xff]   ;;  %v11171_v4 = vld [vmem:[#allocation11 + $0x4] ss:$8 sps:$4 sm:$0xff]   ;;  %vm245_vm1 = vcmask 257024  }
  0x5c   :  { %11167 = vset.pattern.permute.xlu1 %v11725_v0  ;;  %10627 = vmatprep.subr.bf16.mxu0 %v11169_v2  ;;  %v11173_v5 = vld [vmem:[#allocation8] sm:$0xff]   ;;  %v11174_v6 = vld [vmem:[#allocation11] ss:$8 sps:$4 sm:$0xff]   ;;  %v11175_v7 = vld [vmem:[#allocation8 + $0x8] sm:$0xff]   ;;  %v11727_v14 = vmov 1966171168  }
  0x5d   :  { %10628 = vmatpush3.bf16.msra.mxu0 %v11169_v2  ;;  %286 = vmatprep.subr.bf16.mxu1 %v11171_v4  ;;  %v11176_v8 = vld [vmem:[#allocation11 + $0x14] ss:$8 sps:$4 sm:$0xff]   ;;  %v11178_v9 = vld [vmem:[#allocation11 + $0x10] ss:$8 sps:$4 sm:$0xff]   ;;  %v11179_v11 = vld [vmem:[#allocation8 + $0x10] sm:$0xff]   ;;  %v346_v15 = vunpack.c.l.s4 %v11727_v14  ;;  %v11872_v18 = vshrl.u32 %v348_v16, 7 }
  0x5e   :  { %10629 = vmatprep.subr.bf16.mxu0 %v11170_v3  ;;  %10631 = vmatprep.mubr.msk.bf16.mxu0 %vm106_vm0, %v11173_v5  ;;  %v11180_v13 = vld [vmem:[#allocation8 + $0x18] sm:$0xff]   ;;  %v10081_v19 = vld [vmem:[%s13822_s3] ss:$0 sm:$0xff]  ;;  %vm529_vm2 = vcmask 1041409   ;;  %vm531_vm3 = vcmask 1042434   ;;  %vm533_vm4 = vcmask 1043459  }
  0x5f   :  { %287 = vmatpush1.bf16.msra.mxu1 %v11174_v6  ;;  %v347_v17 = vunpack.c.0.s8 %v346_v15  ;;  %v11895_v44 = vsub.s32 0, %v11872_v18  ;;  %vm535_vm5 = vcmask 1044484   ;;  %vm537_vm6 = vcmask 1045509   ;;  %s11728_s13 = smov 96   ;;  %s11730_s18 = smov 32  }
  0x60   :  { %288 = vmatprep.subr.bf16.mxu1 %v11176_v8  ;;  %vm539_vm7 = vcmask 1046534   ;;  %vm541_vm8 = vcmask 1047559   ;;  %vm544_vm9 = vcmask 64512   ;;  %vm767_vm10 = vcmask 1043456  }
  0x61   :  { %10630 = vmatpush3.bf16.msra.mxu0 %v11170_v3  ;;  %v11878_v21 = vsub.s32 %v347_v17, %v11872_v18  ;;  %vm11729_vm11 = vmmov 0   ;;  %vm1271_vm12 = vcmask 785408  }
  0x62   :  { %v254_v10 = vld [vmem:[#allocation3] sm:$0xff]  ;;  %10645 = vmatprep.subr.bf16.mxu0 %v11726_v1 }
  0x63   :  { %v257_v12 = vpack.c.bf16 %v254_v10, %v254_v10  ;;  %289 = vmatpush1.bf16.msra.mxu1 %v11178_v9 }
  0x64   :  { %10632 = vmatmul.mubr.msk.bf16.vlgmr.msra.gmra.mrb[0].mxu0 %vm106_vm0, %v11175_v7  ;;  %10639 = vmatprep.subr.bf16.mxu1 %v11726_v1 }
  0x65   :  { %10635 = vmatprep.mubr.msk.bf16.mxu0 %vm106_vm0, %v11179_v11 }
  0x66   :  { %10096 = vmatmul.mubr.msk.bf16.vlgmr.msra.gmra.mrb[0].mxu1 %vm106_vm0, %v257_v12 }
  0x67   :  { %10641 = vmatprep.mubr.msk.bf16.mxu1 %vm11729_vm11, %v11726_v1 }
  0x6c   :  { %10636 = vmatmul.mubr.msk.bf16.gmra.mrb[4].mxu0 %vm106_vm0, %v11180_v13 }
  0x6d   :  { %10647 = vmatprep.mubr.msk.bf16.mxu0 %vm11729_vm11, %v11726_v1 }
 0x137   :  { %v10633_v20 = vpop.f32.mrb[0].mxu0 }
 0x138   :  { %v215_v22 = vadd.f32 %v10633_v20, %v10081_v19  ;;  %v206_v23 = vpop.f32.mrb[1].mxu0 }
 0x139   :  { %v207_v24 = vadd.f32 %v10081_v19, %v206_v23  ;;  %v10634_v25 = vpop.f32.mrb[2].mxu0  ;;  %v11880_v29 = vpop.f32.mrb[0].mxu1 }
 0x13a   :  { %v239_v26 = vpack.c.bf16 %v215_v22, %v215_v22  ;;  %v218_v27 = vadd.f32 %v10634_v25, %v10081_v19  ;;  %v209_v28 = vpop.f32.mrb[3].mxu0  ;;  %v351_v32 = vrot.slane %v11880_v29, %v11878_v21  ;;  %v11884_v33 = vpop.f32.mrb[1].mxu1  ;;  %v344_v37 = vcombine.high %v11880_v29, %v11880_v29 }
 0x13b   :  { %v237_v30 = vpack.c.bf16 %v207_v24, %v207_v24  ;;  %v210_v31 = vadd.f32 %v10081_v19, %v209_v28  ;;  %v324_v35 = vpop.f32.mrb[2].mxu1  ;;  %v11939_v28 = vld [vmem:[%s13824_s5] ss:$0 sm:$0xff] }
 0x13c   :  { %248 = vst.msk [vmem:[#allocation2 + $0x8] sm:$0xf] %vm245_vm1, %v239_v26  ;;  %v240_v34 = vpack.c.bf16 %v218_v27, %v218_v27  ;;  %v359_v38 = vcombine.high %v351_v32, %v351_v32  ;;  %v367_v39 = vrot.slane %v351_v32, %v11878_v21  ;;  %v325_v40 = vpop.f32.mrb[3].mxu1  ;;  %v358_v47 = vrot.slane %v344_v37, %v11878_v21 }
 0x13d   :  { %246 = vst.msk [vmem:[#allocation2] sm:$0xf] %vm245_vm1, %v237_v30  ;;  %v238_v36 = vpack.c.bf16 %v210_v31, %v210_v31 }
 0x13e   :  { %249 = vst.msk [vmem:[#allocation2 + $0xc] sm:$0xf] %vm245_vm1, %v240_v34  ;;  %v381_v41 = vrot.slane %v359_v38, %v11878_v21  ;;  %v389_v43 = vcombine.high %v367_v39, %v367_v39  ;;  %v360_v58 = vcombine.high %v358_v47, %v358_v47  ;;  %v396_v59 = vrot.slane %v367_v39, %v11895_v44 }
 0x13f   :  { %247 = vst.msk [vmem:[#allocation2 + $0x4] sm:$0xf] %vm245_vm1, %v238_v36  ;;  %v10637_v42 = vpop.f32.mrb[4].mxu0  ;;  %v374_v7 = vrot.slane %v358_v47, %v11878_v21 }
 0x140   :  { %v231_v45 = vadd.f32 %v10637_v42, %v10081_v19  ;;  %v222_v46 = vpop.f32.mrb[5].mxu0  ;;  %v391_v48 = vcombine.high %v381_v41, %v381_v41  ;;  %v404_v53 = vrot.slane %v389_v43, %v11895_v44  ;;  %v400_v60 = vrot.slane %v381_v41, %v11895_v44 }
 0x141   :  { %v10638_v49 = vpop.f32.mrb[6].mxu0  ;;  %v223_v51 = vadd.f32 %v10081_v19, %v222_v46  ;;  %v388_v9 = vrot.slane %v360_v58, %v11878_v21  ;;  %v390_v13 = vcombine.high %v374_v7, %v374_v7  ;;  %v412_v15 = vrot.slane %v374_v7, %v11895_v44 }
 0x142   :  { %v243_v50 = vpack.c.bf16 %v231_v45, %v231_v45  ;;  %v225_v52 = vpop.f32.mrb[7].mxu0  ;;  %v234_v55 = vadd.f32 %v10638_v49, %v10081_v19  ;;  %v408_v61 = vrot.slane %v391_v48, %v11895_v44 }
 0x143   :  { %v241_v54 = vpack.c.bf16 %v223_v51, %v223_v51  ;;  %v226_v56 = vadd.f32 %v10081_v19, %v225_v52  ;;  %v392_v14 = vcombine.high %v388_v9, %v388_v9  ;;  %v416_v17 = vrot.slane %v388_v9, %v11895_v44 }
 0x144   :  { %252 = vst.msk [vmem:[#allocation2 + $0x18] sm:$0xf] %vm245_vm1, %v243_v50  ;;  %v244_v3 = vpack.c.bf16 %v234_v55, %v234_v55  ;;  %v420_v19 = vrot.slane %v390_v13, %v11895_v44 }
 0x145   :  { %v11900_v57 = vld [vmem:[#allocation2 + $0x8] sm:$0xff]   ;;  %250 = vst.msk [vmem:[#allocation2 + $0x10] sm:$0xf] %vm245_vm1, %v241_v54  ;;  %v242_v4 = vpack.c.bf16 %v226_v56, %v226_v56  ;;  %v424_v27 = vrot.slane %v392_v14, %v11895_v44 }
 0x146   :  { %v11905_v62 = vld [vmem:[#allocation2] sm:$0xff]   ;;  %v10299_v63 = vunpack.c.l.bf16 %v11900_v57  ;;  %v10300_v2 = vunpack.c.h.bf16 %v11900_v57  ;;  %253 = vst.msk [vmem:[#allocation2 + $0x1c] sm:$0xf] %vm245_vm1, %v244_v3 }
 0x147   :  { %v10295_v5 = vunpack.c.l.bf16 %v11905_v62  ;;  %v10296_v6 = vunpack.c.h.bf16 %v11905_v62  ;;  %251 = vst.msk [vmem:[#allocation2 + $0x14] sm:$0xf] %vm245_vm1, %v242_v4 }
 0x148   :  { %v435_v8 = vadd.f32 %v10299_v63, %v404_v53  ;;  %v436_v12 = vadd.f32 %v10300_v2, %v408_v61  ;;  %v496_v61 = vand.u32 127, %v348_v16 }
 0x149   :  { %v433_v10 = vadd.f32 %v10295_v5, %v396_v59  ;;  %v434_v11 = vadd.f32 %v10296_v6, %v400_v60 }
 0x14a   :  { %11234 = vtanh.f32 %v435_v8  ;;  %v11967_v7 = vsub.s32 %v496_v61, %v11872_v18  ;;  %v12006_v61 = vsub.s32 6, %v11872_v18 }
 0x14b   :  { %11236 = vtanh.f32 %v433_v10 }
 0x14c   :  { %11238 = vtanh.f32 %v434_v11 }
 0x14d   :  { %11240 = vtanh.f32 %v436_v12  ;;  %v11929_v22 = vld [vmem:[#allocation2 + $0x18] sm:$0xff]  }
 0x14e   :  { %v11927_v20 = vld [vmem:[#allocation2 + $0x10] sm:$0xff]   ;;  %v10307_v25 = vunpack.c.l.bf16 %v11929_v22  ;;  %v10308_v26 = vunpack.c.h.bf16 %v11929_v22 }
 0x14f   :  { %v10303_v23 = vunpack.c.l.bf16 %v11927_v20  ;;  %v10304_v24 = vunpack.c.h.bf16 %v11927_v20 }
 0x150   :  { %v439_v32 = vadd.f32 %v10307_v25, %v420_v19  ;;  %v440_v34 = vadd.f32 %v10308_v26, %v424_v27 }
 0x151   :  { %v437_v30 = vadd.f32 %v10303_v23, %v412_v15  ;;  %v438_v31 = vadd.f32 %v10304_v24, %v416_v17 }
 0x153   :  { %11242 = vtanh.f32 %v437_v30 }
 0x154   :  { %v11235_v35 = vpop.eup %11234  ;;  %11244 = vtanh.f32 %v438_v31 }
 0x155   :  { %v11237_v36 = vpop.eup %11236  ;;  %v457_v37 = vmul.f32 %v11235_v35, %v11939_v28  ;;  %11246 = vtanh.f32 %v439_v32 }
 0x156   :  { %v11239_v38 = vpop.eup %11238  ;;  %v455_v39 = vmul.f32 %v11237_v36, %v11939_v28  ;;  %11248 = vtanh.f32 %v440_v34 }
 0x157   :  { %v11241_v40 = vpop.eup %11240  ;;  %v469_v41 = vsel %vm106_vm0, %v457_v37, 0.0  ;;  %v456_v45 = vmul.f32 %v11239_v38, %v11939_v28 }
 0x158   :  { %470 = vadd.xlane.f32.xlu1 %v469_v41  ;;  %v463_v42 = vsel %vm106_vm0, %v455_v39, 0.0  ;;  %v458_v43 = vmul.f32 %v11241_v40, %v11939_v28  ;;  %v11986_v41 = vsub.s32 1, %v11872_v18 }
 0x159   :  { %464 = vadd.xlane.f32.xlu0 %v463_v42  ;;  %v466_v47 = vsel %vm106_vm0, %v456_v45, 0.0  ;;  %v11989_v42 = vsub.s32 2, %v11872_v18 }
 0x15a   :  { %v472_v46 = vsel %vm106_vm0, %v458_v43, 0.0  ;;  %v11992_v43 = vsub.s32 3, %v11872_v18 }
 0x15c   :  { %473 = vadd.xlane.f32.xlu1 %v472_v46 }
 0x15d   :  { %467 = vadd.xlane.f32.xlu0 %v466_v47  ;;  %v11243_v48 = vpop.eup %11242 }
 0x15e   :  { %v11245_v49 = vpop.eup %11244  ;;  %v459_v50 = vmul.f32 %v11243_v48, %v11939_v28 }
 0x15f   :  { %v11247_v51 = vpop.eup %11246  ;;  %v460_v52 = vmul.f32 %v11245_v49, %v11939_v28 }
 0x160   :  { %v11249_v53 = vpop.eup %11248  ;;  %v475_v54 = vsel %vm106_vm0, %v459_v50, 0.0  ;;  %v461_v55 = vmul.f32 %v11247_v51, %v11939_v28  ;;  %v11998_v51 = vsub.s32 4, %v11872_v18 }
 0x161   :  { %476 = vadd.xlane.f32.xlu0 %v475_v54  ;;  %v478_v56 = vsel %vm106_vm0, %v460_v52, 0.0  ;;  %v462_v58 = vmul.f32 %v11249_v53, %v11939_v28 }
 0x162   :  { %479 = vadd.xlane.f32.xlu1 %v478_v56  ;;  %v481_v59 = vsel %vm106_vm0, %v461_v55, 0.0  ;;  %v12002_v56 = vsub.s32 5, %v11872_v18 }
 0x163   :  { %v484_v60 = vsel %vm106_vm0, %v462_v58, 0.0 }
 0x165   :  { %482 = vadd.xlane.f32.xlu0 %v481_v59 }
 0x166   :  { %485 = vadd.xlane.f32.xlu1 %v484_v60 }
 0x1e5   :  { %v471_v3 = vpop.xlane.xlu1 %470 }
 0x1e6   :  { %v465_v4 = vpop.xlane.xlu0 %464  ;;  %v508_v12 = vrot.slane %v471_v3, %v11967_v7 }
 0x1e7   :  { %v500_v10 = vrot.slane %v465_v4, %v11967_v7 }
 0x1e9   :  { %v474_v8 = vpop.xlane.xlu1 %473 }
 0x1ea   :  { %v468_v9 = vpop.xlane.xlu0 %467  ;;  %v512_v13 = vrot.slane %v474_v8, %v11967_v7 }
 0x1eb   :  { %v504_v11 = vrot.slane %v468_v9, %v11967_v7 }
 0x1ed   :  { %v530_v16 = vsel %vm529_vm2, %v504_v11, %v500_v10 }
 0x1ee   :  { %v532_v14 = vsel %vm531_vm3, %v508_v12, %v530_v16  ;;  %v477_v17 = vpop.xlane.xlu0 %476 }
 0x1ef   :  { %v534_v15 = vsel %vm533_vm4, %v512_v13, %v532_v14  ;;  %v516_v19 = vrot.slane %v477_v17, %v11967_v7  ;;  %v480_v27 = vpop.xlane.xlu1 %479 }
 0x1f0   :  { %v520_v30 = vrot.slane %v480_v27, %v11967_v7 }
 0x1f1   :  { %v536_v31 = vsel %vm535_vm5, %v516_v19, %v534_v15 }
 0x1f2   :  { %v483_v32 = vpop.xlane.xlu0 %482  ;;  %v538_v37 = vsel %vm537_vm6, %v520_v30, %v536_v31 }
 0x1f3   :  { %v524_v34 = vrot.slane %v483_v32, %v11967_v7  ;;  %v486_v35 = vpop.xlane.xlu1 %485 }
 0x1f4   :  { %v528_v36 = vrot.slane %v486_v35, %v11967_v7 }
 0x1f5   :  { %v540_v38 = vsel %vm539_vm7, %v524_v34, %v538_v37 }
 0x1f6   :  { %v542_v39 = vsel %vm541_vm8, %v528_v36, %v540_v38 }
 0x1f7   :  { %v545_v40 = vsel %vm544_vm9, %v542_v39, -inf }
 0x1f8   :  { %546 = vmax.xlane.f32.xlu0 %v545_v40 }
 0x285   :  { %v547_v45 = vpop.xlane.xlu0 %546 }
 0x286   :  { %v552_v46 = vrot.slane %v547_v45, %v11895_v44  ;;  %v556_v47 = vrot.slane %v547_v45, %v11986_v41  ;;  %v560_v48 = vrot.slane %v547_v45, %v11989_v42  ;;  %v564_v52 = vrot.slane %v547_v45, %v11992_v43 }
 0x287   :  { %v568_v58 = vrot.slane %v547_v45, %v11998_v51  ;;  %v576_v11 = vrot.slane %v547_v45, %v12006_v61 }
 0x288   :  { %v590_v49 = vsub.f32 %v468_v9, %v556_v47  ;;  %v589_v50 = vsub.f32 %v465_v4, %v552_v46  ;;  %v591_v53 = vsub.f32 %v471_v3, %v560_v48  ;;  %v592_v60 = vsub.f32 %v474_v8, %v564_v52 }
 0x289   :  { %v572_v4 = vrot.slane %v547_v45, %v12002_v56  ;;  %v593_v10 = vsub.f32 %v477_v17, %v568_v58  ;;  %v12010_v3 = vsub.s32 7, %v11872_v18  ;;  %v595_v17 = vsub.f32 %v483_v32, %v576_v11 }
 0x28a   :  { %v599_v54 = vmul.f32 1.442695, %v590_v49  ;;  %v597_v55 = vmul.f32 1.442695, %v589_v50  ;;  %v601_v59 = vmul.f32 1.442695, %v591_v53 }
 0x28b   :  { %v603_v9 = vmul.f32 1.442695, %v592_v60  ;;  %v605_v12 = vmul.f32 1.442695, %v593_v10  ;;  %v594_v13 = vsub.f32 %v480_v27, %v572_v4  ;;  %v580_v8 = vrot.slane %v547_v45, %v12010_v3 }
 0x28c   :  { %11250 = vpow2.f32 %v599_v54  ;;  %v609_v19 = vmul.f32 1.442695, %v595_v17  ;;  %v746_v17 = vld [vmem:[#allocation8] sm:$0xf] }
 0x28d   :  { %11252 = vpow2.f32 %v597_v55  ;;  %v607_v15 = vmul.f32 1.442695, %v594_v13  ;;  %v596_v27 = vsub.f32 %v486_v35, %v580_v8 }
 0x28e   :  { %11254 = vpow2.f32 %v601_v59 }
 0x28f   :  { %11256 = vpow2.f32 %v603_v9  ;;  %v611_v31 = vmul.f32 1.442695, %v596_v27  ;;  %v769_v27 = vsel %vm767_vm10, %v746_v17, 0 }
 0x290   :  { %11258 = vpow2.f32 %v605_v12  ;;  %10640 = vmatpush3.bf16.msra.mxu1 %v769_v27  ;;  %v748_v27 = vld [vmem:[#allocation8 + $0x8] sm:$0xf] }
 0x291   :  { %11260 = vpow2.f32 %v607_v15  ;;  %v747_v15 = vld [vmem:[#allocation8 + $0x4] sm:$0xf]  ;;  %10651 = vmatprep.subr.bf16.mxu1 %v11726_v1 }
 0x292   :  { %11262 = vpow2.f32 %v609_v19  ;;  %v825_v19 = vsel %vm767_vm10, %v747_v15, 0 }
 0x293   :  { %11264 = vpow2.f32 %v611_v31  ;;  %10646 = vmatpush3.bf16.msra.mxu0 %v825_v19 }
 0x294   :  { %10657 = vmatprep.subr.bf16.mxu0 %v11726_v1 }
 0x296   :  { %v12013_v16 = vpop.eup %11250 }
 0x297   :  { %v12015_v14 = vpop.eup %11252  ;;  %625 = vperm.xlu0 %11168, %v12013_v16  }
 0x298   :  { %622 = vperm.xlu1 %11167, %v12015_v14   ;;  %v12020_v18 = vpop.eup %11254 }
 0x299   :  { %v12023_v30 = vpop.eup %11256 }
 0x29a   :  { %v12026_v34 = vpop.eup %11258 }
 0x29b   :  { %v12029_v36 = vpop.eup %11260 }
 0x29c   :  { %628 = vperm.xlu1 %11167, %v12020_v18   ;;  %v12032_v32 = vpop.eup %11262 }
 0x29d   :  { %v12035_v35 = vpop.eup %11264 }
 0x2a0   :  { %631 = vperm.xlu1 %11167, %v12023_v30  }
 0x2a4   :  { %634 = vperm.xlu1 %11167, %v12026_v34  }
 0x2a8   :  { %637 = vperm.xlu1 %11167, %v12029_v36  }
 0x2ac   :  { %640 = vperm.xlu1 %11167, %v12032_v32  }
 0x2b0   :  { %643 = vperm.xlu1 %11167, %v12035_v35  }
 0x316   :  { %v626_v45 = vpop.permute.xlu0 %625 }
 0x317   :  { %v623_v37 = vpop.permute.xlu1 %622  ;;  %v652_v47 = vrot.slane %v626_v45, %v11967_v7 }
 0x318   :  { %v648_v48 = vrot.slane %v623_v37, %v11967_v7 }
 0x31a   :  { %v677_v54 = vsel %vm529_vm2, %v652_v47, %v648_v48 }
 0x31b   :  { %v629_v38 = vpop.permute.xlu1 %628 }
 0x31c   :  { %v656_v49 = vrot.slane %v629_v38, %v11967_v7 }
 0x31e   :  { %v678_v58 = vsel %vm531_vm3, %v656_v49, %v677_v54 }
 0x31f   :  { %v632_v39 = vpop.permute.xlu1 %631 }
 0x320   :  { %v660_v50 = vrot.slane %v632_v39, %v11967_v7 }
 0x322   :  { %v679_v60 = vsel %vm533_vm4, %v660_v50, %v678_v58 }
 0x323   :  { %v635_v40 = vpop.permute.xlu1 %634 }
 0x324   :  { %v664_v52 = vrot.slane %v635_v40, %v11967_v7 }
 0x326   :  { %v680_v4 = vsel %vm535_vm5, %v664_v52, %v679_v60 }
 0x327   :  { %v638_v46 = vpop.permute.xlu1 %637 }
 0x328   :  { %v668_v55 = vrot.slane %v638_v46, %v11967_v7 }
 0x32a   :  { %v681_v11 = vsel %vm537_vm6, %v668_v55, %v680_v4 }
 0x32b   :  { %v641_v53 = vpop.permute.xlu1 %640 }
 0x32c   :  { %v672_v59 = vrot.slane %v641_v53, %v11967_v7 }
 0x32e   :  { %v682_v12 = vsel %vm539_vm7, %v672_v59, %v681_v11 }
 0x32f   :  { %v644_v9 = vpop.permute.xlu1 %643 }
 0x330   :  { %v676_v10 = vrot.slane %v644_v9, %v11967_v7 }
 0x332   :  { %v683_v13 = vsel %vm541_vm8, %v676_v10, %v682_v12 }
 0x333   :  { %v685_v8 = vsel %vm544_vm9, %v683_v13, 0.0 }
 0x334   :  { %686 = vadd.xlane.f32.xlu1 %v685_v8 }
 0x345   :  { %1267 = vrot.lane.b32.xlu1 %v11880_v29, %s11728_s13 }
 0x3c1   :  { %v687_v31 = vpop.xlane.xlu1 %686 }
 0x3c2   :  { %11266 = vrcp.f32 %v687_v31 }
 0x3cc   :  { %v11267_v37 = vpop.eup %11266 }
 0x3cd   :  { %v693_v38 = vrot.slane %v11267_v37, %v11895_v44  ;;  %v697_v29 = vrot.slane %v11267_v37, %v11986_v41  ;;  %v701_v45 = vrot.slane %v11267_v37, %v11989_v42  ;;  %v705_v50 = vrot.slane %v11267_v37, %v11992_v43 }
 0x3ce   :  { %v709_v52 = vrot.slane %v11267_v37, %v11998_v51  ;;  %v713_v58 = vrot.slane %v11267_v37, %v12002_v56  ;;  %v721_v12 = vrot.slane %v11267_v37, %v12010_v3 }
 0x3cf   :  { %v730_v39 = vmul.f32 %v12015_v14, %v693_v38  ;;  %v731_v40 = vmul.f32 %v12013_v16, %v697_v29  ;;  %v732_v49 = vmul.f32 %v12020_v18, %v701_v45  ;;  %v733_v55 = vmul.f32 %v12023_v30, %v705_v50  ;;  %v749_v29 = vld [vmem:[#allocation8 + $0xc] sm:$0xf]  ;;  %v750_v45 = vld [vmem:[#allocation8 + $0x10] sm:$0xf]  ;;  %v751_v50 = vld [vmem:[#allocation8 + $0x14] sm:$0xf] }
 0x3d0   :  { %v734_v18 = vmul.f32 %v12026_v34, %v709_v52  ;;  %v735_v4 = vmul.f32 %v12029_v36, %v713_v58  ;;  %v717_v30 = vrot.slane %v11267_v37, %v12006_v61  ;;  %v737_v34 = vmul.f32 %v12035_v35, %v721_v12 }
 0x3d1   :  { %v738_v46 = vpack.c.bf16 %v730_v39, %v730_v39  ;;  %v739_v48 = vpack.c.bf16 %v731_v40, %v731_v40  ;;  %v740_v54 = vpack.c.bf16 %v732_v49, %v732_v49  ;;  %v741_v14 = vpack.c.bf16 %v733_v55, %v733_v55 }
 0x3d2   :  { %v742_v60 = vpack.c.bf16 %v734_v18, %v734_v18  ;;  %v743_v10 = vpack.c.bf16 %v735_v4, %v735_v4  ;;  %v736_v11 = vmul.f32 %v12032_v32, %v717_v30  ;;  %v745_v17 = vpack.c.bf16 %v737_v34, %v737_v34 }
 0x3d3   :  { %v755_v47 = vunpack.c.l.b16 %v738_v46  ;;  %v812_v53 = vunpack.c.l.b16 %v739_v48  ;;  %v868_v16 = vunpack.c.l.b16 %v740_v54  ;;  %v924_v59 = vunpack.c.l.b16 %v741_v14 }
 0x3d4   :  { %v980_v9 = vunpack.c.l.b16 %v742_v60  ;;  %v1036_v13 = vunpack.c.l.b16 %v743_v10  ;;  %v744_v8 = vpack.c.bf16 %v736_v11, %v736_v11  ;;  %v1148_v19 = vunpack.c.l.b16 %v745_v17  ;;  %v753_v60 = vld [vmem:[#allocation8 + $0x1c] sm:$0xf] }
 0x3d5   :  { %757 = vperm.xlu0 %11168, %v755_v47   ;;  %v881_v37 = vsel %vm767_vm10, %v748_v27, 0  ;;  %v993_v48 = vsel %vm767_vm10, %v750_v45, 0  ;;  %v1049_v54 = vsel %vm767_vm10, %v751_v50, 0  ;;  %v11182_v17 = vld [vmem:[%s13825_s6 + $0x8] sm:$0xff]  }
 0x3d6   :  { %v1092_v15 = vunpack.c.l.b16 %v744_v8 }
 0x3d9   :  { %814 = vperm.xlu0 %11168, %v812_v53  }
 0x3dd   :  { %870 = vperm.xlu0 %11168, %v868_v16   ;;  %v752_v16 = vld [vmem:[#allocation8 + $0x18] sm:$0xf] }
 0x3de   :  { %v1105_v58 = vsel %vm767_vm10, %v752_v16, 0 }
 0x3e1   :  { %926 = vperm.xlu0 %11168, %v924_v59  }
 0x3e5   :  { %982 = vperm.xlu0 %11168, %v980_v9   ;;  %v1161_v9 = vsel %vm767_vm10, %v753_v60, 0 }
 0x3e9   :  { %1038 = vperm.xlu0 %11168, %v1036_v13  }
 0x3ed   :  { %1094 = vperm.xlu0 %11168, %v1092_v15   ;;  %v11181_v15 = vld [vmem:[%s13825_s6] sm:$0xff]  }
 0x3f1   :  { %1150 = vperm.xlu0 %11168, %v1148_v19  }
 0x3f5   :  { %1269 = vrot.lane.b32.xlu0 %v11884_v33, %s11728_s13  ;;  %v937_v33 = vsel %vm767_vm10, %v749_v29, 0 }
 0x454   :  { %v758_v36 = vpop.permute.xlu0 %757 }
 0x455   :  { %v762_v32 = vrot.slane %v758_v36, %v11967_v7 }
 0x457   :  { %v763_v31 = vpack.c.b16 %v762_v32, %v762_v32 }
 0x458   :  { %v815_v38 = vpop.permute.xlu0 %814 }
 0x459   :  { %v819_v35 = vrot.slane %v815_v38, %v11967_v7  ;;  %10642 = vmatmul.mubr.msk.bf16.vlgmr.msra.gmra.mrb[4].mxu1 %vm544_vm9, %v763_v31 }
 0x45a   :  { %10652 = vmatpush3.bf16.msra.mxu1 %v881_v37  ;;  %10653 = vmatprep.mubr.msk.bf16.mxu1 %vm11729_vm11, %v11726_v1 }
 0x45b   :  { %v820_v39 = vpack.c.b16 %v819_v35, %v819_v35  ;;  %10663 = vmatprep.subr.bf16.mxu1 %v11726_v1 }
 0x45c   :  { %v871_v40 = vpop.permute.xlu0 %870 }
 0x45d   :  { %v875_v46 = vrot.slane %v871_v40, %v11967_v7  ;;  %10648 = vmatmul.mubr.msk.bf16.vlgmr.msra.gmra.mrb[8].mxu0 %vm544_vm9, %v820_v39 }
 0x45e   :  { %10658 = vmatpush3.bf16.msra.mxu0 %v937_v33  ;;  %10659 = vmatprep.mubr.msk.bf16.mxu0 %vm11729_vm11, %v11726_v1 }
 0x45f   :  { %v876_v47 = vpack.c.b16 %v875_v46, %v875_v46  ;;  %10669 = vmatprep.subr.bf16.mxu0 %v11726_v1 }
 0x460   :  { %v927_v49 = vpop.permute.xlu0 %926 }
 0x461   :  { %v931_v52 = vrot.slane %v927_v49, %v11967_v7  ;;  %10654 = vmatmul.mubr.msk.bf16.vlgmr.msra.gmra.mrb[8].mxu1 %vm544_vm9, %v876_v47 }
 0x462   :  { %10664 = vmatpush3.bf16.msra.mxu1 %v993_v48  ;;  %10665 = vmatprep.mubr.msk.bf16.mxu1 %vm11729_vm11, %v11726_v1 }
 0x463   :  { %v932_v53 = vpack.c.b16 %v931_v52, %v931_v52  ;;  %10675 = vmatprep.subr.bf16.mxu1 %v11726_v1 }
 0x464   :  { %v983_v55 = vpop.permute.xlu0 %982 }
 0x465   :  { %v987_v14 = vrot.slane %v983_v55, %v11967_v7  ;;  %10660 = vmatmul.mubr.msk.bf16.vlgmr.msra.gmra.mrb[12].mxu0 %vm544_vm9, %v932_v53 }
 0x466   :  { %10670 = vmatpush3.bf16.msra.mxu0 %v1049_v54  ;;  %10671 = vmatprep.mubr.msk.bf16.mxu0 %vm11729_vm11, %v11726_v1 }
 0x467   :  { %v988_v18 = vpack.c.b16 %v987_v14, %v987_v14  ;;  %10681 = vmatprep.subr.bf16.mxu0 %v11726_v1 }
 0x468   :  { %v1039_v59 = vpop.permute.xlu0 %1038 }
 0x469   :  { %v1043_v4 = vrot.slane %v1039_v59, %v11967_v7  ;;  %10666 = vmatmul.mubr.msk.bf16.vlgmr.msra.gmra.mrb[12].mxu1 %vm544_vm9, %v988_v18 }
 0x46a   :  { %10676 = vmatpush3.bf16.msra.mxu1 %v1105_v58  ;;  %10677 = vmatprep.mubr.msk.bf16.mxu1 %vm11729_vm11, %v11726_v1 }
 0x46b   :  { %v1044_v30 = vpack.c.b16 %v1043_v4, %v1043_v4  ;;  %10687 = vmatprep.subr.bf16.mxu1 %v11726_v1 }
 0x46c   :  { %v1095_v10 = vpop.permute.xlu0 %1094 }
 0x46d   :  { %v1099_v11 = vrot.slane %v1095_v10, %v11967_v7  ;;  %10672 = vmatmul.mubr.msk.bf16.vlgmr.msra.gmra.mrb[16].mxu0 %vm544_vm9, %v1044_v30 }
 0x46e   :  { %10682 = vmatpush3.bf16.msra.mxu0 %v1161_v9  ;;  %10683 = vmatprep.mubr.msk.bf16.mxu0 %vm11729_vm11, %v11726_v1 }
 0x46f   :  { %v1100_v12 = vpack.c.b16 %v1099_v11, %v1099_v11  ;;  %10695 = vmatprep.subr.bf16.mxu0 %v11726_v1 }
 0x470   :  { %v1151_v13 = vpop.permute.xlu0 %1150 }
 0x471   :  { %v1155_v8 = vrot.slane %v1151_v13, %v11967_v7  ;;  %10678 = vmatmul.mubr.msk.bf16.vlgmr.msra.gmra.mrb[16].mxu1 %vm544_vm9, %v1100_v12 }
 0x472   :  { %10691 = vmatprep.mubr.msk.bf16.mxu1 %vm11729_vm11, %v11726_v1  ;;  %10688 = vmatpush3.bf16.msra.mxu1 %v11181_v15 }
 0x473   :  { %v1156_v34 = vpack.c.b16 %v1155_v8, %v1155_v8  ;;  %10689 = vmatprep.subr.bf16.mxu1 %v11726_v1 }
 0x475   :  { %10684 = vmatmul.mubr.msk.bf16.vlgmr.msra.gmra.mrb[20].mxu0 %vm544_vm9, %v1156_v34 }
 0x476   :  { %10699 = vmatprep.mubr.msk.bf16.mxu0 %vm11729_vm11, %v11726_v1  ;;  %10690 = vmatpush3.bf16.msra.mxu1 %v11182_v17 }
 0x52c   :  { %v805_v19 = vpop.f32.mrb[4].mxu1 }
 0x52d   :  { %v10643_v36 = vpop.f32.mrb[5].mxu1  ;;  %v1211_v37 = vpack.c.bf16 %v805_v19, %v805_v19 }
 0x52e   :  { %v808_v27 = vpop.f32.mrb[6].mxu1 }
 0x52f   :  { %v10644_v32 = vpop.f32.mrb[7].mxu1  ;;  %v1231_v45 = vunpack.c.l.b16 %v1211_v37 }
 0x530   :  { %v861_v31 = vpop.f32.mrb[8].mxu0 }
 0x531   :  { %v1212_v38 = vpack.c.bf16 %v861_v31, %v861_v31  ;;  %v10649_v29 = vpop.f32.mrb[9].mxu0 }
 0x532   :  { %v864_v35 = vpop.f32.mrb[10].mxu0 }
 0x533   :  { %v1232_v39 = vunpack.c.l.b16 %v1212_v38  ;;  %v10650_v33 = vpop.f32.mrb[11].mxu0 }
 0x534   :  { %v917_v40 = vpop.f32.mrb[8].mxu1 }
 0x535   :  { %v1239_v46 = vrot.slane %v1232_v39, 7  ;;  %v1213_v47 = vpack.c.bf16 %v917_v40, %v917_v40  ;;  %v10655_v48 = vpop.f32.mrb[9].mxu1 }
 0x536   :  { %v920_v49 = vpop.f32.mrb[10].mxu1 }
 0x537   :  { %v1240_v50 = vsel %vm529_vm2, %v1239_v46, %v1231_v45  ;;  %v1233_v52 = vunpack.c.l.b16 %v1213_v47  ;;  %v10656_v53 = vpop.f32.mrb[11].mxu1 }
 0x538   :  { %v973_v54 = vpop.f32.mrb[12].mxu0 }
 0x539   :  { %v1241_v55 = vrot.slane %v1233_v52, 6  ;;  %v1214_v16 = vpack.c.bf16 %v973_v54, %v973_v54  ;;  %v10661_v14 = vpop.f32.mrb[13].mxu0 }
 0x53a   :  { %v976_v18 = vpop.f32.mrb[14].mxu0 }
 0x53b   :  { %v1242_v58 = vsel %vm531_vm3, %v1241_v55, %v1240_v50  ;;  %v1234_v59 = vunpack.c.l.b16 %v1214_v16  ;;  %v10662_v60 = vpop.f32.mrb[15].mxu0  ;;  %v1204_v18 = vld [vmem:[#allocation5 + $0x8] sm:$0x1] }
 0x53c   :  { %v1029_v4 = vpop.f32.mrb[12].mxu1  ;;  %v1203_v60 = vld [vmem:[#allocation5] sm:$0x1] }
 0x53d   :  { %v1243_v30 = vrot.slane %v1234_v59, 5  ;;  %v1215_v9 = vpack.c.bf16 %v1029_v4, %v1029_v4  ;;  %v10667_v10 = vpop.f32.mrb[13].mxu1  ;;  %v1325_v59 = vrot.slane %v1204_v18, 7  ;;  %v1206_v4 = vld [vmem:[#allocation5 + $0x18] sm:$0x1] }
 0x53e   :  { %v1032_v11 = vpop.f32.mrb[14].mxu1  ;;  %v1207_v10 = vld [vmem:[#allocation5 + $0x20] sm:$0x1] }
 0x53f   :  { %v1244_v12 = vsel %vm533_vm4, %v1243_v30, %v1242_v58  ;;  %v1235_v13 = vunpack.c.l.b16 %v1215_v9  ;;  %v10668_v8 = vpop.f32.mrb[15].mxu1  ;;  %v1205_v58 = vld [vmem:[#allocation5 + $0x10] sm:$0x1]  ;;  %v1326_v9 = vsel %vm529_vm2, %v1325_v59, %v1203_v60  ;;  %v1329_v11 = vrot.slane %v1206_v4, 5 }
 0x540   :  { %v1085_v34 = vpop.f32.mrb[16].mxu0  ;;  %v1327_v30 = vrot.slane %v1205_v58, 6  ;;  %v1331_v8 = vrot.slane %v1207_v10, 4  ;;  %v12156_v4 = vld [vmem:[#allocation11] ss:$8 sps:$4 sm:$0xff]  }
 0x541   :  { %v1245_v15 = vrot.slane %v1235_v13, 4  ;;  %v1216_v17 = vpack.c.bf16 %v1085_v34, %v1085_v34  ;;  %v10673_v19 = vpop.f32.mrb[17].mxu0  ;;  %v1208_v13 = vld [vmem:[#allocation5 + $0x28] sm:$0x1]  ;;  %v11187_v10 = vld [vmem:[#allocation13 + $0x8] sm:$0xff]  }
 0x542   :  { %v1088_v36 = vpop.f32.mrb[18].mxu0 }
 0x543   :  { %v1246_v27 = vsel %vm535_vm5, %v1245_v15, %v1244_v12  ;;  %v1236_v32 = vunpack.c.l.b16 %v1216_v17  ;;  %v10674_v31 = vpop.f32.mrb[19].mxu0  ;;  %v1328_v12 = vsel %vm531_vm3, %v1327_v30, %v1326_v9  ;;  %v1209_v15 = vld [vmem:[#allocation5 + $0x30] sm:$0x1]  ;;  %v1333_v17 = vrot.slane %v1208_v13, 3  ;;  %v1210_v36 = vld [vmem:[#allocation5 + $0x38] sm:$0x1] }
 0x544   :  { %v1141_v37 = vpop.f32.mrb[16].mxu1  ;;  %v1330_v34 = vsel %vm533_vm4, %v1329_v11, %v1328_v12  ;;  %v1337_v31 = vrot.slane %v1210_v36, 1  ;;  %v12158_v30 = vld [vmem:[#allocation11 + $0x4] ss:$8 sps:$4 sm:$0xff]   ;;  %v11570_v11 = vld [vmem:[#allocation11 + $0x14] ss:$8 sps:$4 sm:$0xff]  }
 0x545   :  { %v1247_v38 = vrot.slane %v1236_v32, 3  ;;  %v1217_v29 = vpack.c.bf16 %v1141_v37, %v1141_v37  ;;  %v10679_v35 = vpop.f32.mrb[17].mxu1  ;;  %v1332_v19 = vsel %vm535_vm5, %v1331_v8, %v1330_v34  ;;  %v1270_v37 = vpop.permute.xlu0 %1269  ;;  %v11186_v9 = vld [vmem:[#allocation13] sm:$0xff]   ;;  %1529 = vmatprep.subr.bf16.mxu1 %v12158_v30  ;;  %v11571_v12 = vld [vmem:[#allocation11 + $0x10] ss:$8 sps:$4 sm:$0xff]  }
 0x546   :  { %v1144_v39 = vpop.f32.mrb[18].mxu1  ;;  %v1334_v32 = vsel %vm537_vm6, %v1333_v17, %v1332_v19  ;;  %10696 = vmatpush3.bf16.msra.mxu0 %v11186_v9  ;;  %v12176_v19 = vld [vmem:[%s13827_s8] ss:$0 sm:$0xff] }
 0x547   :  { %v1248_v33 = vsel %vm537_vm6, %v1247_v38, %v1246_v27  ;;  %v1237_v40 = vunpack.c.l.b16 %v1217_v29  ;;  %v10680_v45 = vpop.f32.mrb[19].mxu1  ;;  %v1335_v27 = vrot.slane %v1209_v15, 2  ;;  %v1268_v29 = vpop.permute.xlu1 %1267  ;;  %10697 = vmatprep.subr.bf16.mxu0 %v11726_v1 }
 0x548   :  { %v1197_v46 = vpop.f32.mrb[20].mxu0  ;;  %v1272_v35 = vsel %vm1271_vm12, %v1268_v29, %v1270_v37 }
 0x549   :  { %v1249_v47 = vrot.slane %v1237_v40, 2  ;;  %v1218_v48 = vpack.c.bf16 %v1197_v46, %v1197_v46  ;;  %v10685_v49 = vpop.f32.mrb[21].mxu0  ;;  %v1336_v38 = vsel %vm539_vm7, %v1335_v27, %v1334_v32 }
 0x54a   :  { %v1200_v50 = vpop.f32.mrb[22].mxu0  ;;  %10698 = vmatpush3.bf16.msra.mxu0 %v11187_v10 }
 0x54b   :  { %v1250_v52 = vsel %vm539_vm7, %v1249_v47, %v1248_v33  ;;  %v1238_v53 = vunpack.c.l.b16 %v1218_v48  ;;  %v10686_v54 = vpop.f32.mrb[23].mxu0  ;;  %v1338_v33 = vsel %vm541_vm8, %v1337_v31, %v1336_v38  ;;  %v255_v50 = vld [vmem:[#allocation4] sm:$0xff]  ;;  %10703 = vmatprep.subr.bf16.mxu0 %v11726_v1 }
 0x54d   :  { %v1251_v55 = vrot.slane %v1238_v53, 1 }
 0x54f   :  { %v1252_v16 = vsel %vm541_vm8, %v1251_v55, %v1250_v52 }
 0x550   :  { %v1253_v14 = vpack.c.b16 %v1252_v16, %v1252_v16 }
 0x552   :  { %10692 = vmatmul.mubr.msk.bf16.vlgmr.msra.gmra.mrb[20].mxu1 %vm106_vm0, %v1253_v14 }
 0x553   :  { %1561 = vmatprep.mubr.bf16.mxu1 %v11725_v0  ;;  %1530 = vmatpush1.bf16.msra.mxu1 %v12156_v4 }
 0x554   :  { %1531 = vmatprep.subr.bf16.mxu1 %v11570_v11 }
 0x557   :  { %1532 = vmatpush1.bf16.msra.mxu1 %v11571_v12 }
 0x558   :  { %10709 = vmatprep.subr.bf16.mxu1 %v11726_v1 }
 0x625   :  { %v1311_v39 = vpop.f32.mrb[20].mxu1 }
 0x626   :  { %v1312_v40 = vadd.f32 %v1311_v39, %v1272_v35  ;;  %v10693_v45 = vpop.f32.mrb[21].mxu1 }
 0x627   :  { %v1314_v46 = vpop.f32.mrb[22].mxu1 }
 0x628   :  { %v1340_v47 = vadd.f32 %v1338_v33, %v1312_v40  ;;  %v10694_v48 = vpop.f32.mrb[23].mxu1 }
 0x62a   :  { %11268 = vtanh.f32 %v1340_v47  ;;  %v10109_v52 = vmul.f32 -1.442695, %v1340_v47 }
 0x62c   :  { %11270 = vpow2.f32 %v10109_v52 }
 0x634   :  { %v11269_v49 = vpop.eup %11268 }
 0x635   :  { %1354 = vrot.lane.b32.xlu0 %v11269_v49, %s11717_s19 }
 0x636   :  { %v11271_v53 = vpop.eup %11270 }
 0x637   :  { %v1344_v54 = vadd.f32 1.0, %v11271_v53 }
 0x639   :  { %1349 = vrot.lane.b32.xlu0 %v255_v50, %s11730_s18  ;;  %11272 = vrcp.f32 %v1344_v54 }
 0x643   :  { %v11273_v55 = vpop.eup %11272 }
 0x6a7   :  { %v1355_v16 = vpop.permute.xlu0 %1354 }
 0x6a8   :  { %v1357_v14 = vmul.f32 %v11273_v55, %v1355_v16 }
 0x6aa   :  { %1359 = vrot.lane.b32.xlu0 %v1357_v14, %s11730_s18 }
 0x6ab   :  { %v1350_v18 = vpop.permute.xlu0 %1349 }
 0x6ac   :  { %v1352_v58 = vmul.f32 %v11273_v55, %v1350_v18 }
 0x71c   :  { %v1360_v59 = vpop.permute.xlu0 %1359 }
 0x71d   :  { %v12153_v60 = vadd.f32 %v1360_v59, %v1352_v58 }
 0x71f   :  { %11274 = vtanh.f32 %v12153_v60 }
 0x729   :  { %v11275_v13 = vpop.eup %11274 }
 0x72a   :  { %1365 = vrot.lane.b32.xlu1 %v11275_v13, %s11717_s19 }
 0x79c   :  { %v1366_v8 = vpop.permute.xlu1 %1365 }
 0x79d   :  { %v1368_v34 = vmul.f32 %v11273_v55, %v1366_v8 }
 0x79f   :  { %v1369_v15 = vpack.c.bf16 %v1368_v34, %v1368_v34 }
 0x7a1   :  { %1382 = vrot.lane.b32.xlu0 %v1369_v15, %s11730_s18 }
 0x813   :  { %v1383_v17 = vpop.permute.xlu0 %1382 }
 0x814   :  { %10700 = vmatmul.mubr.msk.bf16.vlgmr.msra.gmra.mrb[24].mxu0 %vm106_vm0, %v1383_v17  ;;  %10122 = vmatmul.mubr.msk.bf16.vlgmr.msra.gmra.mrb[24].mxu1 %vm106_vm0, %v1383_v17 }
 0x815   :  { %10705 = vmatprep.mubr.msk.bf16.mxu0 %vm11729_vm11, %v11726_v1  ;;  %10711 = vmatprep.mubr.msk.bf16.mxu1 %vm11729_vm11, %v11726_v1 }
 0x8e7   :  { %v1433_v36 = vpop.f32.mrb[24].mxu0  ;;  %v12178_v27 = vpop.f32.mrb[24].mxu1 }
 0x8e8   :  { %v1434_v32 = vadd.f32 %v12176_v19, %v1433_v36  ;;  %v1587_v31 = vcombine.high %v12178_v27, %v12178_v27  ;;  %v1594_v37 = vrot.slane %v12178_v27, %v11878_v21  ;;  %v10701_v38 = vpop.f32.mrb[25].mxu0  ;;  %v12185_v29 = vpop.f32.mrb[25].mxu1 }
 0x8e9   :  { %v1436_v35 = vpop.f32.mrb[26].mxu0  ;;  %v1567_v39 = vpop.f32.mrb[26].mxu1 }
 0x8ea   :  { %v1440_v33 = vcombine.high %v1434_v32, %v1434_v32  ;;  %v1447_v40 = vrot.slane %v1434_v32, %v11878_v21  ;;  %v1601_v45 = vrot.slane %v1587_v31, %v11878_v21  ;;  %v1602_v46 = vcombine.high %v1594_v37, %v1594_v37  ;;  %v10702_v47 = vpop.f32.mrb[27].mxu0  ;;  %v1568_v48 = vpop.f32.mrb[27].mxu1 }
 0x8eb   :  { %v1610_v49 = vrot.slane %v1594_v37, %v11878_v21 }
 0x8ec   :  { %v1454_v50 = vrot.slane %v1440_v33, %v11878_v21  ;;  %v1455_v52 = vcombine.high %v1447_v40, %v1447_v40  ;;  %v1463_v53 = vrot.slane %v1447_v40, %v11878_v21  ;;  %10114 = vst.sshfl [vmem:[#allocation14] sm:$0x1 pattern:$0x73625140] %v1447_v40  ;;  %v1603_v54 = vcombine.high %v1601_v45, %v1601_v45 }
 0x8ed   :  { %v1617_v55 = vrot.slane %v1601_v45, %v11878_v21  ;;  %v1624_v16 = vrot.slane %v1602_v46, %v11878_v21  ;;  %v1632_v14 = vcombine.high %v1610_v49, %v1610_v49  ;;  %v1639_v18 = vrot.slane %v1610_v49, %v11895_v44 }
 0x8ee   :  { %v1456_v58 = vcombine.high %v1454_v50, %v1454_v50  ;;  %v1470_v59 = vrot.slane %v1454_v50, %v11878_v21  ;;  %v1477_v9 = vrot.slane %v1455_v52, %v11878_v21  ;;  %v1485_v10 = vcombine.high %v1463_v53, %v1463_v53  ;;  %10115 = vst.sshfl [vmem:[#allocation14 + $0x8] sm:$0x1 pattern:$0x73625140] %v1455_v52 }
 0x8ef   :  { %10116 = vst.sshfl [vmem:[#allocation14 + $0x20] sm:$0x1 pattern:$0x73625140] %v1454_v50  ;;  %v1631_v11 = vrot.slane %v1603_v54, %v11878_v21  ;;  %v1633_v12 = vcombine.high %v1617_v55, %v1617_v55  ;;  %v1634_v13 = vcombine.high %v1624_v16, %v1624_v16  ;;  %v1643_v8 = vrot.slane %v1624_v16, %v11895_v44 }
 0x8f0   :  { %v1484_v34 = vrot.slane %v1456_v58, %v11878_v21  ;;  %v1486_v15 = vcombine.high %v1470_v59, %v1470_v59  ;;  %v1487_v17 = vcombine.high %v1477_v9, %v1477_v9  ;;  %1499 = vst [vmem:[#allocation14 + $0x10] sm:$0x1] %v1485_v10  ;;  %10117 = vst.sshfl [vmem:[#allocation14 + $0x28] sm:$0x1 pattern:$0x73625140] %v1456_v58 }
 0x8f1   :  { %v1647_v36 = vrot.slane %v1632_v14, %v11895_v44  ;;  %v1635_v32 = vcombine.high %v1631_v11, %v1631_v11  ;;  %v1651_v31 = vrot.slane %v1634_v13, %v11895_v44  ;;  %v1655_v37 = vrot.slane %v1617_v55, %v11895_v44  ;;  %v12234_v14 = vld [vmem:[%s13824_s5] ss:$0 sm:$0xff] }
 0x8f2   :  { %v1659_v38 = vrot.slane %v1631_v11, %v11895_v44  ;;  %v1488_v35 = vcombine.high %v1484_v34, %v1484_v34  ;;  %1500 = vst [vmem:[#allocation14 + $0x18] sm:$0x1] %v1487_v17  ;;  %1503 = vst [vmem:[#allocation14 + $0x30] sm:$0x1] %v1486_v15  ;;  %v1676_v39 = vadd.f32 %v10295_v5, %v1639_v18 }
 0x8f3   :  { %v1677_v33 = vadd.f32 %v10296_v6, %v1643_v8  ;;  %v1678_v40 = vadd.f32 %v10299_v63, %v1647_v36  ;;  %v1680_v45 = vadd.f32 %v10303_v23, %v1655_v37  ;;  %v1667_v46 = vrot.slane %v1635_v32, %v11895_v44 }
 0x8f4   :  { %1504 = vst [vmem:[#allocation14 + $0x38] sm:$0x1] %v1488_v35  ;;  %v1679_v47 = vadd.f32 %v10300_v2, %v1651_v31  ;;  %11276 = vtanh.f32 %v1676_v39  ;;  %v1663_v48 = vrot.slane %v1633_v12, %v11895_v44  ;;  %v1681_v5 = vadd.f32 %v10304_v24, %v1659_v38 }
 0x8f5   :  { %11278 = vtanh.f32 %v1677_v33  ;;  %v1683_v62 = vadd.f32 %v10308_v26, %v1667_v46 }
 0x8f6   :  { %11280 = vtanh.f32 %v1678_v40  ;;  %v1682_v63 = vadd.f32 %v10307_v25, %v1663_v48 }
 0x8f7   :  { %11282 = vtanh.f32 %v1680_v45 }
 0x8f8   :  { %11284 = vtanh.f32 %v1679_v47 }
 0x8f9   :  { %11286 = vtanh.f32 %v1681_v5 }
 0x8fa   :  { %11288 = vtanh.f32 %v1683_v62 }
 0x8fb   :  { %11290 = vtanh.f32 %v1682_v63 }
 0x8fe   :  { %v11277_v57 = vpop.eup %11276 }
 0x8ff   :  { %v11279_v2 = vpop.eup %11278  ;;  %v1692_v6 = vmul.f32 %v11277_v57, %v11939_v28 }
 0x900   :  { %v11281_v23 = vpop.eup %11280  ;;  %v1693_v20 = vmul.f32 %v11279_v2, %v11939_v28 }
 0x901   :  { %v11283_v24 = vpop.eup %11282  ;;  %v1700_v49 = vsel %vm106_vm0, %v1692_v6, 0.0  ;;  %v1694_v22 = vmul.f32 %v11281_v23, %v11939_v28 }
 0x902   :  { %v11285_v50 = vpop.eup %11284  ;;  %1701 = vadd.xlane.f32.xlu1 %v1700_v49  ;;  %v1703_v26 = vsel %vm106_vm0, %v1693_v20, 0.0  ;;  %v1696_v18 = vmul.f32 %v12234_v14, %v11283_v24 }
 0x903   :  { %v11287_v25 = vpop.eup %11286  ;;  %1704 = vadd.xlane.f32.xlu0 %v1703_v26  ;;  %v1695_v52 = vmul.f32 %v11285_v50, %v11939_v28  ;;  %v1706_v16 = vsel %vm106_vm0, %v1694_v22, 0.0 }
 0x904   :  { %v1697_v54 = vmul.f32 %v11287_v25, %v11939_v28  ;;  %v11289_v55 = vpop.eup %11288  ;;  %v1712_v28 = vsel %vm106_vm0, %v1696_v18, 0.0 }
 0x905   :  { %v1709_v53 = vsel %vm106_vm0, %v1695_v52, 0.0  ;;  %v11291_v58 = vpop.eup %11290  ;;  %v1699_v9 = vmul.f32 %v12234_v14, %v11289_v55 }
 0x906   :  { %1710 = vadd.xlane.f32.xlu1 %v1709_v53  ;;  %v1715_v59 = vsel %vm106_vm0, %v1697_v54, 0.0  ;;  %v1698_v10 = vmul.f32 %v12234_v14, %v11291_v58 }
 0x907   :  { %1707 = vadd.xlane.f32.xlu0 %v1706_v16  ;;  %v1721_v11 = vsel %vm106_vm0, %v1699_v9, 0.0 }
 0x908   :  { %v1718_v12 = vsel %vm106_vm0, %v1698_v10, 0.0 }
 0x90a   :  { %1716 = vadd.xlane.f32.xlu1 %v1715_v59 }
 0x90b   :  { %1713 = vadd.xlane.f32.xlu0 %v1712_v28 }
 0x90e   :  { %1722 = vadd.xlane.f32.xlu1 %v1721_v11 }
 0x90f   :  { %1719 = vadd.xlane.f32.xlu0 %v1718_v12 }
 0x98f   :  { %v1702_v13 = vpop.xlane.xlu1 %1701 }
 0x990   :  { %v1705_v8 = vpop.xlane.xlu0 %1704  ;;  %v1735_v17 = vrot.slane %v1702_v13, %v11967_v7 }
 0x991   :  { %v1739_v34 = vrot.slane %v1705_v8, %v11967_v7 }
 0x993   :  { %v1711_v15 = vpop.xlane.xlu1 %1710  ;;  %v1764_v31 = vsel %vm529_vm2, %v1739_v34, %v1735_v17 }
 0x994   :  { %v1708_v36 = vpop.xlane.xlu0 %1707  ;;  %v1747_v35 = vrot.slane %v1711_v15, %v11967_v7 }
 0x995   :  { %v1743_v32 = vrot.slane %v1708_v36, %v11967_v7 }
 0x997   :  { %v1765_v37 = vsel %vm531_vm3, %v1743_v32, %v1764_v31  ;;  %v1717_v38 = vpop.xlane.xlu1 %1716 }
 0x998   :  { %v1714_v39 = vpop.xlane.xlu0 %1713  ;;  %v1766_v40 = vsel %vm533_vm4, %v1747_v35, %v1765_v37  ;;  %v1755_v47 = vrot.slane %v1717_v38, %v11967_v7 }
 0x999   :  { %v1751_v33 = vrot.slane %v1714_v39, %v11967_v7 }
 0x99b   :  { %v1767_v45 = vsel %vm535_vm5, %v1751_v33, %v1766_v40  ;;  %v1723_v46 = vpop.xlane.xlu1 %1722 }
 0x99c   :  { %v1720_v48 = vpop.xlane.xlu0 %1719  ;;  %v1763_v62 = vrot.slane %v1723_v46, %v11967_v7  ;;  %v1768_v63 = vsel %vm537_vm6, %v1755_v47, %v1767_v45 }
 0x99d   :  { %v1759_v5 = vrot.slane %v1720_v48, %v11967_v7 }
 0x99f   :  { %v1769_v57 = vsel %vm539_vm7, %v1759_v5, %v1768_v63 }
 0x9a0   :  { %v1770_v2 = vsel %vm541_vm8, %v1763_v62, %v1769_v57 }
 0x9a1   :  { %v1772_v6 = vsel %vm544_vm9, %v1770_v2, -inf }
 0x9a2   :  { %1773 = vmax.xlane.f32.xlu0 %v1772_v6 }
 0xa2f   :  { %v1774_v23 = vpop.xlane.xlu0 %1773 }
 0xa30   :  { %v1779_v20 = vrot.slane %v1774_v23, %v11895_v44  ;;  %v1783_v24 = vrot.slane %v1774_v23, %v11986_v41  ;;  %v1787_v49 = vrot.slane %v1774_v23, %v11989_v42  ;;  %v1795_v50 = vrot.slane %v1774_v23, %v11998_v51 }
 0xa31   :  { %v1803_v26 = vrot.slane %v1774_v23, %v12006_v61  ;;  %v1791_v52 = vrot.slane %v1774_v23, %v11992_v43  ;;  %v1799_v59 = vrot.slane %v1774_v23, %v12002_v56  ;;  %v1807_v11 = vrot.slane %v1774_v23, %v12010_v3 }
 0xa32   :  { %v1817_v22 = vsub.f32 %v1705_v8, %v1783_v24  ;;  %v1816_v25 = vsub.f32 %v1702_v13, %v1779_v20  ;;  %v1820_v53 = vsub.f32 %v1714_v39, %v1795_v50  ;;  %v1818_v54 = vsub.f32 %v1708_v36, %v1787_v49 }
 0xa33   :  { %v1822_v58 = vsub.f32 %v1720_v48, %v1803_v26  ;;  %v1819_v28 = vsub.f32 %v1711_v15, %v1791_v52  ;;  %v1821_v13 = vsub.f32 %v1717_v38, %v1799_v59  ;;  %v1823_v34 = vsub.f32 %v1723_v46, %v1807_v11 }
 0xa34   :  { %v1826_v55 = vmul.f32 1.442695, %v1817_v22  ;;  %v1824_v16 = vmul.f32 1.442695, %v1816_v25  ;;  %v1832_v18 = vmul.f32 1.442695, %v1820_v53 }
 0xa35   :  { %v1828_v9 = vmul.f32 1.442695, %v1818_v54  ;;  %v1836_v10 = vmul.f32 1.442695, %v1822_v58  ;;  %v1830_v12 = vmul.f32 1.442695, %v1819_v28 }
 0xa36   :  { %11292 = vpow2.f32 %v1826_v55  ;;  %v1834_v8 = vmul.f32 1.442695, %v1821_v13  ;;  %v1838_v32 = vmul.f32 1.442695, %v1823_v34 }
 0xa37   :  { %11294 = vpow2.f32 %v1824_v16  ;;  %v1973_v16 = vld [vmem:[#allocation8] sm:$0xf] }
 0xa38   :  { %11296 = vpow2.f32 %v1832_v18  ;;  %v1995_v18 = vsel %vm767_vm10, %v1973_v16, 0 }
 0xa39   :  { %11298 = vpow2.f32 %v1828_v9  ;;  %10704 = vmatpush3.bf16.msra.mxu0 %v1995_v18 }
 0xa3a   :  { %11300 = vpow2.f32 %v1836_v10  ;;  %10715 = vmatprep.subr.bf16.mxu0 %v11726_v1 }
 0xa3b   :  { %11302 = vpow2.f32 %v1830_v12 }
 0xa3c   :  { %11304 = vpow2.f32 %v1834_v8 }
 0xa3d   :  { %11306 = vpow2.f32 %v1838_v32 }
 0xa40   :  { %v11293_v17 = vpop.eup %11292 }
 0xa41   :  { %v11295_v36 = vpop.eup %11294  ;;  %1852 = vperm.xlu0 %11168, %v11293_v17  }
 0xa42   :  { %1849 = vperm.xlu1 %11167, %v11295_v36   ;;  %v12267_v31 = vpop.eup %11296 }
 0xa43   :  { %v11299_v15 = vpop.eup %11298 }
 0xa44   :  { %v12270_v37 = vpop.eup %11300 }
 0xa45   :  { %1861 = vperm.xlu0 %11168, %v12267_v31   ;;  %v11303_v38 = vpop.eup %11302 }
 0xa46   :  { %1855 = vperm.xlu1 %11167, %v11299_v15   ;;  %v12273_v35 = vpop.eup %11304 }
 0xa47   :  { %v12276_v39 = vpop.eup %11306 }
 0xa49   :  { %1867 = vperm.xlu0 %11168, %v12270_v37  }
 0xa4a   :  { %1858 = vperm.xlu1 %11167, %v11303_v38  }
 0xa4e   :  { %1864 = vperm.xlu1 %11167, %v12273_v35  }
 0xa52   :  { %1870 = vperm.xlu1 %11167, %v12276_v39  }
 0xac0   :  { %v1853_v40 = vpop.permute.xlu0 %1852 }
 0xac1   :  { %v1850_v33 = vpop.permute.xlu1 %1849  ;;  %v1879_v46 = vrot.slane %v1853_v40, %v11967_v7 }
 0xac2   :  { %v1875_v47 = vrot.slane %v1850_v33, %v11967_v7 }
 0xac4   :  { %v1862_v5 = vpop.permute.xlu0 %1861  ;;  %v1904_v63 = vsel %vm529_vm2, %v1879_v46, %v1875_v47  ;;  %v1974_v47 = vld [vmem:[#allocation8 + $0x4] sm:$0xf] }
 0xac5   :  { %v1856_v45 = vpop.permute.xlu1 %1855  ;;  %v1891_v23 = vrot.slane %v1862_v5, %v11967_v7 }
 0xac6   :  { %v1883_v48 = vrot.slane %v1856_v45, %v11967_v7 }
 0xac8   :  { %v1905_v2 = vsel %vm531_vm3, %v1883_v48, %v1904_v63  ;;  %v1868_v24 = vpop.permute.xlu0 %1867  ;;  %v2051_v48 = vsel %vm767_vm10, %v1974_v47, 0 }
 0xac9   :  { %v1859_v62 = vpop.permute.xlu1 %1858  ;;  %v1899_v22 = vrot.slane %v1868_v24, %v11967_v7  ;;  %10710 = vmatpush3.bf16.msra.mxu1 %v2051_v48 }
 0xaca   :  { %v1887_v57 = vrot.slane %v1859_v62, %v11967_v7  ;;  %10721 = vmatprep.subr.bf16.mxu1 %v11726_v1 }
 0xacc   :  { %v1906_v6 = vsel %vm533_vm4, %v1887_v57, %v1905_v2 }
 0xacd   :  { %v1865_v20 = vpop.permute.xlu1 %1864  ;;  %v1907_v50 = vsel %vm535_vm5, %v1891_v23, %v1906_v6 }
 0xace   :  { %v1895_v49 = vrot.slane %v1865_v20, %v11967_v7 }
 0xad0   :  { %v1908_v26 = vsel %vm537_vm6, %v1895_v49, %v1907_v50 }
 0xad1   :  { %v1871_v25 = vpop.permute.xlu1 %1870  ;;  %v1909_v53 = vsel %vm539_vm7, %v1899_v22, %v1908_v26 }
 0xad2   :  { %v1903_v52 = vrot.slane %v1871_v25, %v11967_v7  ;;  %v1975_v25 = vld [vmem:[#allocation8 + $0x8] sm:$0xf] }
 0xad4   :  { %v1910_v54 = vsel %vm541_vm8, %v1903_v52, %v1909_v53  ;;  %v2107_v53 = vsel %vm767_vm10, %v1975_v25, 0 }
 0xad5   :  { %v1912_v55 = vsel %vm544_vm9, %v1910_v54, 0.0 }
 0xad6   :  { %1913 = vadd.xlane.f32.xlu0 %v1912_v55  ;;  %v1976_v55 = vld [vmem:[#allocation8 + $0xc] sm:$0xf] }
 0xaec   :  { %2493 = vrot.lane.b32.xlu0 %v12178_v27, %s11728_s13 }
 0xb63   :  { %v1914_v58 = vpop.xlane.xlu0 %1913 }
 0xb64   :  { %11308 = vrcp.f32 %v1914_v58  ;;  %v1977_v58 = vld [vmem:[#allocation8 + $0x10] sm:$0xf] }
 0xb6e   :  { %v11309_v59 = vpop.eup %11308 }
 0xb6f   :  { %v1920_v9 = vrot.slane %v11309_v59, %v11895_v44  ;;  %v1924_v28 = vrot.slane %v11309_v59, %v11986_v41  ;;  %v1928_v12 = vrot.slane %v11309_v59, %v11989_v42  ;;  %v1932_v32 = vrot.slane %v11309_v59, %v11992_v43 }
 0xb70   :  { %v1936_v46 = vrot.slane %v11309_v59, %v11998_v51  ;;  %v1944_v57 = vrot.slane %v11309_v59, %v12006_v61  ;;  %v1948_v20 = vrot.slane %v11309_v59, %v12010_v3 }
 0xb71   :  { %v1957_v10 = vmul.f32 %v11295_v36, %v1920_v9  ;;  %v1958_v11 = vmul.f32 %v11293_v17, %v1924_v28  ;;  %v1959_v34 = vmul.f32 %v11299_v15, %v1928_v12  ;;  %v1960_v45 = vmul.f32 %v11303_v38, %v1932_v32 }
 0xb72   :  { %v1961_v5 = vmul.f32 %v12267_v31, %v1936_v46  ;;  %v1940_v15 = vrot.slane %v11309_v59, %v12002_v56  ;;  %v1963_v23 = vmul.f32 %v12270_v37, %v1944_v57  ;;  %v1964_v31 = vmul.f32 %v12276_v39, %v1948_v20  ;;  %v1980_v46 = vld [vmem:[#allocation8 + $0x1c] sm:$0xf]  ;;  %v11188_v57 = vld [vmem:[%s13825_s6] sm:$0xff]  }
 0xb73   :  { %v1965_v13 = vpack.c.bf16 %v1957_v10, %v1957_v10  ;;  %v1966_v27 = vpack.c.bf16 %v1958_v11, %v1958_v11  ;;  %v1967_v40 = vpack.c.bf16 %v1959_v34, %v1959_v34  ;;  %v1968_v36 = vpack.c.bf16 %v1960_v45, %v1960_v45  ;;  %v1978_v11 = vld [vmem:[#allocation8 + $0x14] sm:$0xf]  ;;  %v1979_v34 = vld [vmem:[#allocation8 + $0x18] sm:$0xf] }
 0xb74   :  { %v1969_v63 = vpack.c.bf16 %v1961_v5, %v1961_v5  ;;  %v1962_v38 = vmul.f32 %v12273_v35, %v1940_v15  ;;  %v1971_v49 = vpack.c.bf16 %v1963_v23, %v1963_v23  ;;  %v1972_v26 = vpack.c.bf16 %v1964_v31, %v1964_v31 }
 0xb75   :  { %v1982_v8 = vunpack.c.l.b16 %v1965_v13  ;;  %v2038_v33 = vunpack.c.l.b16 %v1966_v27  ;;  %v2094_v17 = vunpack.c.l.b16 %v1967_v40  ;;  %v2150_v62 = vunpack.c.l.b16 %v1968_v36 }
 0xb76   :  { %v2206_v2 = vunpack.c.l.b16 %v1969_v63  ;;  %v1970_v6 = vpack.c.bf16 %v1962_v38, %v1962_v38  ;;  %v2318_v50 = vunpack.c.l.b16 %v1971_v49  ;;  %v2374_v22 = vunpack.c.l.b16 %v1972_v26 }
 0xb77   :  { %1984 = vperm.xlu1 %11167, %v1982_v8   ;;  %v2219_v28 = vsel %vm767_vm10, %v1977_v58, 0  ;;  %v2275_v8 = vsel %vm767_vm10, %v1978_v11, 0  ;;  %v2331_v40 = vsel %vm767_vm10, %v1979_v34, 0 }
 0xb78   :  { %v2262_v24 = vunpack.c.l.b16 %v1970_v6 }
 0xb7b   :  { %2040 = vperm.xlu1 %11167, %v2038_v33  }
 0xb7f   :  { %2096 = vperm.xlu1 %11167, %v2094_v17   ;;  %v2387_v17 = vsel %vm767_vm10, %v1980_v46, 0 }
 0xb83   :  { %2152 = vperm.xlu1 %11167, %v2150_v62  }
 0xb87   :  { %2208 = vperm.xlu1 %11167, %v2206_v2   ;;  %v11189_v2 = vld [vmem:[%s13825_s6 + $0x8] sm:$0xff]  }
 0xb8b   :  { %2264 = vperm.xlu1 %11167, %v2262_v24  }
 0xb8f   :  { %2320 = vperm.xlu1 %11167, %v2318_v50  }
 0xb93   :  { %2376 = vperm.xlu1 %11167, %v2374_v22  }
 0xb97   :  { %2495 = vrot.lane.b32.xlu1 %v12185_v29, %s11728_s13  ;;  %v2163_v29 = vsel %vm767_vm10, %v1976_v55, 0 }
 0xbf6   :  { %v1985_v35 = vpop.permute.xlu1 %1984 }
 0xbf7   :  { %v1989_v37 = vrot.slane %v1985_v35, %v11967_v7 }
 0xbf9   :  { %v1990_v52 = vpack.c.b16 %v1989_v37, %v1989_v37 }
 0xbfa   :  { %v2041_v54 = vpop.permute.xlu1 %2040 }
 0xbfb   :  { %v2045_v39 = vrot.slane %v2041_v54, %v11967_v7  ;;  %10706 = vmatmul.mubr.msk.bf16.vlgmr.msra.gmra.mrb[28].mxu0 %vm544_vm9, %v1990_v52 }
 0xbfc   :  { %10716 = vmatpush3.bf16.msra.mxu0 %v2107_v53  ;;  %10717 = vmatprep.mubr.msk.bf16.mxu0 %vm11729_vm11, %v11726_v1 }
 0xbfd   :  { %v2046_v16 = vpack.c.b16 %v2045_v39, %v2045_v39  ;;  %10727 = vmatprep.subr.bf16.mxu0 %v11726_v1 }
 0xbfe   :  { %v2097_v18 = vpop.permute.xlu1 %2096 }
 0xbff   :  { %v2101_v59 = vrot.slane %v2097_v18, %v11967_v7  ;;  %10712 = vmatmul.mubr.msk.bf16.vlgmr.msra.gmra.mrb[28].mxu1 %vm544_vm9, %v2046_v16 }
 0xc00   :  { %10722 = vmatpush3.bf16.msra.mxu1 %v2163_v29  ;;  %10723 = vmatprep.mubr.msk.bf16.mxu1 %vm11729_vm11, %v11726_v1 }
 0xc01   :  { %v2102_v9 = vpack.c.b16 %v2101_v59, %v2101_v59  ;;  %10733 = vmatprep.subr.bf16.mxu1 %v11726_v1 }
 0xc02   :  { %v2153_v10 = vpop.permute.xlu1 %2152 }
 0xc03   :  { %v2157_v12 = vrot.slane %v2153_v10, %v11967_v7  ;;  %10718 = vmatmul.mubr.msk.bf16.vlgmr.msra.gmra.mrb[32].mxu0 %vm544_vm9, %v2102_v9 }
 0xc04   :  { %10728 = vmatpush3.bf16.msra.mxu0 %v2219_v28  ;;  %10729 = vmatprep.mubr.msk.bf16.mxu0 %vm11729_vm11, %v11726_v1 }
 0xc05   :  { %v2158_v13 = vpack.c.b16 %v2157_v12, %v2157_v12  ;;  %10739 = vmatprep.subr.bf16.mxu0 %v11726_v1 }
 0xc06   :  { %v2209_v27 = vpop.permute.xlu1 %2208 }
 0xc07   :  { %v2213_v32 = vrot.slane %v2209_v27, %v11967_v7  ;;  %10724 = vmatmul.mubr.msk.bf16.vlgmr.msra.gmra.mrb[32].mxu1 %vm544_vm9, %v2158_v13 }
 0xc08   :  { %10734 = vmatpush3.bf16.msra.mxu1 %v2275_v8  ;;  %10735 = vmatprep.mubr.msk.bf16.mxu1 %vm11729_vm11, %v11726_v1 }
 0xc09   :  { %v2214_v33 = vpack.c.b16 %v2213_v32, %v2213_v32  ;;  %10745 = vmatprep.subr.bf16.mxu1 %v11726_v1 }
 0xc0a   :  { %v2265_v45 = vpop.permute.xlu1 %2264 }
 0xc0b   :  { %v2269_v47 = vrot.slane %v2265_v45, %v11967_v7  ;;  %10730 = vmatmul.mubr.msk.bf16.vlgmr.msra.gmra.mrb[36].mxu0 %vm544_vm9, %v2214_v33 }
 0xc0c   :  { %10740 = vmatpush3.bf16.msra.mxu0 %v2331_v40  ;;  %10741 = vmatprep.mubr.msk.bf16.mxu0 %vm11729_vm11, %v11726_v1 }
 0xc0d   :  { %v2270_v48 = vpack.c.b16 %v2269_v47, %v2269_v47  ;;  %10751 = vmatprep.subr.bf16.mxu0 %v11726_v1 }
 0xc0e   :  { %v2321_v36 = vpop.permute.xlu1 %2320 }
 0xc0f   :  { %v2325_v5 = vrot.slane %v2321_v36, %v11967_v7  ;;  %10736 = vmatmul.mubr.msk.bf16.vlgmr.msra.gmra.mrb[36].mxu1 %vm544_vm9, %v2270_v48 }
 0xc10   :  { %10746 = vmatpush3.bf16.msra.mxu1 %v2387_v17  ;;  %10747 = vmatprep.mubr.msk.bf16.mxu1 %vm11729_vm11, %v11726_v1 }
 0xc11   :  { %v2326_v15 = vpack.c.b16 %v2325_v5, %v2325_v5  ;;  %10759 = vmatprep.subr.bf16.mxu1 %v11726_v1 }
 0xc12   :  { %v2377_v62 = vpop.permute.xlu1 %2376 }
 0xc13   :  { %v2381_v63 = vrot.slane %v2377_v62, %v11967_v7  ;;  %10742 = vmatmul.mubr.msk.bf16.vlgmr.msra.gmra.mrb[40].mxu0 %vm544_vm9, %v2326_v15 }
 0xc14   :  { %10755 = vmatprep.mubr.msk.bf16.mxu0 %vm11729_vm11, %v11726_v1  ;;  %10752 = vmatpush3.bf16.msra.mxu0 %v11188_v57 }
 0xc15   :  { %v2382_v38 = vpack.c.b16 %v2381_v63, %v2381_v63  ;;  %10753 = vmatprep.subr.bf16.mxu0 %v11726_v1 }
 0xc17   :  { %10748 = vmatmul.mubr.msk.bf16.vlgmr.msra.gmra.mrb[40].mxu1 %vm544_vm9, %v2382_v38 }
 0xc18   :  { %10763 = vmatprep.mubr.msk.bf16.mxu1 %vm11729_vm11, %v11726_v1  ;;  %10754 = vmatpush3.bf16.msra.mxu0 %v11189_v2 }
 0xc19   :  { %2750 = vmatprep.subr.bf16.mxu0 %v12158_v30 }
 0xcce   :  { %v2031_v6 = vpop.f32.mrb[28].mxu0 }
 0xccf   :  { %v10707_v23 = vpop.f32.mrb[29].mxu0  ;;  %v2437_v31 = vpack.c.bf16 %v2031_v6, %v2031_v6 }
 0xcd0   :  { %v2034_v20 = vpop.f32.mrb[30].mxu0 }
 0xcd1   :  { %v10708_v24 = vpop.f32.mrb[31].mxu0  ;;  %v2457_v52 = vunpack.c.l.b16 %v2437_v31 }
 0xcd2   :  { %v2087_v49 = vpop.f32.mrb[28].mxu1 }
 0xcd3   :  { %v2438_v50 = vpack.c.bf16 %v2087_v49, %v2087_v49  ;;  %v10713_v26 = vpop.f32.mrb[29].mxu1 }
 0xcd4   :  { %v2090_v22 = vpop.f32.mrb[30].mxu1 }
 0xcd5   :  { %v2458_v35 = vunpack.c.l.b16 %v2438_v50  ;;  %v10714_v25 = vpop.f32.mrb[31].mxu1 }
 0xcd6   :  { %v2143_v37 = vpop.f32.mrb[32].mxu0 }
 0xcd7   :  { %v2465_v53 = vrot.slane %v2458_v35, 7  ;;  %v2439_v54 = vpack.c.bf16 %v2143_v37, %v2143_v37  ;;  %v10719_v55 = vpop.f32.mrb[33].mxu0 }
 0xcd8   :  { %v2146_v39 = vpop.f32.mrb[34].mxu0  ;;  %v2430_v55 = vld [vmem:[#allocation5 + $0x9] sm:$0x1] }
 0xcd9   :  { %v2466_v16 = vsel %vm529_vm2, %v2465_v53, %v2457_v52  ;;  %v2459_v30 = vunpack.c.l.b16 %v2439_v54  ;;  %v10720_v29 = vpop.f32.mrb[35].mxu0  ;;  %v2431_v39 = vld [vmem:[#allocation5 + $0x11] sm:$0x1] }
 0xcda   :  { %v2199_v18 = vpop.f32.mrb[32].mxu1  ;;  %v2432_v29 = vld [vmem:[#allocation5 + $0x19] sm:$0x1] }
 0xcdb   :  { %v2467_v58 = vrot.slane %v2459_v30, 6  ;;  %v2440_v59 = vpack.c.bf16 %v2199_v18, %v2199_v18  ;;  %v10725_v9 = vpop.f32.mrb[33].mxu1  ;;  %v2429_v30 = vld [vmem:[#allocation5 + $0x1] sm:$0x1]  ;;  %v2552_v18 = vrot.slane %v2431_v39, 6 }
 0xcdc   :  { %v2202_v28 = vpop.f32.mrb[34].mxu1  ;;  %v2554_v9 = vrot.slane %v2432_v29, 5  ;;  %v12413_v29 = vld [vmem:[#allocation2 + $0x8] sm:$0xff]  }
 0xcdd   :  { %v2468_v10 = vsel %vm531_vm3, %v2467_v58, %v2466_v16  ;;  %v2460_v11 = vunpack.c.l.b16 %v2440_v59  ;;  %v10726_v12 = vpop.f32.mrb[35].mxu1  ;;  %v2550_v16 = vrot.slane %v2430_v55, 7  ;;  %v2433_v59 = vld [vmem:[#allocation5 + $0x21] sm:$0x1] }
 0xcde   :  { %v2255_v13 = vpop.f32.mrb[36].mxu0 }
 0xcdf   :  { %v2469_v8 = vrot.slane %v2460_v11, 5  ;;  %v2441_v27 = vpack.c.bf16 %v2255_v13, %v2255_v13  ;;  %v10731_v34 = vpop.f32.mrb[37].mxu0  ;;  %v2551_v58 = vsel %vm529_vm2, %v2550_v16, %v2429_v30  ;;  %v2556_v11 = vrot.slane %v2433_v59, 4  ;;  %v2435_v13 = vld [vmem:[#allocation5 + $0x31] sm:$0x1] }
 0xce0   :  { %v2258_v32 = vpop.f32.mrb[38].mxu0  ;;  %v2553_v28 = vsel %vm531_vm3, %v2552_v18, %v2551_v58  ;;  %v2560_v34 = vrot.slane %v2435_v13, 2  ;;  %v12411_v30 = vld [vmem:[#allocation2] sm:$0xff]  }
 0xce1   :  { %v2470_v33 = vsel %vm533_vm4, %v2469_v8, %v2468_v10  ;;  %v2461_v40 = vunpack.c.l.b16 %v2441_v27  ;;  %v10732_v45 = vpop.f32.mrb[39].mxu0  ;;  %v2434_v10 = vld [vmem:[#allocation5 + $0x29] sm:$0x1]  ;;  %v2555_v12 = vsel %vm533_vm4, %v2554_v9, %v2553_v28  ;;  %v2436_v27 = vld [vmem:[#allocation5 + $0x39] sm:$0x1] }
 0xce2   :  { %v2311_v46 = vpop.f32.mrb[36].mxu1  ;;  %v2557_v8 = vsel %vm535_vm5, %v2556_v11, %v2555_v12 }
 0xce3   :  { %v2471_v47 = vrot.slane %v2461_v40, 4  ;;  %v2442_v48 = vpack.c.bf16 %v2311_v46, %v2311_v46  ;;  %v10737_v17 = vpop.f32.mrb[37].mxu1  ;;  %v2496_v40 = vpop.permute.xlu1 %2495 }
 0xce4   :  { %v2314_v36 = vpop.f32.mrb[38].mxu1  ;;  %v2494_v46 = vpop.permute.xlu0 %2493 }
 0xce5   :  { %v2472_v5 = vsel %vm535_vm5, %v2471_v47, %v2470_v33  ;;  %v2462_v15 = vunpack.c.l.b16 %v2442_v48  ;;  %v10738_v62 = vpop.f32.mrb[39].mxu1  ;;  %v2562_v33 = vrot.slane %v2436_v27, 1  ;;  %v2497_v47 = vsel %vm1271_vm12, %v2494_v46, %v2496_v40 }
 0xce6   :  { %v2367_v63 = vpop.f32.mrb[40].mxu0  ;;  %v10327_v27 = vunpack.c.l.bf16 %v12411_v30 }
 0xce7   :  { %v2473_v38 = vrot.slane %v2462_v15, 3  ;;  %v2443_v57 = vpack.c.bf16 %v2367_v63, %v2367_v63  ;;  %v10743_v2 = vpop.f32.mrb[41].mxu0 }
 0xce8   :  { %v2370_v6 = vpop.f32.mrb[42].mxu0 }
 0xce9   :  { %v2474_v23 = vsel %vm537_vm6, %v2473_v38, %v2472_v5  ;;  %v2463_v20 = vunpack.c.l.b16 %v2443_v57  ;;  %v10744_v24 = vpop.f32.mrb[43].mxu0 }
 0xcea   :  { %v2423_v49 = vpop.f32.mrb[40].mxu1 }
 0xceb   :  { %v2475_v31 = vrot.slane %v2463_v20, 2  ;;  %v2444_v50 = vpack.c.bf16 %v2423_v49, %v2423_v49  ;;  %v10749_v26 = vpop.f32.mrb[41].mxu1 }
 0xcec   :  { %v2426_v22 = vpop.f32.mrb[42].mxu1  ;;  %v11190_v26 = vld [vmem:[#allocation13] sm:$0xff]  }
 0xced   :  { %v2476_v35 = vsel %vm539_vm7, %v2475_v31, %v2474_v23  ;;  %v2464_v25 = vunpack.c.l.b16 %v2444_v50  ;;  %v10750_v37 = vpop.f32.mrb[43].mxu1  ;;  %v12391_v22 = vld [vmem:[#allocation11 + $0x10] ss:$8 sps:$4 sm:$0xff]   ;;  %10760 = vmatpush3.bf16.msra.mxu1 %v11190_v26 }
 0xcee   :  { %10761 = vmatprep.subr.bf16.mxu1 %v11726_v1  ;;  %v12439_v26 = vld [vmem:[#allocation2 + $0x18] sm:$0xff]  }
 0xcef   :  { %v2477_v52 = vrot.slane %v2464_v25, 1  ;;  %v11194_v25 = vld [vmem:[#allocation13 + $0x8] sm:$0xff]  }
 0xcf1   :  { %v2478_v53 = vsel %vm541_vm8, %v2477_v52, %v2476_v35  ;;  %v12393_v35 = vld [vmem:[#allocation11 + $0x14] ss:$8 sps:$4 sm:$0xff]   ;;  %10762 = vmatpush3.bf16.msra.mxu1 %v11194_v25 }
 0xcf2   :  { %v2479_v54 = vpack.c.b16 %v2478_v53, %v2478_v53  ;;  %10767 = vmatprep.subr.bf16.mxu1 %v11726_v1 }
 0xcf4   :  { %10756 = vmatmul.mubr.msk.bf16.vlgmr.msra.gmra.mrb[44].mxu0 %vm106_vm0, %v2479_v54 }
 0xcf5   :  { %2751 = vmatpush1.bf16.msra.mxu0 %v12156_v4  ;;  %2782 = vmatprep.mubr.bf16.mxu0 %v11725_v0  ;;  %v2558_v4 = vrot.slane %v2434_v10, 3 }
 0xcf6   :  { %2752 = vmatprep.subr.bf16.mxu0 %v12393_v35 }
 0xcf7   :  { %v2559_v32 = vsel %vm537_vm6, %v2558_v4, %v2557_v8 }
 0xcf8   :  { %v2561_v45 = vsel %vm539_vm7, %v2560_v34, %v2559_v32  ;;  %v10328_v34 = vunpack.c.h.bf16 %v12411_v30  ;;  %v10331_v32 = vunpack.c.l.bf16 %v12413_v29 }
 0xcf9   :  { %v2563_v17 = vsel %vm541_vm8, %v2562_v33, %v2561_v45  ;;  %2753 = vmatpush1.bf16.msra.mxu0 %v12391_v22 }
 0xcfa   :  { %10773 = vmatprep.subr.bf16.mxu0 %v11726_v1 }
 0xdc7   :  { %v2536_v48 = vpop.f32.mrb[44].mxu0 }
 0xdc8   :  { %v2537_v36 = vadd.f32 %v2536_v48, %v2497_v47  ;;  %v10757_v5 = vpop.f32.mrb[45].mxu0 }
 0xdc9   :  { %v2539_v15 = vpop.f32.mrb[46].mxu0 }
 0xdca   :  { %v2565_v62 = vadd.f32 %v2563_v17, %v2537_v36  ;;  %v10758_v63 = vpop.f32.mrb[47].mxu0 }
 0xdcc   :  { %11310 = vtanh.f32 %v2565_v62  ;;  %v10134_v57 = vmul.f32 -1.442695, %v2565_v62 }
 0xdce   :  { %11312 = vpow2.f32 %v10134_v57  ;;  %v12434_v57 = vld [vmem:[#allocation2 + $0x10] sm:$0xff]  }
 0xdd6   :  { %v11311_v38 = vpop.eup %11310 }
 0xdd7   :  { %2575 = vrot.lane.b32.xlu1 %v11311_v38, %s11717_s19 }
 0xdd8   :  { %v11313_v2 = vpop.eup %11312 }
 0xdd9   :  { %v2569_v6 = vadd.f32 1.0, %v11313_v2 }
 0xddb   :  { %11314 = vrcp.f32 %v2569_v6 }
 0xde5   :  { %v11315_v23 = vpop.eup %11314 }
 0xde6   :  { %v2573_v49 = vmul.f32 %v11315_v23, %v12153_v60 }
 0xe49   :  { %v2576_v20 = vpop.permute.xlu1 %2575 }
 0xe4a   :  { %v2578_v24 = vmul.f32 %v11315_v23, %v2576_v20 }
 0xe4c   :  { %2580 = vrot.lane.b32.xlu1 %v2578_v24, %s11730_s18 }
 0xebe   :  { %v2581_v31 = vpop.permute.xlu1 %2580 }
 0xebf   :  { %v12388_v50 = vadd.f32 %v2581_v31, %v2573_v49 }
 0xec1   :  { %11316 = vtanh.f32 %v12388_v50 }
 0xecb   :  { %v11317_v60 = vpop.eup %11316 }
 0xecc   :  { %2586 = vrot.lane.b32.xlu1 %v11317_v60, %s11717_s19  ;;  %v10332_v60 = vunpack.c.h.bf16 %v12413_v29  ;;  %v12701_v29 = vld [vmem:[%s13824_s5] ss:$0 sm:$0xff] }
 0xf3e   :  { %v2587_v37 = vpop.permute.xlu1 %2586 }
 0xf3f   :  { %v2589_v52 = vmul.f32 %v11315_v23, %v2587_v37  ;;  %v10335_v37 = vunpack.c.l.bf16 %v12434_v57 }
 0xf41   :  { %v2590_v53 = vpack.c.bf16 %v2589_v52, %v2589_v52 }
 0xf43   :  { %2603 = vrot.lane.b32.xlu1 %v2590_v53, %s11730_s18 }
 0xfb5   :  { %v2604_v54 = vpop.permute.xlu1 %2603 }
 0xfb6   :  { %10764 = vmatmul.mubr.msk.bf16.vlgmr.msra.gmra.mrb[44].mxu1 %vm106_vm0, %v2604_v54  ;;  %10147 = vmatmul.mubr.msk.bf16.vlgmr.msra.gmra.mrb[48].mxu0 %vm106_vm0, %v2604_v54 }
 0xfb7   :  { %10769 = vmatprep.mubr.msk.bf16.mxu1 %vm11729_vm11, %v11726_v1  ;;  %10775 = vmatprep.mubr.msk.bf16.mxu0 %vm11729_vm11, %v11726_v1 }
0x1089   :  { %v2654_v55 = vpop.f32.mrb[44].mxu1  ;;  %v12408_v39 = vpop.f32.mrb[48].mxu0 }
0x108a   :  { %v2655_v16 = vadd.f32 %v12176_v19, %v2654_v55  ;;  %v2808_v18 = vcombine.high %v12408_v39, %v12408_v39  ;;  %v2815_v58 = vrot.slane %v12408_v39, %v11878_v21  ;;  %v10765_v59 = vpop.f32.mrb[45].mxu1  ;;  %v12419_v9 = vpop.f32.mrb[49].mxu0 }
0x108b   :  { %v2657_v28 = vpop.f32.mrb[46].mxu1  ;;  %v2788_v10 = vpop.f32.mrb[50].mxu0 }
0x108c   :  { %v2661_v11 = vcombine.high %v2655_v16, %v2655_v16  ;;  %v2668_v12 = vrot.slane %v2655_v16, %v11878_v21  ;;  %v2822_v19 = vrot.slane %v2808_v18, %v11878_v21  ;;  %v2823_v13 = vcombine.high %v2815_v58, %v2815_v58  ;;  %v10766_v4 = vpop.f32.mrb[47].mxu1  ;;  %v2789_v8 = vpop.f32.mrb[51].mxu0 }
0x108d   :  { %v2831_v33 = vrot.slane %v2815_v58, %v11878_v21  ;;  %v10339_v58 = vunpack.c.l.bf16 %v12439_v26 }
0x108e   :  { %v2675_v40 = vrot.slane %v2661_v11, %v11878_v21  ;;  %v2676_v45 = vcombine.high %v2668_v12, %v2668_v12  ;;  %v2684_v46 = vrot.slane %v2668_v12, %v11878_v21  ;;  %10139 = vst.sshfl [vmem:[#allocation14 + $0x1] sm:$0x1 pattern:$0x73625140] %v2668_v12  ;;  %v2824_v47 = vcombine.high %v2822_v19, %v2822_v19 }
0x108f   :  { %v2838_v48 = vrot.slane %v2822_v19, %v11878_v21  ;;  %v2845_v17 = vrot.slane %v2823_v13, %v11878_v21  ;;  %v2853_v36 = vcombine.high %v2831_v33, %v2831_v33  ;;  %v2860_v5 = vrot.slane %v2831_v33, %v11895_v44 }
0x1090   :  { %v2677_v15 = vcombine.high %v2675_v40, %v2675_v40  ;;  %v2691_v62 = vrot.slane %v2675_v40, %v11878_v21  ;;  %v2698_v63 = vrot.slane %v2676_v45, %v11878_v21  ;;  %v2706_v38 = vcombine.high %v2684_v46, %v2684_v46  ;;  %10140 = vst.sshfl [vmem:[#allocation14 + $0x9] sm:$0x1 pattern:$0x73625140] %v2676_v45 }
0x1091   :  { %10141 = vst.sshfl [vmem:[#allocation14 + $0x21] sm:$0x1 pattern:$0x73625140] %v2675_v40  ;;  %v2852_v2 = vrot.slane %v2824_v47, %v11878_v21  ;;  %v2854_v6 = vcombine.high %v2838_v48, %v2838_v48  ;;  %v2855_v23 = vcombine.high %v2845_v17, %v2845_v17  ;;  %v2864_v20 = vrot.slane %v2845_v17, %v11895_v44 }
0x1092   :  { %v2705_v24 = vrot.slane %v2677_v15, %v11878_v21  ;;  %v2707_v49 = vcombine.high %v2691_v62, %v2691_v62  ;;  %v2708_v31 = vcombine.high %v2698_v63, %v2698_v63  ;;  %2720 = vst [vmem:[#allocation14 + $0x11] sm:$0x1] %v2706_v38  ;;  %10142 = vst.sshfl [vmem:[#allocation14 + $0x29] sm:$0x1 pattern:$0x73625140] %v2677_v15  ;;  %v10336_v13 = vunpack.c.h.bf16 %v12434_v57 }
0x1093   :  { %v2868_v25 = vrot.slane %v2853_v36, %v11895_v44  ;;  %v2872_v52 = vrot.slane %v2855_v23, %v11895_v44  ;;  %v2876_v53 = vrot.slane %v2838_v48, %v11895_v44  ;;  %v2884_v55 = vrot.slane %v2854_v6, %v11895_v44 }
0x1094   :  { %v2709_v54 = vcombine.high %v2705_v24, %v2705_v24  ;;  %2721 = vst [vmem:[#allocation14 + $0x19] sm:$0x1] %v2708_v31  ;;  %2724 = vst [vmem:[#allocation14 + $0x31] sm:$0x1] %v2707_v49  ;;  %v2897_v16 = vadd.f32 %v10327_v27, %v2860_v5  ;;  %v2898_v18 = vadd.f32 %v10328_v34, %v2864_v20  ;;  %v10340_v33 = vunpack.c.h.bf16 %v12439_v26 }
0x1095   :  { %v2899_v59 = vadd.f32 %v10331_v32, %v2868_v25  ;;  %v2901_v28 = vadd.f32 %v10335_v37, %v2876_v53  ;;  %v2856_v10 = vcombine.high %v2852_v2, %v2852_v2  ;;  %v2880_v11 = vrot.slane %v2852_v2, %v11895_v44 }
0x1096   :  { %2725 = vst [vmem:[#allocation14 + $0x39] sm:$0x1] %v2709_v54  ;;  %v2900_v12 = vadd.f32 %v10332_v60, %v2872_v52  ;;  %11318 = vtanh.f32 %v2897_v16  ;;  %v2903_v19 = vadd.f32 %v10339_v58, %v2884_v55 }
0x1097   :  { %11320 = vtanh.f32 %v2898_v18  ;;  %v2888_v4 = vrot.slane %v2856_v10, %v11895_v44  ;;  %v2902_v8 = vadd.f32 %v10336_v13, %v2880_v11 }
0x1098   :  { %11322 = vtanh.f32 %v2899_v59 }
0x1099   :  { %11324 = vtanh.f32 %v2901_v28  ;;  %v2904_v40 = vadd.f32 %v10340_v33, %v2888_v4 }
0x109a   :  { %11326 = vtanh.f32 %v2900_v12 }
0x109b   :  { %11328 = vtanh.f32 %v2903_v19 }
0x109c   :  { %11330 = vtanh.f32 %v2902_v8 }
0x109d   :  { %11332 = vtanh.f32 %v2904_v40 }
0x10a0   :  { %v11319_v45 = vpop.eup %11318 }
0x10a1   :  { %v11321_v46 = vpop.eup %11320  ;;  %v2913_v47 = vmul.f32 %v12234_v14, %v11319_v45 }
0x10a2   :  { %v11323_v48 = vpop.eup %11322  ;;  %v2914_v17 = vmul.f32 %v12234_v14, %v11321_v46 }
0x10a3   :  { %v11325_v36 = vpop.eup %11324  ;;  %v2921_v5 = vsel %vm106_vm0, %v2913_v47, 0.0  ;;  %v2915_v15 = vmul.f32 %v12234_v14, %v11323_v48 }
0x10a4   :  { %v11327_v62 = vpop.eup %11326  ;;  %2922 = vadd.xlane.f32.xlu0 %v2921_v5  ;;  %v2924_v63 = vsel %vm106_vm0, %v2914_v17, 0.0  ;;  %v2917_v38 = vmul.f32 %v12234_v14, %v11325_v36 }
0x10a5   :  { %v11329_v2 = vpop.eup %11328  ;;  %2925 = vadd.xlane.f32.xlu1 %v2924_v63  ;;  %v2927_v6 = vsel %vm106_vm0, %v2915_v15, 0.0  ;;  %v2916_v23 = vmul.f32 %v12234_v14, %v11327_v62 }
0x10a6   :  { %v11331_v20 = vpop.eup %11330  ;;  %v2933_v24 = vsel %vm106_vm0, %v2917_v38, 0.0  ;;  %v2919_v49 = vmul.f32 %v12234_v14, %v11329_v2 }
0x10a7   :  { %v2930_v31 = vsel %vm106_vm0, %v2916_v23, 0.0  ;;  %v2918_v25 = vmul.f32 %v12234_v14, %v11331_v20  ;;  %v11333_v52 = vpop.eup %11332 }
0x10a8   :  { %2928 = vadd.xlane.f32.xlu0 %v2927_v6  ;;  %v2939_v53 = vsel %vm106_vm0, %v2919_v49, 0.0  ;;  %v2920_v55 = vmul.f32 %v12234_v14, %v11333_v52 }
0x10a9   :  { %2934 = vadd.xlane.f32.xlu1 %v2933_v24  ;;  %v2936_v54 = vsel %vm106_vm0, %v2918_v25, 0.0 }
0x10aa   :  { %v2942_v16 = vsel %vm106_vm0, %v2920_v55, 0.0 }
0x10ac   :  { %2931 = vadd.xlane.f32.xlu0 %v2930_v31 }
0x10ad   :  { %2940 = vadd.xlane.f32.xlu1 %v2939_v53 }
0x10b0   :  { %2937 = vadd.xlane.f32.xlu0 %v2936_v54 }
0x10b4   :  { %2943 = vadd.xlane.f32.xlu0 %v2942_v16 }
0x1131   :  { %v2923_v18 = vpop.xlane.xlu0 %2922 }
0x1132   :  { %v2926_v59 = vpop.xlane.xlu1 %2925  ;;  %v2956_v11 = vrot.slane %v2923_v18, %v11967_v7 }
0x1133   :  { %v2960_v28 = vrot.slane %v2926_v59, %v11967_v7 }
0x1135   :  { %v2929_v10 = vpop.xlane.xlu0 %2928  ;;  %v2985_v19 = vsel %vm529_vm2, %v2960_v28, %v2956_v11 }
0x1136   :  { %v2964_v12 = vrot.slane %v2929_v10, %v11967_v7  ;;  %v2935_v4 = vpop.xlane.xlu1 %2934 }
0x1137   :  { %v2972_v46 = vrot.slane %v2935_v4, %v11967_v7 }
0x1138   :  { %v2986_v14 = vsel %vm531_vm3, %v2964_v12, %v2985_v19 }
0x1139   :  { %v2932_v8 = vpop.xlane.xlu0 %2931 }
0x113a   :  { %v2968_v40 = vrot.slane %v2932_v8, %v11967_v7  ;;  %v2941_v48 = vpop.xlane.xlu1 %2940 }
0x113b   :  { %v2980_v15 = vrot.slane %v2941_v48, %v11967_v7 }
0x113c   :  { %v2987_v45 = vsel %vm533_vm4, %v2968_v40, %v2986_v14 }
0x113d   :  { %v2938_v47 = vpop.xlane.xlu0 %2937  ;;  %v2988_v36 = vsel %vm535_vm5, %v2972_v46, %v2987_v45 }
0x113e   :  { %v2976_v17 = vrot.slane %v2938_v47, %v11967_v7 }
0x1140   :  { %v2989_v5 = vsel %vm537_vm6, %v2976_v17, %v2988_v36 }
0x1141   :  { %v2944_v62 = vpop.xlane.xlu0 %2943  ;;  %v2990_v38 = vsel %vm539_vm7, %v2980_v15, %v2989_v5 }
0x1142   :  { %v2984_v63 = vrot.slane %v2944_v62, %v11967_v7 }
0x1144   :  { %v2991_v2 = vsel %vm541_vm8, %v2984_v63, %v2990_v38 }
0x1145   :  { %v2993_v6 = vsel %vm544_vm9, %v2991_v2, -inf }
0x1146   :  { %2994 = vmax.xlane.f32.xlu1 %v2993_v6 }
0x11d3   :  { %v2995_v23 = vpop.xlane.xlu1 %2994 }
0x11d4   :  { %v3000_v20 = vrot.slane %v2995_v23, %v11895_v44  ;;  %v3004_v24 = vrot.slane %v2995_v23, %v11986_v41  ;;  %v3008_v49 = vrot.slane %v2995_v23, %v11989_v42  ;;  %v3012_v31 = vrot.slane %v2995_v23, %v11992_v43 }
0x11d5   :  { %v3016_v25 = vrot.slane %v2995_v23, %v11998_v51  ;;  %v3020_v55 = vrot.slane %v2995_v23, %v12002_v56  ;;  %v3024_v12 = vrot.slane %v2995_v23, %v12006_v61  ;;  %v3028_v14 = vrot.slane %v2995_v23, %v12010_v3 }
0x11d6   :  { %v3038_v52 = vsub.f32 %v2926_v59, %v3004_v24  ;;  %v3037_v53 = vsub.f32 %v2923_v18, %v3000_v20  ;;  %v3039_v54 = vsub.f32 %v2929_v10, %v3008_v49  ;;  %v3040_v16 = vsub.f32 %v2932_v8, %v3012_v31 }
0x11d7   :  { %v3041_v40 = vsub.f32 %v2935_v4, %v3016_v25  ;;  %v3042_v46 = vsub.f32 %v2938_v47, %v3020_v55  ;;  %v3043_v59 = vsub.f32 %v2941_v48, %v3024_v12  ;;  %v3044_v10 = vsub.f32 %v2944_v62, %v3028_v14 }
0x11d8   :  { %v3047_v28 = vmul.f32 1.442695, %v3038_v52  ;;  %v3045_v11 = vmul.f32 1.442695, %v3037_v53  ;;  %v3049_v19 = vmul.f32 1.442695, %v3039_v54 }
0x11d9   :  { %v3051_v45 = vmul.f32 1.442695, %v3040_v16  ;;  %v3053_v17 = vmul.f32 1.442695, %v3041_v40  ;;  %v3055_v18 = vmul.f32 1.442695, %v3042_v46 }
0x11da   :  { %11334 = vpow2.f32 %v3047_v28  ;;  %v3057_v8 = vmul.f32 1.442695, %v3043_v59  ;;  %v3059_v36 = vmul.f32 1.442695, %v3044_v10  ;;  %v3194_v10 = vld [vmem:[#allocation8] sm:$0xf] }
0x11db   :  { %11336 = vpow2.f32 %v3045_v11 }
0x11dc   :  { %11338 = vpow2.f32 %v3049_v19 }
0x11dd   :  { %11340 = vpow2.f32 %v3051_v45 }
0x11de   :  { %11342 = vpow2.f32 %v3053_v17 }
0x11df   :  { %11344 = vpow2.f32 %v3055_v18 }
0x11e0   :  { %11346 = vpow2.f32 %v3057_v8  ;;  %v3216_v8 = vsel %vm767_vm10, %v3194_v10, 0 }
0x11e1   :  { %11348 = vpow2.f32 %v3059_v36  ;;  %10768 = vmatpush3.bf16.msra.mxu1 %v3216_v8 }
0x11e2   :  { %10779 = vmatprep.subr.bf16.mxu1 %v11726_v1 }
0x11e4   :  { %v11335_v5 = vpop.eup %11334 }
0x11e5   :  { %v11337_v15 = vpop.eup %11336  ;;  %3073 = vperm.xlu1 %11167, %v11335_v5  }
0x11e6   :  { %3070 = vperm.xlu0 %11168, %v11337_v15   ;;  %v11339_v4 = vpop.eup %11338 }
0x11e7   :  { %v11341_v63 = vpop.eup %11340 }
0x11e8   :  { %v12508_v47 = vpop.eup %11342 }
0x11e9   :  { %3076 = vperm.xlu1 %11167, %v11339_v4   ;;  %v12510_v48 = vpop.eup %11344 }
0x11ea   :  { %3079 = vperm.xlu0 %11168, %v11341_v63   ;;  %v12514_v62 = vpop.eup %11346 }
0x11eb   :  { %v12516_v38 = vpop.eup %11348 }
0x11ed   :  { %3082 = vperm.xlu1 %11167, %v12508_v47  }
0x11ee   :  { %3085 = vperm.xlu0 %11168, %v12510_v48  }
0x11f1   :  { %3088 = vperm.xlu1 %11167, %v12514_v62  }
0x11f2   :  { %3091 = vperm.xlu0 %11168, %v12516_v38  }
0x1264   :  { %v3074_v2 = vpop.permute.xlu1 %3073 }
0x1265   :  { %v3071_v6 = vpop.permute.xlu0 %3070  ;;  %v3100_v23 = vrot.slane %v3074_v2, %v11967_v7 }
0x1266   :  { %v3096_v20 = vrot.slane %v3071_v6, %v11967_v7 }
0x1268   :  { %v3077_v24 = vpop.permute.xlu1 %3076  ;;  %v3125_v25 = vsel %vm529_vm2, %v3100_v23, %v3096_v20 }
0x1269   :  { %v3104_v49 = vrot.slane %v3077_v24, %v11967_v7  ;;  %v3080_v31 = vpop.permute.xlu0 %3079 }
0x126a   :  { %v3108_v52 = vrot.slane %v3080_v31, %v11967_v7 }
0x126b   :  { %v3126_v53 = vsel %vm531_vm3, %v3104_v49, %v3125_v25 }
0x126c   :  { %v3083_v54 = vpop.permute.xlu1 %3082  ;;  %v3127_v28 = vsel %vm533_vm4, %v3108_v52, %v3126_v53 }
0x126d   :  { %v3112_v55 = vrot.slane %v3083_v54, %v11967_v7  ;;  %v3086_v16 = vpop.permute.xlu0 %3085 }
0x126e   :  { %v3116_v11 = vrot.slane %v3086_v16, %v11967_v7 }
0x126f   :  { %v3128_v12 = vsel %vm535_vm5, %v3112_v55, %v3127_v28 }
0x1270   :  { %v3089_v19 = vpop.permute.xlu1 %3088  ;;  %v3129_v46 = vsel %vm537_vm6, %v3116_v11, %v3128_v12  ;;  %v3195_v11 = vld [vmem:[#allocation8 + $0x4] sm:$0xf] }
0x1271   :  { %v3120_v40 = vrot.slane %v3089_v19, %v11967_v7  ;;  %v3092_v14 = vpop.permute.xlu0 %3091  ;;  %v3272_v12 = vsel %vm767_vm10, %v3195_v11, 0 }
0x1272   :  { %v3124_v45 = vrot.slane %v3092_v14, %v11967_v7  ;;  %10774 = vmatpush3.bf16.msra.mxu0 %v3272_v12 }
0x1273   :  { %v3130_v17 = vsel %vm539_vm7, %v3120_v40, %v3129_v46  ;;  %10785 = vmatprep.subr.bf16.mxu0 %v11726_v1 }
0x1274   :  { %v3131_v59 = vsel %vm541_vm8, %v3124_v45, %v3130_v17 }
0x1275   :  { %v3133_v18 = vsel %vm544_vm9, %v3131_v59, 0.0 }
0x1276   :  { %3134 = vadd.xlane.f32.xlu1 %v3133_v18 }
0x1287   :  { %3716 = vrot.lane.b32.xlu1 %v12419_v9, %s11728_s13 }
0x1303   :  { %v3135_v36 = vpop.xlane.xlu1 %3134 }
0x1304   :  { %11350 = vrcp.f32 %v3135_v36 }
0x130e   :  { %v11351_v2 = vpop.eup %11350 }
0x130f   :  { %v3141_v6 = vrot.slane %v11351_v2, %v11895_v44  ;;  %v3145_v23 = vrot.slane %v11351_v2, %v11986_v41  ;;  %v3149_v49 = vrot.slane %v11351_v2, %v11989_v42  ;;  %v3153_v53 = vrot.slane %v11351_v2, %v11992_v43 }
0x1310   :  { %v3157_v28 = vrot.slane %v11351_v2, %v11998_v51  ;;  %v3165_v45 = vrot.slane %v11351_v2, %v12006_v61  ;;  %v3169_v18 = vrot.slane %v11351_v2, %v12010_v3 }
0x1311   :  { %v3178_v20 = vmul.f32 %v11337_v15, %v3141_v6  ;;  %v3179_v24 = vmul.f32 %v11335_v5, %v3145_v23  ;;  %v3180_v52 = vmul.f32 %v11339_v4, %v3149_v49  ;;  %v3181_v16 = vmul.f32 %v11341_v63, %v3153_v53 }
0x1312   :  { %v3182_v19 = vmul.f32 %v12508_v47, %v3157_v28  ;;  %v3161_v4 = vrot.slane %v11351_v2, %v12002_v56  ;;  %v3184_v59 = vmul.f32 %v12514_v62, %v3165_v45  ;;  %v3185_v47 = vmul.f32 %v12516_v38, %v3169_v18  ;;  %v3199_v28 = vld [vmem:[#allocation8 + $0x14] sm:$0xf]  ;;  %v3201_v45 = vld [vmem:[#allocation8 + $0x1c] sm:$0xf] }
0x1313   :  { %v3186_v31 = vpack.c.bf16 %v3178_v20, %v3178_v20  ;;  %v3187_v9 = vpack.c.bf16 %v3179_v24, %v3179_v24  ;;  %v3188_v55 = vpack.c.bf16 %v3180_v52, %v3180_v52  ;;  %v3189_v15 = vpack.c.bf16 %v3181_v16, %v3181_v16  ;;  %v3196_v20 = vld [vmem:[#allocation8 + $0x8] sm:$0xf]  ;;  %v3198_v52 = vld [vmem:[#allocation8 + $0x10] sm:$0xf] }
0x1314   :  { %v3190_v14 = vpack.c.bf16 %v3182_v19, %v3182_v19  ;;  %v3183_v63 = vmul.f32 %v12510_v48, %v3161_v4  ;;  %v3192_v8 = vpack.c.bf16 %v3184_v59, %v3184_v59  ;;  %v3193_v6 = vpack.c.bf16 %v3185_v47, %v3185_v47  ;;  %v3200_v19 = vld [vmem:[#allocation8 + $0x18] sm:$0xf] }
0x1315   :  { %v3203_v25 = vunpack.c.l.b16 %v3186_v31  ;;  %v3259_v54 = vunpack.c.l.b16 %v3187_v9  ;;  %v3315_v5 = vunpack.c.l.b16 %v3188_v55  ;;  %v3371_v40 = vunpack.c.l.b16 %v3189_v15  ;;  %v3197_v31 = vld [vmem:[#allocation8 + $0xc] sm:$0xf] }
0x1316   :  { %v3427_v46 = vunpack.c.l.b16 %v3190_v14  ;;  %v3191_v17 = vpack.c.bf16 %v3183_v63, %v3183_v63  ;;  %v3539_v36 = vunpack.c.l.b16 %v3192_v8  ;;  %v3595_v23 = vunpack.c.l.b16 %v3193_v6 }
0x1317   :  { %3205 = vperm.xlu0 %11168, %v3203_v25   ;;  %v3328_v2 = vsel %vm767_vm10, %v3196_v20, 0  ;;  %v3440_v55 = vsel %vm767_vm10, %v3198_v52, 0  ;;  %v3552_v14 = vsel %vm767_vm10, %v3200_v19, 0  ;;  %v3608_v59 = vsel %vm767_vm10, %v3201_v45, 0 }
0x1318   :  { %v3483_v10 = vunpack.c.l.b16 %v3191_v17 }
0x131b   :  { %3261 = vperm.xlu0 %11168, %v3259_v54  }
0x131f   :  { %3317 = vperm.xlu0 %11168, %v3315_v5   ;;  %v3496_v5 = vsel %vm767_vm10, %v3199_v28, 0 }
0x1323   :  { %3373 = vperm.xlu0 %11168, %v3371_v40  }
0x1327   :  { %3429 = vperm.xlu0 %11168, %v3427_v46  }
0x132b   :  { %3485 = vperm.xlu0 %11168, %v3483_v10  }
0x132f   :  { %3541 = vperm.xlu0 %11168, %v3539_v36  }
0x1333   :  { %3597 = vperm.xlu0 %11168, %v3595_v23   ;;  %v11195_v23 = vld [vmem:[%s13825_s6] sm:$0xff]  }
0x1337   :  { %3714 = vrot.lane.b32.xlu0 %v12408_v39, %s11728_s13  ;;  %v3384_v39 = vsel %vm767_vm10, %v3197_v31, 0 }
0x1396   :  { %v3206_v48 = vpop.permute.xlu0 %3205 }
0x1397   :  { %v3210_v62 = vrot.slane %v3206_v48, %v11967_v7  ;;  %v11196_v48 = vld [vmem:[%s13825_s6 + $0x8] sm:$0xff]  }
0x1399   :  { %v3211_v24 = vpack.c.b16 %v3210_v62, %v3210_v62 }
0x139a   :  { %v3262_v49 = vpop.permute.xlu0 %3261 }
0x139b   :  { %v3266_v38 = vrot.slane %v3262_v49, %v11967_v7  ;;  %10770 = vmatmul.mubr.msk.bf16.vlgmr.msra.gmra.mrb[48].mxu1 %vm544_vm9, %v3211_v24 }
0x139c   :  { %10780 = vmatpush3.bf16.msra.mxu1 %v3328_v2  ;;  %10781 = vmatprep.mubr.msk.bf16.mxu1 %vm11729_vm11, %v11726_v1 }
0x139d   :  { %v3267_v25 = vpack.c.b16 %v3266_v38, %v3266_v38  ;;  %10791 = vmatprep.subr.bf16.mxu1 %v11726_v1 }
0x139e   :  { %v3318_v9 = vpop.permute.xlu0 %3317 }
0x139f   :  { %v3322_v53 = vrot.slane %v3318_v9, %v11967_v7  ;;  %10776 = vmatmul.mubr.msk.bf16.vlgmr.msra.gmra.mrb[52].mxu0 %vm544_vm9, %v3267_v25 }
0x13a0   :  { %10786 = vmatpush3.bf16.msra.mxu0 %v3384_v39  ;;  %10787 = vmatprep.mubr.msk.bf16.mxu0 %vm11729_vm11, %v11726_v1 }
0x13a1   :  { %v3323_v54 = vpack.c.b16 %v3322_v53, %v3322_v53  ;;  %10797 = vmatprep.subr.bf16.mxu0 %v11726_v1 }
0x13a2   :  { %v3374_v16 = vpop.permute.xlu0 %3373 }
0x13a3   :  { %v3378_v11 = vrot.slane %v3374_v16, %v11967_v7  ;;  %10782 = vmatmul.mubr.msk.bf16.vlgmr.msra.gmra.mrb[52].mxu1 %vm544_vm9, %v3323_v54 }
0x13a4   :  { %10792 = vmatpush3.bf16.msra.mxu1 %v3440_v55  ;;  %10793 = vmatprep.mubr.msk.bf16.mxu1 %vm11729_vm11, %v11726_v1 }
0x13a5   :  { %v3379_v12 = vpack.c.b16 %v3378_v11, %v3378_v11  ;;  %10803 = vmatprep.subr.bf16.mxu1 %v11726_v1 }
0x13a6   :  { %v3430_v15 = vpop.permute.xlu0 %3429 }
0x13a7   :  { %v3434_v4 = vrot.slane %v3430_v15, %v11967_v7  ;;  %10788 = vmatmul.mubr.msk.bf16.vlgmr.msra.gmra.mrb[56].mxu0 %vm544_vm9, %v3379_v12 }
0x13a8   :  { %10798 = vmatpush3.bf16.msra.mxu0 %v3496_v5  ;;  %10799 = vmatprep.mubr.msk.bf16.mxu0 %vm11729_vm11, %v11726_v1 }
0x13a9   :  { %v3435_v40 = vpack.c.b16 %v3434_v4, %v3434_v4  ;;  %10809 = vmatprep.subr.bf16.mxu0 %v11726_v1 }
0x13aa   :  { %v3486_v63 = vpop.permute.xlu0 %3485 }
0x13ab   :  { %v3490_v46 = vrot.slane %v3486_v63, %v11967_v7  ;;  %10794 = vmatmul.mubr.msk.bf16.vlgmr.msra.gmra.mrb[56].mxu1 %vm544_vm9, %v3435_v40 }
0x13ac   :  { %10804 = vmatpush3.bf16.msra.mxu1 %v3552_v14  ;;  %10805 = vmatprep.mubr.msk.bf16.mxu1 %vm11729_vm11, %v11726_v1 }
0x13ad   :  { %v3491_v17 = vpack.c.b16 %v3490_v46, %v3490_v46  ;;  %10815 = vmatprep.subr.bf16.mxu1 %v11726_v1 }
0x13ae   :  { %v3542_v18 = vpop.permute.xlu0 %3541 }
0x13af   :  { %v3546_v10 = vrot.slane %v3542_v18, %v11967_v7  ;;  %10800 = vmatmul.mubr.msk.bf16.vlgmr.msra.gmra.mrb[60].mxu0 %vm544_vm9, %v3491_v17 }
0x13b0   :  { %10810 = vmatpush3.bf16.msra.mxu0 %v3608_v59  ;;  %10811 = vmatprep.mubr.msk.bf16.mxu0 %vm11729_vm11, %v11726_v1 }
0x13b1   :  { %v3547_v8 = vpack.c.b16 %v3546_v10, %v3546_v10  ;;  %10823 = vmatprep.subr.bf16.mxu0 %v11726_v1 }
0x13b2   :  { %v3598_v47 = vpop.permute.xlu0 %3597 }
0x13b3   :  { %v3602_v36 = vrot.slane %v3598_v47, %v11967_v7  ;;  %10806 = vmatmul.mubr.msk.bf16.vlgmr.msra.gmra.mrb[60].mxu1 %vm544_vm9, %v3547_v8 }
0x13b4   :  { %10819 = vmatprep.mubr.msk.bf16.mxu1 %vm11729_vm11, %v11726_v1  ;;  %10816 = vmatpush3.bf16.msra.mxu1 %v11195_v23 }
0x13b5   :  { %v3603_v6 = vpack.c.b16 %v3602_v36, %v3602_v36  ;;  %10817 = vmatprep.subr.bf16.mxu1 %v11726_v1 }
0x13b7   :  { %10812 = vmatmul.mubr.msk.bf16.vlgmr.msra.gmra.mrb[64].mxu0 %vm544_vm9, %v3603_v6 }
0x13b8   :  { %10827 = vmatprep.mubr.msk.bf16.mxu0 %vm11729_vm11, %v11726_v1  ;;  %10818 = vmatpush3.bf16.msra.mxu1 %v11196_v48 }
0x146e   :  { %v3252_v20 = vpop.f32.mrb[48].mxu1 }
0x146f   :  { %v10771_v62 = vpop.f32.mrb[49].mxu1  ;;  %v3658_v31 = vpack.c.bf16 %v3252_v20, %v3252_v20 }
0x1470   :  { %v3255_v24 = vpop.f32.mrb[50].mxu1 }
0x1471   :  { %v10772_v2 = vpop.f32.mrb[51].mxu1  ;;  %v3678_v54 = vunpack.c.l.b16 %v3658_v31 }
0x1472   :  { %v3308_v49 = vpop.f32.mrb[52].mxu0 }
0x1473   :  { %v3659_v38 = vpack.c.bf16 %v3308_v49, %v3308_v49  ;;  %v10777_v25 = vpop.f32.mrb[53].mxu0 }
0x1474   :  { %v3311_v39 = vpop.f32.mrb[54].mxu0 }
0x1475   :  { %v3679_v9 = vunpack.c.l.b16 %v3659_v38  ;;  %v10778_v52 = vpop.f32.mrb[55].mxu0 }
0x1476   :  { %v3364_v53 = vpop.f32.mrb[52].mxu1 }
0x1477   :  { %v3686_v55 = vrot.slane %v3679_v9, 7  ;;  %v3660_v16 = vpack.c.bf16 %v3364_v53, %v3364_v53  ;;  %v10783_v28 = vpop.f32.mrb[53].mxu1 }
0x1478   :  { %v3367_v11 = vpop.f32.mrb[54].mxu1 }
0x1479   :  { %v3687_v12 = vsel %vm529_vm2, %v3686_v55, %v3678_v54  ;;  %v3680_v5 = vunpack.c.l.b16 %v3660_v16  ;;  %v10784_v15 = vpop.f32.mrb[55].mxu1 }
0x147a   :  { %v3420_v19 = vpop.f32.mrb[56].mxu0 }
0x147b   :  { %v3688_v4 = vrot.slane %v3680_v5, 6  ;;  %v3661_v40 = vpack.c.bf16 %v3420_v19, %v3420_v19  ;;  %v10789_v14 = vpop.f32.mrb[57].mxu0 }
0x147c   :  { %v3423_v63 = vpop.f32.mrb[58].mxu0 }
0x147d   :  { %v3689_v45 = vsel %vm531_vm3, %v3688_v4, %v3687_v12  ;;  %v3681_v46 = vunpack.c.l.b16 %v3661_v40  ;;  %v10790_v17 = vpop.f32.mrb[59].mxu0 }
0x147e   :  { %v3476_v59 = vpop.f32.mrb[56].mxu1  ;;  %v3652_v17 = vld [vmem:[#allocation5 + $0x12] sm:$0x1] }
0x147f   :  { %v3690_v18 = vrot.slane %v3681_v46, 5  ;;  %v3662_v10 = vpack.c.bf16 %v3476_v59, %v3476_v59  ;;  %v10795_v8 = vpop.f32.mrb[57].mxu1  ;;  %v3651_v46 = vld [vmem:[#allocation5 + $0xa] sm:$0x1] }
0x1480   :  { %v3479_v47 = vpop.f32.mrb[58].mxu1  ;;  %v3771_v59 = vrot.slane %v3651_v46, 7  ;;  %v3773_v8 = vrot.slane %v3652_v17, 6 }
0x1481   :  { %v3691_v36 = vsel %vm533_vm4, %v3690_v18, %v3689_v45  ;;  %v3682_v6 = vunpack.c.l.b16 %v3662_v10  ;;  %v10796_v23 = vpop.f32.mrb[59].mxu1  ;;  %v3650_v18 = vld [vmem:[#allocation5 + $0x2] sm:$0x1]  ;;  %v3653_v10 = vld [vmem:[#allocation5 + $0x1a] sm:$0x1] }
0x1482   :  { %v3532_v48 = vpop.f32.mrb[60].mxu0  ;;  %v3772_v47 = vsel %vm529_vm2, %v3771_v59, %v3650_v18 }
0x1483   :  { %v3692_v20 = vrot.slane %v3682_v6, 4  ;;  %v3663_v62 = vpack.c.bf16 %v3532_v48, %v3532_v48  ;;  %v10801_v24 = vpop.f32.mrb[61].mxu0  ;;  %v3775_v6 = vrot.slane %v3653_v10, 5  ;;  %v3774_v23 = vsel %vm531_vm3, %v3773_v8, %v3772_v47  ;;  %v3655_v48 = vld [vmem:[#allocation5 + $0x2a] sm:$0x1]  ;;  %v11200_v47 = vld [vmem:[#allocation13] sm:$0xff]  }
0x1484   :  { %v3535_v2 = vpop.f32.mrb[62].mxu0  ;;  %v3656_v24 = vld [vmem:[#allocation5 + $0x32] sm:$0x1]  ;;  %v12632_v8 = vld [vmem:[#allocation11 + $0x4] ss:$8 sps:$4 sm:$0xff]   ;;  %10824 = vmatpush3.bf16.msra.mxu0 %v11200_v47 }
0x1485   :  { %v3693_v49 = vsel %vm535_vm5, %v3692_v20, %v3691_v36  ;;  %v3683_v31 = vunpack.c.l.b16 %v3663_v62  ;;  %v10802_v38 = vpop.f32.mrb[63].mxu0  ;;  %v3654_v36 = vld [vmem:[#allocation5 + $0x22] sm:$0x1]  ;;  %v3776_v62 = vsel %vm533_vm4, %v3775_v6, %v3774_v23  ;;  %v3779_v2 = vrot.slane %v3655_v48, 3  ;;  %v12630_v10 = vld [vmem:[#allocation11] ss:$8 sps:$4 sm:$0xff]   ;;  %3971 = vmatprep.subr.bf16.mxu1 %v12632_v8  ;;  %10825 = vmatprep.subr.bf16.mxu0 %v11726_v1 }
0x1486   :  { %v3588_v25 = vpop.f32.mrb[60].mxu1  ;;  %v3777_v20 = vrot.slane %v3654_v36, 4  ;;  %v3781_v38 = vrot.slane %v3656_v24, 2  ;;  %v11201_v36 = vld [vmem:[#allocation13 + $0x8] sm:$0xff]  }
0x1487   :  { %v3694_v39 = vrot.slane %v3683_v31, 3  ;;  %v3664_v9 = vpack.c.bf16 %v3588_v25, %v3588_v25  ;;  %v10807_v52 = vpop.f32.mrb[61].mxu1  ;;  %v3657_v31 = vld [vmem:[#allocation5 + $0x3a] sm:$0x1] }
0x1488   :  { %v3591_v53 = vpop.f32.mrb[62].mxu1  ;;  %10826 = vmatpush3.bf16.msra.mxu0 %v11201_v36 }
0x1489   :  { %v3695_v54 = vsel %vm537_vm6, %v3694_v39, %v3693_v49  ;;  %v3684_v55 = vunpack.c.l.b16 %v3664_v9  ;;  %v10808_v16 = vpop.f32.mrb[63].mxu1  ;;  %v3778_v49 = vsel %vm535_vm5, %v3777_v20, %v3776_v62  ;;  %v3783_v39 = vrot.slane %v3657_v31, 1  ;;  %v3715_v9 = vpop.permute.xlu0 %3714  ;;  %10831 = vmatprep.subr.bf16.mxu0 %v11726_v1 }
0x148a   :  { %v3644_v28 = vpop.f32.mrb[64].mxu0  ;;  %v3780_v25 = vsel %vm537_vm6, %v3779_v2, %v3778_v49  ;;  %v3717_v53 = vpop.permute.xlu1 %3716 }
0x148b   :  { %v3696_v11 = vrot.slane %v3684_v55, 2  ;;  %v3665_v12 = vpack.c.bf16 %v3644_v28, %v3644_v28  ;;  %v10813_v5 = vpop.f32.mrb[65].mxu0  ;;  %v3782_v52 = vsel %vm539_vm7, %v3781_v38, %v3780_v25 }
0x148c   :  { %v3647_v15 = vpop.f32.mrb[66].mxu0  ;;  %v3784_v16 = vsel %vm541_vm8, %v3783_v39, %v3782_v52 }
0x148d   :  { %v3697_v19 = vsel %vm539_vm7, %v3696_v11, %v3695_v54  ;;  %v3685_v4 = vunpack.c.l.b16 %v3665_v12  ;;  %v10814_v40 = vpop.f32.mrb[67].mxu0  ;;  %v3718_v54 = vsel %vm1271_vm12, %v3715_v9, %v3717_v53 }
0x148f   :  { %v3698_v14 = vrot.slane %v3685_v4, 1 }
0x1491   :  { %v3699_v63 = vsel %vm541_vm8, %v3698_v14, %v3697_v19 }
0x1492   :  { %v3700_v45 = vpack.c.b16 %v3699_v63, %v3699_v63 }
0x1494   :  { %10820 = vmatmul.mubr.msk.bf16.vlgmr.msra.gmra.mrb[64].mxu1 %vm106_vm0, %v3700_v45 }
0x1495   :  { %4003 = vmatprep.mubr.bf16.mxu1 %v11725_v0  ;;  %3972 = vmatpush1.bf16.msra.mxu1 %v12630_v10 }
0x1496   :  { %3973 = vmatprep.subr.bf16.mxu1 %v12393_v35 }
0x1499   :  { %3974 = vmatpush1.bf16.msra.mxu1 %v12391_v22  ;;  %v12652_v22 = vld [vmem:[%s13827_s8] ss:$0 sm:$0xff] }
0x149a   :  { %10837 = vmatprep.subr.bf16.mxu1 %v11726_v1 }
0x1567   :  { %v3757_v55 = vpop.f32.mrb[64].mxu1 }
0x1568   :  { %v3758_v28 = vadd.f32 %v3757_v55, %v3718_v54  ;;  %v10821_v11 = vpop.f32.mrb[65].mxu1 }
0x1569   :  { %v3760_v12 = vpop.f32.mrb[66].mxu1 }
0x156a   :  { %v3786_v5 = vadd.f32 %v3784_v16, %v3758_v28  ;;  %v10822_v15 = vpop.f32.mrb[67].mxu1 }
0x156c   :  { %11352 = vtanh.f32 %v3786_v5  ;;  %v10159_v4 = vmul.f32 -1.442695, %v3786_v5 }
0x156e   :  { %11354 = vpow2.f32 %v10159_v4 }
0x1576   :  { %v11353_v19 = vpop.eup %11352 }
0x1577   :  { %3796 = vrot.lane.b32.xlu0 %v11353_v19, %s11717_s19 }
0x1578   :  { %v11355_v40 = vpop.eup %11354 }
0x1579   :  { %v3790_v14 = vadd.f32 1.0, %v11355_v40 }
0x157b   :  { %11356 = vrcp.f32 %v3790_v14 }
0x1585   :  { %v11357_v63 = vpop.eup %11356 }
0x1586   :  { %v3794_v17 = vmul.f32 %v11357_v63, %v12388_v50 }
0x15e9   :  { %v3797_v45 = vpop.permute.xlu0 %3796 }
0x15ea   :  { %v3799_v46 = vmul.f32 %v11357_v63, %v3797_v45 }
0x15ec   :  { %3801 = vrot.lane.b32.xlu0 %v3799_v46, %s11730_s18 }
0x165e   :  { %v3802_v59 = vpop.permute.xlu0 %3801 }
0x165f   :  { %v12627_v18 = vadd.f32 %v3802_v59, %v3794_v17 }
0x1661   :  { %11358 = vtanh.f32 %v12627_v18 }
0x166b   :  { %v11359_v50 = vpop.eup %11358 }
0x166c   :  { %3807 = vrot.lane.b32.xlu0 %v11359_v50, %s11717_s19 }
0x16de   :  { %v3808_v6 = vpop.permute.xlu0 %3807 }
0x16df   :  { %v3810_v23 = vmul.f32 %v11357_v63, %v3808_v6 }
0x16e1   :  { %v3811_v48 = vpack.c.bf16 %v3810_v23, %v3810_v23 }
0x16e3   :  { %3824 = vrot.lane.b32.xlu0 %v3811_v48, %s11730_s18 }
0x1755   :  { %v3825_v20 = vpop.permute.xlu0 %3824 }
0x1756   :  { %10828 = vmatmul.mubr.msk.bf16.vlgmr.msra.gmra.mrb[68].mxu0 %vm106_vm0, %v3825_v20  ;;  %10172 = vmatmul.mubr.msk.bf16.vlgmr.msra.gmra.mrb[68].mxu1 %vm106_vm0, %v3825_v20 }
0x1757   :  { %10833 = vmatprep.mubr.msk.bf16.mxu0 %vm11729_vm11, %v11726_v1  ;;  %10839 = vmatprep.mubr.msk.bf16.mxu1 %vm11729_vm11, %v11726_v1 }
0x1829   :  { %v3875_v35 = vpop.f32.mrb[68].mxu0  ;;  %v12654_v62 = vpop.f32.mrb[68].mxu1 }
0x182a   :  { %v3876_v24 = vadd.f32 %v12652_v22, %v3875_v35  ;;  %v4029_v2 = vcombine.high %v12654_v62, %v12654_v62  ;;  %v4036_v49 = vrot.slane %v12654_v62, %v11878_v21  ;;  %v10829_v31 = vpop.f32.mrb[69].mxu0  ;;  %v12661_v38 = vpop.f32.mrb[69].mxu1 }
0x182b   :  { %v3878_v25 = vpop.f32.mrb[70].mxu0  ;;  %v4009_v39 = vpop.f32.mrb[70].mxu1 }
0x182c   :  { %v3882_v9 = vcombine.high %v3876_v24, %v3876_v24  ;;  %v3889_v52 = vrot.slane %v3876_v24, %v11878_v21  ;;  %v4043_v53 = vrot.slane %v4029_v2, %v11878_v21  ;;  %v4044_v54 = vcombine.high %v4036_v49, %v4036_v49  ;;  %v10830_v55 = vpop.f32.mrb[71].mxu0  ;;  %v4010_v16 = vpop.f32.mrb[71].mxu1 }
0x182d   :  { %v4052_v28 = vrot.slane %v4036_v49, %v11878_v21 }
0x182e   :  { %v3896_v11 = vrot.slane %v3882_v9, %v11878_v21  ;;  %v3897_v12 = vcombine.high %v3889_v52, %v3889_v52  ;;  %v3905_v5 = vrot.slane %v3889_v52, %v11878_v21  ;;  %10164 = vst.sshfl [vmem:[#allocation14 + $0x2] sm:$0x1 pattern:$0x73625140] %v3889_v52  ;;  %v4045_v15 = vcombine.high %v4043_v53, %v4043_v53 }
0x182f   :  { %v4059_v19 = vrot.slane %v4043_v53, %v11878_v21  ;;  %v4066_v4 = vrot.slane %v4044_v54, %v11878_v21  ;;  %v4074_v40 = vcombine.high %v4052_v28, %v4052_v28  ;;  %v4081_v14 = vrot.slane %v4052_v28, %v11895_v44 }
0x1830   :  { %v3898_v63 = vcombine.high %v3896_v11, %v3896_v11  ;;  %v3912_v45 = vrot.slane %v3896_v11, %v11878_v21  ;;  %v3919_v46 = vrot.slane %v3897_v12, %v11878_v21  ;;  %v3927_v17 = vcombine.high %v3905_v5, %v3905_v5  ;;  %10165 = vst.sshfl [vmem:[#allocation14 + $0xa] sm:$0x1 pattern:$0x73625140] %v3897_v12 }
0x1831   :  { %10166 = vst.sshfl [vmem:[#allocation14 + $0x22] sm:$0x1 pattern:$0x73625140] %v3896_v11  ;;  %v4073_v59 = vrot.slane %v4045_v15, %v11878_v21  ;;  %v4075_v47 = vcombine.high %v4059_v19, %v4059_v19  ;;  %v4076_v36 = vcombine.high %v4066_v4, %v4066_v4  ;;  %v4085_v50 = vrot.slane %v4066_v4, %v11895_v44 }
0x1832   :  { %v3926_v6 = vrot.slane %v3898_v63, %v11878_v21  ;;  %v3928_v23 = vcombine.high %v3912_v45, %v3912_v45  ;;  %v3929_v48 = vcombine.high %v3919_v46, %v3919_v46  ;;  %3941 = vst [vmem:[#allocation14 + $0x12] sm:$0x1] %v3927_v17  ;;  %10167 = vst.sshfl [vmem:[#allocation14 + $0x2a] sm:$0x1 pattern:$0x73625140] %v3898_v63 }
0x1833   :  { %v4089_v20 = vrot.slane %v4074_v40, %v11895_v44  ;;  %v4077_v35 = vcombine.high %v4073_v59, %v4073_v59  ;;  %v4093_v24 = vrot.slane %v4076_v36, %v11895_v44  ;;  %v4097_v2 = vrot.slane %v4059_v19, %v11895_v44 }
0x1834   :  { %v3930_v49 = vcombine.high %v3926_v6, %v3926_v6  ;;  %3942 = vst [vmem:[#allocation14 + $0x1a] sm:$0x1] %v3929_v48  ;;  %3945 = vst [vmem:[#allocation14 + $0x32] sm:$0x1] %v3928_v23  ;;  %v4101_v31 = vrot.slane %v4073_v59, %v11895_v44  ;;  %v4118_v25 = vadd.f32 %v10327_v27, %v4081_v14 }
0x1835   :  { %v4119_v39 = vadd.f32 %v10328_v34, %v4085_v50  ;;  %v4120_v9 = vadd.f32 %v10331_v32, %v4089_v20  ;;  %v4105_v52 = vrot.slane %v4075_v47, %v11895_v44  ;;  %v4122_v53 = vadd.f32 %v10335_v37, %v4097_v2 }
0x1836   :  { %3946 = vst [vmem:[#allocation14 + $0x3a] sm:$0x1] %v3930_v49  ;;  %11360 = vtanh.f32 %v4118_v25  ;;  %v4109_v54 = vrot.slane %v4077_v35, %v11895_v44  ;;  %v4121_v55 = vadd.f32 %v10332_v60, %v4093_v24  ;;  %v4123_v30 = vadd.f32 %v10336_v13, %v4101_v31 }
0x1837   :  { %11362 = vtanh.f32 %v4119_v39  ;;  %v4124_v27 = vadd.f32 %v10339_v58, %v4105_v52 }
0x1838   :  { %11364 = vtanh.f32 %v4120_v9  ;;  %v4125_v34 = vadd.f32 %v10340_v33, %v4109_v54 }
0x1839   :  { %11366 = vtanh.f32 %v4122_v53 }
0x183a   :  { %11368 = vtanh.f32 %v4121_v55 }
0x183b   :  { %11370 = vtanh.f32 %v4123_v30 }
0x183c   :  { %11372 = vtanh.f32 %v4124_v27 }
0x183d   :  { %11374 = vtanh.f32 %v4125_v34 }
0x1840   :  { %v11361_v32 = vpop.eup %11360 }
0x1841   :  { %v11363_v37 = vpop.eup %11362  ;;  %v4134_v57 = vmul.f32 %v12701_v29, %v11361_v32 }
0x1842   :  { %v11365_v60 = vpop.eup %11364  ;;  %v4135_v58 = vmul.f32 %v12701_v29, %v11363_v37 }
0x1843   :  { %v4142_v13 = vsel %vm106_vm0, %v4134_v57, 0.0  ;;  %v11367_v16 = vpop.eup %11366  ;;  %v4136_v33 = vmul.f32 %v12701_v29, %v11365_v60 }
0x1844   :  { %4143 = vadd.xlane.f32.xlu1 %v4142_v13  ;;  %v4145_v26 = vsel %vm106_vm0, %v4135_v58, 0.0  ;;  %v11369_v28 = vpop.eup %11368  ;;  %v4138_v40 = vmul.f32 %v12701_v29, %v11367_v16 }
0x1845   :  { %4146 = vadd.xlane.f32.xlu0 %v4145_v26  ;;  %v11371_v11 = vpop.eup %11370  ;;  %v4137_v12 = vmul.f32 %v12701_v29, %v11369_v28  ;;  %v4148_v19 = vsel %vm106_vm0, %v4136_v33, 0.0 }
0x1846   :  { %v11373_v5 = vpop.eup %11372  ;;  %v4139_v4 = vmul.f32 %v12701_v29, %v11371_v11  ;;  %v4154_v45 = vsel %vm106_vm0, %v4138_v40, 0.0 }
0x1847   :  { %v4151_v15 = vsel %vm106_vm0, %v4137_v12, 0.0  ;;  %v11375_v14 = vpop.eup %11374  ;;  %v4140_v17 = vmul.f32 %v12701_v29, %v11373_v5 }
0x1848   :  { %4152 = vadd.xlane.f32.xlu1 %v4151_v15  ;;  %v4157_v63 = vsel %vm106_vm0, %v4139_v4, 0.0  ;;  %v4141_v46 = vmul.f32 %v12701_v29, %v11375_v14 }
0x1849   :  { %4149 = vadd.xlane.f32.xlu0 %v4148_v19  ;;  %v4160_v47 = vsel %vm106_vm0, %v4140_v17, 0.0 }
0x184a   :  { %v4163_v59 = vsel %vm106_vm0, %v4141_v46, 0.0 }
0x184c   :  { %4158 = vadd.xlane.f32.xlu1 %v4157_v63 }
0x184d   :  { %4155 = vadd.xlane.f32.xlu0 %v4154_v45 }
0x1850   :  { %4164 = vadd.xlane.f32.xlu1 %v4163_v59 }
0x1851   :  { %4161 = vadd.xlane.f32.xlu0 %v4160_v47 }
0x18d1   :  { %v4144_v36 = vpop.xlane.xlu1 %4143 }
0x18d2   :  { %v4147_v50 = vpop.xlane.xlu0 %4146  ;;  %v4177_v23 = vrot.slane %v4144_v36, %v11967_v7 }
0x18d3   :  { %v4181_v6 = vrot.slane %v4147_v50, %v11967_v7 }
0x18d5   :  { %v4153_v48 = vpop.xlane.xlu1 %4152  ;;  %v4206_v24 = vsel %vm529_vm2, %v4181_v6, %v4177_v23 }
0x18d6   :  { %v4150_v20 = vpop.xlane.xlu0 %4149  ;;  %v4189_v49 = vrot.slane %v4153_v48, %v11967_v7 }
0x18d7   :  { %v4185_v35 = vrot.slane %v4150_v20, %v11967_v7 }
0x18d9   :  { %v4207_v2 = vsel %vm531_vm3, %v4185_v35, %v4206_v24  ;;  %v4159_v31 = vpop.xlane.xlu1 %4158 }
0x18da   :  { %v4156_v25 = vpop.xlane.xlu0 %4155  ;;  %v4208_v9 = vsel %vm533_vm4, %v4189_v49, %v4207_v2  ;;  %v4197_v53 = vrot.slane %v4159_v31, %v11967_v7 }
0x18db   :  { %v4193_v39 = vrot.slane %v4156_v25, %v11967_v7 }
0x18dd   :  { %v4209_v52 = vsel %vm535_vm5, %v4193_v39, %v4208_v9  ;;  %v4165_v54 = vpop.xlane.xlu1 %4164 }
0x18de   :  { %v4162_v55 = vpop.xlane.xlu0 %4161  ;;  %v4205_v27 = vrot.slane %v4165_v54, %v11967_v7  ;;  %v4210_v34 = vsel %vm537_vm6, %v4197_v53, %v4209_v52 }
0x18df   :  { %v4201_v30 = vrot.slane %v4162_v55, %v11967_v7 }
0x18e1   :  { %v4211_v32 = vsel %vm539_vm7, %v4201_v30, %v4210_v34 }
0x18e2   :  { %v4212_v37 = vsel %vm541_vm8, %v4205_v27, %v4211_v32 }
0x18e3   :  { %v4214_v57 = vsel %vm544_vm9, %v4212_v37, -inf }
0x18e4   :  { %4215 = vmax.xlane.f32.xlu0 %v4214_v57 }
0x1971   :  { %v4216_v60 = vpop.xlane.xlu0 %4215 }
0x1972   :  { %v4221_v58 = vrot.slane %v4216_v60, %v11895_v44  ;;  %v4225_v13 = vrot.slane %v4216_v60, %v11986_v41  ;;  %v4229_v16 = vrot.slane %v4216_v60, %v11989_v42  ;;  %v4237_v26 = vrot.slane %v4216_v60, %v11998_v51 }
0x1973   :  { %v4233_v33 = vrot.slane %v4216_v60, %v11992_v43  ;;  %v4245_v5 = vrot.slane %v4216_v60, %v12006_v61  ;;  %v4241_v40 = vrot.slane %v4216_v60, %v12002_v56  ;;  %v4249_v17 = vrot.slane %v4216_v60, %v12010_v3 }
0x1974   :  { %v4258_v28 = vsub.f32 %v4144_v36, %v4221_v58  ;;  %v4259_v11 = vsub.f32 %v4147_v50, %v4225_v13  ;;  %v4260_v12 = vsub.f32 %v4150_v20, %v4229_v16  ;;  %v4262_v15 = vsub.f32 %v4156_v25, %v4237_v26 }
0x1975   :  { %v4261_v14 = vsub.f32 %v4153_v48, %v4233_v33  ;;  %v4264_v45 = vsub.f32 %v4162_v55, %v4245_v5  ;;  %v4263_v59 = vsub.f32 %v4159_v31, %v4241_v40  ;;  %v4265_v50 = vsub.f32 %v4165_v54, %v4249_v17 }
0x1976   :  { %v4266_v19 = vmul.f32 1.442695, %v4258_v28  ;;  %v4268_v4 = vmul.f32 1.442695, %v4259_v11  ;;  %v4270_v63 = vmul.f32 1.442695, %v4260_v12 }
0x1977   :  { %v4274_v46 = vmul.f32 1.442695, %v4262_v15  ;;  %v4272_v47 = vmul.f32 1.442695, %v4261_v14  ;;  %v4278_v36 = vmul.f32 1.442695, %v4264_v45 }
0x1978   :  { %11376 = vpow2.f32 %v4266_v19  ;;  %v4276_v6 = vmul.f32 1.442695, %v4263_v59  ;;  %v4280_v48 = vmul.f32 1.442695, %v4265_v50 }
0x1979   :  { %11378 = vpow2.f32 %v4268_v4  ;;  %v4415_v4 = vld [vmem:[#allocation8] sm:$0xf] }
0x197a   :  { %11380 = vpow2.f32 %v4270_v63  ;;  %v4437_v40 = vsel %vm767_vm10, %v4415_v4, 0 }
0x197b   :  { %11382 = vpow2.f32 %v4274_v46  ;;  %10832 = vmatpush3.bf16.msra.mxu0 %v4437_v40 }
0x197c   :  { %11384 = vpow2.f32 %v4272_v47  ;;  %10843 = vmatprep.subr.bf16.mxu0 %v11726_v1 }
0x197d   :  { %11386 = vpow2.f32 %v4278_v36 }
0x197e   :  { %11388 = vpow2.f32 %v4276_v6 }
0x197f   :  { %11390 = vpow2.f32 %v4280_v48 }
0x1982   :  { %v11377_v23 = vpop.eup %11376 }
0x1983   :  { %v11379_v20 = vpop.eup %11378  ;;  %4291 = vperm.xlu1 %11167, %v11377_v23  }
0x1984   :  { %4294 = vperm.xlu0 %11168, %v11379_v20   ;;  %v11381_v35 = vpop.eup %11380 }
0x1985   :  { %v12743_v24 = vpop.eup %11382 }
0x1986   :  { %v11385_v2 = vpop.eup %11384 }
0x1987   :  { %4297 = vperm.xlu1 %11167, %v11381_v35   ;;  %v12746_v49 = vpop.eup %11386 }
0x1988   :  { %4303 = vperm.xlu0 %11168, %v12743_v24   ;;  %v12749_v31 = vpop.eup %11388 }
0x1989   :  { %v12752_v25 = vpop.eup %11390 }
0x198b   :  { %4300 = vperm.xlu1 %11167, %v11385_v2  }
0x198c   :  { %4309 = vperm.xlu0 %11168, %v12746_v49  }
0x198f   :  { %4306 = vperm.xlu1 %11167, %v12749_v31  }
0x1993   :  { %4312 = vperm.xlu1 %11167, %v12752_v25  }
0x1a02   :  { %v4292_v39 = vpop.permute.xlu1 %4291 }
0x1a03   :  { %v4295_v9 = vpop.permute.xlu0 %4294  ;;  %v4317_v54 = vrot.slane %v4292_v39, %v11967_v7 }
0x1a04   :  { %v4321_v53 = vrot.slane %v4295_v9, %v11967_v7 }
0x1a06   :  { %v4298_v52 = vpop.permute.xlu1 %4297  ;;  %v4346_v34 = vsel %vm529_vm2, %v4321_v53, %v4317_v54  ;;  %v4416_v54 = vld [vmem:[#allocation8 + $0x4] sm:$0xf] }
0x1a07   :  { %v4325_v55 = vrot.slane %v4298_v52, %v11967_v7  ;;  %v4304_v30 = vpop.permute.xlu0 %4303 }
0x1a08   :  { %v4333_v60 = vrot.slane %v4304_v30, %v11967_v7 }
0x1a09   :  { %v4347_v37 = vsel %vm531_vm3, %v4325_v55, %v4346_v34  ;;  %v4493_v55 = vsel %vm767_vm10, %v4416_v54, 0 }
0x1a0a   :  { %v4301_v27 = vpop.permute.xlu1 %4300  ;;  %10838 = vmatpush3.bf16.msra.mxu1 %v4493_v55 }
0x1a0b   :  { %v4329_v32 = vrot.slane %v4301_v27, %v11967_v7  ;;  %v4310_v13 = vpop.permute.xlu0 %4309  ;;  %10849 = vmatprep.subr.bf16.mxu1 %v11726_v1 }
0x1a0c   :  { %v4341_v28 = vrot.slane %v4310_v13, %v11967_v7 }
0x1a0d   :  { %v4348_v57 = vsel %vm533_vm4, %v4329_v32, %v4347_v37 }
0x1a0e   :  { %v4307_v58 = vpop.permute.xlu1 %4306  ;;  %v4349_v26 = vsel %vm535_vm5, %v4333_v60, %v4348_v57 }
0x1a0f   :  { %v4337_v16 = vrot.slane %v4307_v58, %v11967_v7 }
0x1a11   :  { %v4350_v33 = vsel %vm537_vm6, %v4337_v16, %v4349_v26 }
0x1a12   :  { %v4313_v11 = vpop.permute.xlu1 %4312  ;;  %v4351_v5 = vsel %vm539_vm7, %v4341_v28, %v4350_v33 }
0x1a13   :  { %v4345_v12 = vrot.slane %v4313_v11, %v11967_v7  ;;  %v4417_v11 = vld [vmem:[#allocation8 + $0x8] sm:$0xf] }
0x1a15   :  { %v4352_v15 = vsel %vm541_vm8, %v4345_v12, %v4351_v5  ;;  %v4549_v5 = vsel %vm767_vm10, %v4417_v11, 0 }
0x1a16   :  { %v4354_v19 = vsel %vm544_vm9, %v4352_v15, 0.0 }
0x1a17   :  { %4355 = vadd.xlane.f32.xlu0 %v4354_v19  ;;  %v4418_v19 = vld [vmem:[#allocation8 + $0xc] sm:$0xf] }
0x1a2d   :  { %4935 = vrot.lane.b32.xlu0 %v12654_v62, %s11728_s13 }
0x1aa4   :  { %v4356_v14 = vpop.xlane.xlu0 %4355 }
0x1aa5   :  { %11392 = vrcp.f32 %v4356_v14  ;;  %v4419_v14 = vld [vmem:[#allocation8 + $0x10] sm:$0xf] }
0x1aaf   :  { %v11393_v63 = vpop.eup %11392 }
0x1ab0   :  { %v4362_v45 = vrot.slane %v11393_v63, %v11895_v44  ;;  %v4366_v46 = vrot.slane %v11393_v63, %v11986_v41  ;;  %v4370_v47 = vrot.slane %v11393_v63, %v11989_v42  ;;  %v4374_v48 = vrot.slane %v11393_v63, %v11992_v43 }
0x1ab1   :  { %v4378_v53 = vrot.slane %v11393_v63, %v11998_v51  ;;  %v4386_v32 = vrot.slane %v11393_v63, %v12006_v61  ;;  %v4390_v58 = vrot.slane %v11393_v63, %v12010_v3 }
0x1ab2   :  { %v4399_v17 = vmul.f32 %v11377_v23, %v4362_v45  ;;  %v4400_v59 = vmul.f32 %v11379_v20, %v4366_v46  ;;  %v4401_v6 = vmul.f32 %v11381_v35, %v4370_v47  ;;  %v4402_v52 = vmul.f32 %v11385_v2, %v4374_v48 }
0x1ab3   :  { %v4403_v30 = vmul.f32 %v12743_v24, %v4378_v53  ;;  %v4382_v35 = vrot.slane %v11393_v63, %v12002_v56  ;;  %v4405_v60 = vmul.f32 %v12746_v49, %v4386_v32  ;;  %v4406_v24 = vmul.f32 %v12752_v25, %v4390_v58  ;;  %v4422_v53 = vld [vmem:[#allocation8 + $0x1c] sm:$0xf]  ;;  %v11202_v32 = vld [vmem:[%s13825_s6] sm:$0xff]  }
0x1ab4   :  { %v4407_v36 = vpack.c.bf16 %v4399_v17, %v4399_v17  ;;  %v4408_v62 = vpack.c.bf16 %v4400_v59, %v4400_v59  ;;  %v4409_v9 = vpack.c.bf16 %v4401_v6, %v4401_v6  ;;  %v4410_v20 = vpack.c.bf16 %v4402_v52, %v4402_v52  ;;  %v4420_v59 = vld [vmem:[#allocation8 + $0x14] sm:$0xf]  ;;  %v4421_v6 = vld [vmem:[#allocation8 + $0x18] sm:$0xf] }
0x1ab5   :  { %v4411_v34 = vpack.c.bf16 %v4403_v30, %v4403_v30  ;;  %v4404_v2 = vmul.f32 %v12749_v31, %v4382_v35  ;;  %v4413_v16 = vpack.c.bf16 %v4405_v60, %v4405_v60  ;;  %v4414_v33 = vpack.c.bf16 %v4406_v24, %v4406_v24 }
0x1ab6   :  { %v4424_v50 = vunpack.c.l.b16 %v4407_v36  ;;  %v4480_v39 = vunpack.c.l.b16 %v4408_v62  ;;  %v4536_v23 = vunpack.c.l.b16 %v4409_v9  ;;  %v4592_v27 = vunpack.c.l.b16 %v4410_v20 }
0x1ab7   :  { %v4648_v37 = vunpack.c.l.b16 %v4411_v34  ;;  %v4412_v57 = vpack.c.bf16 %v4404_v2, %v4404_v2  ;;  %v4760_v26 = vunpack.c.l.b16 %v4413_v16  ;;  %v4816_v28 = vunpack.c.l.b16 %v4414_v33 }
0x1ab8   :  { %4426 = vperm.xlu1 %11167, %v4424_v50   ;;  %v4661_v46 = vsel %vm767_vm10, %v4419_v14, 0  ;;  %v4717_v50 = vsel %vm767_vm10, %v4420_v59, 0  ;;  %v4773_v9 = vsel %vm767_vm10, %v4421_v6, 0 }
0x1ab9   :  { %v4704_v13 = vunpack.c.l.b16 %v4412_v57 }
0x1abc   :  { %4482 = vperm.xlu1 %11167, %v4480_v39  }
0x1ac0   :  { %4538 = vperm.xlu1 %11167, %v4536_v23   ;;  %v4829_v23 = vsel %vm767_vm10, %v4422_v53, 0 }
0x1ac4   :  { %4594 = vperm.xlu1 %11167, %v4592_v27  }
0x1ac8   :  { %4650 = vperm.xlu1 %11167, %v4648_v37   ;;  %v11203_v37 = vld [vmem:[%s13825_s6 + $0x8] sm:$0xff]  }
0x1acc   :  { %4706 = vperm.xlu1 %11167, %v4704_v13  }
0x1ad0   :  { %4762 = vperm.xlu1 %11167, %v4760_v26  }
0x1ad4   :  { %4818 = vperm.xlu1 %11167, %v4816_v28  }
0x1ad8   :  { %4937 = vrot.lane.b32.xlu1 %v12661_v38, %s11728_s13  ;;  %v4605_v38 = vsel %vm767_vm10, %v4418_v19, 0 }
0x1b37   :  { %v4427_v31 = vpop.permute.xlu1 %4426 }
0x1b38   :  { %v4431_v49 = vrot.slane %v4427_v31, %v11967_v7 }
0x1b3a   :  { %v4432_v12 = vpack.c.b16 %v4431_v49, %v4431_v49 }
0x1b3b   :  { %v4483_v15 = vpop.permute.xlu1 %4482 }
0x1b3c   :  { %v4487_v25 = vrot.slane %v4483_v15, %v11967_v7  ;;  %10834 = vmatmul.mubr.msk.bf16.vlgmr.msra.gmra.mrb[72].mxu0 %vm544_vm9, %v4432_v12 }
0x1b3d   :  { %10844 = vmatpush3.bf16.msra.mxu0 %v4549_v5  ;;  %10845 = vmatprep.mubr.msk.bf16.mxu0 %vm11729_vm11, %v11726_v1 }
0x1b3e   :  { %v4488_v4 = vpack.c.b16 %v4487_v25, %v4487_v25  ;;  %10855 = vmatprep.subr.bf16.mxu0 %v11726_v1 }
0x1b3f   :  { %v4539_v40 = vpop.permute.xlu1 %4538 }
0x1b40   :  { %v4543_v63 = vrot.slane %v4539_v40, %v11967_v7  ;;  %10840 = vmatmul.mubr.msk.bf16.vlgmr.msra.gmra.mrb[72].mxu1 %vm544_vm9, %v4488_v4 }
0x1b41   :  { %10850 = vmatpush3.bf16.msra.mxu1 %v4605_v38  ;;  %10851 = vmatprep.mubr.msk.bf16.mxu1 %vm11729_vm11, %v11726_v1 }
0x1b42   :  { %v4544_v45 = vpack.c.b16 %v4543_v63, %v4543_v63  ;;  %10861 = vmatprep.subr.bf16.mxu1 %v11726_v1 }
0x1b43   :  { %v4595_v17 = vpop.permute.xlu1 %4594 }
0x1b44   :  { %v4599_v47 = vrot.slane %v4595_v17, %v11967_v7  ;;  %10846 = vmatmul.mubr.msk.bf16.vlgmr.msra.gmra.mrb[76].mxu0 %vm544_vm9, %v4544_v45 }
0x1b45   :  { %10856 = vmatpush3.bf16.msra.mxu0 %v4661_v46  ;;  %10857 = vmatprep.mubr.msk.bf16.mxu0 %vm11729_vm11, %v11726_v1 }
0x1b46   :  { %v4600_v36 = vpack.c.b16 %v4599_v47, %v4599_v47  ;;  %10867 = vmatprep.subr.bf16.mxu0 %v11726_v1 }
0x1b47   :  { %v4651_v62 = vpop.permute.xlu1 %4650 }
0x1b48   :  { %v4655_v48 = vrot.slane %v4651_v62, %v11967_v7  ;;  %10852 = vmatmul.mubr.msk.bf16.vlgmr.msra.gmra.mrb[76].mxu1 %vm544_vm9, %v4600_v36 }
0x1b49   :  { %10862 = vmatpush3.bf16.msra.mxu1 %v4717_v50  ;;  %10863 = vmatprep.mubr.msk.bf16.mxu1 %vm11729_vm11, %v11726_v1 }
0x1b4a   :  { %v4656_v39 = vpack.c.b16 %v4655_v48, %v4655_v48  ;;  %10873 = vmatprep.subr.bf16.mxu1 %v11726_v1 }
0x1b4b   :  { %v4707_v52 = vpop.permute.xlu1 %4706 }
0x1b4c   :  { %v4711_v54 = vrot.slane %v4707_v52, %v11967_v7  ;;  %10858 = vmatmul.mubr.msk.bf16.vlgmr.msra.gmra.mrb[80].mxu0 %vm544_vm9, %v4656_v39 }
0x1b4d   :  { %10868 = vmatpush3.bf16.msra.mxu0 %v4773_v9  ;;  %10869 = vmatprep.mubr.msk.bf16.mxu0 %vm11729_vm11, %v11726_v1 }
0x1b4e   :  { %v4712_v55 = vpack.c.b16 %v4711_v54, %v4711_v54  ;;  %10879 = vmatprep.subr.bf16.mxu0 %v11726_v1 }
0x1b4f   :  { %v4763_v20 = vpop.permute.xlu1 %4762 }
0x1b50   :  { %v4767_v30 = vrot.slane %v4763_v20, %v11967_v7  ;;  %10864 = vmatmul.mubr.msk.bf16.vlgmr.msra.gmra.mrb[80].mxu1 %vm544_vm9, %v4712_v55 }
0x1b51   :  { %10874 = vmatpush3.bf16.msra.mxu1 %v4829_v23  ;;  %10875 = vmatprep.mubr.msk.bf16.mxu1 %vm11729_vm11, %v11726_v1 }
0x1b52   :  { %v4768_v35 = vpack.c.b16 %v4767_v30, %v4767_v30  ;;  %10887 = vmatprep.subr.bf16.mxu1 %v11726_v1 }
0x1b53   :  { %v4819_v27 = vpop.permute.xlu1 %4818 }
0x1b54   :  { %v4823_v34 = vrot.slane %v4819_v27, %v11967_v7  ;;  %10870 = vmatmul.mubr.msk.bf16.vlgmr.msra.gmra.mrb[84].mxu0 %vm544_vm9, %v4768_v35 }
0x1b55   :  { %10883 = vmatprep.mubr.msk.bf16.mxu0 %vm11729_vm11, %v11726_v1  ;;  %10880 = vmatpush3.bf16.msra.mxu0 %v11202_v32 }
0x1b56   :  { %v4824_v2 = vpack.c.b16 %v4823_v34, %v4823_v34  ;;  %10881 = vmatprep.subr.bf16.mxu0 %v11726_v1 }
0x1b58   :  { %10876 = vmatmul.mubr.msk.bf16.vlgmr.msra.gmra.mrb[84].mxu1 %vm544_vm9, %v4824_v2 }
0x1b59   :  { %10891 = vmatprep.mubr.msk.bf16.mxu1 %vm11729_vm11, %v11726_v1  ;;  %10882 = vmatpush3.bf16.msra.mxu0 %v11203_v37 }
0x1b5a   :  { %5192 = vmatprep.subr.bf16.mxu0 %v12632_v8 }
0x1c0f   :  { %v4473_v57 = vpop.f32.mrb[72].mxu0 }
0x1c10   :  { %v10835_v60 = vpop.f32.mrb[73].mxu0  ;;  %v4879_v24 = vpack.c.bf16 %v4473_v57, %v4473_v57 }
0x1c11   :  { %v4476_v58 = vpop.f32.mrb[74].mxu0 }
0x1c12   :  { %v10836_v13 = vpop.f32.mrb[75].mxu0  ;;  %v4899_v12 = vunpack.c.l.b16 %v4879_v24 }
0x1c13   :  { %v4529_v16 = vpop.f32.mrb[72].mxu1 }
0x1c14   :  { %v4880_v26 = vpack.c.bf16 %v4529_v16, %v4529_v16  ;;  %v10841_v33 = vpop.f32.mrb[73].mxu1 }
0x1c15   :  { %v4532_v28 = vpop.f32.mrb[74].mxu1 }
0x1c16   :  { %v4900_v31 = vunpack.c.l.b16 %v4880_v26  ;;  %v10842_v11 = vpop.f32.mrb[75].mxu1 }
0x1c17   :  { %v4585_v49 = vpop.f32.mrb[76].mxu0 }
0x1c18   :  { %v4907_v5 = vrot.slane %v4900_v31, 7  ;;  %v4881_v15 = vpack.c.bf16 %v4585_v49, %v4585_v49  ;;  %v10847_v19 = vpop.f32.mrb[77].mxu0 }
0x1c19   :  { %v4588_v25 = vpop.f32.mrb[78].mxu0  ;;  %v4872_v19 = vld [vmem:[#allocation5 + $0xb] sm:$0x1] }
0x1c1a   :  { %v4908_v4 = vsel %vm529_vm2, %v4907_v5, %v4899_v12  ;;  %v4901_v8 = vunpack.c.l.b16 %v4881_v15  ;;  %v10848_v38 = vpop.f32.mrb[79].mxu0  ;;  %v4873_v25 = vld [vmem:[#allocation5 + $0x13] sm:$0x1] }
0x1c1b   :  { %v4641_v40 = vpop.f32.mrb[76].mxu1  ;;  %v4874_v38 = vld [vmem:[#allocation5 + $0x1b] sm:$0x1] }
0x1c1c   :  { %v4909_v14 = vrot.slane %v4901_v8, 6  ;;  %v4882_v63 = vpack.c.bf16 %v4641_v40, %v4641_v40  ;;  %v10853_v45 = vpop.f32.mrb[77].mxu1  ;;  %v4871_v8 = vld [vmem:[#allocation5 + $0x3] sm:$0x1]  ;;  %v4994_v40 = vrot.slane %v4873_v25, 6 }
0x1c1d   :  { %v4644_v46 = vpop.f32.mrb[78].mxu1  ;;  %v4996_v45 = vrot.slane %v4874_v38, 5  ;;  %v12889_v38 = vld [vmem:[#allocation2 + $0x8] sm:$0xff]  }
0x1c1e   :  { %v4910_v17 = vsel %vm531_vm3, %v4909_v14, %v4908_v4  ;;  %v4902_v59 = vunpack.c.l.b16 %v4882_v63  ;;  %v10854_v47 = vpop.f32.mrb[79].mxu1  ;;  %v4992_v4 = vrot.slane %v4872_v19, 7  ;;  %v4875_v63 = vld [vmem:[#allocation5 + $0x23] sm:$0x1] }
0x1c1f   :  { %v4697_v36 = vpop.f32.mrb[80].mxu0 }
0x1c20   :  { %v4911_v50 = vrot.slane %v4902_v59, 5  ;;  %v4883_v62 = vpack.c.bf16 %v4697_v36, %v4697_v36  ;;  %v10859_v6 = vpop.f32.mrb[81].mxu0  ;;  %v4993_v14 = vsel %vm529_vm2, %v4992_v4, %v4871_v8  ;;  %v4998_v59 = vrot.slane %v4875_v63, 4  ;;  %v4877_v36 = vld [vmem:[#allocation5 + $0x33] sm:$0x1] }
0x1c21   :  { %v4700_v48 = vpop.f32.mrb[82].mxu0  ;;  %v4995_v46 = vsel %vm531_vm3, %v4994_v40, %v4993_v14  ;;  %v5002_v6 = vrot.slane %v4877_v36, 2  ;;  %v12887_v8 = vld [vmem:[#allocation2] sm:$0xff]  }
0x1c22   :  { %v4912_v39 = vsel %vm533_vm4, %v4911_v50, %v4910_v17  ;;  %v4903_v9 = vunpack.c.l.b16 %v4883_v62  ;;  %v10860_v52 = vpop.f32.mrb[83].mxu0  ;;  %v4876_v17 = vld [vmem:[#allocation5 + $0x2b] sm:$0x1]  ;;  %v4997_v47 = vsel %vm533_vm4, %v4996_v45, %v4995_v46  ;;  %v4878_v62 = vld [vmem:[#allocation5 + $0x3b] sm:$0x1] }
0x1c23   :  { %v4753_v53 = vpop.f32.mrb[80].mxu1  ;;  %v4999_v50 = vsel %vm535_vm5, %v4998_v59, %v4997_v47 }
0x1c24   :  { %v4913_v54 = vrot.slane %v4903_v9, 4  ;;  %v4884_v55 = vpack.c.bf16 %v4753_v53, %v4753_v53  ;;  %v10865_v23 = vpop.f32.mrb[81].mxu1  ;;  %v4938_v9 = vpop.permute.xlu1 %4937 }
0x1c25   :  { %v4756_v20 = vpop.f32.mrb[82].mxu1  ;;  %v4936_v53 = vpop.permute.xlu0 %4935 }
0x1c26   :  { %v4914_v30 = vsel %vm535_vm5, %v4913_v54, %v4912_v39  ;;  %v4904_v35 = vunpack.c.l.b16 %v4884_v55  ;;  %v10866_v27 = vpop.f32.mrb[83].mxu1  ;;  %v5004_v39 = vrot.slane %v4878_v62, 1  ;;  %v4939_v54 = vsel %vm1271_vm12, %v4936_v53, %v4938_v9 }
0x1c27   :  { %v4809_v34 = vpop.f32.mrb[84].mxu0  ;;  %v10359_v62 = vunpack.c.l.bf16 %v12887_v8 }
0x1c28   :  { %v4915_v2 = vrot.slane %v4904_v35, 3  ;;  %v4885_v32 = vpack.c.bf16 %v4809_v34, %v4809_v34  ;;  %v10871_v37 = vpop.f32.mrb[85].mxu0 }
0x1c29   :  { %v4812_v57 = vpop.f32.mrb[86].mxu0 }
0x1c2a   :  { %v4916_v60 = vsel %vm537_vm6, %v4915_v2, %v4914_v30  ;;  %v4905_v58 = vunpack.c.l.b16 %v4885_v32  ;;  %v10872_v13 = vpop.f32.mrb[87].mxu0 }
0x1c2b   :  { %v4865_v16 = vpop.f32.mrb[84].mxu1 }
0x1c2c   :  { %v4917_v24 = vrot.slane %v4905_v58, 2  ;;  %v4886_v26 = vpack.c.bf16 %v4865_v16, %v4865_v16  ;;  %v10877_v33 = vpop.f32.mrb[85].mxu1 }
0x1c2d   :  { %v4868_v28 = vpop.f32.mrb[86].mxu1  ;;  %v11204_v33 = vld [vmem:[#allocation13] sm:$0xff]  }
0x1c2e   :  { %v4918_v31 = vsel %vm539_vm7, %v4917_v24, %v4916_v60  ;;  %v4906_v11 = vunpack.c.l.b16 %v4886_v26  ;;  %v10878_v49 = vpop.f32.mrb[87].mxu1  ;;  %v12867_v28 = vld [vmem:[#allocation11 + $0x10] ss:$8 sps:$4 sm:$0xff]   ;;  %10888 = vmatpush3.bf16.msra.mxu1 %v11204_v33 }
0x1c2f   :  { %10889 = vmatprep.subr.bf16.mxu1 %v11726_v1  ;;  %v12915_v33 = vld [vmem:[#allocation2 + $0x18] sm:$0xff]  }
0x1c30   :  { %v4919_v12 = vrot.slane %v4906_v11, 1  ;;  %v11208_v11 = vld [vmem:[#allocation13 + $0x8] sm:$0xff]  }
0x1c32   :  { %v4920_v5 = vsel %vm541_vm8, %v4919_v12, %v4918_v31  ;;  %v12869_v31 = vld [vmem:[#allocation11 + $0x14] ss:$8 sps:$4 sm:$0xff]   ;;  %10890 = vmatpush3.bf16.msra.mxu1 %v11208_v11 }
0x1c33   :  { %v4921_v15 = vpack.c.b16 %v4920_v5, %v4920_v5  ;;  %10895 = vmatprep.subr.bf16.mxu1 %v11726_v1 }
0x1c35   :  { %10884 = vmatmul.mubr.msk.bf16.vlgmr.msra.gmra.mrb[88].mxu0 %vm106_vm0, %v4921_v15 }
0x1c36   :  { %5193 = vmatpush1.bf16.msra.mxu0 %v12630_v10  ;;  %5224 = vmatprep.mubr.bf16.mxu0 %v11725_v0  ;;  %v5000_v10 = vrot.slane %v4876_v17, 3 }
0x1c37   :  { %5194 = vmatprep.subr.bf16.mxu0 %v12869_v31 }
0x1c38   :  { %v5001_v48 = vsel %vm537_vm6, %v5000_v10, %v4999_v50 }
0x1c39   :  { %v5003_v52 = vsel %vm539_vm7, %v5002_v6, %v5001_v48  ;;  %v10360_v6 = vunpack.c.h.bf16 %v12887_v8  ;;  %v10363_v48 = vunpack.c.l.bf16 %v12889_v38 }
0x1c3a   :  { %v5005_v23 = vsel %vm541_vm8, %v5004_v39, %v5003_v52  ;;  %5195 = vmatpush1.bf16.msra.mxu0 %v12867_v28 }
0x1c3b   :  { %10901 = vmatprep.subr.bf16.mxu0 %v11726_v1 }
0x1d08   :  { %v4978_v55 = vpop.f32.mrb[88].mxu0 }
0x1d09   :  { %v4979_v20 = vadd.f32 %v4978_v55, %v4939_v54  ;;  %v10885_v30 = vpop.f32.mrb[89].mxu0 }
0x1d0a   :  { %v4981_v35 = vpop.f32.mrb[90].mxu0 }
0x1d0b   :  { %v5007_v27 = vadd.f32 %v5005_v23, %v4979_v20  ;;  %v10886_v34 = vpop.f32.mrb[91].mxu0 }
0x1d0d   :  { %11394 = vtanh.f32 %v5007_v27  ;;  %v10184_v32 = vmul.f32 -1.442695, %v5007_v27 }
0x1d0f   :  { %11396 = vpow2.f32 %v10184_v32  ;;  %v12910_v32 = vld [vmem:[#allocation2 + $0x10] sm:$0xff]  }
0x1d17   :  { %v11395_v2 = vpop.eup %11394 }
0x1d18   :  { %5017 = vrot.lane.b32.xlu1 %v11395_v2, %s11717_s19 }
0x1d19   :  { %v11397_v37 = vpop.eup %11396 }
0x1d1a   :  { %v5011_v57 = vadd.f32 1.0, %v11397_v37 }
0x1d1c   :  { %11398 = vrcp.f32 %v5011_v57 }
0x1d26   :  { %v11399_v60 = vpop.eup %11398 }
0x1d27   :  { %v5015_v16 = vmul.f32 %v11399_v60, %v12627_v18 }
0x1d8a   :  { %v5018_v58 = vpop.permute.xlu1 %5017 }
0x1d8b   :  { %v5020_v13 = vmul.f32 %v11399_v60, %v5018_v58 }
0x1d8d   :  { %5022 = vrot.lane.b32.xlu1 %v5020_v13, %s11730_s18 }
0x1dff   :  { %v5023_v24 = vpop.permute.xlu1 %5022 }
0x1e00   :  { %v12864_v26 = vadd.f32 %v5023_v24, %v5015_v16 }
0x1e02   :  { %11400 = vtanh.f32 %v12864_v26 }
0x1e0c   :  { %v11401_v18 = vpop.eup %11400 }
0x1e0d   :  { %5028 = vrot.lane.b32.xlu1 %v11401_v18, %s11717_s19  ;;  %v10364_v18 = vunpack.c.h.bf16 %v12889_v38 }
0x1e7f   :  { %v5029_v49 = vpop.permute.xlu1 %5028 }
0x1e80   :  { %v5031_v12 = vmul.f32 %v11399_v60, %v5029_v49  ;;  %v10367_v49 = vunpack.c.l.bf16 %v12910_v32 }
0x1e82   :  { %v5032_v5 = vpack.c.bf16 %v5031_v12, %v5031_v12 }
0x1e84   :  { %5045 = vrot.lane.b32.xlu1 %v5032_v5, %s11730_s18 }
0x1ef6   :  { %v5046_v15 = vpop.permute.xlu1 %5045 }
0x1ef7   :  { %10892 = vmatmul.mubr.msk.bf16.vlgmr.msra.gmra.mrb[88].mxu1 %vm106_vm0, %v5046_v15  ;;  %10197 = vmatmul.mubr.msk.bf16.vlgmr.msra.gmra.mrb[92].mxu0 %vm106_vm0, %v5046_v15 }
0x1ef8   :  { %10897 = vmatprep.mubr.msk.bf16.mxu1 %vm11729_vm11, %v11726_v1  ;;  %10903 = vmatprep.mubr.msk.bf16.mxu0 %vm11729_vm11, %v11726_v1 }
0x1fca   :  { %v5096_v19 = vpop.f32.mrb[88].mxu1  ;;  %v12884_v25 = vpop.f32.mrb[92].mxu0 }
0x1fcb   :  { %v5097_v4 = vadd.f32 %v12652_v22, %v5096_v19  ;;  %v5250_v40 = vcombine.high %v12884_v25, %v12884_v25  ;;  %v5257_v14 = vrot.slane %v12884_v25, %v11878_v21  ;;  %v10893_v63 = vpop.f32.mrb[89].mxu1  ;;  %v12895_v45 = vpop.f32.mrb[93].mxu0 }
0x1fcc   :  { %v5099_v46 = vpop.f32.mrb[90].mxu1  ;;  %v5230_v17 = vpop.f32.mrb[94].mxu0 }
0x1fcd   :  { %v5103_v59 = vcombine.high %v5097_v4, %v5097_v4  ;;  %v5110_v47 = vrot.slane %v5097_v4, %v11878_v21  ;;  %v5264_v22 = vrot.slane %v5250_v40, %v11878_v21  ;;  %v5265_v36 = vcombine.high %v5257_v14, %v5257_v14  ;;  %v10894_v10 = vpop.f32.mrb[91].mxu1  ;;  %v5231_v50 = vpop.f32.mrb[95].mxu0 }
0x1fce   :  { %v5273_v39 = vrot.slane %v5257_v14, %v11878_v21  ;;  %v10371_v14 = vunpack.c.l.bf16 %v12915_v33 }
0x1fcf   :  { %v5117_v9 = vrot.slane %v5103_v59, %v11878_v21  ;;  %v5118_v52 = vcombine.high %v5110_v47, %v5110_v47  ;;  %v5126_v53 = vrot.slane %v5110_v47, %v11878_v21  ;;  %10189 = vst.sshfl [vmem:[#allocation14 + $0x3] sm:$0x1 pattern:$0x73625140] %v5110_v47  ;;  %v5266_v54 = vcombine.high %v5264_v22, %v5264_v22 }
0x1fd0   :  { %v5280_v55 = vrot.slane %v5264_v22, %v11878_v21  ;;  %v5287_v23 = vrot.slane %v5265_v36, %v11878_v21  ;;  %v5295_v20 = vcombine.high %v5273_v39, %v5273_v39  ;;  %v5302_v30 = vrot.slane %v5273_v39, %v11895_v44 }
0x1fd1   :  { %v5119_v35 = vcombine.high %v5117_v9, %v5117_v9  ;;  %v5133_v27 = vrot.slane %v5117_v9, %v11878_v21  ;;  %v5140_v34 = vrot.slane %v5118_v52, %v11878_v21  ;;  %v5148_v2 = vcombine.high %v5126_v53, %v5126_v53  ;;  %10190 = vst.sshfl [vmem:[#allocation14 + $0xb] sm:$0x1 pattern:$0x73625140] %v5118_v52 }
0x1fd2   :  { %10191 = vst.sshfl [vmem:[#allocation14 + $0x23] sm:$0x1 pattern:$0x73625140] %v5117_v9  ;;  %v5294_v37 = vrot.slane %v5266_v54, %v11878_v21  ;;  %v5296_v57 = vcombine.high %v5280_v55, %v5280_v55  ;;  %v5297_v60 = vcombine.high %v5287_v23, %v5287_v23  ;;  %v5306_v58 = vrot.slane %v5287_v23, %v11895_v44 }
0x1fd3   :  { %v5147_v13 = vrot.slane %v5119_v35, %v11878_v21  ;;  %v5149_v16 = vcombine.high %v5133_v27, %v5133_v27  ;;  %v5150_v24 = vcombine.high %v5140_v34, %v5140_v34  ;;  %5162 = vst [vmem:[#allocation14 + $0x13] sm:$0x1] %v5148_v2  ;;  %10192 = vst.sshfl [vmem:[#allocation14 + $0x2b] sm:$0x1 pattern:$0x73625140] %v5119_v35  ;;  %v10368_v22 = vunpack.c.h.bf16 %v12910_v32 }
0x1fd4   :  { %v5310_v11 = vrot.slane %v5295_v20, %v11895_v44  ;;  %v5314_v12 = vrot.slane %v5297_v60, %v11895_v44  ;;  %v5318_v5 = vrot.slane %v5280_v55, %v11895_v44  ;;  %v5326_v19 = vrot.slane %v5296_v57, %v11895_v44  ;;  %v13173_v32 = vld [vmem:[%s13824_s5] ss:$0 sm:$0xff] }
0x1fd5   :  { %v5151_v15 = vcombine.high %v5147_v13, %v5147_v13  ;;  %5163 = vst [vmem:[#allocation14 + $0x1b] sm:$0x1] %v5150_v24  ;;  %5166 = vst [vmem:[#allocation14 + $0x33] sm:$0x1] %v5149_v16  ;;  %v5339_v4 = vadd.f32 %v10359_v62, %v5302_v30  ;;  %v5340_v40 = vadd.f32 %v10360_v6, %v5306_v58  ;;  %v10372_v39 = vunpack.c.h.bf16 %v12915_v33 }
0x1fd6   :  { %v5341_v63 = vadd.f32 %v10363_v48, %v5310_v11  ;;  %v5342_v46 = vadd.f32 %v10364_v18, %v5314_v12  ;;  %v5298_v17 = vcombine.high %v5294_v37, %v5294_v37  ;;  %v5322_v59 = vrot.slane %v5294_v37, %v11895_v44 }
0x1fd7   :  { %5167 = vst [vmem:[#allocation14 + $0x3b] sm:$0x1] %v5151_v15  ;;  %v5343_v47 = vadd.f32 %v10367_v49, %v5318_v5  ;;  %11402 = vtanh.f32 %v5339_v4  ;;  %v5345_v36 = vadd.f32 %v10371_v14, %v5326_v19 }
0x1fd8   :  { %11404 = vtanh.f32 %v5340_v40  ;;  %v5330_v10 = vrot.slane %v5298_v17, %v11895_v44  ;;  %v5344_v50 = vadd.f32 %v10368_v22, %v5322_v59 }
0x1fd9   :  { %11406 = vtanh.f32 %v5341_v63 }
0x1fda   :  { %11408 = vtanh.f32 %v5342_v46  ;;  %v5346_v9 = vadd.f32 %v10372_v39, %v5330_v10 }
0x1fdb   :  { %11410 = vtanh.f32 %v5343_v47 }
0x1fdc   :  { %11412 = vtanh.f32 %v5345_v36 }
0x1fdd   :  { %11414 = vtanh.f32 %v5344_v50 }
0x1fde   :  { %11416 = vtanh.f32 %v5346_v9 }
0x1fe1   :  { %v11403_v52 = vpop.eup %11402 }
0x1fe2   :  { %v11405_v53 = vpop.eup %11404  ;;  %v5355_v54 = vmul.f32 %v12701_v29, %v11403_v52 }
0x1fe3   :  { %v11407_v55 = vpop.eup %11406  ;;  %v5356_v23 = vmul.f32 %v12701_v29, %v11405_v53 }
0x1fe4   :  { %v11409_v20 = vpop.eup %11408  ;;  %v5363_v30 = vsel %vm106_vm0, %v5355_v54, 0.0  ;;  %v5357_v35 = vmul.f32 %v12701_v29, %v11407_v55 }
0x1fe5   :  { %v11411_v27 = vpop.eup %11410  ;;  %5364 = vadd.xlane.f32.xlu0 %v5363_v30  ;;  %v5366_v34 = vsel %vm106_vm0, %v5356_v23, 0.0  ;;  %v5358_v60 = vmul.f32 %v12701_v29, %v11409_v20 }
0x1fe6   :  { %5367 = vadd.xlane.f32.xlu1 %v5366_v34  ;;  %v5359_v2 = vmul.f32 %v12701_v29, %v11411_v27  ;;  %v11413_v37 = vpop.eup %11412  ;;  %v5369_v57 = vsel %vm106_vm0, %v5357_v35, 0.0 }
0x1fe7   :  { %v11415_v58 = vpop.eup %11414  ;;  %v5361_v16 = vmul.f32 %v12701_v29, %v11413_v37  ;;  %v5372_v24 = vsel %vm106_vm0, %v5358_v60, 0.0 }
0x1fe8   :  { %v5375_v13 = vsel %vm106_vm0, %v5359_v2, 0.0  ;;  %v5360_v11 = vmul.f32 %v12701_v29, %v11415_v58  ;;  %v11417_v12 = vpop.eup %11416 }
0x1fe9   :  { %5370 = vadd.xlane.f32.xlu0 %v5369_v57  ;;  %v5381_v5 = vsel %vm106_vm0, %v5361_v16, 0.0  ;;  %v5362_v19 = vmul.f32 %v12701_v29, %v11417_v12 }
0x1fea   :  { %5376 = vadd.xlane.f32.xlu1 %v5375_v13  ;;  %v5378_v15 = vsel %vm106_vm0, %v5360_v11, 0.0 }
0x1feb   :  { %v5384_v4 = vsel %vm106_vm0, %v5362_v19, 0.0 }
0x1fed   :  { %5373 = vadd.xlane.f32.xlu0 %v5372_v24 }
0x1fee   :  { %5382 = vadd.xlane.f32.xlu1 %v5381_v5 }
0x1ff1   :  { %5379 = vadd.xlane.f32.xlu0 %v5378_v15 }
0x1ff5   :  { %5385 = vadd.xlane.f32.xlu0 %v5384_v4 }
0x2072   :  { %v5365_v40 = vpop.xlane.xlu0 %5364 }
0x2073   :  { %v5368_v63 = vpop.xlane.xlu1 %5367  ;;  %v5398_v59 = vrot.slane %v5365_v40, %v11967_v7 }
0x2074   :  { %v5402_v46 = vrot.slane %v5368_v63, %v11967_v7 }
0x2076   :  { %v5371_v17 = vpop.xlane.xlu0 %5370  ;;  %v5427_v36 = vsel %vm529_vm2, %v5402_v46, %v5398_v59 }
0x2077   :  { %v5406_v47 = vrot.slane %v5371_v17, %v11967_v7  ;;  %v5377_v10 = vpop.xlane.xlu1 %5376 }
0x2078   :  { %v5414_v53 = vrot.slane %v5377_v10, %v11967_v7 }
0x2079   :  { %v5428_v29 = vsel %vm531_vm3, %v5406_v47, %v5427_v36 }
0x207a   :  { %v5374_v50 = vpop.xlane.xlu0 %5373 }
0x207b   :  { %v5410_v9 = vrot.slane %v5374_v50, %v11967_v7  ;;  %v5383_v55 = vpop.xlane.xlu1 %5382 }
0x207c   :  { %v5422_v35 = vrot.slane %v5383_v55, %v11967_v7 }
0x207d   :  { %v5429_v52 = vsel %vm533_vm4, %v5410_v9, %v5428_v29 }
0x207e   :  { %v5380_v54 = vpop.xlane.xlu0 %5379  ;;  %v5430_v20 = vsel %vm535_vm5, %v5414_v53, %v5429_v52 }
0x207f   :  { %v5418_v23 = vrot.slane %v5380_v54, %v11967_v7 }
0x2081   :  { %v5431_v30 = vsel %vm537_vm6, %v5418_v23, %v5430_v20 }
0x2082   :  { %v5386_v27 = vpop.xlane.xlu0 %5385  ;;  %v5432_v2 = vsel %vm539_vm7, %v5422_v35, %v5431_v30 }
0x2083   :  { %v5426_v34 = vrot.slane %v5386_v27, %v11967_v7 }
0x2085   :  { %v5433_v37 = vsel %vm541_vm8, %v5426_v34, %v5432_v2 }
0x2086   :  { %v5435_v57 = vsel %vm544_vm9, %v5433_v37, -inf }
0x2087   :  { %5436 = vmax.xlane.f32.xlu1 %v5435_v57 }
0x2114   :  { %v5437_v60 = vpop.xlane.xlu1 %5436 }
0x2115   :  { %v5442_v58 = vrot.slane %v5437_v60, %v11895_v44  ;;  %v5446_v13 = vrot.slane %v5437_v60, %v11986_v41  ;;  %v5450_v16 = vrot.slane %v5437_v60, %v11989_v42  ;;  %v5454_v24 = vrot.slane %v5437_v60, %v11992_v43 }
0x2116   :  { %v5462_v11 = vrot.slane %v5437_v60, %v12002_v56  ;;  %v5458_v19 = vrot.slane %v5437_v60, %v11998_v51  ;;  %v5470_v47 = vrot.slane %v5437_v60, %v12010_v3  ;;  %v5466_v29 = vrot.slane %v5437_v60, %v12006_v61 }
0x2117   :  { %v5479_v12 = vsub.f32 %v5365_v40, %v5442_v58  ;;  %v5480_v5 = vsub.f32 %v5368_v63, %v5446_v13  ;;  %v5482_v15 = vsub.f32 %v5374_v50, %v5454_v24  ;;  %v5481_v4 = vsub.f32 %v5371_v17, %v5450_v16 }
0x2118   :  { %v5484_v36 = vsub.f32 %v5380_v54, %v5462_v11  ;;  %v5483_v52 = vsub.f32 %v5377_v10, %v5458_v19  ;;  %v5486_v23 = vsub.f32 %v5386_v27, %v5470_v47  ;;  %v5485_v63 = vsub.f32 %v5383_v55, %v5466_v29 }
0x2119   :  { %v5487_v46 = vmul.f32 1.442695, %v5479_v12  ;;  %v5489_v59 = vmul.f32 1.442695, %v5480_v5  ;;  %v5493_v9 = vmul.f32 1.442695, %v5482_v15 }
0x211a   :  { %v5491_v53 = vmul.f32 1.442695, %v5481_v4  ;;  %v5497_v40 = vmul.f32 1.442695, %v5484_v36  ;;  %v5495_v50 = vmul.f32 1.442695, %v5483_v52 }
0x211b   :  { %11418 = vpow2.f32 %v5487_v46  ;;  %v5501_v17 = vmul.f32 1.442695, %v5486_v23  ;;  %v5499_v20 = vmul.f32 1.442695, %v5485_v63 }
0x211c   :  { %11420 = vpow2.f32 %v5489_v59 }
0x211d   :  { %11422 = vpow2.f32 %v5493_v9 }
0x211e   :  { %11424 = vpow2.f32 %v5491_v53 }
0x211f   :  { %11426 = vpow2.f32 %v5497_v40 }
0x2120   :  { %11428 = vpow2.f32 %v5495_v50  ;;  %v5636_v50 = vld [vmem:[#allocation8] sm:$0xf] }
0x2121   :  { %11430 = vpow2.f32 %v5501_v17  ;;  %v5658_v17 = vsel %vm767_vm10, %v5636_v50, 0 }
0x2122   :  { %11432 = vpow2.f32 %v5499_v20  ;;  %10896 = vmatpush3.bf16.msra.mxu1 %v5658_v17 }
0x2123   :  { %10907 = vmatprep.subr.bf16.mxu1 %v11726_v1 }
0x2125   :  { %v11419_v30 = vpop.eup %11418 }
0x2126   :  { %v11421_v35 = vpop.eup %11420  ;;  %5512 = vperm.xlu0 %11168, %v11419_v30  }
0x2127   :  { %5515 = vperm.xlu1 %11167, %v11421_v35   ;;  %v11423_v54 = vpop.eup %11422 }
0x2128   :  { %v11425_v10 = vpop.eup %11424 }
0x2129   :  { %v12984_v27 = vpop.eup %11426 }
0x212a   :  { %5521 = vperm.xlu0 %11168, %v11423_v54   ;;  %v11429_v34 = vpop.eup %11428 }
0x212b   :  { %5518 = vperm.xlu1 %11167, %v11425_v10   ;;  %v12987_v55 = vpop.eup %11430 }
0x212c   :  { %v12989_v2 = vpop.eup %11432 }
0x212e   :  { %5527 = vperm.xlu0 %11168, %v12984_v27  }
0x212f   :  { %5524 = vperm.xlu1 %11167, %v11429_v34  }
0x2132   :  { %5533 = vperm.xlu0 %11168, %v12987_v55  }
0x2133   :  { %5530 = vperm.xlu1 %11167, %v12989_v2  }
0x21a5   :  { %v5513_v37 = vpop.permute.xlu0 %5512 }
0x21a6   :  { %v5516_v57 = vpop.permute.xlu1 %5515  ;;  %v5538_v58 = vrot.slane %v5513_v37, %v11967_v7 }
0x21a7   :  { %v5542_v60 = vrot.slane %v5516_v57, %v11967_v7 }
0x21a9   :  { %v5522_v13 = vpop.permute.xlu0 %5521  ;;  %v5567_v11 = vsel %vm529_vm2, %v5542_v60, %v5538_v58 }
0x21aa   :  { %v5519_v16 = vpop.permute.xlu1 %5518  ;;  %v5550_v12 = vrot.slane %v5522_v13, %v11967_v7 }
0x21ab   :  { %v5546_v24 = vrot.slane %v5519_v16, %v11967_v7 }
0x21ad   :  { %v5568_v5 = vsel %vm531_vm3, %v5546_v24, %v5567_v11  ;;  %v5528_v15 = vpop.permute.xlu0 %5527 }
0x21ae   :  { %v5525_v19 = vpop.permute.xlu1 %5524  ;;  %v5569_v46 = vsel %vm533_vm4, %v5550_v12, %v5568_v5  ;;  %v5558_v59 = vrot.slane %v5528_v15, %v11967_v7 }
0x21af   :  { %v5554_v4 = vrot.slane %v5525_v19, %v11967_v7 }
0x21b1   :  { %v5570_v47 = vsel %vm535_vm5, %v5554_v4, %v5569_v46  ;;  %v5534_v36 = vpop.permute.xlu0 %5533 }
0x21b2   :  { %v5531_v9 = vpop.permute.xlu1 %5530  ;;  %v5566_v29 = vrot.slane %v5534_v36, %v11967_v7  ;;  %v5571_v53 = vsel %vm537_vm6, %v5558_v59, %v5570_v47  ;;  %v5637_v59 = vld [vmem:[#allocation8 + $0x4] sm:$0xf] }
0x21b3   :  { %v5562_v52 = vrot.slane %v5531_v9, %v11967_v7  ;;  %v5714_v47 = vsel %vm767_vm10, %v5637_v59, 0 }
0x21b4   :  { %10902 = vmatpush3.bf16.msra.mxu0 %v5714_v47 }
0x21b5   :  { %v5572_v23 = vsel %vm539_vm7, %v5562_v52, %v5571_v53  ;;  %10913 = vmatprep.subr.bf16.mxu0 %v11726_v1 }
0x21b6   :  { %v5573_v40 = vsel %vm541_vm8, %v5566_v29, %v5572_v23 }
0x21b7   :  { %v5575_v63 = vsel %vm544_vm9, %v5573_v40, 0.0 }
0x21b8   :  { %5576 = vadd.xlane.f32.xlu1 %v5575_v63 }
0x21c9   :  { %6158 = vrot.lane.b32.xlu1 %v12895_v45, %s11728_s13 }
0x2245   :  { %v5577_v20 = vpop.xlane.xlu1 %5576 }
0x2246   :  { %11434 = vrcp.f32 %v5577_v20 }
0x2250   :  { %v11435_v37 = vpop.eup %11434 }
0x2251   :  { %v5583_v57 = vrot.slane %v11435_v37, %v11895_v44  ;;  %v5587_v60 = vrot.slane %v11435_v37, %v11986_v41  ;;  %v5591_v16 = vrot.slane %v11435_v37, %v11989_v42  ;;  %v5595_v5 = vrot.slane %v11435_v37, %v11992_v43 }
0x2252   :  { %v5599_v46 = vrot.slane %v11435_v37, %v11998_v51  ;;  %v5611_v63 = vrot.slane %v11435_v37, %v12010_v3 }
0x2253   :  { %v5620_v58 = vmul.f32 %v11419_v30, %v5583_v57  ;;  %v5621_v13 = vmul.f32 %v11421_v35, %v5587_v60  ;;  %v5622_v12 = vmul.f32 %v11425_v10, %v5591_v16  ;;  %v5623_v4 = vmul.f32 %v11423_v54, %v5595_v5 }
0x2254   :  { %v5624_v36 = vmul.f32 %v11429_v34, %v5599_v46  ;;  %v5603_v10 = vrot.slane %v11435_v37, %v12002_v56  ;;  %v5607_v54 = vrot.slane %v11435_v37, %v12006_v61  ;;  %v5627_v34 = vmul.f32 %v12987_v55, %v5611_v63  ;;  %v5641_v46 = vld [vmem:[#allocation8 + $0x14] sm:$0xf] }
0x2255   :  { %v5628_v24 = vpack.c.bf16 %v5620_v58, %v5620_v58  ;;  %v5629_v45 = vpack.c.bf16 %v5621_v13, %v5621_v13  ;;  %v5630_v19 = vpack.c.bf16 %v5622_v12, %v5622_v12  ;;  %v5631_v35 = vpack.c.bf16 %v5623_v4, %v5623_v4  ;;  %v5638_v58 = vld [vmem:[#allocation8 + $0x8] sm:$0xf]  ;;  %v5640_v12 = vld [vmem:[#allocation8 + $0x10] sm:$0xf] }
0x2256   :  { %v5632_v29 = vpack.c.bf16 %v5624_v36, %v5624_v36  ;;  %v5625_v52 = vmul.f32 %v12984_v27, %v5603_v10  ;;  %v5626_v40 = vmul.f32 %v12989_v2, %v5607_v54  ;;  %v5635_v57 = vpack.c.bf16 %v5627_v34, %v5627_v34  ;;  %v5642_v36 = vld [vmem:[#allocation8 + $0x18] sm:$0xf]  ;;  %v5643_v54 = vld [vmem:[#allocation8 + $0x1c] sm:$0xf] }
0x2257   :  { %v5645_v11 = vunpack.c.l.b16 %v5628_v24  ;;  %v5701_v15 = vunpack.c.l.b16 %v5629_v45  ;;  %v5757_v30 = vunpack.c.l.b16 %v5630_v19  ;;  %v5813_v9 = vunpack.c.l.b16 %v5631_v35  ;;  %v5639_v24 = vld [vmem:[#allocation8 + $0xc] sm:$0xf] }
0x2258   :  { %v5869_v53 = vunpack.c.l.b16 %v5632_v29  ;;  %v5633_v23 = vpack.c.bf16 %v5625_v52, %v5625_v52  ;;  %v5634_v17 = vpack.c.bf16 %v5626_v40, %v5626_v40  ;;  %v6037_v60 = vunpack.c.l.b16 %v5635_v57 }
0x2259   :  { %5647 = vperm.xlu0 %11168, %v5645_v11   ;;  %v5770_v37 = vsel %vm767_vm10, %v5638_v58, 0  ;;  %v5882_v19 = vsel %vm767_vm10, %v5640_v12, 0  ;;  %v5994_v29 = vsel %vm767_vm10, %v5642_v36, 0  ;;  %v6050_v40 = vsel %vm767_vm10, %v5643_v54, 0 }
0x225a   :  { %v5925_v50 = vunpack.c.l.b16 %v5633_v23  ;;  %v5981_v20 = vunpack.c.l.b16 %v5634_v17 }
0x225d   :  { %5703 = vperm.xlu0 %11168, %v5701_v15  }
0x2261   :  { %5759 = vperm.xlu0 %11168, %v5757_v30   ;;  %v5938_v30 = vsel %vm767_vm10, %v5641_v46, 0 }
0x2265   :  { %5815 = vperm.xlu0 %11168, %v5813_v9  }
0x2269   :  { %5871 = vperm.xlu0 %11168, %v5869_v53  }
0x226d   :  { %5927 = vperm.xlu0 %11168, %v5925_v50  }
0x2271   :  { %5983 = vperm.xlu0 %11168, %v5981_v20  }
0x2275   :  { %6039 = vperm.xlu0 %11168, %v6037_v60   ;;  %v11209_v60 = vld [vmem:[%s13825_s6] sm:$0xff]  }
0x2279   :  { %6156 = vrot.lane.b32.xlu0 %v12884_v25, %s11728_s13  ;;  %v5826_v25 = vsel %vm767_vm10, %v5639_v24, 0 }
0x22d8   :  { %v5648_v27 = vpop.permute.xlu0 %5647 }
0x22d9   :  { %v5652_v2 = vrot.slane %v5648_v27, %v11967_v7  ;;  %v11210_v27 = vld [vmem:[%s13825_s6 + $0x8] sm:$0xff]  }
0x22db   :  { %v5653_v13 = vpack.c.b16 %v5652_v2, %v5652_v2 }
0x22dc   :  { %v5704_v16 = vpop.permute.xlu0 %5703 }
0x22dd   :  { %v5708_v55 = vrot.slane %v5704_v16, %v11967_v7  ;;  %10898 = vmatmul.mubr.msk.bf16.vlgmr.msra.gmra.mrb[92].mxu1 %vm544_vm9, %v5653_v13 }
0x22de   :  { %10908 = vmatpush3.bf16.msra.mxu1 %v5770_v37  ;;  %10909 = vmatprep.mubr.msk.bf16.mxu1 %vm11729_vm11, %v11726_v1 }
0x22df   :  { %v5709_v11 = vpack.c.b16 %v5708_v55, %v5708_v55  ;;  %10919 = vmatprep.subr.bf16.mxu1 %v11726_v1 }
0x22e0   :  { %v5760_v45 = vpop.permute.xlu0 %5759 }
0x22e1   :  { %v5764_v5 = vrot.slane %v5760_v45, %v11967_v7  ;;  %10904 = vmatmul.mubr.msk.bf16.vlgmr.msra.gmra.mrb[96].mxu0 %vm544_vm9, %v5709_v11 }
0x22e2   :  { %10914 = vmatpush3.bf16.msra.mxu0 %v5826_v25  ;;  %10915 = vmatprep.mubr.msk.bf16.mxu0 %vm11729_vm11, %v11726_v1 }
0x22e3   :  { %v5765_v15 = vpack.c.b16 %v5764_v5, %v5764_v5  ;;  %10925 = vmatprep.subr.bf16.mxu0 %v11726_v1 }
0x22e4   :  { %v5816_v4 = vpop.permute.xlu0 %5815 }
0x22e5   :  { %v5820_v59 = vrot.slane %v5816_v4, %v11967_v7  ;;  %10910 = vmatmul.mubr.msk.bf16.vlgmr.msra.gmra.mrb[96].mxu1 %vm544_vm9, %v5765_v15 }
0x22e6   :  { %10920 = vmatpush3.bf16.msra.mxu1 %v5882_v19  ;;  %10921 = vmatprep.mubr.msk.bf16.mxu1 %vm11729_vm11, %v11726_v1 }
0x22e7   :  { %v5821_v47 = vpack.c.b16 %v5820_v59, %v5820_v59  ;;  %10931 = vmatprep.subr.bf16.mxu1 %v11726_v1 }
0x22e8   :  { %v5872_v35 = vpop.permute.xlu0 %5871 }
0x22e9   :  { %v5876_v10 = vrot.slane %v5872_v35, %v11967_v7  ;;  %10916 = vmatmul.mubr.msk.bf16.vlgmr.msra.gmra.mrb[100].mxu0 %vm544_vm9, %v5821_v47 }
0x22ea   :  { %10926 = vmatpush3.bf16.msra.mxu0 %v5938_v30  ;;  %10927 = vmatprep.mubr.msk.bf16.mxu0 %vm11729_vm11, %v11726_v1 }
0x22eb   :  { %v5877_v9 = vpack.c.b16 %v5876_v10, %v5876_v10  ;;  %10937 = vmatprep.subr.bf16.mxu0 %v11726_v1 }
0x22ec   :  { %v5928_v52 = vpop.permute.xlu0 %5927 }
0x22ed   :  { %v5932_v53 = vrot.slane %v5928_v52, %v11967_v7  ;;  %10922 = vmatmul.mubr.msk.bf16.vlgmr.msra.gmra.mrb[100].mxu1 %vm544_vm9, %v5877_v9 }
0x22ee   :  { %10932 = vmatpush3.bf16.msra.mxu1 %v5994_v29  ;;  %10933 = vmatprep.mubr.msk.bf16.mxu1 %vm11729_vm11, %v11726_v1 }
0x22ef   :  { %v5933_v23 = vpack.c.b16 %v5932_v53, %v5932_v53  ;;  %10943 = vmatprep.subr.bf16.mxu1 %v11726_v1 }
0x22f0   :  { %v5984_v63 = vpop.permute.xlu0 %5983 }
0x22f1   :  { %v5988_v50 = vrot.slane %v5984_v63, %v11967_v7  ;;  %10928 = vmatmul.mubr.msk.bf16.vlgmr.msra.gmra.mrb[104].mxu0 %vm544_vm9, %v5933_v23 }
0x22f2   :  { %10938 = vmatpush3.bf16.msra.mxu0 %v6050_v40  ;;  %10939 = vmatprep.mubr.msk.bf16.mxu0 %vm11729_vm11, %v11726_v1 }
0x22f3   :  { %v5989_v17 = vpack.c.b16 %v5988_v50, %v5988_v50  ;;  %10951 = vmatprep.subr.bf16.mxu0 %v11726_v1 }
0x22f4   :  { %v6040_v34 = vpop.permute.xlu0 %6039 }
0x22f5   :  { %v6044_v20 = vrot.slane %v6040_v34, %v11967_v7  ;;  %10934 = vmatmul.mubr.msk.bf16.vlgmr.msra.gmra.mrb[104].mxu1 %vm544_vm9, %v5989_v17 }
0x22f6   :  { %10947 = vmatprep.mubr.msk.bf16.mxu1 %vm11729_vm11, %v11726_v1  ;;  %10944 = vmatpush3.bf16.msra.mxu1 %v11209_v60 }
0x22f7   :  { %v6045_v57 = vpack.c.b16 %v6044_v20, %v6044_v20  ;;  %10945 = vmatprep.subr.bf16.mxu1 %v11726_v1 }
0x22f9   :  { %10940 = vmatmul.mubr.msk.bf16.vlgmr.msra.gmra.mrb[108].mxu0 %vm544_vm9, %v6045_v57 }
0x22fa   :  { %10955 = vmatprep.mubr.msk.bf16.mxu0 %vm11729_vm11, %v11726_v1  ;;  %10946 = vmatpush3.bf16.msra.mxu1 %v11210_v27 }
0x23b0   :  { %v5694_v58 = vpop.f32.mrb[92].mxu1 }
0x23b1   :  { %v10899_v2 = vpop.f32.mrb[93].mxu1  ;;  %v6100_v24 = vpack.c.bf16 %v5694_v58, %v5694_v58 }
0x23b2   :  { %v5697_v13 = vpop.f32.mrb[94].mxu1 }
0x23b3   :  { %v10900_v37 = vpop.f32.mrb[95].mxu1  ;;  %v6120_v15 = vunpack.c.l.b16 %v6100_v24 }
0x23b4   :  { %v5750_v16 = vpop.f32.mrb[96].mxu0 }
0x23b5   :  { %v6101_v55 = vpack.c.bf16 %v5750_v16, %v5750_v16  ;;  %v10905_v11 = vpop.f32.mrb[97].mxu0 }
0x23b6   :  { %v5753_v25 = vpop.f32.mrb[98].mxu0 }
0x23b7   :  { %v6121_v45 = vunpack.c.l.b16 %v6101_v55  ;;  %v10906_v12 = vpop.f32.mrb[99].mxu0 }
0x23b8   :  { %v5806_v5 = vpop.f32.mrb[96].mxu1 }
0x23b9   :  { %v6128_v19 = vrot.slane %v6121_v45, 7  ;;  %v6102_v4 = vpack.c.bf16 %v5806_v5, %v5806_v5  ;;  %v10911_v46 = vpop.f32.mrb[97].mxu1 }
0x23ba   :  { %v5809_v59 = vpop.f32.mrb[98].mxu1 }
0x23bb   :  { %v6129_v47 = vsel %vm529_vm2, %v6128_v19, %v6120_v15  ;;  %v6122_v30 = vunpack.c.l.b16 %v6102_v4  ;;  %v10912_v35 = vpop.f32.mrb[99].mxu1 }
0x23bc   :  { %v5862_v36 = vpop.f32.mrb[100].mxu0 }
0x23bd   :  { %v6130_v10 = vrot.slane %v6122_v30, 6  ;;  %v6103_v9 = vpack.c.bf16 %v5862_v36, %v5862_v36  ;;  %v10917_v29 = vpop.f32.mrb[101].mxu0 }
0x23be   :  { %v5865_v52 = vpop.f32.mrb[102].mxu0 }
0x23bf   :  { %v6131_v54 = vsel %vm531_vm3, %v6130_v10, %v6129_v47  ;;  %v6123_v53 = vunpack.c.l.b16 %v6103_v9  ;;  %v10918_v23 = vpop.f32.mrb[103].mxu0 }
0x23c0   :  { %v5918_v40 = vpop.f32.mrb[100].mxu1  ;;  %v6094_v23 = vld [vmem:[#allocation5 + $0x14] sm:$0x1] }
0x23c1   :  { %v6132_v63 = vrot.slane %v6123_v53, 5  ;;  %v6104_v50 = vpack.c.bf16 %v5918_v40, %v5918_v40  ;;  %v10923_v17 = vpop.f32.mrb[101].mxu1  ;;  %v6093_v53 = vld [vmem:[#allocation5 + $0xc] sm:$0x1] }
0x23c2   :  { %v5921_v34 = vpop.f32.mrb[102].mxu1  ;;  %v6213_v40 = vrot.slane %v6093_v53, 7  ;;  %v6215_v17 = vrot.slane %v6094_v23, 6 }
0x23c3   :  { %v6133_v20 = vsel %vm533_vm4, %v6132_v63, %v6131_v54  ;;  %v6124_v57 = vunpack.c.l.b16 %v6104_v50  ;;  %v10924_v60 = vpop.f32.mrb[103].mxu1  ;;  %v6092_v63 = vld [vmem:[#allocation5 + $0x4] sm:$0x1]  ;;  %v6095_v50 = vld [vmem:[#allocation5 + $0x1c] sm:$0x1] }
0x23c4   :  { %v5974_v27 = vpop.f32.mrb[104].mxu0  ;;  %v6214_v34 = vsel %vm529_vm2, %v6213_v40, %v6092_v63 }
0x23c5   :  { %v6134_v58 = vrot.slane %v6124_v57, 4  ;;  %v6105_v2 = vpack.c.bf16 %v5974_v27, %v5974_v27  ;;  %v10929_v13 = vpop.f32.mrb[105].mxu0  ;;  %v6217_v57 = vrot.slane %v6095_v50, 5  ;;  %v6216_v60 = vsel %vm531_vm3, %v6215_v17, %v6214_v34  ;;  %v6097_v27 = vld [vmem:[#allocation5 + $0x2c] sm:$0x1]  ;;  %v11214_v34 = vld [vmem:[#allocation13] sm:$0xff]  }
0x23c6   :  { %v5977_v37 = vpop.f32.mrb[106].mxu0  ;;  %v6098_v13 = vld [vmem:[#allocation5 + $0x34] sm:$0x1]  ;;  %v13102_v50 = vld [vmem:[#allocation11] ss:$8 sps:$4 sm:$0xff]   ;;  %10952 = vmatpush3.bf16.msra.mxu0 %v11214_v34 }
0x23c7   :  { %v6135_v16 = vsel %vm535_vm5, %v6134_v58, %v6133_v20  ;;  %v6125_v24 = vunpack.c.l.b16 %v6105_v2  ;;  %v10930_v55 = vpop.f32.mrb[107].mxu0  ;;  %v6096_v20 = vld [vmem:[#allocation5 + $0x24] sm:$0x1]  ;;  %v6218_v2 = vsel %vm533_vm4, %v6217_v57, %v6216_v60  ;;  %v6221_v37 = vrot.slane %v6097_v27, 3  ;;  %v13104_v17 = vld [vmem:[#allocation11 + $0x4] ss:$8 sps:$4 sm:$0xff]   ;;  %10953 = vmatprep.subr.bf16.mxu0 %v11726_v1 }
0x23c8   :  { %v6030_v11 = vpop.f32.mrb[104].mxu1  ;;  %v6219_v58 = vrot.slane %v6096_v20, 4  ;;  %v6223_v55 = vrot.slane %v6098_v13, 2  ;;  %6413 = vmatprep.subr.bf16.mxu1 %v13104_v17  ;;  %v11215_v20 = vld [vmem:[#allocation13 + $0x8] sm:$0xff]  }
0x23c9   :  { %v6136_v25 = vrot.slane %v6125_v24, 3  ;;  %v6106_v45 = vpack.c.bf16 %v6030_v11, %v6030_v11  ;;  %v10935_v12 = vpop.f32.mrb[105].mxu1  ;;  %v6099_v24 = vld [vmem:[#allocation5 + $0x3c] sm:$0x1] }
0x23ca   :  { %v6033_v5 = vpop.f32.mrb[106].mxu1  ;;  %10954 = vmatpush3.bf16.msra.mxu0 %v11215_v20 }
0x23cb   :  { %v6137_v15 = vsel %vm537_vm6, %v6136_v25, %v6135_v16  ;;  %v6126_v19 = vunpack.c.l.b16 %v6106_v45  ;;  %v10936_v4 = vpop.f32.mrb[107].mxu1  ;;  %v6220_v16 = vsel %vm535_vm5, %v6219_v58, %v6218_v2  ;;  %v6225_v25 = vrot.slane %v6099_v24, 1  ;;  %v6157_v45 = vpop.permute.xlu0 %6156  ;;  %10959 = vmatprep.subr.bf16.mxu0 %v11726_v1 }
0x23cc   :  { %v6086_v46 = vpop.f32.mrb[108].mxu0  ;;  %v6222_v11 = vsel %vm537_vm6, %v6221_v37, %v6220_v16  ;;  %v6159_v5 = vpop.permute.xlu1 %6158 }
0x23cd   :  { %v6138_v59 = vrot.slane %v6126_v19, 2  ;;  %v6107_v47 = vpack.c.bf16 %v6086_v46, %v6086_v46  ;;  %v10941_v30 = vpop.f32.mrb[109].mxu0  ;;  %v6224_v12 = vsel %vm539_vm7, %v6223_v55, %v6222_v11 }
0x23ce   :  { %v6089_v35 = vpop.f32.mrb[110].mxu0  ;;  %v6226_v4 = vsel %vm541_vm8, %v6225_v25, %v6224_v12 }
0x23cf   :  { %v6139_v36 = vsel %vm539_vm7, %v6138_v59, %v6137_v15  ;;  %v6127_v10 = vunpack.c.l.b16 %v6107_v47  ;;  %v10942_v9 = vpop.f32.mrb[111].mxu0  ;;  %v6160_v15 = vsel %vm1271_vm12, %v6157_v45, %v6159_v5 }
0x23d1   :  { %v6140_v29 = vrot.slane %v6127_v10, 1 }
0x23d3   :  { %v6141_v52 = vsel %vm541_vm8, %v6140_v29, %v6139_v36 }
0x23d4   :  { %v6142_v54 = vpack.c.b16 %v6141_v52, %v6141_v52 }
0x23d6   :  { %10948 = vmatmul.mubr.msk.bf16.vlgmr.msra.gmra.mrb[108].mxu1 %vm106_vm0, %v6142_v54 }
0x23d7   :  { %6445 = vmatprep.mubr.bf16.mxu1 %v11725_v0  ;;  %6414 = vmatpush1.bf16.msra.mxu1 %v13102_v50 }
0x23d8   :  { %6415 = vmatprep.subr.bf16.mxu1 %v12869_v31 }
0x23db   :  { %6416 = vmatpush1.bf16.msra.mxu1 %v12867_v28  ;;  %v13124_v28 = vld [vmem:[%s13827_s8] ss:$0 sm:$0xff] }
0x23dc   :  { %10965 = vmatprep.subr.bf16.mxu1 %v11726_v1 }
0x24a9   :  { %v6199_v19 = vpop.f32.mrb[108].mxu1 }
0x24aa   :  { %v6200_v46 = vadd.f32 %v6199_v19, %v6160_v15  ;;  %v10949_v59 = vpop.f32.mrb[109].mxu1 }
0x24ab   :  { %v6202_v47 = vpop.f32.mrb[110].mxu1 }
0x24ac   :  { %v6228_v30 = vadd.f32 %v6226_v4, %v6200_v46  ;;  %v10950_v35 = vpop.f32.mrb[111].mxu1 }
0x24ae   :  { %11436 = vtanh.f32 %v6228_v30  ;;  %v10209_v10 = vmul.f32 -1.442695, %v6228_v30 }
0x24b0   :  { %11438 = vpow2.f32 %v10209_v10 }
0x24b8   :  { %v11437_v36 = vpop.eup %11436 }
0x24b9   :  { %6238 = vrot.lane.b32.xlu0 %v11437_v36, %s11717_s19 }
0x24ba   :  { %v11439_v9 = vpop.eup %11438 }
0x24bb   :  { %v6232_v29 = vadd.f32 1.0, %v11439_v9 }
0x24bd   :  { %11440 = vrcp.f32 %v6232_v29 }
0x24c7   :  { %v11441_v52 = vpop.eup %11440 }
0x24c8   :  { %v6236_v23 = vmul.f32 %v11441_v52, %v12864_v26 }
0x252b   :  { %v6239_v54 = vpop.permute.xlu0 %6238 }
0x252c   :  { %v6241_v53 = vmul.f32 %v11441_v52, %v6239_v54 }
0x252e   :  { %6243 = vrot.lane.b32.xlu0 %v6241_v53, %s11730_s18 }
0x25a0   :  { %v6244_v40 = vpop.permute.xlu0 %6243 }
0x25a1   :  { %v13099_v63 = vadd.f32 %v6244_v40, %v6236_v23 }
0x25a3   :  { %11442 = vtanh.f32 %v13099_v63 }
0x25ad   :  { %v11443_v26 = vpop.eup %11442 }
0x25ae   :  { %6249 = vrot.lane.b32.xlu0 %v11443_v26, %s11717_s19 }
0x2620   :  { %v6250_v57 = vpop.permute.xlu0 %6249 }
0x2621   :  { %v6252_v60 = vmul.f32 %v11441_v52, %v6250_v57 }
0x2623   :  { %v6253_v27 = vpack.c.bf16 %v6252_v60, %v6252_v60 }
0x2625   :  { %6266 = vrot.lane.b32.xlu0 %v6253_v27, %s11730_s18 }
0x2697   :  { %v6267_v58 = vpop.permute.xlu0 %6266 }
0x2698   :  { %10956 = vmatmul.mubr.msk.bf16.vlgmr.msra.gmra.mrb[112].mxu0 %vm106_vm0, %v6267_v58  ;;  %10222 = vmatmul.mubr.msk.bf16.vlgmr.msra.gmra.mrb[112].mxu1 %vm106_vm0, %v6267_v58 }
0x2699   :  { %10961 = vmatprep.mubr.msk.bf16.mxu0 %vm11729_vm11, %v11726_v1  ;;  %10967 = vmatprep.mubr.msk.bf16.mxu1 %vm11729_vm11, %v11726_v1 }
0x276b   :  { %v6317_v31 = vpop.f32.mrb[112].mxu0  ;;  %v13126_v2 = vpop.f32.mrb[112].mxu1 }
0x276c   :  { %v6318_v13 = vadd.f32 %v13124_v28, %v6317_v31  ;;  %v6471_v37 = vcombine.high %v13126_v2, %v13126_v2  ;;  %v6478_v16 = vrot.slane %v13126_v2, %v11878_v21  ;;  %v10957_v24 = vpop.f32.mrb[113].mxu0  ;;  %v13133_v55 = vpop.f32.mrb[113].mxu1 }
0x276d   :  { %v6320_v11 = vpop.f32.mrb[114].mxu0  ;;  %v6451_v25 = vpop.f32.mrb[114].mxu1 }
0x276e   :  { %v6324_v45 = vcombine.high %v6318_v13, %v6318_v13  ;;  %v6331_v12 = vrot.slane %v6318_v13, %v11878_v21  ;;  %v6485_v5 = vrot.slane %v6471_v37, %v11878_v21  ;;  %v6486_v15 = vcombine.high %v6478_v16, %v6478_v16  ;;  %v10958_v19 = vpop.f32.mrb[115].mxu0  ;;  %v6452_v4 = vpop.f32.mrb[115].mxu1 }
0x276f   :  { %v6494_v46 = vrot.slane %v6478_v16, %v11878_v21 }
0x2770   :  { %v6338_v59 = vrot.slane %v6324_v45, %v11878_v21  ;;  %v6339_v47 = vcombine.high %v6331_v12, %v6331_v12  ;;  %v6347_v30 = vrot.slane %v6331_v12, %v11878_v21  ;;  %10214 = vst.sshfl [vmem:[#allocation14 + $0x4] sm:$0x1 pattern:$0x73625140] %v6331_v12  ;;  %v6487_v35 = vcombine.high %v6485_v5, %v6485_v5 }
0x2771   :  { %v6501_v36 = vrot.slane %v6485_v5, %v11878_v21  ;;  %v6508_v10 = vrot.slane %v6486_v15, %v11878_v21  ;;  %v6516_v9 = vcombine.high %v6494_v46, %v6494_v46  ;;  %v6523_v29 = vrot.slane %v6494_v46, %v11895_v44 }
0x2772   :  { %v6340_v52 = vcombine.high %v6338_v59, %v6338_v59  ;;  %v6354_v54 = vrot.slane %v6338_v59, %v11878_v21  ;;  %v6361_v53 = vrot.slane %v6339_v47, %v11878_v21  ;;  %v6369_v23 = vcombine.high %v6347_v30, %v6347_v30  ;;  %10215 = vst.sshfl [vmem:[#allocation14 + $0xc] sm:$0x1 pattern:$0x73625140] %v6339_v47 }
0x2773   :  { %10216 = vst.sshfl [vmem:[#allocation14 + $0x24] sm:$0x1 pattern:$0x73625140] %v6338_v59  ;;  %v6515_v40 = vrot.slane %v6487_v35, %v11878_v21  ;;  %v6517_v34 = vcombine.high %v6501_v36, %v6501_v36  ;;  %v6518_v20 = vcombine.high %v6508_v10, %v6508_v10  ;;  %v6527_v26 = vrot.slane %v6508_v10, %v11895_v44 }
0x2774   :  { %v6368_v57 = vrot.slane %v6340_v52, %v11878_v21  ;;  %v6370_v60 = vcombine.high %v6354_v54, %v6354_v54  ;;  %v6371_v27 = vcombine.high %v6361_v53, %v6361_v53  ;;  %6383 = vst [vmem:[#allocation14 + $0x14] sm:$0x1] %v6369_v23  ;;  %10217 = vst.sshfl [vmem:[#allocation14 + $0x2c] sm:$0x1 pattern:$0x73625140] %v6340_v52 }
0x2775   :  { %v6531_v58 = vrot.slane %v6516_v9, %v11895_v44  ;;  %v6519_v31 = vcombine.high %v6515_v40, %v6515_v40  ;;  %v6535_v13 = vrot.slane %v6518_v20, %v11895_v44  ;;  %v6539_v37 = vrot.slane %v6501_v36, %v11895_v44 }
0x2776   :  { %v6543_v16 = vrot.slane %v6515_v40, %v11895_v44  ;;  %v6372_v24 = vcombine.high %v6368_v57, %v6368_v57  ;;  %6384 = vst [vmem:[#allocation14 + $0x1c] sm:$0x1] %v6371_v27  ;;  %6387 = vst [vmem:[#allocation14 + $0x34] sm:$0x1] %v6370_v60  ;;  %v6560_v11 = vadd.f32 %v10359_v62, %v6523_v29 }
0x2777   :  { %v6561_v25 = vadd.f32 %v10360_v6, %v6527_v26  ;;  %v6562_v45 = vadd.f32 %v10363_v48, %v6531_v58  ;;  %v6563_v12 = vadd.f32 %v10364_v18, %v6535_v13  ;;  %v6551_v5 = vrot.slane %v6519_v31, %v11895_v44 }
0x2778   :  { %6388 = vst [vmem:[#allocation14 + $0x3c] sm:$0x1] %v6372_v24  ;;  %v6564_v15 = vadd.f32 %v10367_v49, %v6539_v37  ;;  %11444 = vtanh.f32 %v6560_v11  ;;  %v6547_v19 = vrot.slane %v6517_v34, %v11895_v44  ;;  %v6565_v62 = vadd.f32 %v10368_v22, %v6543_v16 }
0x2779   :  { %11446 = vtanh.f32 %v6561_v25  ;;  %v6567_v8 = vadd.f32 %v10372_v39, %v6551_v5 }
0x277a   :  { %11448 = vtanh.f32 %v6562_v45  ;;  %v6566_v38 = vadd.f32 %v10371_v14, %v6547_v19 }
0x277b   :  { %11450 = vtanh.f32 %v6563_v12 }
0x277c   :  { %11452 = vtanh.f32 %v6564_v15 }
0x277d   :  { %11454 = vtanh.f32 %v6565_v62 }
0x277e   :  { %11456 = vtanh.f32 %v6567_v8 }
0x277f   :  { %11458 = vtanh.f32 %v6566_v38 }
0x2782   :  { %v11445_v6 = vpop.eup %11444 }
0x2783   :  { %v11447_v48 = vpop.eup %11446  ;;  %v6576_v18 = vmul.f32 %v13173_v32, %v11445_v6 }
0x2784   :  { %v11449_v49 = vpop.eup %11448  ;;  %v6577_v22 = vmul.f32 %v13173_v32, %v11447_v48 }
0x2785   :  { %v11451_v4 = vpop.eup %11450  ;;  %v6584_v39 = vsel %vm106_vm0, %v6576_v18, 0.0  ;;  %v6578_v59 = vmul.f32 %v13173_v32, %v11449_v49 }
0x2786   :  { %v11453_v33 = vpop.eup %11452  ;;  %6585 = vadd.xlane.f32.xlu1 %v6584_v39  ;;  %v6587_v14 = vsel %vm106_vm0, %v6577_v22, 0.0  ;;  %v6579_v46 = vmul.f32 %v13173_v32, %v11451_v4 }
0x2787   :  { %v11455_v47 = vpop.eup %11454  ;;  %6588 = vadd.xlane.f32.xlu0 %v6587_v14  ;;  %v6590_v10 = vsel %vm106_vm0, %v6578_v59, 0.0  ;;  %v6580_v9 = vmul.f32 %v13173_v32, %v11453_v33 }
0x2788   :  { %v6593_v30 = vsel %vm106_vm0, %v6579_v46, 0.0  ;;  %v6581_v35 = vmul.f32 %v13173_v32, %v11455_v47  ;;  %v11457_v36 = vpop.eup %11456 }
0x2789   :  { %v11459_v29 = vpop.eup %11458  ;;  %v6583_v54 = vmul.f32 %v13173_v32, %v11457_v36  ;;  %v6596_v53 = vsel %vm106_vm0, %v6580_v9, 0.0 }
0x278a   :  { %6594 = vadd.xlane.f32.xlu1 %v6593_v30  ;;  %v6599_v52 = vsel %vm106_vm0, %v6581_v35, 0.0  ;;  %v6582_v23 = vmul.f32 %v13173_v32, %v11459_v29 }
0x278b   :  { %6591 = vadd.xlane.f32.xlu0 %v6590_v10  ;;  %v6605_v40 = vsel %vm106_vm0, %v6583_v54, 0.0 }
0x278c   :  { %v6602_v34 = vsel %vm106_vm0, %v6582_v23, 0.0 }
0x278e   :  { %6600 = vadd.xlane.f32.xlu1 %v6599_v52 }
0x278f   :  { %6597 = vadd.xlane.f32.xlu0 %v6596_v53 }
0x2792   :  { %6606 = vadd.xlane.f32.xlu1 %v6605_v40 }
0x2793   :  { %6603 = vadd.xlane.f32.xlu0 %v6602_v34 }
0x2813   :  { %v6586_v20 = vpop.xlane.xlu1 %6585 }
0x2814   :  { %v6589_v26 = vpop.xlane.xlu0 %6588  ;;  %v6619_v27 = vrot.slane %v6586_v20, %v11967_v7 }
0x2815   :  { %v6623_v57 = vrot.slane %v6589_v26, %v11967_v7 }
0x2817   :  { %v6595_v60 = vpop.xlane.xlu1 %6594  ;;  %v6648_v13 = vsel %vm529_vm2, %v6623_v57, %v6619_v27 }
0x2818   :  { %v6592_v58 = vpop.xlane.xlu0 %6591  ;;  %v6631_v24 = vrot.slane %v6595_v60, %v11967_v7 }
0x2819   :  { %v6627_v31 = vrot.slane %v6592_v58, %v11967_v7 }
0x281b   :  { %v6649_v37 = vsel %vm531_vm3, %v6627_v31, %v6648_v13  ;;  %v6601_v16 = vpop.xlane.xlu1 %6600 }
0x281c   :  { %v6598_v11 = vpop.xlane.xlu0 %6597  ;;  %v6650_v45 = vsel %vm533_vm4, %v6631_v24, %v6649_v37  ;;  %v6639_v15 = vrot.slane %v6601_v16, %v11967_v7 }
0x281d   :  { %v6635_v25 = vrot.slane %v6598_v11, %v11967_v7 }
0x281f   :  { %v6651_v12 = vsel %vm535_vm5, %v6635_v25, %v6650_v45  ;;  %v6607_v5 = vpop.xlane.xlu1 %6606 }
0x2820   :  { %v6604_v19 = vpop.xlane.xlu0 %6603  ;;  %v6647_v8 = vrot.slane %v6607_v5, %v11967_v7  ;;  %v6652_v38 = vsel %vm537_vm6, %v6639_v15, %v6651_v12 }
0x2821   :  { %v6643_v62 = vrot.slane %v6604_v19, %v11967_v7 }
0x2823   :  { %v6653_v6 = vsel %vm539_vm7, %v6643_v62, %v6652_v38 }
0x2824   :  { %v6654_v48 = vsel %vm541_vm8, %v6647_v8, %v6653_v6 }
0x2825   :  { %v6656_v18 = vsel %vm544_vm9, %v6654_v48, -inf }
0x2826   :  { %6657 = vmax.xlane.f32.xlu0 %v6656_v18 }
0x28b3   :  { %v6658_v49 = vpop.xlane.xlu0 %6657 }
0x28b4   :  { %v6663_v22 = vrot.slane %v6658_v49, %v11895_v44  ;;  %v6667_v4 = vrot.slane %v6658_v49, %v11986_v41  ;;  %v6671_v39 = vrot.slane %v6658_v49, %v11989_v42  ;;  %v6679_v33 = vrot.slane %v6658_v49, %v11998_v51 }
0x28b5   :  { %v6675_v14 = vrot.slane %v6658_v49, %v11992_v43  ;;  %v6687_v30 = vrot.slane %v6658_v49, %v12006_v61  ;;  %v6683_v9 = vrot.slane %v6658_v49, %v12002_v56  ;;  %v6691_v23 = vrot.slane %v6658_v49, %v12010_v3 }
0x28b6   :  { %v6700_v46 = vsub.f32 %v6586_v20, %v6663_v22  ;;  %v6701_v59 = vsub.f32 %v6589_v26, %v6667_v4  ;;  %v6702_v47 = vsub.f32 %v6592_v58, %v6671_v39  ;;  %v6704_v35 = vsub.f32 %v6598_v11, %v6679_v33 }
0x28b7   :  { %v6703_v29 = vsub.f32 %v6595_v60, %v6675_v14  ;;  %v6706_v54 = vsub.f32 %v6604_v19, %v6687_v30  ;;  %v6705_v40 = vsub.f32 %v6601_v16, %v6683_v9  ;;  %v6707_v26 = vsub.f32 %v6607_v5, %v6691_v23 }
0x28b8   :  { %v6708_v36 = vmul.f32 1.442695, %v6700_v46  ;;  %v6710_v10 = vmul.f32 1.442695, %v6701_v59  ;;  %v6712_v52 = vmul.f32 1.442695, %v6702_v47 }
0x28b9   :  { %v6716_v53 = vmul.f32 1.442695, %v6704_v35  ;;  %v6714_v34 = vmul.f32 1.442695, %v6703_v29  ;;  %v6720_v20 = vmul.f32 1.442695, %v6706_v54 }
0x28ba   :  { %11460 = vpow2.f32 %v6708_v36  ;;  %v6718_v57 = vmul.f32 1.442695, %v6705_v40  ;;  %v6722_v60 = vmul.f32 1.442695, %v6707_v26 }
0x28bb   :  { %11462 = vpow2.f32 %v6710_v10  ;;  %v6857_v10 = vld [vmem:[#allocation8] sm:$0xf] }
0x28bc   :  { %11464 = vpow2.f32 %v6712_v52  ;;  %v6879_v9 = vsel %vm767_vm10, %v6857_v10, 0 }
0x28bd   :  { %11466 = vpow2.f32 %v6716_v53  ;;  %10960 = vmatpush3.bf16.msra.mxu0 %v6879_v9 }
0x28be   :  { %11468 = vpow2.f32 %v6714_v34  ;;  %10971 = vmatprep.subr.bf16.mxu0 %v11726_v1 }
0x28bf   :  { %11470 = vpow2.f32 %v6720_v20 }
0x28c0   :  { %11472 = vpow2.f32 %v6718_v57 }
0x28c1   :  { %11474 = vpow2.f32 %v6722_v60 }
0x28c4   :  { %v11461_v27 = vpop.eup %11460 }
0x28c5   :  { %v11463_v58 = vpop.eup %11462  ;;  %6733 = vperm.xlu1 %11167, %v11461_v27  }
0x28c6   :  { %6736 = vperm.xlu0 %11168, %v11463_v58   ;;  %v11465_v31 = vpop.eup %11464 }
0x28c7   :  { %v13215_v13 = vpop.eup %11466 }
0x28c8   :  { %v11469_v37 = vpop.eup %11468 }
0x28c9   :  { %6739 = vperm.xlu1 %11167, %v11465_v31   ;;  %v13218_v16 = vpop.eup %11470 }
0x28ca   :  { %6745 = vperm.xlu0 %11168, %v13215_v13   ;;  %v13221_v24 = vpop.eup %11472 }
0x28cb   :  { %v13224_v11 = vpop.eup %11474 }
0x28cd   :  { %6742 = vperm.xlu1 %11167, %v11469_v37  }
0x28ce   :  { %6751 = vperm.xlu0 %11168, %v13218_v16  }
0x28d1   :  { %6748 = vperm.xlu1 %11167, %v13221_v24  }
0x28d5   :  { %6754 = vperm.xlu1 %11167, %v13224_v11  }
0x2944   :  { %v6734_v25 = vpop.permute.xlu1 %6733 }
0x2945   :  { %v6737_v45 = vpop.permute.xlu0 %6736  ;;  %v6759_v15 = vrot.slane %v6734_v25, %v11967_v7 }
0x2946   :  { %v6763_v5 = vrot.slane %v6737_v45, %v11967_v7 }
0x2948   :  { %v6740_v12 = vpop.permute.xlu1 %6739  ;;  %v6788_v38 = vsel %vm529_vm2, %v6763_v5, %v6759_v15  ;;  %v6858_v15 = vld [vmem:[#allocation8 + $0x4] sm:$0xf] }
0x2949   :  { %v6767_v19 = vrot.slane %v6740_v12, %v11967_v7  ;;  %v6746_v62 = vpop.permute.xlu0 %6745 }
0x294a   :  { %v6775_v49 = vrot.slane %v6746_v62, %v11967_v7 }
0x294b   :  { %v6789_v48 = vsel %vm531_vm3, %v6767_v19, %v6788_v38  ;;  %v6935_v19 = vsel %vm767_vm10, %v6858_v15, 0 }
0x294c   :  { %v6743_v8 = vpop.permute.xlu1 %6742  ;;  %10966 = vmatpush3.bf16.msra.mxu1 %v6935_v19 }
0x294d   :  { %v6771_v6 = vrot.slane %v6743_v8, %v11967_v7  ;;  %v6752_v4 = vpop.permute.xlu0 %6751  ;;  %10977 = vmatprep.subr.bf16.mxu1 %v11726_v1 }
0x294e   :  { %v6783_v46 = vrot.slane %v6752_v4, %v11967_v7 }
0x294f   :  { %v6790_v18 = vsel %vm533_vm4, %v6771_v6, %v6789_v48 }
0x2950   :  { %v6749_v22 = vpop.permute.xlu1 %6748  ;;  %v6791_v33 = vsel %vm535_vm5, %v6775_v49, %v6790_v18 }
0x2951   :  { %v6779_v39 = vrot.slane %v6749_v22, %v11967_v7 }
0x2953   :  { %v6792_v14 = vsel %vm537_vm6, %v6779_v39, %v6791_v33 }
0x2954   :  { %v6755_v59 = vpop.permute.xlu1 %6754  ;;  %v6793_v30 = vsel %vm539_vm7, %v6783_v46, %v6792_v14 }
0x2955   :  { %v6787_v47 = vrot.slane %v6755_v59, %v11967_v7  ;;  %v6859_v59 = vld [vmem:[#allocation8 + $0x8] sm:$0xf] }
0x2957   :  { %v6794_v35 = vsel %vm541_vm8, %v6787_v47, %v6793_v30  ;;  %v6991_v30 = vsel %vm767_vm10, %v6859_v59, 0 }
0x2958   :  { %v6796_v36 = vsel %vm544_vm9, %v6794_v35, 0.0 }
0x2959   :  { %6797 = vadd.xlane.f32.xlu0 %v6796_v36  ;;  %v6860_v36 = vld [vmem:[#allocation8 + $0xc] sm:$0xf] }
0x296f   :  { %7377 = vrot.lane.b32.xlu0 %v13126_v2, %s11728_s13 }
0x29e6   :  { %v6798_v29 = vpop.xlane.xlu0 %6797 }
0x29e7   :  { %11476 = vrcp.f32 %v6798_v29  ;;  %v6861_v29 = vld [vmem:[#allocation8 + $0x10] sm:$0xf] }
0x29f1   :  { %v11477_v52 = vpop.eup %11476 }
0x29f2   :  { %v6804_v54 = vrot.slane %v11477_v52, %v11895_v44  ;;  %v6808_v53 = vrot.slane %v11477_v52, %v11986_v41  ;;  %v6812_v34 = vrot.slane %v11477_v52, %v11989_v42  ;;  %v6816_v60 = vrot.slane %v11477_v52, %v11992_v43 }
0x29f3   :  { %v6820_v5 = vrot.slane %v11477_v52, %v11998_v51  ;;  %v6828_v6 = vrot.slane %v11477_v52, %v12006_v61  ;;  %v6832_v22 = vrot.slane %v11477_v52, %v12010_v3 }
0x29f4   :  { %v6841_v23 = vmul.f32 %v11461_v27, %v6804_v54  ;;  %v6842_v40 = vmul.f32 %v11463_v58, %v6808_v53  ;;  %v6843_v57 = vmul.f32 %v11465_v31, %v6812_v34  ;;  %v6844_v12 = vmul.f32 %v11469_v37, %v6816_v60 }
0x29f5   :  { %v6845_v62 = vmul.f32 %v13215_v13, %v6820_v5  ;;  %v6824_v31 = vrot.slane %v11477_v52, %v12002_v56  ;;  %v6847_v49 = vmul.f32 %v13218_v16, %v6828_v6  ;;  %v6848_v13 = vmul.f32 %v13224_v11, %v6832_v22  ;;  %v6864_v5 = vld [vmem:[#allocation8 + $0x1c] sm:$0xf]  ;;  %v11216_v6 = vld [vmem:[%s13825_s6] sm:$0xff]  }
0x29f6   :  { %v6849_v20 = vpack.c.bf16 %v6841_v23, %v6841_v23  ;;  %v6850_v2 = vpack.c.bf16 %v6842_v40, %v6842_v40  ;;  %v6851_v45 = vpack.c.bf16 %v6843_v57, %v6843_v57  ;;  %v6852_v58 = vpack.c.bf16 %v6844_v12, %v6844_v12  ;;  %v6862_v40 = vld [vmem:[#allocation8 + $0x14] sm:$0xf]  ;;  %v6863_v57 = vld [vmem:[#allocation8 + $0x18] sm:$0xf] }
0x29f7   :  { %v6853_v38 = vpack.c.bf16 %v6845_v62, %v6845_v62  ;;  %v6846_v37 = vmul.f32 %v13221_v24, %v6824_v31  ;;  %v6855_v39 = vpack.c.bf16 %v6847_v49, %v6847_v49  ;;  %v6856_v14 = vpack.c.bf16 %v6848_v13, %v6848_v13 }
0x29f8   :  { %v6866_v26 = vunpack.c.l.b16 %v6849_v20  ;;  %v6922_v25 = vunpack.c.l.b16 %v6850_v2  ;;  %v6978_v27 = vunpack.c.l.b16 %v6851_v45  ;;  %v7034_v8 = vunpack.c.l.b16 %v6852_v58 }
0x29f9   :  { %v7090_v48 = vunpack.c.l.b16 %v6853_v38  ;;  %v6854_v18 = vpack.c.bf16 %v6846_v37, %v6846_v37  ;;  %v7202_v33 = vunpack.c.l.b16 %v6855_v39  ;;  %v7258_v46 = vunpack.c.l.b16 %v6856_v14 }
0x29fa   :  { %6868 = vperm.xlu1 %11167, %v6866_v26   ;;  %v7103_v53 = vsel %vm767_vm10, %v6861_v29, 0  ;;  %v7159_v26 = vsel %vm767_vm10, %v6862_v40, 0  ;;  %v7215_v45 = vsel %vm767_vm10, %v6863_v57, 0 }
0x29fb   :  { %v7146_v4 = vunpack.c.l.b16 %v6854_v18 }
0x29fe   :  { %6924 = vperm.xlu1 %11167, %v6922_v25  }
0x2a02   :  { %6980 = vperm.xlu1 %11167, %v6978_v27   ;;  %v7271_v27 = vsel %vm767_vm10, %v6864_v5, 0 }
0x2a06   :  { %7036 = vperm.xlu1 %11167, %v7034_v8  }
0x2a0a   :  { %7092 = vperm.xlu1 %11167, %v7090_v48   ;;  %v11217_v48 = vld [vmem:[%s13825_s6 + $0x8] sm:$0xff]  }
0x2a0e   :  { %7148 = vperm.xlu1 %11167, %v7146_v4  }
0x2a12   :  { %7204 = vperm.xlu1 %11167, %v7202_v33  }
0x2a16   :  { %7260 = vperm.xlu1 %11167, %v7258_v46  }
0x2a1a   :  { %7379 = vrot.lane.b32.xlu1 %v13133_v55, %s11728_s13  ;;  %v7047_v55 = vsel %vm767_vm10, %v6860_v36, 0 }
0x2a79   :  { %v6869_v24 = vpop.permute.xlu1 %6868 }
0x2a7a   :  { %v6873_v16 = vrot.slane %v6869_v24, %v11967_v7 }
0x2a7c   :  { %v6874_v47 = vpack.c.b16 %v6873_v16, %v6873_v16 }
0x2a7d   :  { %v6925_v35 = vpop.permute.xlu1 %6924 }
0x2a7e   :  { %v6929_v11 = vrot.slane %v6925_v35, %v11967_v7  ;;  %10962 = vmatmul.mubr.msk.bf16.vlgmr.msra.gmra.mrb[116].mxu0 %vm544_vm9, %v6874_v47 }
0x2a7f   :  { %10972 = vmatpush3.bf16.msra.mxu0 %v6991_v30  ;;  %10973 = vmatprep.mubr.msk.bf16.mxu0 %vm11729_vm11, %v11726_v1 }
0x2a80   :  { %v6930_v10 = vpack.c.b16 %v6929_v11, %v6929_v11  ;;  %10983 = vmatprep.subr.bf16.mxu0 %v11726_v1 }
0x2a81   :  { %v6981_v9 = vpop.permute.xlu1 %6980 }
0x2a82   :  { %v6985_v52 = vrot.slane %v6981_v9, %v11967_v7  ;;  %10968 = vmatmul.mubr.msk.bf16.vlgmr.msra.gmra.mrb[116].mxu1 %vm544_vm9, %v6930_v10 }
0x2a83   :  { %10978 = vmatpush3.bf16.msra.mxu1 %v7047_v55  ;;  %10979 = vmatprep.mubr.msk.bf16.mxu1 %vm11729_vm11, %v11726_v1 }
0x2a84   :  { %v6986_v54 = vpack.c.b16 %v6985_v52, %v6985_v52  ;;  %10989 = vmatprep.subr.bf16.mxu1 %v11726_v1 }
0x2a85   :  { %v7037_v23 = vpop.permute.xlu1 %7036 }
0x2a86   :  { %v7041_v34 = vrot.slane %v7037_v23, %v11967_v7  ;;  %10974 = vmatmul.mubr.msk.bf16.vlgmr.msra.gmra.mrb[120].mxu0 %vm544_vm9, %v6986_v54 }
0x2a87   :  { %10984 = vmatpush3.bf16.msra.mxu0 %v7103_v53  ;;  %10985 = vmatprep.mubr.msk.bf16.mxu0 %vm11729_vm11, %v11726_v1 }
0x2a88   :  { %v7042_v20 = vpack.c.b16 %v7041_v34, %v7041_v34  ;;  %10995 = vmatprep.subr.bf16.mxu0 %v11726_v1 }
0x2a89   :  { %v7093_v2 = vpop.permute.xlu1 %7092 }
0x2a8a   :  { %v7097_v60 = vrot.slane %v7093_v2, %v11967_v7  ;;  %10980 = vmatmul.mubr.msk.bf16.vlgmr.msra.gmra.mrb[120].mxu1 %vm544_vm9, %v7042_v20 }
0x2a8b   :  { %10990 = vmatpush3.bf16.msra.mxu1 %v7159_v26  ;;  %10991 = vmatprep.mubr.msk.bf16.mxu1 %vm11729_vm11, %v11726_v1 }
0x2a8c   :  { %v7098_v25 = vpack.c.b16 %v7097_v60, %v7097_v60  ;;  %11001 = vmatprep.subr.bf16.mxu1 %v11726_v1 }
0x2a8d   :  { %v7149_v12 = vpop.permute.xlu1 %7148 }
0x2a8e   :  { %v7153_v15 = vrot.slane %v7149_v12, %v11967_v7  ;;  %10986 = vmatmul.mubr.msk.bf16.vlgmr.msra.gmra.mrb[124].mxu0 %vm544_vm9, %v7098_v25 }
0x2a8f   :  { %10996 = vmatpush3.bf16.msra.mxu0 %v7215_v45  ;;  %10997 = vmatprep.mubr.msk.bf16.mxu0 %vm11729_vm11, %v11726_v1 }
0x2a90   :  { %v7154_v19 = vpack.c.b16 %v7153_v15, %v7153_v15  ;;  %11007 = vmatprep.subr.bf16.mxu0 %v11726_v1 }
0x2a91   :  { %v7205_v58 = vpop.permute.xlu1 %7204 }
0x2a92   :  { %v7209_v62 = vrot.slane %v7205_v58, %v11967_v7  ;;  %10992 = vmatmul.mubr.msk.bf16.vlgmr.msra.gmra.mrb[124].mxu1 %vm544_vm9, %v7154_v19 }
0x2a93   :  { %11002 = vmatpush3.bf16.msra.mxu1 %v7271_v27  ;;  %11003 = vmatprep.mubr.msk.bf16.mxu1 %vm11729_vm11, %v11726_v1 }
0x2a94   :  { %v7210_v31 = vpack.c.b16 %v7209_v62, %v7209_v62  ;;  %11015 = vmatprep.subr.bf16.mxu1 %v11726_v1 }
0x2a95   :  { %v7261_v8 = vpop.permute.xlu1 %7260 }
0x2a96   :  { %v7265_v38 = vrot.slane %v7261_v8, %v11967_v7  ;;  %10998 = vmatmul.mubr.msk.bf16.vlgmr.msra.gmra.mrb[128].mxu0 %vm544_vm9, %v7210_v31 }
0x2a97   :  { %11011 = vmatprep.mubr.msk.bf16.mxu0 %vm11729_vm11, %v11726_v1  ;;  %11008 = vmatpush3.bf16.msra.mxu0 %v11216_v6 }
0x2a98   :  { %v7266_v37 = vpack.c.b16 %v7265_v38, %v7265_v38  ;;  %11009 = vmatprep.subr.bf16.mxu0 %v11726_v1 }
0x2a9a   :  { %11004 = vmatmul.mubr.msk.bf16.vlgmr.msra.gmra.mrb[128].mxu1 %vm544_vm9, %v7266_v37 }
0x2a9b   :  { %11019 = vmatprep.mubr.msk.bf16.mxu1 %vm11729_vm11, %v11726_v1  ;;  %11010 = vmatpush3.bf16.msra.mxu0 %v11217_v48 }
0x2a9c   :  { %7634 = vmatprep.subr.bf16.mxu0 %v13104_v17 }
0x2b51   :  { %v6915_v18 = vpop.f32.mrb[116].mxu0 }
0x2b52   :  { %v10963_v49 = vpop.f32.mrb[117].mxu0  ;;  %v7321_v13 = vpack.c.bf16 %v6915_v18, %v6915_v18 }
0x2b53   :  { %v6918_v22 = vpop.f32.mrb[118].mxu0 }
0x2b54   :  { %v10964_v4 = vpop.f32.mrb[119].mxu0  ;;  %v7341_v47 = vunpack.c.l.b16 %v7321_v13 }
0x2b55   :  { %v6971_v39 = vpop.f32.mrb[116].mxu1 }
0x2b56   :  { %v7322_v33 = vpack.c.bf16 %v6971_v39, %v6971_v39  ;;  %v10969_v14 = vpop.f32.mrb[117].mxu1 }
0x2b57   :  { %v6974_v46 = vpop.f32.mrb[118].mxu1 }
0x2b58   :  { %v7342_v24 = vunpack.c.l.b16 %v7322_v33  ;;  %v10970_v59 = vpop.f32.mrb[119].mxu1 }
0x2b59   :  { %v7027_v16 = vpop.f32.mrb[120].mxu0 }
0x2b5a   :  { %v7349_v30 = vrot.slane %v7342_v24, 7  ;;  %v7323_v35 = vpack.c.bf16 %v7027_v16, %v7027_v16  ;;  %v10975_v36 = vpop.f32.mrb[121].mxu0 }
0x2b5b   :  { %v7030_v11 = vpop.f32.mrb[122].mxu0  ;;  %v7314_v36 = vld [vmem:[#allocation5 + $0xd] sm:$0x1] }
0x2b5c   :  { %v7350_v10 = vsel %vm529_vm2, %v7349_v30, %v7341_v47  ;;  %v7343_v17 = vunpack.c.l.b16 %v7323_v35  ;;  %v10976_v55 = vpop.f32.mrb[123].mxu0  ;;  %v7315_v11 = vld [vmem:[#allocation5 + $0x15] sm:$0x1] }
0x2b5d   :  { %v7083_v9 = vpop.f32.mrb[120].mxu1  ;;  %v7316_v55 = vld [vmem:[#allocation5 + $0x1d] sm:$0x1] }
0x2b5e   :  { %v7351_v29 = vrot.slane %v7343_v17, 6  ;;  %v7324_v52 = vpack.c.bf16 %v7083_v9, %v7083_v9  ;;  %v10981_v54 = vpop.f32.mrb[121].mxu1  ;;  %v7313_v17 = vld [vmem:[#allocation5 + $0x5] sm:$0x1]  ;;  %v7436_v9 = vrot.slane %v7315_v11, 6 }
0x2b5f   :  { %v7086_v53 = vpop.f32.mrb[122].mxu1  ;;  %v7438_v54 = vrot.slane %v7316_v55, 5  ;;  %v13361_v55 = vld [vmem:[#allocation2 + $0x8] sm:$0xff]  }
0x2b60   :  { %v7352_v23 = vsel %vm531_vm3, %v7351_v29, %v7350_v10  ;;  %v7344_v40 = vunpack.c.l.b16 %v7324_v52  ;;  %v10982_v34 = vpop.f32.mrb[123].mxu1  ;;  %v7434_v10 = vrot.slane %v7314_v36, 7  ;;  %v7317_v52 = vld [vmem:[#allocation5 + $0x25] sm:$0x1] }
0x2b61   :  { %v7139_v20 = vpop.f32.mrb[124].mxu0 }
0x2b62   :  { %v7353_v26 = vrot.slane %v7344_v40, 5  ;;  %v7325_v2 = vpack.c.bf16 %v7139_v20, %v7139_v20  ;;  %v10987_v57 = vpop.f32.mrb[125].mxu0  ;;  %v7435_v29 = vsel %vm529_vm2, %v7434_v10, %v7313_v17  ;;  %v7440_v40 = vrot.slane %v7317_v52, 4  ;;  %v7319_v20 = vld [vmem:[#allocation5 + $0x35] sm:$0x1] }
0x2b63   :  { %v7142_v60 = vpop.f32.mrb[126].mxu0  ;;  %v7437_v53 = vsel %vm531_vm3, %v7436_v9, %v7435_v29  ;;  %v7444_v57 = vrot.slane %v7319_v20, 2  ;;  %v13359_v17 = vld [vmem:[#allocation2] sm:$0xff]  }
0x2b64   :  { %v7354_v25 = vsel %vm533_vm4, %v7353_v26, %v7352_v23  ;;  %v7345_v45 = vunpack.c.l.b16 %v7325_v2  ;;  %v10988_v12 = vpop.f32.mrb[127].mxu0  ;;  %v7318_v23 = vld [vmem:[#allocation5 + $0x2d] sm:$0x1]  ;;  %v7439_v34 = vsel %vm533_vm4, %v7438_v54, %v7437_v53  ;;  %v7320_v2 = vld [vmem:[#allocation5 + $0x3d] sm:$0x1] }
0x2b65   :  { %v7195_v5 = vpop.f32.mrb[124].mxu1  ;;  %v7441_v26 = vsel %vm535_vm5, %v7440_v40, %v7439_v34 }
0x2b66   :  { %v7355_v15 = vrot.slane %v7345_v45, 4  ;;  %v7326_v19 = vpack.c.bf16 %v7195_v5, %v7195_v5  ;;  %v10993_v27 = vpop.f32.mrb[125].mxu1  ;;  %v7380_v45 = vpop.permute.xlu1 %7379 }
0x2b67   :  { %v7198_v58 = vpop.f32.mrb[126].mxu1  ;;  %v7378_v5 = vpop.permute.xlu0 %7377 }
0x2b68   :  { %v7356_v62 = vsel %vm535_vm5, %v7355_v15, %v7354_v25  ;;  %v7346_v31 = vunpack.c.l.b16 %v7326_v19  ;;  %v10994_v8 = vpop.f32.mrb[127].mxu1  ;;  %v7446_v25 = vrot.slane %v7320_v2, 1  ;;  %v7381_v15 = vsel %vm1271_vm12, %v7378_v5, %v7380_v45 }
0x2b69   :  { %v7251_v38 = vpop.f32.mrb[128].mxu0  ;;  %v10391_v2 = vunpack.c.l.bf16 %v13359_v17 }
0x2b6a   :  { %v7357_v37 = vrot.slane %v7346_v31, 3  ;;  %v7327_v6 = vpack.c.bf16 %v7251_v38, %v7251_v38  ;;  %v10999_v48 = vpop.f32.mrb[129].mxu0 }
0x2b6b   :  { %v7254_v18 = vpop.f32.mrb[130].mxu0 }
0x2b6c   :  { %v7358_v49 = vsel %vm537_vm6, %v7357_v37, %v7356_v62  ;;  %v7347_v22 = vunpack.c.l.b16 %v7327_v6  ;;  %v11000_v4 = vpop.f32.mrb[131].mxu0 }
0x2b6d   :  { %v7307_v39 = vpop.f32.mrb[128].mxu1 }
0x2b6e   :  { %v7359_v13 = vrot.slane %v7347_v22, 2  ;;  %v7328_v33 = vpack.c.bf16 %v7307_v39, %v7307_v39  ;;  %v11005_v14 = vpop.f32.mrb[129].mxu1 }
0x2b6f   :  { %v7310_v46 = vpop.f32.mrb[130].mxu1  ;;  %v11218_v14 = vld [vmem:[#allocation13] sm:$0xff]  }
0x2b70   :  { %v7360_v24 = vsel %vm539_vm7, %v7359_v13, %v7358_v49  ;;  %v7348_v59 = vunpack.c.l.b16 %v7328_v33  ;;  %v11006_v16 = vpop.f32.mrb[131].mxu1  ;;  %v13339_v46 = vld [vmem:[#allocation11 + $0x10] ss:$8 sps:$4 sm:$0xff]   ;;  %11016 = vmatpush3.bf16.msra.mxu1 %v11218_v14 }
0x2b71   :  { %11017 = vmatprep.subr.bf16.mxu1 %v11726_v1  ;;  %v13387_v14 = vld [vmem:[#allocation2 + $0x18] sm:$0xff]  }
0x2b72   :  { %v7361_v47 = vrot.slane %v7348_v59, 1  ;;  %v11222_v59 = vld [vmem:[#allocation13 + $0x8] sm:$0xff]  }
0x2b74   :  { %v7362_v30 = vsel %vm541_vm8, %v7361_v47, %v7360_v24  ;;  %v13341_v24 = vld [vmem:[#allocation11 + $0x14] ss:$8 sps:$4 sm:$0xff]   ;;  %11018 = vmatpush3.bf16.msra.mxu1 %v11222_v59 }
0x2b75   :  { %v7363_v35 = vpack.c.b16 %v7362_v30, %v7362_v30  ;;  %11023 = vmatprep.subr.bf16.mxu1 %v11726_v1 }
0x2b77   :  { %11012 = vmatmul.mubr.msk.bf16.vlgmr.msra.gmra.mrb[132].mxu0 %vm106_vm0, %v7363_v35 }
0x2b78   :  { %7635 = vmatpush1.bf16.msra.mxu0 %v13102_v50  ;;  %7666 = vmatprep.mubr.bf16.mxu0 %v11725_v0  ;;  %v7442_v50 = vrot.slane %v7318_v23, 3 }
0x2b79   :  { %7636 = vmatprep.subr.bf16.mxu0 %v13341_v24 }
0x2b7a   :  { %v7443_v60 = vsel %vm537_vm6, %v7442_v50, %v7441_v26 }
0x2b7b   :  { %v7445_v12 = vsel %vm539_vm7, %v7444_v57, %v7443_v60  ;;  %v10392_v57 = vunpack.c.h.bf16 %v13359_v17  ;;  %v10395_v60 = vunpack.c.l.bf16 %v13361_v55 }
0x2b7c   :  { %v7447_v27 = vsel %vm541_vm8, %v7446_v25, %v7445_v12  ;;  %7637 = vmatpush1.bf16.msra.mxu0 %v13339_v46 }
0x2b7d   :  { %11029 = vmatprep.subr.bf16.mxu0 %v11726_v1 }
0x2c4a   :  { %v7420_v19 = vpop.f32.mrb[132].mxu0 }
0x2c4b   :  { %v7421_v58 = vadd.f32 %v7420_v19, %v7381_v15  ;;  %v11013_v62 = vpop.f32.mrb[133].mxu0 }
0x2c4c   :  { %v7423_v31 = vpop.f32.mrb[134].mxu0 }
0x2c4d   :  { %v7449_v8 = vadd.f32 %v7447_v27, %v7421_v58  ;;  %v11014_v38 = vpop.f32.mrb[135].mxu0 }
0x2c4f   :  { %11478 = vtanh.f32 %v7449_v8  ;;  %v10234_v6 = vmul.f32 -1.442695, %v7449_v8 }
0x2c51   :  { %11480 = vpow2.f32 %v10234_v6  ;;  %v13382_v6 = vld [vmem:[#allocation2 + $0x10] sm:$0xff]  }
0x2c59   :  { %v11479_v37 = vpop.eup %11478 }
0x2c5a   :  { %7459 = vrot.lane.b32.xlu1 %v11479_v37, %s11717_s19 }
0x2c5b   :  { %v11481_v48 = vpop.eup %11480 }
0x2c5c   :  { %v7453_v18 = vadd.f32 1.0, %v11481_v48 }
0x2c5e   :  { %11482 = vrcp.f32 %v7453_v18 }
0x2c68   :  { %v11483_v49 = vpop.eup %11482 }
0x2c69   :  { %v7457_v39 = vmul.f32 %v11483_v49, %v13099_v63 }
0x2ccc   :  { %v7460_v22 = vpop.permute.xlu1 %7459 }
0x2ccd   :  { %v7462_v4 = vmul.f32 %v11483_v49, %v7460_v22 }
0x2ccf   :  { %7464 = vrot.lane.b32.xlu1 %v7462_v4, %s11730_s18 }
0x2d41   :  { %v7465_v13 = vpop.permute.xlu1 %7464 }
0x2d42   :  { %v13336_v33 = vadd.f32 %v7465_v13, %v7457_v39 }
0x2d44   :  { %11484 = vtanh.f32 %v13336_v33 }
0x2d4e   :  { %v11485_v63 = vpop.eup %11484 }
0x2d4f   :  { %7470 = vrot.lane.b32.xlu1 %v11485_v63, %s11717_s19  ;;  %v10396_v63 = vunpack.c.h.bf16 %v13361_v55 }
0x2dc1   :  { %v7471_v16 = vpop.permute.xlu1 %7470 }
0x2dc2   :  { %v7473_v47 = vmul.f32 %v11483_v49, %v7471_v16  ;;  %v10399_v16 = vunpack.c.l.bf16 %v13382_v6 }
0x2dc4   :  { %v7474_v30 = vpack.c.bf16 %v7473_v47, %v7473_v47 }
0x2dc6   :  { %7487 = vrot.lane.b32.xlu1 %v7474_v30, %s11730_s18 }
0x2e38   :  { %v7488_v35 = vpop.permute.xlu1 %7487 }
0x2e39   :  { %11020 = vmatmul.mubr.msk.bf16.vlgmr.msra.gmra.mrb[132].mxu1 %vm106_vm0, %v7488_v35  ;;  %10247 = vmatmul.mubr.msk.bf16.vlgmr.msra.gmra.mrb[136].mxu0 %vm106_vm0, %v7488_v35 }
0x2e3a   :  { %11025 = vmatprep.mubr.msk.bf16.mxu1 %vm11729_vm11, %v11726_v1  ;;  %11031 = vmatprep.mubr.msk.bf16.mxu0 %vm11729_vm11, %v11726_v1 }
0x2f0c   :  { %v7538_v36 = vpop.f32.mrb[132].mxu1  ;;  %v13356_v11 = vpop.f32.mrb[136].mxu0 }
0x2f0d   :  { %v7539_v10 = vadd.f32 %v13124_v28, %v7538_v36  ;;  %v7692_v9 = vcombine.high %v13356_v11, %v13356_v11  ;;  %v7699_v29 = vrot.slane %v13356_v11, %v11878_v21  ;;  %v11021_v52 = vpop.f32.mrb[133].mxu1  ;;  %v13367_v54 = vpop.f32.mrb[137].mxu0 }
0x2f0e   :  { %v7541_v53 = vpop.f32.mrb[134].mxu1  ;;  %v7672_v23 = vpop.f32.mrb[138].mxu0 }
0x2f0f   :  { %v7545_v40 = vcombine.high %v7539_v10, %v7539_v10  ;;  %v7552_v34 = vrot.slane %v7539_v10, %v11878_v21  ;;  %v7706_v28 = vrot.slane %v7692_v9, %v11878_v21  ;;  %v7707_v20 = vcombine.high %v7699_v29, %v7699_v29  ;;  %v11022_v50 = vpop.f32.mrb[135].mxu1  ;;  %v7673_v26 = vpop.f32.mrb[139].mxu0 }
0x2f10   :  { %v7715_v25 = vrot.slane %v7699_v29, %v11878_v21  ;;  %v10403_v29 = vunpack.c.l.bf16 %v13387_v14 }
0x2f11   :  { %v7559_v45 = vrot.slane %v7545_v40, %v11878_v21  ;;  %v7560_v12 = vcombine.high %v7552_v34, %v7552_v34  ;;  %v7568_v5 = vrot.slane %v7552_v34, %v11878_v21  ;;  %10239 = vst.sshfl [vmem:[#allocation14 + $0x5] sm:$0x1 pattern:$0x73625140] %v7552_v34  ;;  %v7708_v15 = vcombine.high %v7706_v28, %v7706_v28 }
0x2f12   :  { %v7722_v19 = vrot.slane %v7706_v28, %v11878_v21  ;;  %v7729_v27 = vrot.slane %v7707_v20, %v11878_v21  ;;  %v7737_v58 = vcombine.high %v7715_v25, %v7715_v25  ;;  %v7744_v62 = vrot.slane %v7715_v25, %v11895_v44 }
0x2f13   :  { %v7561_v31 = vcombine.high %v7559_v45, %v7559_v45  ;;  %v7575_v8 = vrot.slane %v7559_v45, %v11878_v21  ;;  %v7582_v38 = vrot.slane %v7560_v12, %v11878_v21  ;;  %v7590_v37 = vcombine.high %v7568_v5, %v7568_v5  ;;  %10240 = vst.sshfl [vmem:[#allocation14 + $0xd] sm:$0x1 pattern:$0x73625140] %v7560_v12 }
0x2f14   :  { %10241 = vst.sshfl [vmem:[#allocation14 + $0x25] sm:$0x1 pattern:$0x73625140] %v7559_v45  ;;  %v7736_v48 = vrot.slane %v7708_v15, %v11878_v21  ;;  %v7738_v18 = vcombine.high %v7722_v19, %v7722_v19  ;;  %v7739_v49 = vcombine.high %v7729_v27, %v7729_v27  ;;  %v7748_v22 = vrot.slane %v7729_v27, %v11895_v44 }
0x2f15   :  { %v7589_v4 = vrot.slane %v7561_v31, %v11878_v21  ;;  %v7591_v39 = vcombine.high %v7575_v8, %v7575_v8  ;;  %v7592_v13 = vcombine.high %v7582_v38, %v7582_v38  ;;  %7604 = vst [vmem:[#allocation14 + $0x15] sm:$0x1] %v7590_v37  ;;  %10242 = vst.sshfl [vmem:[#allocation14 + $0x2d] sm:$0x1 pattern:$0x73625140] %v7561_v31  ;;  %v10400_v28 = vunpack.c.h.bf16 %v13382_v6 }
0x2f16   :  { %v7752_v59 = vrot.slane %v7737_v58, %v11895_v44  ;;  %v7756_v47 = vrot.slane %v7739_v49, %v11895_v44  ;;  %v7760_v30 = vrot.slane %v7722_v19, %v11895_v44  ;;  %v7768_v36 = vrot.slane %v7738_v18, %v11895_v44  ;;  %v11575_v6 = vld [vmem:[%s13824_s5] ss:$0 sm:$0xff] }
0x2f17   :  { %v7593_v35 = vcombine.high %v7589_v4, %v7589_v4  ;;  %7605 = vst [vmem:[#allocation14 + $0x1d] sm:$0x1] %v7592_v13  ;;  %7608 = vst [vmem:[#allocation14 + $0x35] sm:$0x1] %v7591_v39  ;;  %v7781_v10 = vadd.f32 %v10391_v2, %v7744_v62  ;;  %v7782_v9 = vadd.f32 %v10392_v57, %v7748_v22  ;;  %v10404_v25 = vunpack.c.h.bf16 %v13387_v14 }
0x2f18   :  { %v7783_v52 = vadd.f32 %v10395_v60, %v7752_v59  ;;  %v7784_v53 = vadd.f32 %v10396_v63, %v7756_v47  ;;  %v7740_v23 = vcombine.high %v7736_v48, %v7736_v48  ;;  %v7764_v40 = vrot.slane %v7736_v48, %v11895_v44 }
0x2f19   :  { %7609 = vst [vmem:[#allocation14 + $0x3d] sm:$0x1] %v7593_v35  ;;  %v7785_v34 = vadd.f32 %v10399_v16, %v7760_v30  ;;  %11486 = vtanh.f32 %v7781_v10  ;;  %v7787_v20 = vadd.f32 %v10403_v29, %v7768_v36 }
0x2f1a   :  { %11488 = vtanh.f32 %v7782_v9  ;;  %v7772_v50 = vrot.slane %v7740_v23, %v11895_v44  ;;  %v7786_v26 = vadd.f32 %v10400_v28, %v7764_v40 }
0x2f1b   :  { %11490 = vtanh.f32 %v7783_v52 }
0x2f1c   :  { %11492 = vtanh.f32 %v7784_v53  ;;  %v7788_v45 = vadd.f32 %v10404_v25, %v7772_v50 }
0x2f1d   :  { %11494 = vtanh.f32 %v7785_v34 }
0x2f1e   :  { %11496 = vtanh.f32 %v7787_v20 }
0x2f1f   :  { %11498 = vtanh.f32 %v7786_v26 }
0x2f20   :  { %11500 = vtanh.f32 %v7788_v45 }
0x2f23   :  { %v11487_v12 = vpop.eup %11486 }
0x2f24   :  { %v11489_v5 = vpop.eup %11488  ;;  %v7797_v15 = vmul.f32 %v13173_v32, %v11487_v12 }
0x2f25   :  { %v11491_v19 = vpop.eup %11490  ;;  %v7798_v27 = vmul.f32 %v13173_v32, %v11489_v5 }
0x2f26   :  { %v11493_v58 = vpop.eup %11492  ;;  %v7805_v62 = vsel %vm106_vm0, %v7797_v15, 0.0  ;;  %v7799_v31 = vmul.f32 %v13173_v32, %v11491_v19 }
0x2f27   :  { %v11495_v8 = vpop.eup %11494  ;;  %7806 = vadd.xlane.f32.xlu0 %v7805_v62  ;;  %v7808_v38 = vsel %vm106_vm0, %v7798_v27, 0.0  ;;  %v7800_v49 = vmul.f32 %v13173_v32, %v11493_v58 }
0x2f28   :  { %7809 = vadd.xlane.f32.xlu1 %v7808_v38  ;;  %v7801_v37 = vmul.f32 %v13173_v32, %v11495_v8  ;;  %v11497_v48 = vpop.eup %11496  ;;  %v7811_v18 = vsel %vm106_vm0, %v7799_v31, 0.0 }
0x2f29   :  { %v11499_v22 = vpop.eup %11498  ;;  %v7803_v39 = vmul.f32 %v13173_v32, %v11497_v48  ;;  %v7814_v13 = vsel %vm106_vm0, %v7800_v49, 0.0 }
0x2f2a   :  { %v7817_v4 = vsel %vm106_vm0, %v7801_v37, 0.0  ;;  %v7802_v59 = vmul.f32 %v13173_v32, %v11499_v22  ;;  %v11501_v47 = vpop.eup %11500 }
0x2f2b   :  { %7812 = vadd.xlane.f32.xlu0 %v7811_v18  ;;  %v7823_v30 = vsel %vm106_vm0, %v7803_v39, 0.0  ;;  %v7804_v36 = vmul.f32 %v13173_v32, %v11501_v47 }
0x2f2c   :  { %7818 = vadd.xlane.f32.xlu1 %v7817_v4  ;;  %v7820_v35 = vsel %vm106_vm0, %v7802_v59, 0.0 }
0x2f2d   :  { %v7826_v10 = vsel %vm106_vm0, %v7804_v36, 0.0 }
0x2f2f   :  { %7815 = vadd.xlane.f32.xlu0 %v7814_v13 }
0x2f30   :  { %7824 = vadd.xlane.f32.xlu1 %v7823_v30 }
0x2f33   :  { %7821 = vadd.xlane.f32.xlu0 %v7820_v35 }
0x2f37   :  { %7827 = vadd.xlane.f32.xlu0 %v7826_v10 }
0x2fb4   :  { %v7807_v9 = vpop.xlane.xlu0 %7806 }
0x2fb5   :  { %v7810_v52 = vpop.xlane.xlu1 %7809  ;;  %v7840_v40 = vrot.slane %v7807_v9, %v11967_v7 }
0x2fb6   :  { %v7844_v53 = vrot.slane %v7810_v52, %v11967_v7 }
0x2fb8   :  { %v7813_v23 = vpop.xlane.xlu0 %7812  ;;  %v7869_v20 = vsel %vm529_vm2, %v7844_v53, %v7840_v40 }
0x2fb9   :  { %v7848_v34 = vrot.slane %v7813_v23, %v11967_v7  ;;  %v7819_v50 = vpop.xlane.xlu1 %7818 }
0x2fba   :  { %v7856_v5 = vrot.slane %v7819_v50, %v11967_v7 }
0x2fbb   :  { %v7870_v32 = vsel %vm531_vm3, %v7848_v34, %v7869_v20 }
0x2fbc   :  { %v7816_v26 = vpop.xlane.xlu0 %7815 }
0x2fbd   :  { %v7852_v45 = vrot.slane %v7816_v26, %v11967_v7  ;;  %v7825_v19 = vpop.xlane.xlu1 %7824 }
0x2fbe   :  { %v7864_v31 = vrot.slane %v7825_v19, %v11967_v7 }
0x2fbf   :  { %v7871_v12 = vsel %vm533_vm4, %v7852_v45, %v7870_v32 }
0x2fc0   :  { %v7822_v15 = vpop.xlane.xlu0 %7821  ;;  %v7872_v58 = vsel %vm535_vm5, %v7856_v5, %v7871_v12 }
0x2fc1   :  { %v7860_v27 = vrot.slane %v7822_v15, %v11967_v7 }
0x2fc3   :  { %v7873_v62 = vsel %vm537_vm6, %v7860_v27, %v7872_v58 }
0x2fc4   :  { %v7828_v8 = vpop.xlane.xlu0 %7827  ;;  %v7874_v37 = vsel %vm539_vm7, %v7864_v31, %v7873_v62 }
0x2fc5   :  { %v7868_v38 = vrot.slane %v7828_v8, %v11967_v7 }
0x2fc7   :  { %v7875_v48 = vsel %vm541_vm8, %v7868_v38, %v7874_v37 }
0x2fc8   :  { %v7877_v18 = vsel %vm544_vm9, %v7875_v48, -inf }
0x2fc9   :  { %7878 = vmax.xlane.f32.xlu1 %v7877_v18 }
0x3056   :  { %v7879_v49 = vpop.xlane.xlu1 %7878 }
0x3057   :  { %v7884_v22 = vrot.slane %v7879_v49, %v11895_v44  ;;  %v7888_v4 = vrot.slane %v7879_v49, %v11986_v41  ;;  %v7892_v39 = vrot.slane %v7879_v49, %v11989_v42  ;;  %v7896_v13 = vrot.slane %v7879_v49, %v11992_v43 }
0x3058   :  { %v7904_v59 = vrot.slane %v7879_v49, %v12002_v56  ;;  %v7900_v36 = vrot.slane %v7879_v49, %v11998_v51  ;;  %v7912_v34 = vrot.slane %v7879_v49, %v12010_v3  ;;  %v7908_v32 = vrot.slane %v7879_v49, %v12006_v61 }
0x3059   :  { %v7921_v47 = vsub.f32 %v7807_v9, %v7884_v22  ;;  %v7922_v30 = vsub.f32 %v7810_v52, %v7888_v4  ;;  %v7924_v35 = vsub.f32 %v7816_v26, %v7896_v13  ;;  %v7923_v10 = vsub.f32 %v7813_v23, %v7892_v39 }
0x305a   :  { %v7926_v20 = vsub.f32 %v7822_v15, %v7904_v59  ;;  %v7925_v12 = vsub.f32 %v7819_v50, %v7900_v36  ;;  %v7928_v27 = vsub.f32 %v7828_v8, %v7912_v34  ;;  %v7927_v52 = vsub.f32 %v7825_v19, %v7908_v32 }
0x305b   :  { %v7929_v53 = vmul.f32 1.442695, %v7921_v47  ;;  %v7931_v40 = vmul.f32 1.442695, %v7922_v30  ;;  %v7935_v45 = vmul.f32 1.442695, %v7924_v35 }
0x305c   :  { %v7933_v5 = vmul.f32 1.442695, %v7923_v10  ;;  %v7939_v9 = vmul.f32 1.442695, %v7926_v20  ;;  %v7937_v26 = vmul.f32 1.442695, %v7925_v12 }
0x305d   :  { %11502 = vpow2.f32 %v7929_v53  ;;  %v7943_v23 = vmul.f32 1.442695, %v7928_v27  ;;  %v7941_v58 = vmul.f32 1.442695, %v7927_v52 }
0x305e   :  { %11504 = vpow2.f32 %v7931_v40 }
0x305f   :  { %11506 = vpow2.f32 %v7935_v45 }
0x3060   :  { %11508 = vpow2.f32 %v7933_v5 }
0x3061   :  { %11510 = vpow2.f32 %v7939_v9 }
0x3062   :  { %11512 = vpow2.f32 %v7937_v26  ;;  %v8078_v26 = vld [vmem:[#allocation8] sm:$0xf] }
0x3063   :  { %11514 = vpow2.f32 %v7943_v23  ;;  %v8100_v23 = vsel %vm767_vm10, %v8078_v26, 0 }
0x3064   :  { %11516 = vpow2.f32 %v7941_v58  ;;  %11024 = vmatpush3.bf16.msra.mxu1 %v8100_v23 }
0x3065   :  { %11035 = vmatprep.subr.bf16.mxu1 %v11726_v1 }
0x3067   :  { %v11503_v62 = vpop.eup %11502 }
0x3068   :  { %v11505_v31 = vpop.eup %11504  ;;  %7954 = vperm.xlu0 %11168, %v11503_v62  }
0x3069   :  { %7957 = vperm.xlu1 %11167, %v11505_v31   ;;  %v11507_v15 = vpop.eup %11506 }
0x306a   :  { %v11509_v50 = vpop.eup %11508 }
0x306b   :  { %v13456_v8 = vpop.eup %11510 }
0x306c   :  { %7963 = vperm.xlu0 %11168, %v11507_v15   ;;  %v11513_v38 = vpop.eup %11512 }
0x306d   :  { %7960 = vperm.xlu1 %11167, %v11509_v50   ;;  %v13459_v19 = vpop.eup %11514 }
0x306e   :  { %v13461_v37 = vpop.eup %11516 }
0x3070   :  { %7969 = vperm.xlu0 %11168, %v13456_v8  }
0x3071   :  { %7966 = vperm.xlu1 %11167, %v11513_v38  }
0x3074   :  { %7975 = vperm.xlu0 %11168, %v13459_v19  }
0x3075   :  { %7972 = vperm.xlu1 %11167, %v13461_v37  }
0x30e7   :  { %v7955_v48 = vpop.permute.xlu0 %7954 }
0x30e8   :  { %v7958_v18 = vpop.permute.xlu1 %7957  ;;  %v7980_v22 = vrot.slane %v7955_v48, %v11967_v7 }
0x30e9   :  { %v7984_v49 = vrot.slane %v7958_v18, %v11967_v7 }
0x30eb   :  { %v7964_v4 = vpop.permute.xlu0 %7963  ;;  %v8009_v59 = vsel %vm529_vm2, %v7984_v49, %v7980_v22 }
0x30ec   :  { %v7961_v39 = vpop.permute.xlu1 %7960  ;;  %v7992_v47 = vrot.slane %v7964_v4, %v11967_v7 }
0x30ed   :  { %v7988_v13 = vrot.slane %v7961_v39, %v11967_v7 }
0x30ef   :  { %v8010_v30 = vsel %vm531_vm3, %v7988_v13, %v8009_v59  ;;  %v7970_v35 = vpop.permute.xlu0 %7969 }
0x30f0   :  { %v7967_v36 = vpop.permute.xlu1 %7966  ;;  %v8011_v53 = vsel %vm533_vm4, %v7992_v47, %v8010_v30  ;;  %v8000_v40 = vrot.slane %v7970_v35, %v11967_v7 }
0x30f1   :  { %v7996_v10 = vrot.slane %v7967_v36, %v11967_v7 }
0x30f3   :  { %v8012_v34 = vsel %vm535_vm5, %v7996_v10, %v8011_v53  ;;  %v7976_v20 = vpop.permute.xlu0 %7975 }
0x30f4   :  { %v7973_v45 = vpop.permute.xlu1 %7972  ;;  %v8008_v32 = vrot.slane %v7976_v20, %v11967_v7  ;;  %v8013_v5 = vsel %vm537_vm6, %v8000_v40, %v8012_v34  ;;  %v8079_v40 = vld [vmem:[#allocation8 + $0x4] sm:$0xf] }
0x30f5   :  { %v8004_v12 = vrot.slane %v7973_v45, %v11967_v7  ;;  %v8156_v34 = vsel %vm767_vm10, %v8079_v40, 0 }
0x30f6   :  { %11030 = vmatpush3.bf16.msra.mxu0 %v8156_v34 }
0x30f7   :  { %v8014_v27 = vsel %vm539_vm7, %v8004_v12, %v8013_v5  ;;  %11041 = vmatprep.subr.bf16.mxu0 %v11726_v1 }
0x30f8   :  { %v8015_v9 = vsel %vm541_vm8, %v8008_v32, %v8014_v27 }
0x30f9   :  { %v8017_v52 = vsel %vm544_vm9, %v8015_v9, 0.0 }
0x30fa   :  { %8018 = vadd.xlane.f32.xlu1 %v8017_v52 }
0x310b   :  { %8600 = vrot.lane.b32.xlu1 %v13367_v54, %s11728_s13 }
0x3187   :  { %v8019_v58 = vpop.xlane.xlu1 %8018 }
0x3188   :  { %11518 = vrcp.f32 %v8019_v58 }
0x3192   :  { %v11519_v48 = vpop.eup %11518 }
0x3193   :  { %v8025_v18 = vrot.slane %v11519_v48, %v11895_v44  ;;  %v8029_v49 = vrot.slane %v11519_v48, %v11986_v41  ;;  %v8033_v39 = vrot.slane %v11519_v48, %v11989_v42  ;;  %v8037_v30 = vrot.slane %v11519_v48, %v11992_v43 }
0x3194   :  { %v8041_v53 = vrot.slane %v11519_v48, %v11998_v51  ;;  %v8053_v52 = vrot.slane %v11519_v48, %v12010_v3 }
0x3195   :  { %v8062_v22 = vmul.f32 %v11503_v62, %v8025_v18  ;;  %v8063_v4 = vmul.f32 %v11505_v31, %v8029_v49  ;;  %v8064_v47 = vmul.f32 %v11509_v50, %v8033_v39  ;;  %v8065_v10 = vmul.f32 %v11507_v15, %v8037_v30 }
0x3196   :  { %v8066_v20 = vmul.f32 %v11513_v38, %v8041_v53  ;;  %v8045_v50 = vrot.slane %v11519_v48, %v12002_v56  ;;  %v8049_v15 = vrot.slane %v11519_v48, %v12006_v61  ;;  %v8069_v38 = vmul.f32 %v13459_v19, %v8053_v52  ;;  %v8083_v53 = vld [vmem:[#allocation8 + $0x14] sm:$0xf] }
0x3197   :  { %v8070_v13 = vpack.c.bf16 %v8062_v22, %v8062_v22  ;;  %v8071_v54 = vpack.c.bf16 %v8063_v4, %v8063_v4  ;;  %v8072_v36 = vpack.c.bf16 %v8064_v47, %v8064_v47  ;;  %v8073_v31 = vpack.c.bf16 %v8065_v10, %v8065_v10  ;;  %v8080_v22 = vld [vmem:[#allocation8 + $0x8] sm:$0xf]  ;;  %v8082_v47 = vld [vmem:[#allocation8 + $0x10] sm:$0xf] }
0x3198   :  { %v8074_v32 = vpack.c.bf16 %v8066_v20, %v8066_v20  ;;  %v8067_v12 = vmul.f32 %v13456_v8, %v8045_v50  ;;  %v8068_v9 = vmul.f32 %v13461_v37, %v8049_v15  ;;  %v8077_v18 = vpack.c.bf16 %v8069_v38, %v8069_v38  ;;  %v8084_v20 = vld [vmem:[#allocation8 + $0x18] sm:$0xf]  ;;  %v8085_v15 = vld [vmem:[#allocation8 + $0x1c] sm:$0xf] }
0x3199   :  { %v8087_v59 = vunpack.c.l.b16 %v8070_v13  ;;  %v8143_v35 = vunpack.c.l.b16 %v8071_v54  ;;  %v8199_v62 = vunpack.c.l.b16 %v8072_v36  ;;  %v8255_v45 = vunpack.c.l.b16 %v8073_v31  ;;  %v8081_v13 = vld [vmem:[#allocation8 + $0xc] sm:$0xf] }
0x319a   :  { %v8311_v5 = vunpack.c.l.b16 %v8074_v32  ;;  %v8075_v27 = vpack.c.bf16 %v8067_v12, %v8067_v12  ;;  %v8076_v23 = vpack.c.bf16 %v8068_v9, %v8068_v9  ;;  %v8479_v49 = vunpack.c.l.b16 %v8077_v18 }
0x319b   :  { %8089 = vperm.xlu0 %11168, %v8087_v59   ;;  %v8212_v48 = vsel %vm767_vm10, %v8080_v22, 0  ;;  %v8324_v36 = vsel %vm767_vm10, %v8082_v47, 0  ;;  %v8436_v32 = vsel %vm767_vm10, %v8084_v20, 0  ;;  %v8492_v9 = vsel %vm767_vm10, %v8085_v15, 0 }
0x319c   :  { %v8367_v26 = vunpack.c.l.b16 %v8075_v27  ;;  %v8423_v58 = vunpack.c.l.b16 %v8076_v23 }
0x319f   :  { %8145 = vperm.xlu0 %11168, %v8143_v35  }
0x31a3   :  { %8201 = vperm.xlu0 %11168, %v8199_v62   ;;  %v8380_v62 = vsel %vm767_vm10, %v8083_v53, 0 }
0x31a7   :  { %8257 = vperm.xlu0 %11168, %v8255_v45  }
0x31ab   :  { %8313 = vperm.xlu0 %11168, %v8311_v5  }
0x31af   :  { %8369 = vperm.xlu0 %11168, %v8367_v26  }
0x31b3   :  { %8425 = vperm.xlu0 %11168, %v8423_v58  }
0x31b7   :  { %8481 = vperm.xlu0 %11168, %v8479_v49   ;;  %v11223_v49 = vld [vmem:[%s13825_s6] sm:$0xff]  }
0x31bb   :  { %8598 = vrot.lane.b32.xlu0 %v13356_v11, %s11728_s13  ;;  %v8268_v11 = vsel %vm767_vm10, %v8081_v13, 0 }
0x321a   :  { %v8090_v8 = vpop.permute.xlu0 %8089 }
0x321b   :  { %v8094_v37 = vrot.slane %v8090_v8, %v11967_v7  ;;  %v11224_v8 = vld [vmem:[%s13825_s6 + $0x8] sm:$0xff]  }
0x321d   :  { %v8095_v4 = vpack.c.b16 %v8094_v37, %v8094_v37 }
0x321e   :  { %v8146_v39 = vpop.permute.xlu0 %8145 }
0x321f   :  { %v8150_v19 = vrot.slane %v8146_v39, %v11967_v7  ;;  %11026 = vmatmul.mubr.msk.bf16.vlgmr.msra.gmra.mrb[136].mxu1 %vm544_vm9, %v8095_v4 }
0x3220   :  { %11036 = vmatpush3.bf16.msra.mxu1 %v8212_v48  ;;  %11037 = vmatprep.mubr.msk.bf16.mxu1 %vm11729_vm11, %v11726_v1 }
0x3221   :  { %v8151_v59 = vpack.c.b16 %v8150_v19, %v8150_v19  ;;  %11047 = vmatprep.subr.bf16.mxu1 %v11726_v1 }
0x3222   :  { %v8202_v54 = vpop.permute.xlu0 %8201 }
0x3223   :  { %v8206_v30 = vrot.slane %v8202_v54, %v11967_v7  ;;  %11032 = vmatmul.mubr.msk.bf16.vlgmr.msra.gmra.mrb[140].mxu0 %vm544_vm9, %v8151_v59 }
0x3224   :  { %11042 = vmatpush3.bf16.msra.mxu0 %v8268_v11  ;;  %11043 = vmatprep.mubr.msk.bf16.mxu0 %vm11729_vm11, %v11726_v1 }
0x3225   :  { %v8207_v35 = vpack.c.b16 %v8206_v30, %v8206_v30  ;;  %11053 = vmatprep.subr.bf16.mxu0 %v11726_v1 }
0x3226   :  { %v8258_v10 = vpop.permute.xlu0 %8257 }
0x3227   :  { %v8262_v40 = vrot.slane %v8258_v10, %v11967_v7  ;;  %11038 = vmatmul.mubr.msk.bf16.vlgmr.msra.gmra.mrb[140].mxu1 %vm544_vm9, %v8207_v35 }
0x3228   :  { %11048 = vmatpush3.bf16.msra.mxu1 %v8324_v36  ;;  %11049 = vmatprep.mubr.msk.bf16.mxu1 %vm11729_vm11, %v11726_v1 }
0x3229   :  { %v8263_v34 = vpack.c.b16 %v8262_v40, %v8262_v40  ;;  %11059 = vmatprep.subr.bf16.mxu1 %v11726_v1 }
0x322a   :  { %v8314_v31 = vpop.permute.xlu0 %8313 }
0x322b   :  { %v8318_v50 = vrot.slane %v8314_v31, %v11967_v7  ;;  %11044 = vmatmul.mubr.msk.bf16.vlgmr.msra.gmra.mrb[144].mxu0 %vm544_vm9, %v8263_v34 }
0x322c   :  { %11054 = vmatpush3.bf16.msra.mxu0 %v8380_v62  ;;  %11055 = vmatprep.mubr.msk.bf16.mxu0 %vm11729_vm11, %v11726_v1 }
0x322d   :  { %v8319_v45 = vpack.c.b16 %v8318_v50, %v8318_v50  ;;  %11065 = vmatprep.subr.bf16.mxu0 %v11726_v1 }
0x322e   :  { %v8370_v12 = vpop.permute.xlu0 %8369 }
0x322f   :  { %v8374_v5 = vrot.slane %v8370_v12, %v11967_v7  ;;  %11050 = vmatmul.mubr.msk.bf16.vlgmr.msra.gmra.mrb[144].mxu1 %vm544_vm9, %v8319_v45 }
0x3230   :  { %11060 = vmatpush3.bf16.msra.mxu1 %v8436_v32  ;;  %11061 = vmatprep.mubr.msk.bf16.mxu1 %vm11729_vm11, %v11726_v1 }
0x3231   :  { %v8375_v27 = vpack.c.b16 %v8374_v5, %v8374_v5  ;;  %11071 = vmatprep.subr.bf16.mxu1 %v11726_v1 }
0x3232   :  { %v8426_v52 = vpop.permute.xlu0 %8425 }
0x3233   :  { %v8430_v26 = vrot.slane %v8426_v52, %v11967_v7  ;;  %11056 = vmatmul.mubr.msk.bf16.vlgmr.msra.gmra.mrb[148].mxu0 %vm544_vm9, %v8375_v27 }
0x3234   :  { %11066 = vmatpush3.bf16.msra.mxu0 %v8492_v9  ;;  %11067 = vmatprep.mubr.msk.bf16.mxu0 %vm11729_vm11, %v11726_v1 }
0x3235   :  { %v8431_v23 = vpack.c.b16 %v8430_v26, %v8430_v26  ;;  %11079 = vmatprep.subr.bf16.mxu0 %v11726_v1 }
0x3236   :  { %v8482_v38 = vpop.permute.xlu0 %8481 }
0x3237   :  { %v8486_v58 = vrot.slane %v8482_v38, %v11967_v7  ;;  %11062 = vmatmul.mubr.msk.bf16.vlgmr.msra.gmra.mrb[148].mxu1 %vm544_vm9, %v8431_v23 }
0x3238   :  { %11075 = vmatprep.mubr.msk.bf16.mxu1 %vm11729_vm11, %v11726_v1  ;;  %11072 = vmatpush3.bf16.msra.mxu1 %v11223_v49 }
0x3239   :  { %v8487_v18 = vpack.c.b16 %v8486_v58, %v8486_v58  ;;  %11073 = vmatprep.subr.bf16.mxu1 %v11726_v1 }
0x323b   :  { %11068 = vmatmul.mubr.msk.bf16.vlgmr.msra.gmra.mrb[152].mxu0 %vm544_vm9, %v8487_v18 }
0x323c   :  { %11083 = vmatprep.mubr.msk.bf16.mxu0 %vm11729_vm11, %v11726_v1  ;;  %11074 = vmatpush3.bf16.msra.mxu1 %v11224_v8 }
0x32f2   :  { %v8136_v22 = vpop.f32.mrb[136].mxu1 }
0x32f3   :  { %v11027_v37 = vpop.f32.mrb[137].mxu1  ;;  %v8542_v13 = vpack.c.bf16 %v8136_v22, %v8136_v22 }
0x32f4   :  { %v8139_v4 = vpop.f32.mrb[138].mxu1 }
0x32f5   :  { %v11028_v48 = vpop.f32.mrb[139].mxu1  ;;  %v8562_v35 = vunpack.c.l.b16 %v8542_v13 }
0x32f6   :  { %v8192_v39 = vpop.f32.mrb[140].mxu0 }
0x32f7   :  { %v8543_v19 = vpack.c.bf16 %v8192_v39, %v8192_v39  ;;  %v11033_v59 = vpop.f32.mrb[141].mxu0 }
0x32f8   :  { %v8195_v11 = vpop.f32.mrb[142].mxu0 }
0x32f9   :  { %v8563_v54 = vunpack.c.l.b16 %v8543_v19  ;;  %v11034_v47 = vpop.f32.mrb[143].mxu0 }
0x32fa   :  { %v8248_v30 = vpop.f32.mrb[140].mxu1 }
0x32fb   :  { %v8570_v36 = vrot.slane %v8563_v54, 7  ;;  %v8544_v10 = vpack.c.bf16 %v8248_v30, %v8248_v30  ;;  %v11039_v53 = vpop.f32.mrb[141].mxu1 }
0x32fc   :  { %v8251_v40 = vpop.f32.mrb[142].mxu1 }
0x32fd   :  { %v8571_v34 = vsel %vm529_vm2, %v8570_v36, %v8562_v35  ;;  %v8564_v62 = vunpack.c.l.b16 %v8544_v10  ;;  %v11040_v31 = vpop.f32.mrb[143].mxu1 }
0x32fe   :  { %v8304_v20 = vpop.f32.mrb[144].mxu0 }
0x32ff   :  { %v8572_v50 = vrot.slane %v8564_v62, 6  ;;  %v8545_v45 = vpack.c.bf16 %v8304_v20, %v8304_v20  ;;  %v11045_v32 = vpop.f32.mrb[145].mxu0 }
0x3300   :  { %v8307_v12 = vpop.f32.mrb[146].mxu0 }
0x3301   :  { %v8573_v15 = vsel %vm531_vm3, %v8572_v50, %v8571_v34  ;;  %v8565_v5 = vunpack.c.l.b16 %v8545_v45  ;;  %v11046_v27 = vpop.f32.mrb[147].mxu0 }
0x3302   :  { %v8360_v9 = vpop.f32.mrb[144].mxu1  ;;  %v8536_v27 = vld [vmem:[#allocation5 + $0x16] sm:$0x1] }
0x3303   :  { %v8574_v52 = vrot.slane %v8565_v5, 5  ;;  %v8546_v26 = vpack.c.bf16 %v8360_v9, %v8360_v9  ;;  %v11051_v23 = vpop.f32.mrb[145].mxu1  ;;  %v8535_v5 = vld [vmem:[#allocation5 + $0xe] sm:$0x1] }
0x3304   :  { %v8363_v38 = vpop.f32.mrb[146].mxu1  ;;  %v8655_v9 = vrot.slane %v8535_v5, 7  ;;  %v8657_v23 = vrot.slane %v8536_v27, 6 }
0x3305   :  { %v8575_v58 = vsel %vm533_vm4, %v8574_v52, %v8573_v15  ;;  %v8566_v18 = vunpack.c.l.b16 %v8546_v26  ;;  %v11052_v49 = vpop.f32.mrb[147].mxu1  ;;  %v8534_v52 = vld [vmem:[#allocation5 + $0x6] sm:$0x1]  ;;  %v8537_v26 = vld [vmem:[#allocation5 + $0x1e] sm:$0x1] }
0x3306   :  { %v8416_v8 = vpop.f32.mrb[148].mxu0  ;;  %v8656_v38 = vsel %vm529_vm2, %v8655_v9, %v8534_v52  ;;  %v11225_v52 = vld [vmem:[#allocation11] ss:$8 sps:$4 sm:$0xff]  }
0x3307   :  { %v8576_v22 = vrot.slane %v8566_v18, 4  ;;  %v8547_v37 = vpack.c.bf16 %v8416_v8, %v8416_v8  ;;  %v11057_v4 = vpop.f32.mrb[149].mxu0  ;;  %v8659_v18 = vrot.slane %v8537_v26, 5  ;;  %v8658_v49 = vsel %vm531_vm3, %v8657_v23, %v8656_v38  ;;  %v8539_v8 = vld [vmem:[#allocation5 + $0x2e] sm:$0x1]  ;;  %v11228_v23 = vld [vmem:[#allocation13] sm:$0xff]  }
0x3308   :  { %v8419_v48 = vpop.f32.mrb[150].mxu0  ;;  %v8540_v4 = vld [vmem:[#allocation5 + $0x36] sm:$0x1]  ;;  %11080 = vmatpush3.bf16.msra.mxu0 %v11228_v23  ;;  %v11229_v38 = vld [vmem:[#allocation13 + $0x8] sm:$0xff]  }
0x3309   :  { %v8577_v39 = vsel %vm535_vm5, %v8576_v22, %v8575_v58  ;;  %v8567_v13 = vunpack.c.l.b16 %v8547_v37  ;;  %v11058_v19 = vpop.f32.mrb[151].mxu0  ;;  %v8538_v58 = vld [vmem:[#allocation5 + $0x26] sm:$0x1]  ;;  %v8660_v37 = vsel %vm533_vm4, %v8659_v18, %v8658_v49  ;;  %v8663_v48 = vrot.slane %v8539_v8, 3  ;;  %v11227_v26 = vld [vmem:[#allocation11 + $0x4] ss:$8 sps:$4 sm:$0xff]   ;;  %11081 = vmatprep.subr.bf16.mxu0 %v11726_v1 }
0x330a   :  { %v8472_v59 = vpop.f32.mrb[148].mxu1  ;;  %v8661_v22 = vrot.slane %v8538_v58, 4  ;;  %8855 = vmatprep.subr.bf16.mxu1 %v11227_v26 }
0x330b   :  { %v8578_v11 = vrot.slane %v8567_v13, 3  ;;  %v8548_v54 = vpack.c.bf16 %v8472_v59, %v8472_v59  ;;  %v11063_v47 = vpop.f32.mrb[149].mxu1  ;;  %v8665_v13 = vrot.slane %v8540_v4, 2 }
0x330c   :  { %v8475_v30 = vpop.f32.mrb[150].mxu1  ;;  %v8601_v47 = vpop.permute.xlu1 %8600  ;;  %11082 = vmatpush3.bf16.msra.mxu0 %v11229_v38 }
0x330d   :  { %v8579_v35 = vsel %vm537_vm6, %v8578_v11, %v8577_v39  ;;  %v8568_v36 = vunpack.c.l.b16 %v8548_v54  ;;  %v11064_v10 = vpop.f32.mrb[151].mxu1  ;;  %v8541_v39 = vld [vmem:[#allocation5 + $0x3e] sm:$0x1]  ;;  %v8599_v11 = vpop.permute.xlu0 %8598  ;;  %11087 = vmatprep.subr.bf16.mxu0 %v11726_v1 }
0x330e   :  { %v8528_v53 = vpop.f32.mrb[152].mxu0  ;;  %v8667_v59 = vrot.slane %v8541_v39, 1  ;;  %v8602_v30 = vsel %vm1271_vm12, %v8599_v11, %v8601_v47 }
0x330f   :  { %v8580_v40 = vrot.slane %v8568_v36, 2  ;;  %v8549_v34 = vpack.c.bf16 %v8528_v53, %v8528_v53  ;;  %v11069_v62 = vpop.f32.mrb[153].mxu0 }
0x3310   :  { %v8531_v31 = vpop.f32.mrb[154].mxu0 }
0x3311   :  { %v8581_v20 = vsel %vm539_vm7, %v8580_v40, %v8579_v35  ;;  %v8569_v50 = vunpack.c.l.b16 %v8549_v34  ;;  %v11070_v45 = vpop.f32.mrb[155].mxu0 }
0x3313   :  { %v8582_v32 = vrot.slane %v8569_v50, 1 }
0x3315   :  { %v8583_v12 = vsel %vm541_vm8, %v8582_v32, %v8581_v20 }
0x3316   :  { %v8584_v15 = vpack.c.b16 %v8583_v12, %v8583_v12 }
0x3318   :  { %11076 = vmatmul.mubr.msk.bf16.vlgmr.msra.gmra.mrb[152].mxu1 %vm106_vm0, %v8584_v15 }
0x3319   :  { %8887 = vmatprep.mubr.bf16.mxu1 %v11725_v0  ;;  %v8662_v0 = vsel %vm535_vm5, %v8661_v22, %v8660_v37  ;;  %8856 = vmatpush1.bf16.msra.mxu1 %v11225_v52 }
0x331a   :  { %v8664_v19 = vsel %vm537_vm6, %v8663_v48, %v8662_v0  ;;  %8857 = vmatprep.subr.bf16.mxu1 %v13341_v24 }
0x331b   :  { %v8666_v54 = vsel %vm539_vm7, %v8665_v13, %v8664_v19 }
0x331c   :  { %v8668_v36 = vsel %vm541_vm8, %v8667_v59, %v8666_v54 }
0x331d   :  { %8858 = vmatpush1.bf16.msra.mxu1 %v13339_v46  ;;  %v13590_v46 = vld [vmem:[%s13827_s8] ss:$0 sm:$0xff] }
0x331e   :  { %11093 = vmatprep.subr.bf16.mxu1 %v11726_v1 }
0x33eb   :  { %v8641_v35 = vpop.f32.mrb[152].mxu1 }
0x33ec   :  { %v8642_v10 = vadd.f32 %v8641_v35, %v8602_v30  ;;  %v11077_v53 = vpop.f32.mrb[153].mxu1 }
0x33ed   :  { %v8644_v40 = vpop.f32.mrb[154].mxu1 }
0x33ee   :  { %v8670_v34 = vadd.f32 %v8668_v36, %v8642_v10  ;;  %v11078_v62 = vpop.f32.mrb[155].mxu1 }
0x33f0   :  { %11520 = vtanh.f32 %v8670_v34  ;;  %v10259_v20 = vmul.f32 -1.442695, %v8670_v34 }
0x33f2   :  { %11522 = vpow2.f32 %v10259_v20 }
0x33fa   :  { %v11521_v31 = vpop.eup %11520 }
0x33fb   :  { %8680 = vrot.lane.b32.xlu0 %v11521_v31, %s11717_s19 }
0x33fc   :  { %v11523_v50 = vpop.eup %11522 }
0x33fd   :  { %v8674_v45 = vadd.f32 1.0, %v11523_v50 }
0x33ff   :  { %11524 = vrcp.f32 %v8674_v45 }
0x3409   :  { %v11525_v32 = vpop.eup %11524 }
0x340a   :  { %v8678_v5 = vmul.f32 %v11525_v32, %v13336_v33 }
0x346d   :  { %v8681_v12 = vpop.permute.xlu0 %8680 }
0x346e   :  { %v8683_v15 = vmul.f32 %v11525_v32, %v8681_v12 }
0x3470   :  { %8685 = vrot.lane.b32.xlu0 %v8683_v15, %s11730_s18 }
0x34e2   :  { %v8686_v27 = vpop.permute.xlu0 %8685 }
0x34e3   :  { %v13571_v9 = vadd.f32 %v8686_v27, %v8678_v5 }
0x34e5   :  { %11526 = vtanh.f32 %v13571_v9 }
0x34ef   :  { %v11527_v33 = vpop.eup %11526 }
0x34f0   :  { %8691 = vrot.lane.b32.xlu0 %v11527_v33, %s11717_s19 }
0x3562   :  { %v8692_v58 = vpop.permute.xlu0 %8691 }
0x3563   :  { %v8694_v18 = vmul.f32 %v11525_v32, %v8692_v58 }
0x3565   :  { %v8695_v49 = vpack.c.bf16 %v8694_v18, %v8694_v18 }
0x3567   :  { %8708 = vrot.lane.b32.xlu0 %v8695_v49, %s11730_s18 }
0x35d9   :  { %v8709_v8 = vpop.permute.xlu0 %8708 }
0x35da   :  { %11084 = vmatmul.mubr.msk.bf16.vlgmr.msra.gmra.mrb[156].mxu0 %vm106_vm0, %v8709_v8  ;;  %10272 = vmatmul.mubr.msk.bf16.vlgmr.msra.gmra.mrb[156].mxu1 %vm106_vm0, %v8709_v8 }
0x35db   :  { %11089 = vmatprep.mubr.msk.bf16.mxu0 %vm11729_vm11, %v11726_v1  ;;  %11095 = vmatprep.mubr.msk.bf16.mxu1 %vm11729_vm11, %v11726_v1 }
0x36ad   :  { %v8759_v24 = vpop.f32.mrb[156].mxu0  ;;  %v13592_v22 = vpop.f32.mrb[156].mxu1 }
0x36ae   :  { %v8760_v37 = vadd.f32 %v13590_v46, %v8759_v24  ;;  %v8913_v4 = vcombine.high %v13592_v22, %v13592_v22  ;;  %v8920_v48 = vrot.slane %v13592_v22, %v11878_v21  ;;  %v11085_v0 = vpop.f32.mrb[157].mxu0  ;;  %v13599_v39 = vpop.f32.mrb[157].mxu1 }
0x36af   :  { %v8762_v13 = vpop.f32.mrb[158].mxu0  ;;  %v8893_v19 = vpop.f32.mrb[158].mxu1 }
0x36b0   :  { %v8766_v59 = vcombine.high %v8760_v37, %v8760_v37  ;;  %v8773_v11 = vrot.slane %v8760_v37, %v11878_v21  ;;  %v8927_v54 = vrot.slane %v8913_v4, %v11878_v21  ;;  %v8928_v47 = vcombine.high %v8920_v48, %v8920_v48  ;;  %v11086_v30 = vpop.f32.mrb[159].mxu0  ;;  %v8894_v35 = vpop.f32.mrb[159].mxu1 }
0x36b1   :  { %v8936_v36 = vrot.slane %v8920_v48, %v11878_v21 }
0x36b2   :  { %v8780_v10 = vrot.slane %v8766_v59, %v11878_v21  ;;  %v8781_v53 = vcombine.high %v8773_v11, %v8773_v11  ;;  %v8789_v40 = vrot.slane %v8773_v11, %v11878_v21  ;;  %10264 = vst.sshfl [vmem:[#allocation14 + $0x6] sm:$0x1 pattern:$0x73625140] %v8773_v11  ;;  %v8929_v34 = vcombine.high %v8927_v54, %v8927_v54 }
0x36b3   :  { %v8943_v62 = vrot.slane %v8927_v54, %v11878_v21  ;;  %v8950_v31 = vrot.slane %v8928_v47, %v11878_v21  ;;  %v8958_v20 = vcombine.high %v8936_v36, %v8936_v36  ;;  %v8965_v50 = vrot.slane %v8936_v36, %v11895_v44 }
0x36b4   :  { %v8782_v45 = vcombine.high %v8780_v10, %v8780_v10  ;;  %v8796_v32 = vrot.slane %v8780_v10, %v11878_v21  ;;  %v8803_v12 = vrot.slane %v8781_v53, %v11878_v21  ;;  %v8811_v15 = vcombine.high %v8789_v40, %v8789_v40  ;;  %10265 = vst.sshfl [vmem:[#allocation14 + $0xe] sm:$0x1 pattern:$0x73625140] %v8781_v53 }
0x36b5   :  { %10266 = vst.sshfl [vmem:[#allocation14 + $0x26] sm:$0x1 pattern:$0x73625140] %v8780_v10  ;;  %v8957_v5 = vrot.slane %v8929_v34, %v11878_v21  ;;  %v8959_v27 = vcombine.high %v8943_v62, %v8943_v62  ;;  %v8960_v52 = vcombine.high %v8950_v31, %v8950_v31  ;;  %v8969_v26 = vrot.slane %v8950_v31, %v11895_v44 }
0x36b6   :  { %v8810_v23 = vrot.slane %v8782_v45, %v11878_v21  ;;  %v8812_v38 = vcombine.high %v8796_v32, %v8796_v32  ;;  %v8813_v33 = vcombine.high %v8803_v12, %v8803_v12  ;;  %8825 = vst [vmem:[#allocation14 + $0x16] sm:$0x1] %v8811_v15  ;;  %10267 = vst.sshfl [vmem:[#allocation14 + $0x2e] sm:$0x1 pattern:$0x73625140] %v8782_v45 }
0x36b7   :  { %v8973_v58 = vrot.slane %v8958_v20, %v11895_v44  ;;  %v8961_v18 = vcombine.high %v8957_v5, %v8957_v5  ;;  %v8977_v49 = vrot.slane %v8960_v52, %v11895_v44  ;;  %v8981_v8 = vrot.slane %v8943_v62, %v11895_v44 }
0x36b8   :  { %v8985_v24 = vrot.slane %v8957_v5, %v11895_v44  ;;  %v8814_v37 = vcombine.high %v8810_v23, %v8810_v23  ;;  %8826 = vst [vmem:[#allocation14 + $0x1e] sm:$0x1] %v8813_v33  ;;  %8829 = vst [vmem:[#allocation14 + $0x36] sm:$0x1] %v8812_v38  ;;  %v9002_v4 = vadd.f32 %v10391_v2, %v8965_v50 }
0x36b9   :  { %v9003_v48 = vadd.f32 %v10392_v57, %v8969_v26  ;;  %v9004_v0 = vadd.f32 %v10395_v60, %v8973_v58  ;;  %v9005_v13 = vadd.f32 %v10396_v63, %v8977_v49  ;;  %v8993_v19 = vrot.slane %v8961_v18, %v11895_v44 }
0x36ba   :  { %8830 = vst [vmem:[#allocation14 + $0x3e] sm:$0x1] %v8814_v37  ;;  %v9006_v59 = vadd.f32 %v10399_v16, %v8981_v8  ;;  %11528 = vtanh.f32 %v9002_v4  ;;  %v8989_v11 = vrot.slane %v8959_v27, %v11895_v44  ;;  %v9007_v2 = vadd.f32 %v10400_v28, %v8985_v24 }
0x36bb   :  { %11530 = vtanh.f32 %v9003_v48  ;;  %v9009_v17 = vadd.f32 %v10404_v25, %v8993_v19 }
0x36bc   :  { %11532 = vtanh.f32 %v9004_v0  ;;  %v9008_v55 = vadd.f32 %v10403_v29, %v8989_v11 }
0x36bd   :  { %11534 = vtanh.f32 %v9005_v13 }
0x36be   :  { %11536 = vtanh.f32 %v9006_v59 }
0x36bf   :  { %11538 = vtanh.f32 %v9007_v2 }
0x36c0   :  { %11540 = vtanh.f32 %v9009_v17 }
0x36c1   :  { %11542 = vtanh.f32 %v9008_v55 }
0x36c4   :  { %v11529_v57 = vpop.eup %11528 }
0x36c5   :  { %v11531_v60 = vpop.eup %11530  ;;  %v9018_v63 = vmul.f32 %v11575_v6, %v11529_v57 }
0x36c6   :  { %v11533_v16 = vpop.eup %11532  ;;  %v9019_v28 = vmul.f32 %v11575_v6, %v11531_v60 }
0x36c7   :  { %v11535_v54 = vpop.eup %11534  ;;  %v9026_v47 = vsel %vm106_vm0, %v9018_v63, 0.0  ;;  %v9020_v25 = vmul.f32 %v11575_v6, %v11533_v16 }
0x36c8   :  { %v11537_v30 = vpop.eup %11536  ;;  %9027 = vadd.xlane.f32.xlu1 %v9026_v47  ;;  %v9029_v14 = vsel %vm106_vm0, %v9019_v28, 0.0  ;;  %v9021_v29 = vmul.f32 %v11575_v6, %v11535_v54 }
0x36c9   :  { %v11539_v35 = vpop.eup %11538  ;;  %9030 = vadd.xlane.f32.xlu0 %v9029_v14  ;;  %v9032_v40 = vsel %vm106_vm0, %v9020_v25, 0.0  ;;  %v9022_v34 = vmul.f32 %v11575_v6, %v11537_v30 }
0x36ca   :  { %v9035_v36 = vsel %vm106_vm0, %v9021_v29, 0.0  ;;  %v9023_v10 = vmul.f32 %v11575_v6, %v11539_v35  ;;  %v11541_v53 = vpop.eup %11540 }
0x36cb   :  { %v11543_v62 = vpop.eup %11542  ;;  %v9025_v20 = vmul.f32 %v11575_v6, %v11541_v53  ;;  %v9038_v50 = vsel %vm106_vm0, %v9022_v34, 0.0 }
0x36cc   :  { %9036 = vadd.xlane.f32.xlu1 %v9035_v36  ;;  %v9041_v31 = vsel %vm106_vm0, %v9023_v10, 0.0  ;;  %v9024_v45 = vmul.f32 %v11575_v6, %v11543_v62 }
0x36cd   :  { %9033 = vadd.xlane.f32.xlu0 %v9032_v40  ;;  %v9047_v32 = vsel %vm106_vm0, %v9025_v20, 0.0 }
0x36ce   :  { %v9044_v12 = vsel %vm106_vm0, %v9024_v45, 0.0 }
0x36d0   :  { %9042 = vadd.xlane.f32.xlu1 %v9041_v31 }
0x36d1   :  { %9039 = vadd.xlane.f32.xlu0 %v9038_v50 }
0x36d4   :  { %9048 = vadd.xlane.f32.xlu1 %v9047_v32 }
0x36d5   :  { %9045 = vadd.xlane.f32.xlu0 %v9044_v12 }
0x3755   :  { %v9028_v15 = vpop.xlane.xlu1 %9027 }
0x3756   :  { %v9031_v5 = vpop.xlane.xlu0 %9030  ;;  %v9061_v26 = vrot.slane %v9028_v15, %v11967_v7 }
0x3757   :  { %v9065_v27 = vrot.slane %v9031_v5, %v11967_v7 }
0x3759   :  { %v9037_v52 = vpop.xlane.xlu1 %9036  ;;  %v9090_v33 = vsel %vm529_vm2, %v9065_v27, %v9061_v26 }
0x375a   :  { %v9034_v23 = vpop.xlane.xlu0 %9033  ;;  %v9073_v49 = vrot.slane %v9037_v52, %v11967_v7 }
0x375b   :  { %v9069_v38 = vrot.slane %v9034_v23, %v11967_v7 }
0x375d   :  { %v9091_v58 = vsel %vm531_vm3, %v9069_v38, %v9090_v33  ;;  %v9043_v18 = vpop.xlane.xlu1 %9042 }
0x375e   :  { %v9040_v8 = vpop.xlane.xlu0 %9039  ;;  %v9092_v37 = vsel %vm533_vm4, %v9073_v49, %v9091_v58  ;;  %v9081_v0 = vrot.slane %v9043_v18, %v11967_v7 }
0x375f   :  { %v9077_v24 = vrot.slane %v9040_v8, %v11967_v7 }
0x3761   :  { %v9093_v4 = vsel %vm535_vm5, %v9077_v24, %v9092_v37  ;;  %v9049_v48 = vpop.xlane.xlu1 %9048 }
0x3762   :  { %v9046_v13 = vpop.xlane.xlu0 %9045  ;;  %v9089_v59 = vrot.slane %v9049_v48, %v11967_v7  ;;  %v9094_v11 = vsel %vm537_vm6, %v9081_v0, %v9093_v4 }
0x3763   :  { %v9085_v19 = vrot.slane %v9046_v13, %v11967_v7 }
0x3765   :  { %v9095_v2 = vsel %vm539_vm7, %v9085_v19, %v9094_v11 }
0x3766   :  { %v9096_v17 = vsel %vm541_vm8, %v9089_v59, %v9095_v2 }
0x3767   :  { %v9098_v55 = vsel %vm544_vm9, %v9096_v17, -inf }
0x3768   :  { %9099 = vmax.xlane.f32.xlu0 %v9098_v55 }
0x37f5   :  { %v9100_v57 = vpop.xlane.xlu0 %9099 }
0x37f6   :  { %v9105_v60 = vrot.slane %v9100_v57, %v11895_v44  ;;  %v9109_v6 = vrot.slane %v9100_v57, %v11986_v41  ;;  %v9113_v63 = vrot.slane %v9100_v57, %v11989_v42  ;;  %v9121_v16 = vrot.slane %v9100_v57, %v11998_v51 }
0x37f7   :  { %v9117_v28 = vrot.slane %v9100_v57, %v11992_v43  ;;  %v9129_v14 = vrot.slane %v9100_v57, %v12006_v61  ;;  %v9125_v36 = vrot.slane %v9100_v57, %v12002_v56  ;;  %v9133_v62 = vrot.slane %v9100_v57, %v12010_v3 }
0x37f8   :  { %v9142_v54 = vsub.f32 %v9028_v15, %v9105_v60  ;;  %v9143_v47 = vsub.f32 %v9031_v5, %v9109_v6  ;;  %v9144_v30 = vsub.f32 %v9034_v23, %v9113_v63  ;;  %v9146_v29 = vsub.f32 %v9040_v8, %v9121_v16 }
0x37f9   :  { %v9145_v10 = vsub.f32 %v9037_v52, %v9117_v28  ;;  %v9148_v40 = vsub.f32 %v9046_v13, %v9129_v14  ;;  %v9147_v31 = vsub.f32 %v9043_v18, %v9125_v36  ;;  %v9149_v45 = vsub.f32 %v9049_v48, %v9133_v62 }
0x37fa   :  { %v9150_v25 = vmul.f32 1.442695, %v9142_v54  ;;  %v9152_v35 = vmul.f32 1.442695, %v9143_v47  ;;  %v9154_v53 = vmul.f32 1.442695, %v9144_v30 }
0x37fb   :  { %v9158_v34 = vmul.f32 1.442695, %v9146_v29  ;;  %v9156_v20 = vmul.f32 1.442695, %v9145_v10  ;;  %v9162_v50 = vmul.f32 1.442695, %v9148_v40 }
0x37fc   :  { %11544 = vpow2.f32 %v9150_v25  ;;  %v9160_v32 = vmul.f32 1.442695, %v9147_v31  ;;  %v9164_v5 = vmul.f32 1.442695, %v9149_v45  ;;  %v9299_v30 = vld [vmem:[#allocation8] sm:$0xf] }
0x37fd   :  { %11546 = vpow2.f32 %v9152_v35  ;;  %v9321_v14 = vsel %vm767_vm10, %v9299_v30, 0  ;;  %v9305_v30 = vld [vmem:[#allocation8 + $0x18] sm:$0xf] }
0x37fe   :  { %11548 = vpow2.f32 %v9154_v53  ;;  %11088 = vmatpush3.bf16.msra.mxu0 %v9321_v14 }
0x37ff   :  { %11550 = vpow2.f32 %v9158_v34  ;;  %11099 = vmatprep.subr.bf16.mxu0 %v11726_v1 }
0x3800   :  { %11552 = vpow2.f32 %v9156_v20 }
0x3801   :  { %11554 = vpow2.f32 %v9162_v50 }
0x3802   :  { %11556 = vpow2.f32 %v9160_v32 }
0x3803   :  { %11558 = vpow2.f32 %v9164_v5 }
0x3806   :  { %v11545_v12 = vpop.eup %11544 }
0x3807   :  { %v11547_v15 = vpop.eup %11546  ;;  %9175 = vperm.xlu1 %11167, %v11545_v12  }
0x3808   :  { %9178 = vperm.xlu0 %11168, %v11547_v15   ;;  %v11549_v27 = vpop.eup %11548 }
0x3809   :  { %v13671_v52 = vpop.eup %11550 }
0x380a   :  { %v11553_v26 = vpop.eup %11552 }
0x380b   :  { %9181 = vperm.xlu1 %11167, %v11549_v27   ;;  %v13674_v23 = vpop.eup %11554 }
0x380c   :  { %9187 = vperm.xlu0 %11168, %v13671_v52   ;;  %v13677_v38 = vpop.eup %11556 }
0x380d   :  { %v13680_v33 = vpop.eup %11558 }
0x380f   :  { %9184 = vperm.xlu1 %11167, %v11553_v26  }
0x3810   :  { %9193 = vperm.xlu0 %11168, %v13674_v23  }
0x3813   :  { %9190 = vperm.xlu1 %11167, %v13677_v38  }
0x3817   :  { %9196 = vperm.xlu1 %11167, %v13680_v33  }
0x3886   :  { %v9176_v58 = vpop.permute.xlu1 %9175 }
0x3887   :  { %v9179_v18 = vpop.permute.xlu0 %9178  ;;  %v9201_v24 = vrot.slane %v9176_v58, %v11967_v7  ;;  %v9300_v58 = vld [vmem:[#allocation8 + $0x4] sm:$0xf] }
0x3888   :  { %v9205_v8 = vrot.slane %v9179_v18, %v11967_v7 }
0x388a   :  { %v9182_v49 = vpop.permute.xlu1 %9181  ;;  %v9230_v0 = vsel %vm529_vm2, %v9205_v8, %v9201_v24 }
0x388b   :  { %v9209_v37 = vrot.slane %v9182_v49, %v11967_v7  ;;  %v9188_v4 = vpop.permute.xlu0 %9187 }
0x388c   :  { %v9217_v11 = vrot.slane %v9188_v4, %v11967_v7 }
0x388d   :  { %v9231_v19 = vsel %vm531_vm3, %v9209_v37, %v9230_v0 }
0x388e   :  { %v9185_v48 = vpop.permute.xlu1 %9184 }
0x388f   :  { %v9213_v13 = vrot.slane %v9185_v48, %v11967_v7  ;;  %v9194_v17 = vpop.permute.xlu0 %9193 }
0x3890   :  { %v9225_v6 = vrot.slane %v9194_v17, %v11967_v7  ;;  %v9303_v17 = vld [vmem:[#allocation8 + $0x10] sm:$0xf] }
0x3891   :  { %v9232_v59 = vsel %vm533_vm4, %v9213_v13, %v9231_v19 }
0x3892   :  { %v9191_v2 = vpop.permute.xlu1 %9190  ;;  %v9233_v57 = vsel %vm535_vm5, %v9217_v11, %v9232_v59  ;;  %v9302_v59 = vld [vmem:[#allocation8 + $0xc] sm:$0xf] }
0x3893   :  { %v9221_v55 = vrot.slane %v9191_v2, %v11967_v7 }
0x3895   :  { %v9234_v60 = vsel %vm537_vm6, %v9221_v55, %v9233_v57 }
0x3896   :  { %v9197_v63 = vpop.permute.xlu1 %9196  ;;  %v9235_v28 = vsel %vm539_vm7, %v9225_v6, %v9234_v60  ;;  %v9545_v60 = vsel %vm767_vm10, %v9303_v17, 0 }
0x3897   :  { %v9229_v16 = vrot.slane %v9197_v63, %v11967_v7  ;;  %v9304_v63 = vld [vmem:[#allocation8 + $0x14] sm:$0xf] }
0x3899   :  { %v9236_v54 = vsel %vm541_vm8, %v9229_v16, %v9235_v28 }
0x389a   :  { %v9238_v47 = vsel %vm544_vm9, %v9236_v54, 0.0  ;;  %v9601_v54 = vsel %vm767_vm10, %v9304_v63, 0 }
0x389b   :  { %9239 = vadd.xlane.f32.xlu0 %v9238_v47 }
0x38b1   :  { %9819 = vrot.lane.b32.xlu0 %v13592_v22, %s11728_s13 }
0x3928   :  { %v9240_v29 = vpop.xlane.xlu0 %9239 }
0x3929   :  { %11560 = vrcp.f32 %v9240_v29 }
0x3933   :  { %v11561_v25 = vpop.eup %11560 }
0x3934   :  { %v9246_v35 = vrot.slane %v11561_v25, %v11895_v44  ;;  %v9250_v36 = vrot.slane %v11561_v25, %v11986_v41  ;;  %v9254_v40 = vrot.slane %v11561_v25, %v11989_v42  ;;  %v9258_v20 = vrot.slane %v11561_v25, %v11992_v43 }
0x3935   :  { %v9262_v5 = vrot.slane %v11561_v25, %v11998_v51  ;;  %v9377_v44 = vsel %vm767_vm10, %v9300_v58, 0  ;;  %v9270_v51 = vrot.slane %v11561_v25, %v12006_v61  ;;  %v9274_v24 = vrot.slane %v11561_v25, %v12010_v3 }
0x3936   :  { %v9283_v10 = vmul.f32 %v11545_v12, %v9246_v35  ;;  %v9284_v53 = vmul.f32 %v11547_v15, %v9250_v36  ;;  %v9285_v31 = vmul.f32 %v11549_v27, %v9254_v40  ;;  %v9286_v32 = vmul.f32 %v11553_v26, %v9258_v20  ;;  %11094 = vmatpush3.bf16.msra.mxu1 %v9377_v44  ;;  %v9306_v36 = vld [vmem:[#allocation8 + $0x1c] sm:$0xf] }
0x3937   :  { %11105 = vmatprep.subr.bf16.mxu1 %v11726_v1  ;;  %v9287_v12 = vmul.f32 %v13671_v52, %v9262_v5  ;;  %v9266_v15 = vrot.slane %v11561_v25, %v12002_v56  ;;  %v9289_v8 = vmul.f32 %v13674_v23, %v9270_v51  ;;  %v9290_v52 = vmul.f32 %v13680_v33, %v9274_v24 }
0x3938   :  { %v9291_v34 = vpack.c.bf16 %v9283_v10, %v9283_v10  ;;  %v9292_v22 = vpack.c.bf16 %v9284_v53, %v9284_v53  ;;  %v9293_v45 = vpack.c.bf16 %v9285_v31, %v9285_v31  ;;  %v9294_v42 = vpack.c.bf16 %v9286_v32, %v9286_v32 }
0x3939   :  { %v9295_v27 = vpack.c.bf16 %v9287_v12, %v9287_v12  ;;  %v9288_v26 = vmul.f32 %v13677_v38, %v9266_v15  ;;  %v9297_v4 = vpack.c.bf16 %v9289_v8, %v9289_v8  ;;  %v9298_v48 = vpack.c.bf16 %v9290_v52, %v9290_v52  ;;  %v9301_v38 = vld [vmem:[#allocation8 + $0x8] sm:$0xf] }
0x393a   :  { %v9308_v62 = vunpack.c.l.b16 %v9291_v34  ;;  %v9364_v50 = vunpack.c.l.b16 %v9292_v22  ;;  %v9420_v41 = vunpack.c.l.b16 %v9293_v45  ;;  %v9476_v43 = vunpack.c.l.b16 %v9294_v42  ;;  %v11230_v45 = vld [vmem:[%s13825_s6] sm:$0xff]  }
0x393b   :  { %v9532_v18 = vunpack.c.l.b16 %v9295_v27  ;;  %v9296_v49 = vpack.c.bf16 %v9288_v26, %v9288_v26  ;;  %v9644_v56 = vunpack.c.l.b16 %v9297_v4  ;;  %v9700_v0 = vunpack.c.l.b16 %v9298_v48 }
0x393c   :  { %9310 = vperm.xlu1 %11167, %v9308_v62   ;;  %v9433_v3 = vsel %vm767_vm10, %v9301_v38, 0  ;;  %v9657_v25 = vsel %vm767_vm10, %v9305_v30, 0  ;;  %v9713_v40 = vsel %vm767_vm10, %v9306_v36, 0 }
0x393d   :  { %v9588_v37 = vunpack.c.l.b16 %v9296_v49 }
0x3940   :  { %9366 = vperm.xlu1 %11167, %v9364_v50  }
0x3944   :  { %9422 = vperm.xlu1 %11167, %v9420_v41  }
0x3948   :  { %9478 = vperm.xlu1 %11167, %v9476_v43  }
0x394c   :  { %9534 = vperm.xlu1 %11167, %v9532_v18  }
0x3950   :  { %9590 = vperm.xlu1 %11167, %v9588_v37  }
0x3954   :  { %9646 = vperm.xlu1 %11167, %v9644_v56  }
0x3958   :  { %9702 = vperm.xlu1 %11167, %v9700_v0  }
0x395c   :  { %9821 = vrot.lane.b32.xlu1 %v13599_v39, %s11728_s13  ;;  %v9489_v39 = vsel %vm767_vm10, %v9302_v59, 0 }
0x39bb   :  { %v9311_v61 = vpop.permute.xlu1 %9310 }
0x39bc   :  { %v9315_v23 = vrot.slane %v9311_v61, %v11967_v7 }
0x39be   :  { %v9316_v13 = vpack.c.b16 %v9315_v23, %v9315_v23 }
0x39bf   :  { %v9367_v19 = vpop.permute.xlu1 %9366 }
0x39c0   :  { %v9371_v33 = vrot.slane %v9367_v19, %v11967_v7  ;;  %11090 = vmatmul.mubr.msk.bf16.vlgmr.msra.gmra.mrb[160].mxu0 %vm544_vm9, %v9316_v13 }
0x39c1   :  { %11100 = vmatpush3.bf16.msra.mxu0 %v9433_v3  ;;  %11101 = vmatprep.mubr.msk.bf16.mxu0 %vm11729_vm11, %v11726_v1 }
0x39c2   :  { %v9372_v11 = vpack.c.b16 %v9371_v33, %v9371_v33  ;;  %11111 = vmatprep.subr.bf16.mxu0 %v11726_v1 }
0x39c3   :  { %v9423_v2 = vpop.permute.xlu1 %9422 }
0x39c4   :  { %v9427_v55 = vrot.slane %v9423_v2, %v11967_v7  ;;  %11096 = vmatmul.mubr.msk.bf16.vlgmr.msra.gmra.mrb[160].mxu1 %vm544_vm9, %v9372_v11 }
0x39c5   :  { %11106 = vmatpush3.bf16.msra.mxu1 %v9489_v39  ;;  %11107 = vmatprep.mubr.msk.bf16.mxu1 %vm11729_vm11, %v11726_v1 }
0x39c6   :  { %v9428_v57 = vpack.c.b16 %v9427_v55, %v9427_v55  ;;  %11117 = vmatprep.subr.bf16.mxu1 %v11726_v1 }
0x39c7   :  { %v9479_v6 = vpop.permute.xlu1 %9478 }
0x39c8   :  { %v9483_v16 = vrot.slane %v9479_v6, %v11967_v7  ;;  %11102 = vmatmul.mubr.msk.bf16.vlgmr.msra.gmra.mrb[164].mxu0 %vm544_vm9, %v9428_v57 }
0x39c9   :  { %11112 = vmatpush3.bf16.msra.mxu0 %v9545_v60  ;;  %11113 = vmatprep.mubr.msk.bf16.mxu0 %vm11729_vm11, %v11726_v1 }
0x39ca   :  { %v9484_v28 = vpack.c.b16 %v9483_v16, %v9483_v16  ;;  %11123 = vmatprep.subr.bf16.mxu0 %v11726_v1 }
0x39cb   :  { %v9535_v47 = vpop.permute.xlu1 %9534 }
0x39cc   :  { %v9539_v14 = vrot.slane %v9535_v47, %v11967_v7  ;;  %11108 = vmatmul.mubr.msk.bf16.vlgmr.msra.gmra.mrb[164].mxu1 %vm544_vm9, %v9484_v28 }
0x39cd   :  { %11118 = vmatpush3.bf16.msra.mxu1 %v9601_v54  ;;  %11119 = vmatprep.mubr.msk.bf16.mxu1 %vm11729_vm11, %v11726_v1 }
0x39ce   :  { %v9540_v29 = vpack.c.b16 %v9539_v14, %v9539_v14  ;;  %11129 = vmatprep.subr.bf16.mxu1 %v11726_v1 }
0x39cf   :  { %v9591_v35 = vpop.permute.xlu1 %9590 }
0x39d0   :  { %v9595_v10 = vrot.slane %v9591_v35, %v11967_v7  ;;  %11114 = vmatmul.mubr.msk.bf16.vlgmr.msra.gmra.mrb[168].mxu0 %vm544_vm9, %v9540_v29 }
0x39d1   :  { %11124 = vmatpush3.bf16.msra.mxu0 %v9657_v25  ;;  %11125 = vmatprep.mubr.msk.bf16.mxu0 %vm11729_vm11, %v11726_v1 }
0x39d2   :  { %v9596_v53 = vpack.c.b16 %v9595_v10, %v9595_v10  ;;  %11135 = vmatprep.subr.bf16.mxu0 %v11726_v1 }
0x39d3   :  { %v9647_v34 = vpop.permute.xlu1 %9646 }
0x39d4   :  { %v9651_v62 = vrot.slane %v9647_v34, %v11967_v7  ;;  %11120 = vmatmul.mubr.msk.bf16.vlgmr.msra.gmra.mrb[168].mxu1 %vm544_vm9, %v9596_v53 }
0x39d5   :  { %11130 = vmatpush3.bf16.msra.mxu1 %v9713_v40  ;;  %11131 = vmatprep.mubr.msk.bf16.mxu1 %vm11729_vm11, %v11726_v1 }
0x39d6   :  { %v9652_v22 = vpack.c.b16 %v9651_v62, %v9651_v62  ;;  %11143 = vmatprep.subr.bf16.mxu1 %v11726_v1 }
0x39d7   :  { %v9703_v31 = vpop.permute.xlu1 %9702 }
0x39d8   :  { %v9707_v20 = vrot.slane %v9703_v31, %v11967_v7  ;;  %11126 = vmatmul.mubr.msk.bf16.vlgmr.msra.gmra.mrb[172].mxu0 %vm544_vm9, %v9652_v22  ;;  %v11231_v7 = vld [vmem:[%s13825_s6 + $0x8] sm:$0xff]   ;;  %s11731_s6 = smov [#allocation14]  }
0x39d9   :  { %11139 = vmatprep.mubr.msk.bf16.mxu0 %vm11729_vm11, %v11726_v1  ;;  %11136 = vmatpush3.bf16.msra.mxu0 %v11230_v45 }
0x39da   :  { %v9708_v50 = vpack.c.b16 %v9707_v20, %v9707_v20  ;;  %11137 = vmatprep.subr.bf16.mxu0 %v11726_v1 }
0x39dc   :  { %11132 = vmatmul.mubr.msk.bf16.vlgmr.msra.gmra.mrb[172].mxu1 %vm544_vm9, %v9708_v50 }
0x39dd   :  { %11147 = vmatprep.mubr.msk.bf16.mxu1 %vm11729_vm11, %v11726_v1  ;;  %11138 = vmatpush3.bf16.msra.mxu0 %v11231_v7 }
0x3a93   :  { %v9357_v32 = vpop.f32.mrb[160].mxu0 }
0x3a94   :  { %v11091_v5 = vpop.f32.mrb[161].mxu0  ;;  %v9763_v42 = vpack.c.bf16 %v9357_v32, %v9357_v32 }
0x3a95   :  { %v9360_v58 = vpop.f32.mrb[162].mxu0 }
0x3a96   :  { %v11092_v44 = vpop.f32.mrb[163].mxu0  ;;  %v9783_v18 = vunpack.c.l.b16 %v9763_v42 }
0x3a97   :  { %v9413_v41 = vpop.f32.mrb[160].mxu1  ;;  %v9756_v44 = vld [vmem:[#allocation5 + $0xf] sm:$0x1] }
0x3a98   :  { %v9764_v12 = vpack.c.bf16 %v9413_v41, %v9413_v41  ;;  %v11097_v15 = vpop.f32.mrb[161].mxu1  ;;  %v9757_v41 = vld [vmem:[#allocation5 + $0x17] sm:$0x1]  ;;  %v9876_v42 = vrot.slane %v9756_v44, 7 }
0x3a99   :  { %v9416_v43 = vpop.f32.mrb[162].mxu1  ;;  %v9758_v15 = vld [vmem:[#allocation5 + $0x1f] sm:$0x1] }
0x3a9a   :  { %v9784_v27 = vunpack.c.l.b16 %v9764_v12  ;;  %v11098_v26 = vpop.f32.mrb[163].mxu1  ;;  %v9755_v12 = vld [vmem:[#allocation5 + $0x7] sm:$0x1]  ;;  %v9878_v43 = vrot.slane %v9757_v41, 6 }
0x3a9b   :  { %v9469_v51 = vpop.f32.mrb[164].mxu0  ;;  %v9759_v26 = vld [vmem:[#allocation5 + $0x27] sm:$0x1] }
0x3a9c   :  { %v9791_v49 = vrot.slane %v9784_v27, 7  ;;  %v9765_v8 = vpack.c.bf16 %v9469_v51, %v9469_v51  ;;  %v11103_v24 = vpop.f32.mrb[165].mxu0  ;;  %v9877_v27 = vsel %vm529_vm2, %v9876_v42, %v9755_v12  ;;  %v9880_v51 = vrot.slane %v9758_v15, 5 }
0x3a9d   :  { %v9472_v37 = vpop.f32.mrb[166].mxu0 }
0x3a9e   :  { %v9792_v4 = vsel %vm529_vm2, %v9791_v49, %v9783_v18  ;;  %v9785_v52 = vunpack.c.l.b16 %v9765_v8  ;;  %v11104_v56 = vpop.f32.mrb[167].mxu0  ;;  %v9879_v18 = vsel %vm531_vm3, %v9878_v43, %v9877_v27  ;;  %v9760_v49 = vld [vmem:[#allocation5 + $0x2f] sm:$0x1]  ;;  %v9882_v8 = vrot.slane %v9759_v26, 4  ;;  %v9761_v37 = vld [vmem:[#allocation5 + $0x37] sm:$0x1] }
0x3a9f   :  { %v9525_v48 = vpop.f32.mrb[164].mxu1  ;;  %v9881_v24 = vsel %vm533_vm4, %v9880_v51, %v9879_v18  ;;  %v9762_v56 = vld [vmem:[#allocation5 + $0x3f] sm:$0x1] }
0x3aa0   :  { %v9793_v0 = vrot.slane %v9785_v52, 6  ;;  %v9766_v61 = vpack.c.bf16 %v9525_v48, %v9525_v48  ;;  %v11109_v38 = vpop.f32.mrb[165].mxu1  ;;  %v9883_v52 = vsel %vm535_vm5, %v9882_v8, %v9881_v24  ;;  %v9886_v48 = vrot.slane %v9761_v37, 2 }
0x3aa1   :  { %v9528_v23 = vpop.f32.mrb[166].mxu1  ;;  %v9822_v38 = vpop.permute.xlu1 %9821 }
0x3aa2   :  { %v9794_v13 = vsel %vm531_vm3, %v9793_v0, %v9792_v4  ;;  %v9786_v3 = vunpack.c.l.b16 %v9766_v61  ;;  %v11110_v19 = vpop.f32.mrb[167].mxu1  ;;  %v9884_v4 = vrot.slane %v9760_v49, 3  ;;  %v9888_v61 = vrot.slane %v9762_v56, 1 }
0x3aa3   :  { %v9581_v59 = vpop.f32.mrb[168].mxu0 }
0x3aa4   :  { %v9795_v33 = vrot.slane %v9786_v3, 5  ;;  %v9767_v11 = vpack.c.bf16 %v9581_v59, %v9581_v59  ;;  %v11115_v39 = vpop.f32.mrb[169].mxu0  ;;  %v9885_v0 = vsel %vm537_vm6, %v9884_v4, %v9883_v52 }
0x3aa5   :  { %v9584_v2 = vpop.f32.mrb[170].mxu0  ;;  %v9887_v23 = vsel %vm539_vm7, %v9886_v48, %v9885_v0 }
0x3aa6   :  { %v9796_v17 = vsel %vm533_vm4, %v9795_v33, %v9794_v13  ;;  %v9787_v55 = vunpack.c.l.b16 %v9767_v11  ;;  %v11116_v57 = vpop.f32.mrb[171].mxu0  ;;  %v9820_v13 = vpop.permute.xlu0 %9819  ;;  %v9889_v59 = vsel %vm541_vm8, %v9888_v61, %v9887_v23 }
0x3aa7   :  { %v9637_v60 = vpop.f32.mrb[168].mxu1  ;;  %v9823_v3 = vsel %vm1271_vm12, %v9820_v13, %v9822_v38 }
0x3aa8   :  { %v9797_v6 = vrot.slane %v9787_v55, 4  ;;  %v9768_v63 = vpack.c.bf16 %v9637_v60, %v9637_v60  ;;  %v11121_v16 = vpop.f32.mrb[169].mxu1 }
0x3aa9   :  { %v9640_v28 = vpop.f32.mrb[170].mxu1 }
0x3aaa   :  { %v9798_v54 = vsel %vm535_vm5, %v9797_v6, %v9796_v17  ;;  %v9788_v47 = vunpack.c.l.b16 %v9768_v63  ;;  %v11122_v30 = vpop.f32.mrb[171].mxu1 }
0x3aab   :  { %v9693_v14 = vpop.f32.mrb[172].mxu0 }
0x3aac   :  { %v9799_v29 = vrot.slane %v9788_v47, 3  ;;  %v9769_v25 = vpack.c.bf16 %v9693_v14, %v9693_v14  ;;  %v11127_v35 = vpop.f32.mrb[173].mxu0  ;;  %v11232_v14 = vld [vmem:[#allocation13] sm:$0xff]  }
0x3aad   :  { %v9696_v36 = vpop.f32.mrb[174].mxu0  ;;  %11144 = vmatpush3.bf16.msra.mxu1 %v11232_v14 }
0x3aae   :  { %v9800_v10 = vsel %vm537_vm6, %v9799_v29, %v9798_v54  ;;  %v9789_v53 = vunpack.c.l.b16 %v9769_v25  ;;  %v11128_v40 = vpop.f32.mrb[175].mxu0  ;;  %v11233_v29 = vld [vmem:[#allocation13 + $0x8] sm:$0xff]   ;;  %11145 = vmatprep.subr.bf16.mxu1 %v11726_v1 }
0x3aaf   :  { %v9749_v34 = vpop.f32.mrb[172].mxu1 }
0x3ab0   :  { %v9801_v62 = vrot.slane %v9789_v53, 2  ;;  %v9770_v22 = vpack.c.bf16 %v9749_v34, %v9749_v34  ;;  %v11133_v31 = vpop.f32.mrb[173].mxu1 }
0x3ab1   :  { %v9752_v20 = vpop.f32.mrb[174].mxu1  ;;  %11146 = vmatpush3.bf16.msra.mxu1 %v11233_v29 }
0x3ab2   :  { %v9802_v50 = vsel %vm539_vm7, %v9801_v62, %v9800_v10  ;;  %v9790_v45 = vunpack.c.l.b16 %v9770_v22  ;;  %v11134_v7 = vpop.f32.mrb[175].mxu1 }
0x3ab4   :  { %v9803_v32 = vrot.slane %v9790_v45, 1 }
0x3ab6   :  { %v9804_v5 = vsel %vm541_vm8, %v9803_v32, %v9802_v50 }
0x3ab7   :  { %v9805_v58 = vpack.c.b16 %v9804_v5, %v9804_v5 }
0x3ab9   :  { %11140 = vmatmul.mubr.msk.bf16.vlgmr.msra.gmra.mrb[176].mxu0 %vm106_vm0, %v9805_v58 }
0x3b8c   :  { %v9862_v19 = vpop.f32.mrb[176].mxu0 }
0x3b8d   :  { %v9863_v33 = vadd.f32 %v9862_v19, %v9823_v3  ;;  %v11141_v11 = vpop.f32.mrb[177].mxu0 }
0x3b8e   :  { %v9865_v39 = vpop.f32.mrb[178].mxu0 }
0x3b8f   :  { %v9891_v2 = vadd.f32 %v9889_v59, %v9863_v33  ;;  %v11142_v17 = vpop.f32.mrb[179].mxu0 }
0x3b91   :  { %11562 = vtanh.f32 %v9891_v2  ;;  %v10284_v57 = vmul.f32 -1.442695, %v9891_v2 }
0x3b93   :  { %11564 = vpow2.f32 %v10284_v57 }
0x3b9b   :  { %v11563_v55 = vpop.eup %11562 }
0x3b9c   :  { %9901 = vrot.lane.b32.xlu1 %v11563_v55, %s11717_s19 }
0x3b9d   :  { %v11565_v60 = vpop.eup %11564 }
0x3b9e   :  { %v9895_v6 = vadd.f32 1.0, %v11565_v60 }
0x3ba0   :  { %11566 = vrcp.f32 %v9895_v6 }
0x3baa   :  { %v11567_v63 = vpop.eup %11566 }
0x3bab   :  { %v9899_v54 = vmul.f32 %v11567_v63, %v13571_v9 }
0x3c0e   :  { %v9902_v16 = vpop.permute.xlu1 %9901 }
0x3c0f   :  { %v9904_v28 = vmul.f32 %v11567_v63, %v9902_v16 }
0x3c11   :  { %9906 = vrot.lane.b32.xlu1 %v9904_v28, %s11730_s18 }
0x3c83   :  { %v9907_v47 = vpop.permute.xlu1 %9906 }
0x3c84   :  { %v9909_v30 = vadd.f32 %v9907_v47, %v9899_v54 }
0x3c86   :  { %11568 = vtanh.f32 %v9909_v30 }
0x3c90   :  { %v11569_v25 = vpop.eup %11568 }
0x3c91   :  { %9912 = vrot.lane.b32.xlu1 %v11569_v25, %s11717_s19  ;;  %s10067_s19 = sshll.u32 %s11731_s6, 4  ;;  %s10068_s19 = int_to_ptr.vmem [resolvable:$true] %s10067_s19 }
0x3c92   :  { %p11691_p13 = scmp.lt.s32.totalorder %s10068_s19, %s10068_s19 }
0x3d03   :  { %v9913_v35 = vpop.permute.xlu1 %9912 }
0x3d04   :  { %v9915_v36 = vmul.f32 %v11567_v63, %v9913_v35 }
0x3d06   :  { %v9916_v10 = vpack.c.bf16 %v9915_v36, %v9915_v36  ;;  %10053 = vrot.lane.b32.xlu0 %v9915_v36, %s11730_s18 }
0x3d08   :  { %9929 = vrot.lane.b32.xlu1 %v9916_v10, %s11730_s18 }
0x3d0c   :  { %10058 = vrot.lane.b32.xlu1 %v9909_v30, %s11728_s13  ;;  %s11686_s13 = scalar_lea.vmem %s10068_s19, 1024 }
0x3d0d   :  { %p11687_p12 = scmp.ne.s32.totalorder %s10068_s19, %s11686_s13  ;;  %p11692_p0 = scmp.lt.s32.totalorder %s11686_s13, %s11686_s13 }
0x3d0f   :  { %p11693_p1 = por %p11692_p0, %p11691_p13 }
0x3d11   :  { %p11694_p2 = pnand %p11693_p1, %p11687_p12 }
0x3d78   :  { %v10054_v9 = vpop.permute.xlu0 %10053 }
0x3d79   :  { %10056 = vst.msk [vmem:[#allocation3] sm:$0xff] %vm106_vm0, %v10054_v9 }
0x3d7a   :  { %v9930_v53 = vpop.permute.xlu1 %9929 }
0x3d7b   :  { %11148 = vmatmul.mubr.msk.bf16.vlgmr.msra.gmra.mrb[176].mxu1 %vm106_vm0, %v9930_v53 }
0x3d7e   :  { %v10059_v1 = vpop.permute.xlu1 %10058 }
0x3d7f   :  { %10061 = vst.msk [vmem:[#allocation4] sm:$0xff] %vm106_vm0, %v10059_v1 }
0x3e4e   :  { %v9980_v40 = vpop.f32.mrb[176].mxu1 }
0x3e4f   :  { %v9981_v34 = vadd.f32 %v13590_v46, %v9980_v40  ;;  %v11149_v62 = vpop.f32.mrb[177].mxu1 }
0x3e50   :  { %v9983_v22 = vpop.f32.mrb[178].mxu1 }
0x3e51   :  { %v9987_v31 = vcombine.high %v9981_v34, %v9981_v34  ;;  %v9994_v20 = vrot.slane %v9981_v34, %v11878_v21  ;;  %v11150_v50 = vpop.f32.mrb[179].mxu1 }
0x3e53   :  { %v10001_v45 = vrot.slane %v9987_v31, %v11878_v21  ;;  %v10002_v7 = vcombine.high %v9994_v20, %v9994_v20  ;;  %v10010_v32 = vrot.slane %v9994_v20, %v11878_v21  ;;  %10289 = vst.sshfl [vmem:[#allocation14 + $0x7] sm:$0x1 pattern:$0x73625140] %v9994_v20 }
0x3e55   :  { %v10003_v5 = vcombine.high %v10001_v45, %v10001_v45  ;;  %v10017_v58 = vrot.slane %v10001_v45, %v11878_v21  ;;  %v10024_v44 = vrot.slane %v10002_v7, %v11878_v21  ;;  %v10032_v41 = vcombine.high %v10010_v32, %v10010_v32  ;;  %10290 = vst.sshfl [vmem:[#allocation14 + $0xf] sm:$0x1 pattern:$0x73625140] %v10002_v7 }
0x3e56   :  { %10291 = vst.sshfl [vmem:[#allocation14 + $0x27] sm:$0x1 pattern:$0x73625140] %v10001_v45 }
0x3e57   :  { %v10031_v46 = vrot.slane %v10003_v5, %v11878_v21  ;;  %v10033_v42 = vcombine.high %v10017_v58, %v10017_v58  ;;  %v10034_v12 = vcombine.high %v10024_v44, %v10024_v44  ;;  %10046 = vst [vmem:[#allocation14 + $0x17] sm:$0x1] %v10032_v41  ;;  %10292 = vst.sshfl [vmem:[#allocation14 + $0x2f] sm:$0x1 pattern:$0x73625140] %v10003_v5 }
0x3e59   :  { %v10035_v15 = vcombine.high %v10031_v46, %v10031_v46  ;;  %10047 = vst [vmem:[#allocation14 + $0x1f] sm:$0x1] %v10034_v12  ;;  %10050 = vst [vmem:[#allocation14 + $0x37] sm:$0x1] %v10033_v42 }
0x3e5b   :  { %10051 = vst [vmem:[#allocation14 + $0x3f] sm:$0x1] %v10035_v15 }
0x3e5c   :  { %11697 = shalt.err (!%p11694_p2)
}
0x3e5d   :  { %s11698_s17 = scalar_lea.hbm %s13828_s9, 1024 }
0x3e5e   :  { %p11699_p3 = scmp.ne.s32.totalorder %s13828_s9, %s11698_s17  ;;  %p11702_p4 = scmp.lt.u32.totalorder %s11698_s17, %s13828_s9 }
0x3e60   :  { %p11704_p5 = pnand %p11702_p4, %p11699_p3 }
0x3e62   :  { %11707 = shalt.err (!%p11704_p5)
}
0x3e63   :  { %10073 = dma.vmem_to_hbm [thread:$0]  %s10068_s19, 1024, %s13828_s9, [#allocation7], %s11721_s10, %s11721_s10, %s11722_s14  }
0x3e64   :  { %11714 = dma.done.wait [#allocation7], 1024  }
0x3e65   :  { %11715 = vsyncadd [#allocation7], 4294966272 }
0x3e66   :  { %10077 = vsyncpa [#allocation6], 1 }
0x3e67   :  { %10078 = vsyncpa [#allocation9], 1 }
0x3e68   :  { %10079 = vsyncpa [#allocation12], 1 }
0x3e69   :  { %10080 = vsyncpa [#allocation7], 1 }

</bundles_post_ra>
